<compile_context>
chip_gen: v6e
topology: v6e:2x2x1
jax: 0.10.0
libtpu: 0.0.40
codegen_flags: <defaults>
</compile_context>

<pallas_src>
import numpy as np
import jax
import jax.numpy as jnp
from jax import lax
from jax.experimental import pallas as pl
from jax.experimental.pallas import tpu as pltpu

NUM_BETAS = 10
NUM_JOINTS = 22          # 1 root + 21 body joints  (63 body_pose params)
NUM_VERTS = 128          # synthetic SMPL vertex count == lane width
SRC_VERTS = 96           # source mesh vertices
SRC_FACES = 64           # source mesh faces
FACE_CHUNK = 16          # faces (sublanes) per unrolled sweep step (32 risks vreg spills)
PAD_FAR = 1.0e4          # padded (invalid) faces are parked far away

_VMEM = pl.BlockSpec(memory_space=pltpu.MemorySpace.VMEM)
_SMEM = pl.BlockSpec(memory_space=pltpu.MemorySpace.SMEM)


# ----------------------------------------------------------------------------- shared math ---
def _point_tri_sqdist(tc, px, py, pz, recip):
    """Sq. distance + (p - closest point) diffs from each point to each triangle (Ericson).

    tc        : (F, 16) per-face constants [a b c ab ac valid], faces on sublanes.
    px, py, pz: (1, Np) point coordinates, points on lanes.
    recip     : reciprocal fn (pl.reciprocal(approx) inside the kernel, 1/x in plain JAX).
    Returns d, dx, dy, dz, each (F, Np), with d = dx^2 + dy^2 + dz^2 and (dx,dy,dz) = p - q.
    """
    ax, ay, az = tc[:, 0:1], tc[:, 1:2], tc[:, 2:3]
    bx, by, bz = tc[:, 3:4], tc[:, 4:5], tc[:, 5:6]
    cx, cy, cz = tc[:, 6:7], tc[:, 7:8], tc[:, 8:9]
    abx, aby, abz = tc[:, 9:10], tc[:, 10:11], tc[:, 11:12]
    acx, acy, acz = tc[:, 12:13], tc[:, 13:14], tc[:, 14:15]

    eps = 1e-12

    def srecip(den):
        return recip(jnp.where(jnp.abs(den) > eps, den, 1.0))

    apx, apy, apz = px - ax, py - ay, pz - az
    d1 = abx * apx + aby * apy + abz * apz
    d2 = acx * apx + acy * apy + acz * apz
    bpx, bpy, bpz = px - bx, py - by, pz - bz
    d3 = abx * bpx + aby * bpy + abz * bpz
    d4 = acx * bpx + acy * bpy + acz * bpz
    cpx, cpy, cpz = px - cx, py - cy, pz - cz
    d5 = abx * cpx + aby * cpy + abz * cpz
    d6 = acx * cpx + acy * cpy + acz * cpz

    vc = d1 * d4 - d3 * d2
    vb = d5 * d2 - d1 * d6
    va = d3 * d6 - d5 * d4

    m1 = (d1 <= 0.0) & (d2 <= 0.0)                                   # vertex A
    m2 = (d3 >= 0.0) & (d4 <= d3)                                    # vertex B
    m3 = (d6 >= 0.0) & (d5 <= d6)                                    # vertex C
    m4 = (vc <= 0.0) & (d1 >= 0.0) & (d3 <= 0.0)                     # edge AB
    m5 = (vb <= 0.0) & (d2 >= 0.0) & (d6 <= 0.0)                     # edge AC
    m6 = (va <= 0.0) & ((d4 - d3) >= 0.0) & ((d5 - d6) >= 0.0)       # edge BC

    # clamp guards degenerate (zero-area) faces; no-op for well-formed regions
    t_ab = jnp.clip(d1 * srecip(d1 - d3), 0.0, 1.0)
    t_ac = jnp.clip(d2 * srecip(d2 - d6), 0.0, 1.0)
    t_bc = jnp.clip((d4 - d3) * srecip((d4 - d3) + (d5 - d6)), 0.0, 1.0)
    inv_den = srecip(va + vb + vc)                                   # shared denominator
    v = jnp.clip(vb * inv_den, 0.0, 1.0)
    w = jnp.clip(vc * inv_den, 0.0, 1.0 - v)

    def build_q(a, b, c, ab, ac):
        q = a + v * ab + w * ac                                      # face interior
        q = jnp.where(m6, b + t_bc * (c - b), q)
        q = jnp.where(m5, a + t_ac * ac, q)
        q = jnp.where(m4, a + t_ab * ab, q)
        q = jnp.where(m3, c, q)
        q = jnp.where(m2, b, q)
        q = jnp.where(m1, a, q)
        return q

    dx = px - build_q(ax, bx, cx, abx, acx)
    dy = py - build_q(ay, by, cy, aby, acy)
    dz = pz - build_q(az, bz, cz, abz, acz)
    d = dx * dx + dy * dy + dz * dz
    return d, dx, dy, dz


def _rodrigues(rvec):
    """Axis-angle (J,3) -> rotation matrices (J,3,3), safe at rvec == 0."""
    sq = jnp.sum(rvec * rvec, axis=-1, keepdims=True)
    angle = jnp.sqrt(sq + 1e-16)
    axis = rvec / angle
    ca = jnp.cos(angle)[:, :, None]
    sa = jnp.sin(angle)[:, :, None]
    x, y, z = axis[:, 0], axis[:, 1], axis[:, 2]
    zeros = jnp.zeros_like(x)
    kmat = jnp.stack([zeros, -z, y, z, zeros, -x, -y, x, zeros], axis=1).reshape(-1, 3, 3)
    outer = axis[:, :, None] * axis[:, None, :]
    eye = jnp.eye(3, dtype=rvec.dtype)[None]
    return eye * ca + sa * kmat + (1.0 - ca) * outer


def kinematic_chain_t(body_pose, joints, parents):
    """body_pose (1,63), rest joints (J,3) -> relative skinning transforms, TRANSPOSED (16,J)."""
    j = joints.shape[0]
    par = np.asarray(parents, dtype=np.int32)
    pose = jnp.concatenate(
        [jnp.zeros((1, 3), body_pose.dtype), body_pose.reshape(j - 1, 3)], axis=0)
    rot = _rodrigues(pose)
    rel = jnp.concatenate([joints[0:1], joints[1:] - joints[par[1:]]], axis=0)
    top = jnp.concatenate([rot, rel[:, :, None]], axis=2)
    bottom = jnp.broadcast_to(
        jnp.array([0.0, 0.0, 0.0, 1.0], jnp.float32)[None, None, :], (j, 1, 4))
    tloc = jnp.concatenate([top, bottom], axis=1)                    # (J,4,4)
    if all(int(par[i]) == i - 1 for i in range(1, j)):
        # simple chain topology: prefix matrix product via associative_scan (log-depth)
        g = lax.associative_scan(jnp.matmul, tloc, axis=0)
    else:
        gs = [tloc[0]]
        for i in range(1, j):
            gs.append(gs[int(par[i])] @ tloc[i])
        g = jnp.stack(gs, axis=0)
    jh = jnp.concatenate([joints, jnp.zeros((j, 1), joints.dtype)], axis=1)
    corr = jnp.einsum('jab,jb->ja', g, jh)
    a = g.at[:, :, 3].add(-corr)
    return a.reshape(j, 16).T                                        # (16, J)


# ------------------------------------------------------------------------------- kernels -----
def _shape_joints_kernel(betas3_ref, sd3_ref, vt3_ref, jregT_ref, v3_ref, joints_ref):
    """v_shaped (3,V) = v_template + blockdiag(betas) @ shapedirs3   (ONE MXU matmul)
       joints  (3,J) = v_shaped @ J_regressor^T                      (ONE MXU matmul)."""
    v3 = vt3_ref[...] + jnp.dot(betas3_ref[...], sd3_ref[...],
                                preferred_element_type=jnp.float32)          # (3, V)
    v3_ref[...] = v3
    joints_ref[...] = jnp.dot(v3, jregT_ref[...],
                              preferred_element_type=jnp.float32)            # (3, J)


def _make_fused_kernel(n_real_faces, chunk, approx_recip=True):
    """Fused LBS skin + point<->face chamfer + analytic dL/dverts kernel."""

    def kernel(scale_ref, v3_ref, a16t_ref, wT_ref, tric_ref,
               loss_ref, verts_ref, dverts_ref):
        v = wT_ref.shape[1]
        f_pad = tric_ref.shape[0]
        n_chunks = f_pad // chunk
        if approx_recip:
            recip = lambda u: pl.reciprocal(u, approx=True)   # divides -> idle EUP slot
        else:
            recip = lambda u: 1.0 / u                         # exact, for validation runs

        # ---- LBS skinning, lane-dense: every per-coordinate row is (1, V) -------------------
        s = scale_ref[0, 0]
        x = v3_ref[0:1, :]
        y = v3_ref[1:2, :]
        z = v3_ref[2:3, :]
        t16 = jnp.dot(a16t_ref[...], wT_ref[...],
                      preferred_element_type=jnp.float32)                    # (16, V)
        px = (t16[0:1] * x + t16[1:2] * y + t16[2:3] * z + t16[3:4]) * s
        py = (t16[4:5] * x + t16[5:6] * y + t16[6:7] * z + t16[7:8]) * s
        pz = (t16[8:9] * x + t16[9:10] * y + t16[10:11] * z + t16[11:12]) * s
        verts_ref[0:1, :] = px
        verts_ref[1:2, :] = py
        verts_ref[2:3, :] = pz

        # ---- chamfer accumulators live in vregs (carried through the unrolled sweep) --------
        pf_min = jnp.full((1, v), 1e30, jnp.float32)   # running point->face min sq-dist
        dbx = jnp.zeros((1, v), jnp.float32)           # (p - q_best) of the winning face
        dby = jnp.zeros((1, v), jnp.float32)
        dbz = jnp.zeros((1, v), jnp.float32)
        gfx = jnp.zeros((1, v), jnp.float32)           # face->point grad scatter
        gfy = jnp.zeros((1, v), jnp.float32)
        gfz = jnp.zeros((1, v), jnp.float32)
        fps = jnp.zeros((1, 1), jnp.float32)           # face->point min sum

        # Fully-unrolled face sweep (n_chunks is static & tiny): equivalent of
        # lax.fori_loop(0, n_chunks, body, ..., unroll=True) but with STATIC tric_ref slice
        # offsets, so the LLO scheduler sees all chunks at once and the 8 accumulators stay
        # in vregs (no VMEM scratch loads/stores).
        for ci in range(n_chunks):
            tc = tric_ref[ci * chunk:(ci + 1) * chunk, :]                    # (chunk, 16)
            valid = tc[:, 15:16]                                             # (chunk, 1)
            d, dx, dy, dz = _point_tri_sqdist(tc, px, py, pz, recip)         # (chunk, V)

            # point -> face: running min over faces + averaged (p - q) of tied winning faces
            cmin = jnp.min(d, axis=0, keepdims=True)                         # (1, V)
            sel = (d <= cmin).astype(jnp.float32)
            inv_cnt = recip(jnp.maximum(jnp.sum(sel, axis=0, keepdims=True), 1.0))
            cdx = jnp.sum(dx * sel, axis=0, keepdims=True) * inv_cnt
            cdy = jnp.sum(dy * sel, axis=0, keepdims=True) * inv_cnt
            cdz = jnp.sum(dz * sel, axis=0, keepdims=True) * inv_cnt
            better = cmin < pf_min       # NOTE: strict across chunks (earlier chunk wins ties)
            dbx = jnp.where(better, cdx, dbx)
            dby = jnp.where(better, cdy, dby)
            dbz = jnp.where(better, cdz, dbz)
            pf_min = jnp.minimum(pf_min, cmin)

            # face -> point: per-face min over points + grad split across tied argmin points
            fmin = jnp.min(d, axis=1, keepdims=True)                         # (chunk, 1)
            fps = fps + jnp.sum(fmin * valid, axis=0, keepdims=True)
            fsel = (d <= fmin).astype(jnp.float32) * valid                   # (chunk, V)
            fsel = fsel * recip(jnp.maximum(jnp.sum(fsel, axis=1, keepdims=True), 1.0))
            gfx = gfx + jnp.sum(fsel * dx, axis=0, keepdims=True)
            gfy = gfy + jnp.sum(fsel * dy, axis=0, keepdims=True)
            gfz = gfz + jnp.sum(fsel * dz, axis=0, keepdims=True)

        inv_np = 1.0 / v
        inv_nf = 1.0 / n_real_faces
        loss_ref[...] = jnp.sum(pf_min, axis=1, keepdims=True) * inv_np + fps * inv_nf
        # analytic dL/dverts (Danskin: closest points treated as constants), lane-dense (3, V)
        dverts_ref[0:1, :] = dbx * (2.0 * inv_np) + gfx * (2.0 * inv_nf)
        dverts_ref[1:2, :] = dby * (2.0 * inv_np) + gfy * (2.0 * inv_nf)
        dverts_ref[2:3, :] = dbz * (2.0 * inv_np) + gfz * (2.0 * inv_nf)

    return kernel


# --------------------------------------------------------------------------- loss / module ---
def make_optimizer_fns(model, src_verts, src_faces, chunk=FACE_CHUNK):
    parents = model['parents']
    v_template = model['v_template']                 # (V, 3)
    shapedirs = model['shapedirs']                   # (10, V, 3)
    j_regressor = model['J_regressor']               # (J, V)
    lbs_weights = model['lbs_weights']               # (V, J)
    V = v_template.shape[0]
    J = j_regressor.shape[0]

    # kernel-friendly layouts, built once on the host side
    vt3 = jnp.transpose(v_template).astype(jnp.float32)                            # (3, V)
    sd3 = jnp.transpose(shapedirs, (2, 0, 1)).reshape(3 * NUM_BETAS, V)            # (30, V)
    jregT = jnp.transpose(j_regressor)                                             # (V, J)
    wT = jnp.transpose(lbs_weights)                                                # (J, V)
    eye3 = jnp.eye(3, dtype=jnp.float32)

    # constant triangle soup of the source mesh, hoisted: [a b c ab ac valid], faces on sublanes
    v0 = src_verts[src_faces[:, 0]]
    v1 = src_verts[src_faces[:, 1]]
    v2 = src_verts[src_faces[:, 2]]
    tri_real = jnp.concatenate(
        [v0, v1, v2, v1 - v0, v2 - v0, jnp.ones((v0.shape[0], 1), jnp.float32)],
        axis=1).astype(jnp.float32)                                                # (F, 16)
    f_real = int(tri_real.shape[0])
    f_pad = ((f_real + chunk - 1) // chunk) * chunk
    if f_pad > f_real:
        # NOTE: padded faces are excluded from the face->point term (valid=0) but still sit in
        # the point->face min; PAD_FAR keeps them from ever winning for sane geometry.
        pad = jnp.concatenate(
            [jnp.full((f_pad - f_real, 9), PAD_FAR, jnp.float32),
             jnp.zeros((f_pad - f_real, 7), jnp.float32)], axis=1)
        tri_const = jnp.concatenate([tri_real, pad], axis=0)
    else:
        tri_const = tri_real

    # Pallas callables (built once)
    shape_call = pl.pallas_call(
        _shape_joints_kernel,
        out_shape=(jax.ShapeDtypeStruct((3, V), jnp.float32),
                   jax.ShapeDtypeStruct((3, J), jnp.float32)),
        in_specs=[_VMEM, _VMEM, _VMEM, _VMEM],
        out_specs=(_VMEM, _VMEM),
    )
    fused_call = pl.pallas_call(
        _make_fused_kernel(f_real, chunk),
        out_shape=(jax.ShapeDtypeStruct((1, 1), jnp.float32),    # loss (VMEM scalar tile)
                   jax.ShapeDtypeStruct((3, V), jnp.float32),    # skinned verts
                   jax.ShapeDtypeStruct((3, V), jnp.float32)),   # dL/dverts
        in_specs=[_SMEM, _VMEM, _VMEM, _VMEM, _VMEM],
        out_specs=(_VMEM, _VMEM, _VMEM),
    )

    def shape_and_joints(betas):
        """Betas-only Pallas kernel; called ONCE per optimization (hoisted out of SGD loop)."""
        betas3 = jnp.kron(eye3, betas.astype(jnp.float32))                  # (3, 30) block-diag
        v3, joints3 = shape_call(betas3, sd3, vt3, jregT)
        return v3, jnp.transpose(joints3)                                   # (3, V), (J, 3)

    # ---------------- plain-JAX skinning given precomputed shape parts (tiny backward chain) -
    def skin_from_parts(body_pose, v3, joints, scale):
        a16t = kinematic_chain_t(body_pose, joints, parents)                # (16, J)
        t16 = jnp.dot(a16t, wT)                                             # (16, V)
        x, y, z = v3[0:1], v3[1:2], v3[2:3]
        s = scale[0, 0]
        vx = (t16[0:1] * x + t16[1:2] * y + t16[2:3] * z + t16[3:4]) * s
        vy = (t16[4:5] * x + t16[5:6] * y + t16[6:7] * z + t16[7:8]) * s
        vz = (t16[8:9] * x + t16[9:10] * y + t16[10:11] * z + t16[11:12]) * s
        return jnp.concatenate([vx, vy, vz], axis=0)                        # (3, V)

    # ---------------- pure-JAX reference (parity checks) --------------------------------------
    def verts_pure(body_pose, betas, scale):
        v_shaped = v_template + jnp.einsum('k,kvc->vc', betas[0], shapedirs)
        joints = jnp.dot(j_regressor, v_shaped)
        a16t = kinematic_chain_t(body_pose, joints, parents)
        t = jnp.dot(lbs_weights, a16t.T)                                     # (V, 16)
        x, y, z = v_shaped[:, 0:1], v_shaped[:, 1:2], v_shaped[:, 2:3]
        vx = t[:, 0:1] * x + t[:, 1:2] * y + t[:, 2:3] * z + t[:, 3:4]
        vy = t[:, 4:5] * x + t[:, 5:6] * y + t[:, 6:7] * z + t[:, 7:8]
        vz = t[:, 8:9] * x + t[:, 9:10] * y + t[:, 10:11] * z + t[:, 11:12]
        return jnp.concatenate([vx, vy, vz], axis=1) * scale[0, 0]

    def loss_ref(body_pose, betas, scale):
        # NOTE: plain mean of per-point / per-face minima (no pytorch3d batch weights).
        verts = verts_pure(body_pose, betas, scale)
        px = verts[:, 0][None, :]
        py = verts[:, 1][None, :]
        pz = verts[:, 2][None, :]
        d, _, _, _ = _point_tri_sqdist(tri_real, px, py, pz, lambda u: 1.0 / u)
        return jnp.mean(jnp.min(d, axis=0)) + jnp.mean(jnp.min(d, axis=1))

    # ---------------- Pallas forward + custom backward (body_pose path only changes per step) -
    def _fused(body_pose, v3, joints, scale):
        a16t = kinematic_chain_t(body_pose, joints, parents)
        return fused_call(scale, v3, a16t, wT, tri_const)

    @jax.custom_vjp
    def chamfer_loss(body_pose, v3, joints, scale):
        loss, _, _ = _fused(body_pose, v3, joints, scale)
        return loss[0, 0]

    def _fwd(body_pose, v3, joints, scale):
        loss, _, dverts3 = _fused(body_pose, v3, joints, scale)
        return loss[0, 0], (body_pose, v3, joints, scale, dverts3)

    def _bwd(res, g):
        body_pose, v3, joints, scale, dverts3 = res
        _, pullback = jax.vjp(skin_from_parts, body_pose, v3, joints, scale)
        return pullback(g * dverts3)

    chamfer_loss.defvjp(_fwd, _bwd)

    def loss_fn(body_pose, betas, scale):
        """Full loss path (shape kernel + fused kernel) — for parity checks / one-off evals."""
        v3, joints = shape_and_joints(betas)
        return chamfer_loss(body_pose, lax.stop_gradient(v3), lax.stop_gradient(joints), scale)

    def lbs_verts_pallas(body_pose, betas, scale):
        v3, joints = shape_and_joints(betas)
        _, verts3, _ = _fused(body_pose, v3, joints, scale)
        return jnp.transpose(verts3)                        # (V, 3)

    return loss_fn, chamfer_loss, shape_and_joints, lbs_verts_pallas, loss_ref


def lbs2pose_forward(src_verts, src_faces, smpl_params, smpl_betas, model,
                     use_gt=True, lr=0.1, iters=5):
    """Equivalent of LBS2PoseOptimizer.forward (use_gt=True path)."""
    # TODO(synk): use_gt=False branch (also optimizing betas/scale) and tqdm omitted.
    loss_fn, chamfer_loss, shape_and_joints, lbs_verts_pallas, loss_ref = make_optimizer_fns(
        model, src_verts, src_faces)
    momentum = 0.99

    @jax.jit
    def run_opt(bp0, betas, scale):
        # Hoisted: betas & scale are constant in the use_gt=True path, so the shape/joints
        # Pallas kernel runs ONCE here instead of once per SGD step (and per grad eval).
        v3, joints = shape_and_joints(betas)

        def step(carry, _):
            bp, mom = carry
            l, g = jax.value_and_grad(chamfer_loss)(bp, v3, joints, scale)
            mom = momentum * mom + g            # torch.optim.SGD (dampening=0, nesterov=False)
            bp = bp - lr * mom
            return (bp, mom), l

        (bp, _), losses = lax.scan(step, (bp0, jnp.zeros_like(bp0)), xs=None, length=iters)
        return bp, losses[-1]

    body_pose0 = jnp.zeros((1, 63), jnp.float32)
    body_pose, last_loss = run_opt(body_pose0, smpl_betas, smpl_params['scale'])
    new_verts = lbs_verts_pallas(body_pose, smpl_betas, smpl_params['scale'])
    return (new_verts, model['faces']), body_pose, last_loss, loss_fn, loss_ref


# ------------------------------------------------------------------------------------ main ---
def build_synthetic_smpl(key):
    k0, k1, k2, k3, k4 = jax.random.split(key, 5)
    v_template = (jax.random.normal(k0, (NUM_VERTS, 3)) * 0.3).astype(jnp.float32)
    shapedirs = (jax.random.normal(k1, (NUM_BETAS, NUM_VERTS, 3)) * 0.01).astype(jnp.float32)
    jreg = jax.random.uniform(k2, (NUM_JOINTS, NUM_VERTS), minval=0.0, maxval=1.0)
    jreg = (jreg / jnp.sum(jreg, axis=1, keepdims=True)).astype(jnp.float32)
    w = jax.random.uniform(k3, (NUM_VERTS, NUM_JOINTS), minval=0.0, maxval=1.0)
    w = (w / jnp.sum(w, axis=1, keepdims=True)).astype(jnp.float32)
    faces = jax.random.randint(k4, (2 * NUM_VERTS, 3), 0, NUM_VERTS, dtype=jnp.int32)
    parents = [0] + list(range(NUM_JOINTS - 1))          # simple chain: parent[j] = j-1
    return {'v_template': v_template, 'shapedirs': shapedirs, 'J_regressor': jreg,
            'lbs_weights': w, 'parents': parents, 'faces': faces}


if __name__ == "__main__":
    key = jax.random.PRNGKey(0)
    k_model, k_src_v, k_src_f, k_betas = jax.random.split(key, 4)

    model = build_synthetic_smpl(k_model)

    # "src_mesh_trimesh"
    src_verts = (jax.random.normal(k_src_v, (SRC_VERTS, 3)) * 0.3).astype(jnp.float32)
    src_faces = jax.random.randint(k_src_f, (SRC_FACES, 3), 0, SRC_VERTS, dtype=jnp.int32)

    # "smpl_params" / ground-truth "smpl_model.betas"
    smpl_params = {'scale': jnp.array([[1.0]], jnp.float32)}
    smpl_betas = (jax.random.normal(k_betas, (1, NUM_BETAS)) * 0.1).astype(jnp.float32)

    (new_verts, new_faces), body_pose, last_loss, loss_fn, loss_ref = lbs2pose_forward(
        src_verts, src_faces, smpl_params, smpl_betas, model,
        use_gt=True, lr=0.1, iters=5)

    jax.block_until_ready((new_verts, body_pose, last_loss))

    # forward parity: fused Pallas path vs pure-JAX reference at the optimized pose
    l_pallas = float(loss_fn(body_pose, smpl_betas, smpl_params['scale']))
    l_ref = float(loss_ref(body_pose, smpl_betas, smpl_params['scale']))
    assert np.isfinite(l_pallas) and np.isfinite(l_ref)
    assert np.allclose(l_pallas, l_ref, rtol=1e-1, atol=1e-2), (l_pallas, l_ref)

    # gradient parity: in-kernel analytic dL/dverts chained through the JAX LBS vjp
    g_pallas = np.asarray(jax.grad(loss_fn)(body_pose, smpl_betas, smpl_params['scale']))
    g_ref = np.asarray(jax.grad(loss_ref)(body_pose, smpl_betas, smpl_params['scale']))
    assert np.all(np.isfinite(g_pallas)) and np.all(np.isfinite(g_ref))
    rel_err = np.linalg.norm(g_pallas - g_ref) / max(np.linalg.norm(g_ref), 1e-6)
    assert rel_err < 0.2, rel_err

    assert bool(jnp.all(jnp.isfinite(new_verts))) and bool(jnp.all(jnp.isfinite(body_pose)))

    print("KERNEL_OK")
</pallas_src>

<mosaic_0001>
module attributes {stable_mosaic.version = 11 : i64} {
  func.func @_shape_joints_kernel(%arg0: memref<3x30xf32, #tpu.memory_space<vmem>>, %arg1: memref<30x128xf32, #tpu.memory_space<vmem>>, %arg2: memref<3x128xf32, #tpu.memory_space<vmem>>, %arg3: memref<128x22xf32, #tpu.memory_space<vmem>>, %arg4: memref<3x128xf32, #tpu.memory_space<vmem>>, %arg5: memref<3x22xf32, #tpu.memory_space<vmem>>) attributes {dimension_semantics = [], scalar_prefetch = 0 : i64, scratch_operands = 0 : i64, tpu.core_type = #tpu.core_type<tc>} {
    %c0 = arith.constant 0 : index
    %c0_0 = arith.constant 0 : index
    %0 = vector.load %arg2[%c0, %c0_0] : memref<3x128xf32, #tpu.memory_space<vmem>>, vector<3x128xf32>
    %c0_1 = arith.constant 0 : index
    %c0_2 = arith.constant 0 : index
    %1 = vector.load %arg0[%c0_1, %c0_2] : memref<3x30xf32, #tpu.memory_space<vmem>>, vector<3x30xf32>
    %c0_3 = arith.constant 0 : index
    %c0_4 = arith.constant 0 : index
    %2 = vector.load %arg1[%c0_3, %c0_4] : memref<30x128xf32, #tpu.memory_space<vmem>>, vector<30x128xf32>
    %cst = arith.constant dense<0.000000e+00> : vector<3x128xf32>
    %3 = tpu.matmul %1, %2, %cst {dimension_numbers = #tpu.dot_dimension_numbers<[1], [0], [0], [1], [0, 0, 1, 1], [], []>} : vector<3x30xf32>, vector<30x128xf32>, vector<3x128xf32> -> vector<3x128xf32>
    %4 = arith.addf %0, %3 : vector<3x128xf32>
    %c0_5 = arith.constant 0 : index
    %c0_6 = arith.constant 0 : index
    %5 = vector.load %arg4[%c0_5, %c0_6] : memref<3x128xf32, #tpu.memory_space<vmem>>, vector<3x128xf32>
    tpu.vector_store %arg4[%c0_5, %c0_6], %4 {strides = array<i32>} : memref<3x128xf32, #tpu.memory_space<vmem>>, vector<3x128xf32>,
    %c0_7 = arith.constant 0 : index
    %c0_8 = arith.constant 0 : index
    %6 = vector.load %arg3[%c0_7, %c0_8] : memref<128x22xf32, #tpu.memory_space<vmem>>, vector<128x22xf32>
    %cst_9 = arith.constant dense<0.000000e+00> : vector<3x22xf32>
    %7 = tpu.matmul %4, %6, %cst_9 {dimension_numbers = #tpu.dot_dimension_numbers<[1], [0], [0], [1], [0, 0, 1, 1], [], []>} : vector<3x128xf32>, vector<128x22xf32>, vector<3x22xf32> -> vector<3x22xf32>
    %c0_10 = arith.constant 0 : index
    %c0_11 = arith.constant 0 : index
    %8 = vector.load %arg5[%c0_10, %c0_11] : memref<3x22xf32, #tpu.memory_space<vmem>>, vector<3x22xf32>
    tpu.vector_store %arg5[%c0_10, %c0_11], %7 {strides = array<i32>} : memref<3x22xf32, #tpu.memory_space<vmem>>, vector<3x22xf32>,
    return
  }
}

module attributes {stable_mosaic.version = 11 : i64} {
  func.func @kernel(%arg0: memref<1x1xf32, #tpu.memory_space<smem>>, %arg1: memref<3x128xf32, #tpu.memory_space<vmem>>, %arg2: memref<16x22xf32, #tpu.memory_space<vmem>>, %arg3: memref<22x128xf32, #tpu.memory_space<vmem>>, %arg4: memref<64x16xf32, #tpu.memory_space<vmem>>, %arg5: memref<1x1xf32, #tpu.memory_space<vmem>>, %arg6: memref<3x128xf32, #tpu.memory_space<vmem>>, %arg7: memref<3x128xf32, #tpu.memory_space<vmem>>) attributes {dimension_semantics = [], scalar_prefetch = 0 : i64, scratch_operands = 0 : i64, tpu.core_type = #tpu.core_type<tc>} {
    %c0 = arith.constant 0 : index
    %c0_0 = arith.constant 0 : index
    %0 = memref.load %arg0[%c0, %c0_0] : memref<1x1xf32, #tpu.memory_space<smem>>
    %c0_1 = arith.constant 0 : index
    %c0_2 = arith.constant 0 : index
    %1 = vector.load %arg1[%c0_1, %c0_2] : memref<3x128xf32, #tpu.memory_space<vmem>>, vector<1x128xf32>
    %c1 = arith.constant 1 : index
    %c0_3 = arith.constant 0 : index
    %2 = vector.load %arg1[%c1, %c0_3] : memref<3x128xf32, #tpu.memory_space<vmem>>, vector<1x128xf32>
    %c2 = arith.constant 2 : index
    %c0_4 = arith.constant 0 : index
    %3 = vector.load %arg1[%c2, %c0_4] : memref<3x128xf32, #tpu.memory_space<vmem>>, vector<1x128xf32>
    %c0_5 = arith.constant 0 : index
    %c0_6 = arith.constant 0 : index
    %4 = vector.load %arg2[%c0_5, %c0_6] : memref<16x22xf32, #tpu.memory_space<vmem>>, vector<16x22xf32>
    %c0_7 = arith.constant 0 : index
    %c0_8 = arith.constant 0 : index
    %5 = vector.load %arg3[%c0_7, %c0_8] : memref<22x128xf32, #tpu.memory_space<vmem>>, vector<22x128xf32>
    %cst = arith.constant dense<0.000000e+00> : vector<16x128xf32>
    %6 = tpu.matmul %4, %5, %cst {dimension_numbers = #tpu.dot_dimension_numbers<[1], [0], [0], [1], [0, 0, 1, 1], [], []>} : vector<16x22xf32>, vector<22x128xf32>, vector<16x128xf32> -> vector<16x128xf32>
    %7 = vector.extract_strided_slice %6 {offsets = [0, 0], sizes = [1, 128], strides = [1, 1]} : vector<16x128xf32> to vector<1x128xf32>
    %8 = arith.mulf %7, %1 : vector<1x128xf32>
    %9 = vector.extract_strided_slice %6 {offsets = [1, 0], sizes = [1, 128], strides = [1, 1]} : vector<16x128xf32> to vector<1x128xf32>
    %10 = arith.mulf %9, %2 : vector<1x128xf32>
    %11 = arith.addf %8, %10 : vector<1x128xf32>
    %12 = vector.extract_strided_slice %6 {offsets = [2, 0], sizes = [1, 128], strides = [1, 1]} : vector<16x128xf32> to vector<1x128xf32>
    %13 = arith.mulf %12, %3 : vector<1x128xf32>
    %14 = arith.addf %11, %13 : vector<1x128xf32>
    %15 = vector.extract_strided_slice %6 {offsets = [3, 0], sizes = [1, 128], strides = [1, 1]} : vector<16x128xf32> to vector<1x128xf32>
    %16 = arith.addf %14, %15 : vector<1x128xf32>
    %17 = vector.broadcast %0 : f32 to vector<1x128xf32>
    %18 = arith.mulf %16, %17 : vector<1x128xf32>
    %19 = vector.extract_strided_slice %6 {offsets = [4, 0], sizes = [1, 128], strides = [1, 1]} : vector<16x128xf32> to vector<1x128xf32>
    %20 = arith.mulf %19, %1 : vector<1x128xf32>
    %21 = vector.extract_strided_slice %6 {offsets = [5, 0], sizes = [1, 128], strides = [1, 1]} : vector<16x128xf32> to vector<1x128xf32>
    %22 = arith.mulf %21, %2 : vector<1x128xf32>
    %23 = arith.addf %20, %22 : vector<1x128xf32>
    %24 = vector.extract_strided_slice %6 {offsets = [6, 0], sizes = [1, 128], strides = [1, 1]} : vector<16x128xf32> to vector<1x128xf32>
    %25 = arith.mulf %24, %3 : vector<1x128xf32>
    %26 = arith.addf %23, %25 : vector<1x128xf32>
    %27 = vector.extract_strided_slice %6 {offsets = [7, 0], sizes = [1, 128], strides = [1, 1]} : vector<16x128xf32> to vector<1x128xf32>
    %28 = arith.addf %26, %27 : vector<1x128xf32>
    %29 = vector.broadcast %0 : f32 to vector<1x128xf32>
    %30 = arith.mulf %28, %29 : vector<1x128xf32>
    %31 = vector.extract_strided_slice %6 {offsets = [8, 0], sizes = [1, 128], strides = [1, 1]} : vector<16x128xf32> to vector<1x128xf32>
    %32 = arith.mulf %31, %1 : vector<1x128xf32>
    %33 = vector.extract_strided_slice %6 {offsets = [9, 0], sizes = [1, 128], strides = [1, 1]} : vector<16x128xf32> to vector<1x128xf32>
    %34 = arith.mulf %33, %2 : vector<1x128xf32>
    %35 = arith.addf %32, %34 : vector<1x128xf32>
    %36 = vector.extract_strided_slice %6 {offsets = [10, 0], sizes = [1, 128], strides = [1, 1]} : vector<16x128xf32> to vector<1x128xf32>
    %37 = arith.mulf %36, %3 : vector<1x128xf32>
    %38 = arith.addf %35, %37 : vector<1x128xf32>
    %39 = vector.extract_strided_slice %6 {offsets = [11, 0], sizes = [1, 128], strides = [1, 1]} : vector<16x128xf32> to vector<1x128xf32>
    %40 = arith.addf %38, %39 : vector<1x128xf32>
    %41 = vector.broadcast %0 : f32 to vector<1x128xf32>
    %42 = arith.mulf %40, %41 : vector<1x128xf32>
    %c0_9 = arith.constant 0 : index
    %c0_10 = arith.constant 0 : index
    %43 = vector.load %arg6[%c0_9, %c0_10] : memref<3x128xf32, #tpu.memory_space<vmem>>, vector<1x128xf32>
    tpu.vector_store %arg6[%c0_9, %c0_10], %18 {strides = array<i32>} : memref<3x128xf32, #tpu.memory_space<vmem>>, vector<1x128xf32>,
    %c1_11 = arith.constant 1 : index
    %c0_12 = arith.constant 0 : index
    %44 = vector.load %arg6[%c1_11, %c0_12] : memref<3x128xf32, #tpu.memory_space<vmem>>, vector<1x128xf32>
    tpu.vector_store %arg6[%c1_11, %c0_12], %30 {strides = array<i32>} : memref<3x128xf32, #tpu.memory_space<vmem>>, vector<1x128xf32>,
    %c2_13 = arith.constant 2 : index
    %c0_14 = arith.constant 0 : index
    %45 = vector.load %arg6[%c2_13, %c0_14] : memref<3x128xf32, #tpu.memory_space<vmem>>, vector<1x128xf32>
    tpu.vector_store %arg6[%c2_13, %c0_14], %42 {strides = array<i32>} : memref<3x128xf32, #tpu.memory_space<vmem>>, vector<1x128xf32>,
    %cst_15 = arith.constant 1.000000e+30 : f32
    %46 = vector.broadcast %cst_15 : f32 to vector<1x128xf32>
    %cst_16 = arith.constant 0.000000e+00 : f32
    %47 = vector.broadcast %cst_16 : f32 to vector<1x128xf32>
    %cst_17 = arith.constant 0.000000e+00 : f32
    %48 = vector.broadcast %cst_17 : f32 to vector<1x128xf32>
    %cst_18 = arith.constant 0.000000e+00 : f32
    %49 = vector.broadcast %cst_18 : f32 to vector<1x128xf32>
    %cst_19 = arith.constant 0.000000e+00 : f32
    %50 = vector.broadcast %cst_19 : f32 to vector<1x128xf32>
    %cst_20 = arith.constant 0.000000e+00 : f32
    %51 = vector.broadcast %cst_20 : f32 to vector<1x128xf32>
    %cst_21 = arith.constant 0.000000e+00 : f32
    %52 = vector.broadcast %cst_21 : f32 to vector<1x128xf32>
    %cst_22 = arith.constant 0.000000e+00 : f32
    %53 = vector.broadcast %cst_22 : f32 to vector<1x1xf32>
    %c0_23 = arith.constant 0 : index
    %c0_24 = arith.constant 0 : index
    %54 = vector.load %arg4[%c0_23, %c0_24] : memref<64x16xf32, #tpu.memory_space<vmem>>, vector<16x16xf32>
    %55 = vector.extract_strided_slice %54 {offsets = [0, 15], sizes = [16, 1], strides = [1, 1]} : vector<16x16xf32> to vector<16x1xf32>
    %56 = vector.extract_strided_slice %54 {offsets = [0, 0], sizes = [16, 1], strides = [1, 1]} : vector<16x16xf32> to vector<16x1xf32>
    %57 = vector.extract_strided_slice %54 {offsets = [0, 1], sizes = [16, 1], strides = [1, 1]} : vector<16x16xf32> to vector<16x1xf32>
    %58 = vector.extract_strided_slice %54 {offsets = [0, 2], sizes = [16, 1], strides = [1, 1]} : vector<16x16xf32> to vector<16x1xf32>
    %59 = vector.extract_strided_slice %54 {offsets = [0, 3], sizes = [16, 1], strides = [1, 1]} : vector<16x16xf32> to vector<16x1xf32>
    %60 = vector.extract_strided_slice %54 {offsets = [0, 4], sizes = [16, 1], strides = [1, 1]} : vector<16x16xf32> to vector<16x1xf32>
    %61 = vector.extract_strided_slice %54 {offsets = [0, 5], sizes = [16, 1], strides = [1, 1]} : vector<16x16xf32> to vector<16x1xf32>
    %62 = vector.extract_strided_slice %54 {offsets = [0, 6], sizes = [16, 1], strides = [1, 1]} : vector<16x16xf32> to vector<16x1xf32>
    %63 = vector.extract_strided_slice %54 {offsets = [0, 7], sizes = [16, 1], strides = [1, 1]} : vector<16x16xf32> to vector<16x1xf32>
    %64 = vector.extract_strided_slice %54 {offsets = [0, 8], sizes = [16, 1], strides = [1, 1]} : vector<16x16xf32> to vector<16x1xf32>
    %65 = vector.extract_strided_slice %54 {offsets = [0, 9], sizes = [16, 1], strides = [1, 1]} : vector<16x16xf32> to vector<16x1xf32>
    %66 = vector.extract_strided_slice %54 {offsets = [0, 10], sizes = [16, 1], strides = [1, 1]} : vector<16x16xf32> to vector<16x1xf32>
    %67 = vector.extract_strided_slice %54 {offsets = [0, 11], sizes = [16, 1], strides = [1, 1]} : vector<16x16xf32> to vector<16x1xf32>
    %68 = vector.extract_strided_slice %54 {offsets = [0, 12], sizes = [16, 1], strides = [1, 1]} : vector<16x16xf32> to vector<16x1xf32>
    %69 = vector.extract_strided_slice %54 {offsets = [0, 13], sizes = [16, 1], strides = [1, 1]} : vector<16x16xf32> to vector<16x1xf32>
    %70 = vector.extract_strided_slice %54 {offsets = [0, 14], sizes = [16, 1], strides = [1, 1]} : vector<16x16xf32> to vector<16x1xf32>
    %71 = vector.broadcast %18 : vector<1x128xf32> to vector<16x128xf32>
    %72 = vector.broadcast %56 : vector<16x1xf32> to vector<16x128xf32>
    %73 = arith.subf %71, %72 : vector<16x128xf32>
    %74 = vector.broadcast %30 : vector<1x128xf32> to vector<16x128xf32>
    %75 = vector.broadcast %57 : vector<16x1xf32> to vector<16x128xf32>
    %76 = arith.subf %74, %75 : vector<16x128xf32>
    %77 = vector.broadcast %42 : vector<1x128xf32> to vector<16x128xf32>
    %78 = vector.broadcast %58 : vector<16x1xf32> to vector<16x128xf32>
    %79 = arith.subf %77, %78 : vector<16x128xf32>
    %80 = vector.broadcast %65 : vector<16x1xf32> to vector<16x128xf32>
    %81 = arith.mulf %80, %73 : vector<16x128xf32>
    %82 = vector.broadcast %66 : vector<16x1xf32> to vector<16x128xf32>
    %83 = arith.mulf %82, %76 : vector<16x128xf32>
    %84 = arith.addf %81, %83 : vector<16x128xf32>
    %85 = vector.broadcast %67 : vector<16x1xf32> to vector<16x128xf32>
    %86 = arith.mulf %85, %79 : vector<16x128xf32>
    %87 = arith.addf %84, %86 : vector<16x128xf32>
    %88 = vector.broadcast %68 : vector<16x1xf32> to vector<16x128xf32>
    %89 = arith.mulf %88, %73 : vector<16x128xf32>
    %90 = vector.broadcast %69 : vector<16x1xf32> to vector<16x128xf32>
    %91 = arith.mulf %90, %76 : vector<16x128xf32>
    %92 = arith.addf %89, %91 : vector<16x128xf32>
    %93 = vector.broadcast %70 : vector<16x1xf32> to vector<16x128xf32>
    %94 = arith.mulf %93, %79 : vector<16x128xf32>
    %95 = arith.addf %92, %94 : vector<16x128xf32>
    %96 = vector.broadcast %18 : vector<1x128xf32> to vector<16x128xf32>
    %97 = vector.broadcast %59 : vector<16x1xf32> to vector<16x128xf32>
    %98 = arith.subf %96, %97 : vector<16x128xf32>
    %99 = vector.broadcast %30 : vector<1x128xf32> to vector<16x128xf32>
    %100 = vector.broadcast %60 : vector<16x1xf32> to vector<16x128xf32>
    %101 = arith.subf %99, %100 : vector<16x128xf32>
    %102 = vector.broadcast %42 : vector<1x128xf32> to vector<16x128xf32>
    %103 = vector.broadcast %61 : vector<16x1xf32> to vector<16x128xf32>
    %104 = arith.subf %102, %103 : vector<16x128xf32>
    %105 = vector.broadcast %65 : vector<16x1xf32> to vector<16x128xf32>
    %106 = arith.mulf %105, %98 : vector<16x128xf32>
    %107 = vector.broadcast %66 : vector<16x1xf32> to vector<16x128xf32>
    %108 = arith.mulf %107, %101 : vector<16x128xf32>
    %109 = arith.addf %106, %108 : vector<16x128xf32>
    %110 = vector.broadcast %67 : vector<16x1xf32> to vector<16x128xf32>
    %111 = arith.mulf %110, %104 : vector<16x128xf32>
    %112 = arith.addf %109, %111 : vector<16x128xf32>
    %113 = vector.broadcast %68 : vector<16x1xf32> to vector<16x128xf32>
    %114 = arith.mulf %113, %98 : vector<16x128xf32>
    %115 = vector.broadcast %69 : vector<16x1xf32> to vector<16x128xf32>
    %116 = arith.mulf %115, %101 : vector<16x128xf32>
    %117 = arith.addf %114, %116 : vector<16x128xf32>
    %118 = vector.broadcast %70 : vector<16x1xf32> to vector<16x128xf32>
    %119 = arith.mulf %118, %104 : vector<16x128xf32>
    %120 = arith.addf %117, %119 : vector<16x128xf32>
    %121 = vector.broadcast %18 : vector<1x128xf32> to vector<16x128xf32>
    %122 = vector.broadcast %62 : vector<16x1xf32> to vector<16x128xf32>
    %123 = arith.subf %121, %122 : vector<16x128xf32>
    %124 = vector.broadcast %30 : vector<1x128xf32> to vector<16x128xf32>
    %125 = vector.broadcast %63 : vector<16x1xf32> to vector<16x128xf32>
    %126 = arith.subf %124, %125 : vector<16x128xf32>
    %127 = vector.broadcast %42 : vector<1x128xf32> to vector<16x128xf32>
    %128 = vector.broadcast %64 : vector<16x1xf32> to vector<16x128xf32>
    %129 = arith.subf %127, %128 : vector<16x128xf32>
    %130 = vector.broadcast %65 : vector<16x1xf32> to vector<16x128xf32>
    %131 = arith.mulf %130, %123 : vector<16x128xf32>
    %132 = vector.broadcast %66 : vector<16x1xf32> to vector<16x128xf32>
    %133 = arith.mulf %132, %126 : vector<16x128xf32>
    %134 = arith.addf %131, %133 : vector<16x128xf32>
    %135 = vector.broadcast %67 : vector<16x1xf32> to vector<16x128xf32>
    %136 = arith.mulf %135, %129 : vector<16x128xf32>
    %137 = arith.addf %134, %136 : vector<16x128xf32>
    %138 = vector.broadcast %68 : vector<16x1xf32> to vector<16x128xf32>
    %139 = arith.mulf %138, %123 : vector<16x128xf32>
    %140 = vector.broadcast %69 : vector<16x1xf32> to vector<16x128xf32>
    %141 = arith.mulf %140, %126 : vector<16x128xf32>
    %142 = arith.addf %139, %141 : vector<16x128xf32>
    %143 = vector.broadcast %70 : vector<16x1xf32> to vector<16x128xf32>
    %144 = arith.mulf %143, %129 : vector<16x128xf32>
    %145 = arith.addf %142, %144 : vector<16x128xf32>
    %146 = arith.mulf %87, %120 : vector<16x128xf32>
    %147 = arith.mulf %112, %95 : vector<16x128xf32>
    %148 = arith.subf %146, %147 : vector<16x128xf32>
    %149 = arith.mulf %137, %95 : vector<16x128xf32>
    %150 = arith.mulf %87, %145 : vector<16x128xf32>
    %151 = arith.subf %149, %150 : vector<16x128xf32>
    %152 = arith.mulf %112, %145 : vector<16x128xf32>
    %153 = arith.mulf %137, %120 : vector<16x128xf32>
    %154 = arith.subf %152, %153 : vector<16x128xf32>
    %cst_25 = arith.constant 0.000000e+00 : f32
    %155 = vector.broadcast %cst_25 : f32 to vector<16x128xf32>
    %156 = arith.cmpf ole, %87, %155 : vector<16x128xf32>
    %cst_26 = arith.constant 0.000000e+00 : f32
    %157 = vector.broadcast %cst_26 : f32 to vector<16x128xf32>
    %158 = arith.cmpf ole, %95, %157 : vector<16x128xf32>
    %159 = arith.andi %156, %158 : vector<16x128xi1>
    %cst_27 = arith.constant 0.000000e+00 : f32
    %160 = vector.broadcast %cst_27 : f32 to vector<16x128xf32>
    %161 = arith.cmpf oge, %112, %160 : vector<16x128xf32>
    %162 = arith.cmpf ole, %120, %112 : vector<16x128xf32>
    %163 = arith.andi %161, %162 : vector<16x128xi1>
    %cst_28 = arith.constant 0.000000e+00 : f32
    %164 = vector.broadcast %cst_28 : f32 to vector<16x128xf32>
    %165 = arith.cmpf oge, %145, %164 : vector<16x128xf32>
    %166 = arith.cmpf ole, %137, %145 : vector<16x128xf32>
    %167 = arith.andi %165, %166 : vector<16x128xi1>
    %cst_29 = arith.constant 0.000000e+00 : f32
    %168 = vector.broadcast %cst_29 : f32 to vector<16x128xf32>
    %169 = arith.cmpf ole, %148, %168 : vector<16x128xf32>
    %cst_30 = arith.constant 0.000000e+00 : f32
    %170 = vector.broadcast %cst_30 : f32 to vector<16x128xf32>
    %171 = arith.cmpf oge, %87, %170 : vector<16x128xf32>
    %172 = arith.andi %169, %171 : vector<16x128xi1>
    %cst_31 = arith.constant 0.000000e+00 : f32
    %173 = vector.broadcast %cst_31 : f32 to vector<16x128xf32>
    %174 = arith.cmpf ole, %112, %173 : vector<16x128xf32>
    %175 = arith.andi %172, %174 : vector<16x128xi1>
    %cst_32 = arith.constant 0.000000e+00 : f32
    %176 = vector.broadcast %cst_32 : f32 to vector<16x128xf32>
    %177 = arith.cmpf ole, %151, %176 : vector<16x128xf32>
    %cst_33 = arith.constant 0.000000e+00 : f32
    %178 = vector.broadcast %cst_33 : f32 to vector<16x128xf32>
    %179 = arith.cmpf oge, %95, %178 : vector<16x128xf32>
    %180 = arith.andi %177, %179 : vector<16x128xi1>
    %cst_34 = arith.constant 0.000000e+00 : f32
    %181 = vector.broadcast %cst_34 : f32 to vector<16x128xf32>
    %182 = arith.cmpf ole, %145, %181 : vector<16x128xf32>
    %183 = arith.andi %180, %182 : vector<16x128xi1>
    %cst_35 = arith.constant 0.000000e+00 : f32
    %184 = vector.broadcast %cst_35 : f32 to vector<16x128xf32>
    %185 = arith.cmpf ole, %154, %184 : vector<16x128xf32>
    %186 = arith.subf %120, %112 : vector<16x128xf32>
    %cst_36 = arith.constant 0.000000e+00 : f32
    %187 = vector.broadcast %cst_36 : f32 to vector<16x128xf32>
    %188 = arith.cmpf oge, %186, %187 : vector<16x128xf32>
    %189 = arith.andi %185, %188 : vector<16x128xi1>
    %190 = arith.subf %137, %145 : vector<16x128xf32>
    %cst_37 = arith.constant 0.000000e+00 : f32
    %191 = vector.broadcast %cst_37 : f32 to vector<16x128xf32>
    %192 = arith.cmpf oge, %190, %191 : vector<16x128xf32>
    %193 = arith.andi %189, %192 : vector<16x128xi1>
    %194 = arith.subf %87, %112 : vector<16x128xf32>
    %195 = math.absf %194 : vector<16x128xf32>
    %cst_38 = arith.constant 9.99999996E-13 : f32
    %196 = vector.broadcast %cst_38 : f32 to vector<16x128xf32>
    %197 = arith.cmpf ogt, %195, %196 : vector<16x128xf32>
    %cst_39 = arith.constant 1.000000e+00 : f32
    %198 = vector.broadcast %cst_39 : f32 to vector<16x128xf32>
    %199 = arith.select %197, %194, %198 : vector<16x128xi1>, vector<16x128xf32>
    %200 = tpu.reciprocal %199 {approx = true} : vector<16x128xf32> -> vector<16x128xf32>
    %201 = arith.mulf %87, %200 : vector<16x128xf32>
    %cst_40 = arith.constant 0.000000e+00 : f32
    %cst_41 = arith.constant 1.000000e+00 : f32
    %202 = vector.broadcast %cst_40 : f32 to vector<16x128xf32>
    %203 = arith.maximumf %202, %201 : vector<16x128xf32>
    %204 = vector.broadcast %cst_41 : f32 to vector<16x128xf32>
    %205 = arith.minimumf %204, %203 : vector<16x128xf32>
    %206 = arith.subf %95, %145 : vector<16x128xf32>
    %207 = math.absf %206 : vector<16x128xf32>
    %cst_42 = arith.constant 9.99999996E-13 : f32
    %208 = vector.broadcast %cst_42 : f32 to vector<16x128xf32>
    %209 = arith.cmpf ogt, %207, %208 : vector<16x128xf32>
    %cst_43 = arith.constant 1.000000e+00 : f32
    %210 = vector.broadcast %cst_43 : f32 to vector<16x128xf32>
    %211 = arith.select %209, %206, %210 : vector<16x128xi1>, vector<16x128xf32>
    %212 = tpu.reciprocal %211 {approx = true} : vector<16x128xf32> -> vector<16x128xf32>
    %213 = arith.mulf %95, %212 : vector<16x128xf32>
    %cst_44 = arith.constant 0.000000e+00 : f32
    %cst_45 = arith.constant 1.000000e+00 : f32
    %214 = vector.broadcast %cst_44 : f32 to vector<16x128xf32>
    %215 = arith.maximumf %214, %213 : vector<16x128xf32>
    %216 = vector.broadcast %cst_45 : f32 to vector<16x128xf32>
    %217 = arith.minimumf %216, %215 : vector<16x128xf32>
    %218 = arith.subf %120, %112 : vector<16x128xf32>
    %219 = arith.subf %120, %112 : vector<16x128xf32>
    %220 = arith.subf %137, %145 : vector<16x128xf32>
    %221 = arith.addf %219, %220 : vector<16x128xf32>
    %222 = math.absf %221 : vector<16x128xf32>
    %cst_46 = arith.constant 9.99999996E-13 : f32
    %223 = vector.broadcast %cst_46 : f32 to vector<16x128xf32>
    %224 = arith.cmpf ogt, %222, %223 : vector<16x128xf32>
    %cst_47 = arith.constant 1.000000e+00 : f32
    %225 = vector.broadcast %cst_47 : f32 to vector<16x128xf32>
    %226 = arith.select %224, %221, %225 : vector<16x128xi1>, vector<16x128xf32>
    %227 = tpu.reciprocal %226 {approx = true} : vector<16x128xf32> -> vector<16x128xf32>
    %228 = arith.mulf %218, %227 : vector<16x128xf32>
    %cst_48 = arith.constant 0.000000e+00 : f32
    %cst_49 = arith.constant 1.000000e+00 : f32
    %229 = vector.broadcast %cst_48 : f32 to vector<16x128xf32>
    %230 = arith.maximumf %229, %228 : vector<16x128xf32>
    %231 = vector.broadcast %cst_49 : f32 to vector<16x128xf32>
    %232 = arith.minimumf %231, %230 : vector<16x128xf32>
    %233 = arith.addf %154, %151 : vector<16x128xf32>
    %234 = arith.addf %233, %148 : vector<16x128xf32>
    %235 = math.absf %234 : vector<16x128xf32>
    %cst_50 = arith.constant 9.99999996E-13 : f32
    %236 = vector.broadcast %cst_50 : f32 to vector<16x128xf32>
    %237 = arith.cmpf ogt, %235, %236 : vector<16x128xf32>
    %cst_51 = arith.constant 1.000000e+00 : f32
    %238 = vector.broadcast %cst_51 : f32 to vector<16x128xf32>
    %239 = arith.select %237, %234, %238 : vector<16x128xi1>, vector<16x128xf32>
    %240 = tpu.reciprocal %239 {approx = true} : vector<16x128xf32> -> vector<16x128xf32>
    %241 = arith.mulf %151, %240 : vector<16x128xf32>
    %cst_52 = arith.constant 0.000000e+00 : f32
    %cst_53 = arith.constant 1.000000e+00 : f32
    %242 = vector.broadcast %cst_52 : f32 to vector<16x128xf32>
    %243 = arith.maximumf %242, %241 : vector<16x128xf32>
    %244 = vector.broadcast %cst_53 : f32 to vector<16x128xf32>
    %245 = arith.minimumf %244, %243 : vector<16x128xf32>
    %246 = arith.mulf %148, %240 : vector<16x128xf32>
    %cst_54 = arith.constant 1.000000e+00 : f32
    %247 = vector.broadcast %cst_54 : f32 to vector<16x128xf32>
    %248 = arith.subf %247, %245 : vector<16x128xf32>
    %cst_55 = arith.constant 0.000000e+00 : f32
    %249 = vector.broadcast %cst_55 : f32 to vector<16x128xf32>
    %250 = arith.maximumf %249, %246 : vector<16x128xf32>
    %251 = arith.minimumf %248, %250 : vector<16x128xf32>
    %252 = vector.broadcast %65 : vector<16x1xf32> to vector<16x128xf32>
    %253 = arith.mulf %245, %252 : vector<16x128xf32>
    %254 = vector.broadcast %56 : vector<16x1xf32> to vector<16x128xf32>
    %255 = arith.addf %254, %253 : vector<16x128xf32>
    %256 = vector.broadcast %68 : vector<16x1xf32> to vector<16x128xf32>
    %257 = arith.mulf %251, %256 : vector<16x128xf32>
    %258 = arith.addf %255, %257 : vector<16x128xf32>
    %259 = arith.subf %62, %59 : vector<16x1xf32>
    %260 = vector.broadcast %259 : vector<16x1xf32> to vector<16x128xf32>
    %261 = arith.mulf %232, %260 : vector<16x128xf32>
    %262 = vector.broadcast %59 : vector<16x1xf32> to vector<16x128xf32>
    %263 = arith.addf %262, %261 : vector<16x128xf32>
    %264 = arith.select %193, %263, %258 : vector<16x128xi1>, vector<16x128xf32>
    %265 = vector.broadcast %68 : vector<16x1xf32> to vector<16x128xf32>
    %266 = arith.mulf %217, %265 : vector<16x128xf32>
    %267 = vector.broadcast %56 : vector<16x1xf32> to vector<16x128xf32>
    %268 = arith.addf %267, %266 : vector<16x128xf32>
    %269 = arith.select %183, %268, %264 : vector<16x128xi1>, vector<16x128xf32>
    %270 = vector.broadcast %65 : vector<16x1xf32> to vector<16x128xf32>
    %271 = arith.mulf %205, %270 : vector<16x128xf32>
    %272 = vector.broadcast %56 : vector<16x1xf32> to vector<16x128xf32>
    %273 = arith.addf %272, %271 : vector<16x128xf32>
    %274 = arith.select %175, %273, %269 : vector<16x128xi1>, vector<16x128xf32>
    %275 = vector.shape_cast %62 : vector<16x1xf32> to vector<16x1xf32>
    %276 = vector.broadcast %275 : vector<16x1xf32> to vector<16x128xf32>
    %277 = arith.select %167, %276, %274 : vector<16x128xi1>, vector<16x128xf32>
    %278 = vector.shape_cast %59 : vector<16x1xf32> to vector<16x1xf32>
    %279 = vector.broadcast %278 : vector<16x1xf32> to vector<16x128xf32>
    %280 = arith.select %163, %279, %277 : vector<16x128xi1>, vector<16x128xf32>
    %281 = vector.shape_cast %56 : vector<16x1xf32> to vector<16x1xf32>
    %282 = vector.broadcast %281 : vector<16x1xf32> to vector<16x128xf32>
    %283 = arith.select %159, %282, %280 : vector<16x128xi1>, vector<16x128xf32>
    %284 = vector.broadcast %18 : vector<1x128xf32> to vector<16x128xf32>
    %285 = arith.subf %284, %283 : vector<16x128xf32>
    %286 = vector.broadcast %66 : vector<16x1xf32> to vector<16x128xf32>
    %287 = arith.mulf %245, %286 : vector<16x128xf32>
    %288 = vector.broadcast %57 : vector<16x1xf32> to vector<16x128xf32>
    %289 = arith.addf %288, %287 : vector<16x128xf32>
    %290 = vector.broadcast %69 : vector<16x1xf32> to vector<16x128xf32>
    %291 = arith.mulf %251, %290 : vector<16x128xf32>
    %292 = arith.addf %289, %291 : vector<16x128xf32>
    %293 = arith.subf %63, %60 : vector<16x1xf32>
    %294 = vector.broadcast %293 : vector<16x1xf32> to vector<16x128xf32>
    %295 = arith.mulf %232, %294 : vector<16x128xf32>
    %296 = vector.broadcast %60 : vector<16x1xf32> to vector<16x128xf32>
    %297 = arith.addf %296, %295 : vector<16x128xf32>
    %298 = arith.select %193, %297, %292 : vector<16x128xi1>, vector<16x128xf32>
    %299 = vector.broadcast %69 : vector<16x1xf32> to vector<16x128xf32>
    %300 = arith.mulf %217, %299 : vector<16x128xf32>
    %301 = vector.broadcast %57 : vector<16x1xf32> to vector<16x128xf32>
    %302 = arith.addf %301, %300 : vector<16x128xf32>
    %303 = arith.select %183, %302, %298 : vector<16x128xi1>, vector<16x128xf32>
    %304 = vector.broadcast %66 : vector<16x1xf32> to vector<16x128xf32>
    %305 = arith.mulf %205, %304 : vector<16x128xf32>
    %306 = vector.broadcast %57 : vector<16x1xf32> to vector<16x128xf32>
    %307 = arith.addf %306, %305 : vector<16x128xf32>
    %308 = arith.select %175, %307, %303 : vector<16x128xi1>, vector<16x128xf32>
    %309 = vector.shape_cast %63 : vector<16x1xf32> to vector<16x1xf32>
    %310 = vector.broadcast %309 : vector<16x1xf32> to vector<16x128xf32>
    %311 = arith.select %167, %310, %308 : vector<16x128xi1>, vector<16x128xf32>
    %312 = vector.shape_cast %60 : vector<16x1xf32> to vector<16x1xf32>
    %313 = vector.broadcast %312 : vector<16x1xf32> to vector<16x128xf32>
    %314 = arith.select %163, %313, %311 : vector<16x128xi1>, vector<16x128xf32>
    %315 = vector.shape_cast %57 : vector<16x1xf32> to vector<16x1xf32>
    %316 = vector.broadcast %315 : vector<16x1xf32> to vector<16x128xf32>
    %317 = arith.select %159, %316, %314 : vector<16x128xi1>, vector<16x128xf32>
    %318 = vector.broadcast %30 : vector<1x128xf32> to vector<16x128xf32>
    %319 = arith.subf %318, %317 : vector<16x128xf32>
    %320 = vector.broadcast %67 : vector<16x1xf32> to vector<16x128xf32>
    %321 = arith.mulf %245, %320 : vector<16x128xf32>
    %322 = vector.broadcast %58 : vector<16x1xf32> to vector<16x128xf32>
    %323 = arith.addf %322, %321 : vector<16x128xf32>
    %324 = vector.broadcast %70 : vector<16x1xf32> to vector<16x128xf32>
    %325 = arith.mulf %251, %324 : vector<16x128xf32>
    %326 = arith.addf %323, %325 : vector<16x128xf32>
    %327 = arith.subf %64, %61 : vector<16x1xf32>
    %328 = vector.broadcast %327 : vector<16x1xf32> to vector<16x128xf32>
    %329 = arith.mulf %232, %328 : vector<16x128xf32>
    %330 = vector.broadcast %61 : vector<16x1xf32> to vector<16x128xf32>
    %331 = arith.addf %330, %329 : vector<16x128xf32>
    %332 = arith.select %193, %331, %326 : vector<16x128xi1>, vector<16x128xf32>
    %333 = vector.broadcast %70 : vector<16x1xf32> to vector<16x128xf32>
    %334 = arith.mulf %217, %333 : vector<16x128xf32>
    %335 = vector.broadcast %58 : vector<16x1xf32> to vector<16x128xf32>
    %336 = arith.addf %335, %334 : vector<16x128xf32>
    %337 = arith.select %183, %336, %332 : vector<16x128xi1>, vector<16x128xf32>
    %338 = vector.broadcast %67 : vector<16x1xf32> to vector<16x128xf32>
    %339 = arith.mulf %205, %338 : vector<16x128xf32>
    %340 = vector.broadcast %58 : vector<16x1xf32> to vector<16x128xf32>
    %341 = arith.addf %340, %339 : vector<16x128xf32>
    %342 = arith.select %175, %341, %337 : vector<16x128xi1>, vector<16x128xf32>
    %343 = vector.shape_cast %64 : vector<16x1xf32> to vector<16x1xf32>
    %344 = vector.broadcast %343 : vector<16x1xf32> to vector<16x128xf32>
    %345 = arith.select %167, %344, %342 : vector<16x128xi1>, vector<16x128xf32>
    %346 = vector.shape_cast %61 : vector<16x1xf32> to vector<16x1xf32>
    %347 = vector.broadcast %346 : vector<16x1xf32> to vector<16x128xf32>
    %348 = arith.select %163, %347, %345 : vector<16x128xi1>, vector<16x128xf32>
    %349 = vector.shape_cast %58 : vector<16x1xf32> to vector<16x1xf32>
    %350 = vector.broadcast %349 : vector<16x1xf32> to vector<16x128xf32>
    %351 = arith.select %159, %350, %348 : vector<16x128xi1>, vector<16x128xf32>
    %352 = vector.broadcast %42 : vector<1x128xf32> to vector<16x128xf32>
    %353 = arith.subf %352, %351 : vector<16x128xf32>
    %354 = arith.mulf %285, %285 : vector<16x128xf32>
    %355 = arith.mulf %319, %319 : vector<16x128xf32>
    %356 = arith.addf %354, %355 : vector<16x128xf32>
    %357 = arith.mulf %353, %353 : vector<16x128xf32>
    %358 = arith.addf %356, %357 : vector<16x128xf32>
    %cst_56 = arith.constant dense<0x7F800000> : vector<128xf32>
    %359 = vector.multi_reduction <minimumf>, %358, %cst_56 [0] : vector<16x128xf32> to vector<128xf32>
    %360 = vector.shape_cast %359 : vector<128xf32> to vector<1x128xf32>
    %361 = vector.broadcast %360 : vector<1x128xf32> to vector<16x128xf32>
    %362 = arith.cmpf ole, %358, %361 : vector<16x128xf32>
    %363 = arith.extui %362 : vector<16x128xi1> to vector<16x128xi32>
    %364 = arith.sitofp %363 : vector<16x128xi32> to vector<16x128xf32>
    %cst_57 = arith.constant dense<0.000000e+00> : vector<128xf32>
    %365 = vector.multi_reduction <add>, %364, %cst_57 [0] : vector<16x128xf32> to vector<128xf32>
    %366 = vector.shape_cast %365 : vector<128xf32> to vector<1x128xf32>
    %cst_58 = arith.constant 1.000000e+00 : f32
    %367 = vector.broadcast %cst_58 : f32 to vector<1x128xf32>
    %368 = arith.maximumf %366, %367 : vector<1x128xf32>
    %369 = tpu.reciprocal %368 {approx = true} : vector<1x128xf32> -> vector<1x128xf32>
    %370 = arith.mulf %285, %364 : vector<16x128xf32>
    %cst_59 = arith.constant dense<0.000000e+00> : vector<128xf32>
    %371 = vector.multi_reduction <add>, %370, %cst_59 [0] : vector<16x128xf32> to vector<128xf32>
    %372 = vector.shape_cast %371 : vector<128xf32> to vector<1x128xf32>
    %373 = arith.mulf %372, %369 : vector<1x128xf32>
    %374 = arith.mulf %319, %364 : vector<16x128xf32>
    %cst_60 = arith.constant dense<0.000000e+00> : vector<128xf32>
    %375 = vector.multi_reduction <add>, %374, %cst_60 [0] : vector<16x128xf32> to vector<128xf32>
    %376 = vector.shape_cast %375 : vector<128xf32> to vector<1x128xf32>
    %377 = arith.mulf %376, %369 : vector<1x128xf32>
    %378 = arith.mulf %353, %364 : vector<16x128xf32>
    %cst_61 = arith.constant dense<0.000000e+00> : vector<128xf32>
    %379 = vector.multi_reduction <add>, %378, %cst_61 [0] : vector<16x128xf32> to vector<128xf32>
    %380 = vector.shape_cast %379 : vector<128xf32> to vector<1x128xf32>
    %381 = arith.mulf %380, %369 : vector<1x128xf32>
    %382 = arith.cmpf olt, %360, %46 : vector<1x128xf32>
    %383 = arith.select %382, %373, %47 : vector<1x128xi1>, vector<1x128xf32>
    %384 = arith.select %382, %377, %48 : vector<1x128xi1>, vector<1x128xf32>
    %385 = arith.select %382, %381, %49 : vector<1x128xi1>, vector<1x128xf32>
    %386 = arith.minimumf %46, %360 : vector<1x128xf32>
    %cst_62 = arith.constant dense<0x7F800000> : vector<16xf32>
    %387 = vector.multi_reduction <minimumf>, %358, %cst_62 [1] : vector<16x128xf32> to vector<16xf32>
    %388 = vector.shape_cast %387 : vector<16xf32> to vector<16x1xf32>
    %389 = arith.mulf %388, %55 : vector<16x1xf32>
    %cst_63 = arith.constant dense<0.000000e+00> : vector<1xf32>
    %390 = vector.multi_reduction <add>, %389, %cst_63 [0] : vector<16x1xf32> to vector<1xf32>
    %391 = vector.shape_cast %390 : vector<1xf32> to vector<1x1xf32>
    %392 = arith.addf %53, %391 : vector<1x1xf32>
    %393 = vector.broadcast %388 : vector<16x1xf32> to vector<16x128xf32>
    %394 = arith.cmpf ole, %358, %393 : vector<16x128xf32>
    %395 = arith.extui %394 : vector<16x128xi1> to vector<16x128xi32>
    %396 = arith.sitofp %395 : vector<16x128xi32> to vector<16x128xf32>
    %397 = vector.broadcast %55 : vector<16x1xf32> to vector<16x128xf32>
    %398 = arith.mulf %396, %397 : vector<16x128xf32>
    %cst_64 = arith.constant dense<0.000000e+00> : vector<16xf32>
    %399 = vector.multi_reduction <add>, %398, %cst_64 [1] : vector<16x128xf32> to vector<16xf32>
    %400 = vector.shape_cast %399 : vector<16xf32> to vector<16x1xf32>
    %cst_65 = arith.constant 1.000000e+00 : f32
    %401 = vector.broadcast %cst_65 : f32 to vector<16x1xf32>
    %402 = arith.maximumf %400, %401 : vector<16x1xf32>
    %403 = tpu.reciprocal %402 {approx = true} : vector<16x1xf32> -> vector<16x1xf32>
    %404 = vector.broadcast %403 : vector<16x1xf32> to vector<16x128xf32>
    %405 = arith.mulf %398, %404 : vector<16x128xf32>
    %406 = arith.mulf %405, %285 : vector<16x128xf32>
    %cst_66 = arith.constant dense<0.000000e+00> : vector<128xf32>
    %407 = vector.multi_reduction <add>, %406, %cst_66 [0] : vector<16x128xf32> to vector<128xf32>
    %408 = vector.shape_cast %407 : vector<128xf32> to vector<1x128xf32>
    %409 = arith.addf %50, %408 : vector<1x128xf32>
    %410 = arith.mulf %405, %319 : vector<16x128xf32>
    %cst_67 = arith.constant dense<0.000000e+00> : vector<128xf32>
    %411 = vector.multi_reduction <add>, %410, %cst_67 [0] : vector<16x128xf32> to vector<128xf32>
    %412 = vector.shape_cast %411 : vector<128xf32> to vector<1x128xf32>
    %413 = arith.addf %51, %412 : vector<1x128xf32>
    %414 = arith.mulf %405, %353 : vector<16x128xf32>
    %cst_68 = arith.constant dense<0.000000e+00> : vector<128xf32>
    %415 = vector.multi_reduction <add>, %414, %cst_68 [0] : vector<16x128xf32> to vector<128xf32>
    %416 = vector.shape_cast %415 : vector<128xf32> to vector<1x128xf32>
    %417 = arith.addf %52, %416 : vector<1x128xf32>
    %c16 = arith.constant 16 : index
    %c0_69 = arith.constant 0 : index
    %418 = vector.load %arg4[%c16, %c0_69] : memref<64x16xf32, #tpu.memory_space<vmem>>, vector<16x16xf32>
    %419 = vector.extract_strided_slice %418 {offsets = [0, 15], sizes = [16, 1], strides = [1, 1]} : vector<16x16xf32> to vector<16x1xf32>
    %420 = vector.extract_strided_slice %418 {offsets = [0, 0], sizes = [16, 1], strides = [1, 1]} : vector<16x16xf32> to vector<16x1xf32>
    %421 = vector.extract_strided_slice %418 {offsets = [0, 1], sizes = [16, 1], strides = [1, 1]} : vector<16x16xf32> to vector<16x1xf32>
    %422 = vector.extract_strided_slice %418 {offsets = [0, 2], sizes = [16, 1], strides = [1, 1]} : vector<16x16xf32> to vector<16x1xf32>
    %423 = vector.extract_strided_slice %418 {offsets = [0, 3], sizes = [16, 1], strides = [1, 1]} : vector<16x16xf32> to vector<16x1xf32>
    %424 = vector.extract_strided_slice %418 {offsets = [0, 4], sizes = [16, 1], strides = [1, 1]} : vector<16x16xf32> to vector<16x1xf32>
    %425 = vector.extract_strided_slice %418 {offsets = [0, 5], sizes = [16, 1], strides = [1, 1]} : vector<16x16xf32> to vector<16x1xf32>
    %426 = vector.extract_strided_slice %418 {offsets = [0, 6], sizes = [16, 1], strides = [1, 1]} : vector<16x16xf32> to vector<16x1xf32>
    %427 = vector.extract_strided_slice %418 {offsets = [0, 7], sizes = [16, 1], strides = [1, 1]} : vector<16x16xf32> to vector<16x1xf32>
    %428 = vector.extract_strided_slice %418 {offsets = [0, 8], sizes = [16, 1], strides = [1, 1]} : vector<16x16xf32> to vector<16x1xf32>
    %429 = vector.extract_strided_slice %418 {offsets = [0, 9], sizes = [16, 1], strides = [1, 1]} : vector<16x16xf32> to vector<16x1xf32>
    %430 = vector.extract_strided_slice %418 {offsets = [0, 10], sizes = [16, 1], strides = [1, 1]} : vector<16x16xf32> to vector<16x1xf32>
    %431 = vector.extract_strided_slice %418 {offsets = [0, 11], sizes = [16, 1], strides = [1, 1]} : vector<16x16xf32> to vector<16x1xf32>
    %432 = vector.extract_strided_slice %418 {offsets = [0, 12], sizes = [16, 1], strides = [1, 1]} : vector<16x16xf32> to vector<16x1xf32>
    %433 = vector.extract_strided_slice %418 {offsets = [0, 13], sizes = [16, 1], strides = [1, 1]} : vector<16x16xf32> to vector<16x1xf32>
    %434 = vector.extract_strided_slice %418 {offsets = [0, 14], sizes = [16, 1], strides = [1, 1]} : vector<16x16xf32> to vector<16x1xf32>
    %435 = vector.broadcast %18 : vector<1x128xf32> to vector<16x128xf32>
    %436 = vector.broadcast %420 : vector<16x1xf32> to vector<16x128xf32>
    %437 = arith.subf %435, %436 : vector<16x128xf32>
    %438 = vector.broadcast %30 : vector<1x128xf32> to vector<16x128xf32>
    %439 = vector.broadcast %421 : vector<16x1xf32> to vector<16x128xf32>
    %440 = arith.subf %438, %439 : vector<16x128xf32>
    %441 = vector.broadcast %42 : vector<1x128xf32> to vector<16x128xf32>
    %442 = vector.broadcast %422 : vector<16x1xf32> to vector<16x128xf32>
    %443 = arith.subf %441, %442 : vector<16x128xf32>
    %444 = vector.broadcast %429 : vector<16x1xf32> to vector<16x128xf32>
    %445 = arith.mulf %444, %437 : vector<16x128xf32>
    %446 = vector.broadcast %430 : vector<16x1xf32> to vector<16x128xf32>
    %447 = arith.mulf %446, %440 : vector<16x128xf32>
    %448 = arith.addf %445, %447 : vector<16x128xf32>
    %449 = vector.broadcast %431 : vector<16x1xf32> to vector<16x128xf32>
    %450 = arith.mulf %449, %443 : vector<16x128xf32>
    %451 = arith.addf %448, %450 : vector<16x128xf32>
    %452 = vector.broadcast %432 : vector<16x1xf32> to vector<16x128xf32>
    %453 = arith.mulf %452, %437 : vector<16x128xf32>
    %454 = vector.broadcast %433 : vector<16x1xf32> to vector<16x128xf32>
    %455 = arith.mulf %454, %440 : vector<16x128xf32>
    %456 = arith.addf %453, %455 : vector<16x128xf32>
    %457 = vector.broadcast %434 : vector<16x1xf32> to vector<16x128xf32>
    %458 = arith.mulf %457, %443 : vector<16x128xf32>
    %459 = arith.addf %456, %458 : vector<16x128xf32>
    %460 = vector.broadcast %18 : vector<1x128xf32> to vector<16x128xf32>
    %461 = vector.broadcast %423 : vector<16x1xf32> to vector<16x128xf32>
    %462 = arith.subf %460, %461 : vector<16x128xf32>
    %463 = vector.broadcast %30 : vector<1x128xf32> to vector<16x128xf32>
    %464 = vector.broadcast %424 : vector<16x1xf32> to vector<16x128xf32>
    %465 = arith.subf %463, %464 : vector<16x128xf32>
    %466 = vector.broadcast %42 : vector<1x128xf32> to vector<16x128xf32>
    %467 = vector.broadcast %425 : vector<16x1xf32> to vector<16x128xf32>
    %468 = arith.subf %466, %467 : vector<16x128xf32>
    %469 = vector.broadcast %429 : vector<16x1xf32> to vector<16x128xf32>
    %470 = arith.mulf %469, %462 : vector<16x128xf32>
    %471 = vector.broadcast %430 : vector<16x1xf32> to vector<16x128xf32>
    %472 = arith.mulf %471, %465 : vector<16x128xf32>
    %473 = arith.addf %470, %472 : vector<16x128xf32>
    %474 = vector.broadcast %431 : vector<16x1xf32> to vector<16x128xf32>
    %475 = arith.mulf %474, %468 : vector<16x128xf32>
    %476 = arith.addf %473, %475 : vector<16x128xf32>
    %477 = vector.broadcast %432 : vector<16x1xf32> to vector<16x128xf32>
    %478 = arith.mulf %477, %462 : vector<16x128xf32>
    %479 = vector.broadcast %433 : vector<16x1xf32> to vector<16x128xf32>
    %480 = arith.mulf %479, %465 : vector<16x128xf32>
    %481 = arith.addf %478, %480 : vector<16x128xf32>
    %482 = vector.broadcast %434 : vector<16x1xf32> to vector<16x128xf32>
    %483 = arith.mulf %482, %468 : vector<16x128xf32>
    %484 = arith.addf %481, %483 : vector<16x128xf32>
    %485 = vector.broadcast %18 : vector<1x128xf32> to vector<16x128xf32>
    %486 = vector.broadcast %426 : vector<16x1xf32> to vector<16x128xf32>
    %487 = arith.subf %485, %486 : vector<16x128xf32>
    %488 = vector.broadcast %30 : vector<1x128xf32> to vector<16x128xf32>
    %489 = vector.broadcast %427 : vector<16x1xf32> to vector<16x128xf32>
    %490 = arith.subf %488, %489 : vector<16x128xf32>
    %491 = vector.broadcast %42 : vector<1x128xf32> to vector<16x128xf32>
    %492 = vector.broadcast %428 : vector<16x1xf32> to vector<16x128xf32>
    %493 = arith.subf %491, %492 : vector<16x128xf32>
    %494 = vector.broadcast %429 : vector<16x1xf32> to vector<16x128xf32>
    %495 = arith.mulf %494, %487 : vector<16x128xf32>
    %496 = vector.broadcast %430 : vector<16x1xf32> to vector<16x128xf32>
    %497 = arith.mulf %496, %490 : vector<16x128xf32>
    %498 = arith.addf %495, %497 : vector<16x128xf32>
    %499 = vector.broadcast %431 : vector<16x1xf32> to vector<16x128xf32>
    %500 = arith.mulf %499, %493 : vector<16x128xf32>
    %501 = arith.addf %498, %500 : vector<16x128xf32>
    %502 = vector.broadcast %432 : vector<16x1xf32> to vector<16x128xf32>
    %503 = arith.mulf %502, %487 : vector<16x128xf32>
    %504 = vector.broadcast %433 : vector<16x1xf32> to vector<16x128xf32>
    %505 = arith.mulf %504, %490 : vector<16x128xf32>
    %506 = arith.addf %503, %505 : vector<16x128xf32>
    %507 = vector.broadcast %434 : vector<16x1xf32> to vector<16x128xf32>
    %508 = arith.mulf %507, %493 : vector<16x128xf32>
    %509 = arith.addf %506, %508 : vector<16x128xf32>
    %510 = arith.mulf %451, %484 : vector<16x128xf32>
    %511 = arith.mulf %476, %459 : vector<16x128xf32>
    %512 = arith.subf %510, %511 : vector<16x128xf32>
    %513 = arith.mulf %501, %459 : vector<16x128xf32>
    %514 = arith.mulf %451, %509 : vector<16x128xf32>
    %515 = arith.subf %513, %514 : vector<16x128xf32>
    %516 = arith.mulf %476, %509 : vector<16x128xf32>
    %517 = arith.mulf %501, %484 : vector<16x128xf32>
    %518 = arith.subf %516, %517 : vector<16x128xf32>
    %cst_70 = arith.constant 0.000000e+00 : f32
    %519 = vector.broadcast %cst_70 : f32 to vector<16x128xf32>
    %520 = arith.cmpf ole, %451, %519 : vector<16x128xf32>
    %cst_71 = arith.constant 0.000000e+00 : f32
    %521 = vector.broadcast %cst_71 : f32 to vector<16x128xf32>
    %522 = arith.cmpf ole, %459, %521 : vector<16x128xf32>
    %523 = arith.andi %520, %522 : vector<16x128xi1>
    %cst_72 = arith.constant 0.000000e+00 : f32
    %524 = vector.broadcast %cst_72 : f32 to vector<16x128xf32>
    %525 = arith.cmpf oge, %476, %524 : vector<16x128xf32>
    %526 = arith.cmpf ole, %484, %476 : vector<16x128xf32>
    %527 = arith.andi %525, %526 : vector<16x128xi1>
    %cst_73 = arith.constant 0.000000e+00 : f32
    %528 = vector.broadcast %cst_73 : f32 to vector<16x128xf32>
    %529 = arith.cmpf oge, %509, %528 : vector<16x128xf32>
    %530 = arith.cmpf ole, %501, %509 : vector<16x128xf32>
    %531 = arith.andi %529, %530 : vector<16x128xi1>
    %cst_74 = arith.constant 0.000000e+00 : f32
    %532 = vector.broadcast %cst_74 : f32 to vector<16x128xf32>
    %533 = arith.cmpf ole, %512, %532 : vector<16x128xf32>
    %cst_75 = arith.constant 0.000000e+00 : f32
    %534 = vector.broadcast %cst_75 : f32 to vector<16x128xf32>
    %535 = arith.cmpf oge, %451, %534 : vector<16x128xf32>
    %536 = arith.andi %533, %535 : vector<16x128xi1>
    %cst_76 = arith.constant 0.000000e+00 : f32
    %537 = vector.broadcast %cst_76 : f32 to vector<16x128xf32>
    %538 = arith.cmpf ole, %476, %537 : vector<16x128xf32>
    %539 = arith.andi %536, %538 : vector<16x128xi1>
    %cst_77 = arith.constant 0.000000e+00 : f32
    %540 = vector.broadcast %cst_77 : f32 to vector<16x128xf32>
    %541 = arith.cmpf ole, %515, %540 : vector<16x128xf32>
    %cst_78 = arith.constant 0.000000e+00 : f32
    %542 = vector.broadcast %cst_78 : f32 to vector<16x128xf32>
    %543 = arith.cmpf oge, %459, %542 : vector<16x128xf32>
    %544 = arith.andi %541, %543 : vector<16x128xi1>
    %cst_79 = arith.constant 0.000000e+00 : f32
    %545 = vector.broadcast %cst_79 : f32 to vector<16x128xf32>
    %546 = arith.cmpf ole, %509, %545 : vector<16x128xf32>
    %547 = arith.andi %544, %546 : vector<16x128xi1>
    %cst_80 = arith.constant 0.000000e+00 : f32
    %548 = vector.broadcast %cst_80 : f32 to vector<16x128xf32>
    %549 = arith.cmpf ole, %518, %548 : vector<16x128xf32>
    %550 = arith.subf %484, %476 : vector<16x128xf32>
    %cst_81 = arith.constant 0.000000e+00 : f32
    %551 = vector.broadcast %cst_81 : f32 to vector<16x128xf32>
    %552 = arith.cmpf oge, %550, %551 : vector<16x128xf32>
    %553 = arith.andi %549, %552 : vector<16x128xi1>
    %554 = arith.subf %501, %509 : vector<16x128xf32>
    %cst_82 = arith.constant 0.000000e+00 : f32
    %555 = vector.broadcast %cst_82 : f32 to vector<16x128xf32>
    %556 = arith.cmpf oge, %554, %555 : vector<16x128xf32>
    %557 = arith.andi %553, %556 : vector<16x128xi1>
    %558 = arith.subf %451, %476 : vector<16x128xf32>
    %559 = math.absf %558 : vector<16x128xf32>
    %cst_83 = arith.constant 9.99999996E-13 : f32
    %560 = vector.broadcast %cst_83 : f32 to vector<16x128xf32>
    %561 = arith.cmpf ogt, %559, %560 : vector<16x128xf32>
    %cst_84 = arith.constant 1.000000e+00 : f32
    %562 = vector.broadcast %cst_84 : f32 to vector<16x128xf32>
    %563 = arith.select %561, %558, %562 : vector<16x128xi1>, vector<16x128xf32>
    %564 = tpu.reciprocal %563 {approx = true} : vector<16x128xf32> -> vector<16x128xf32>
    %565 = arith.mulf %451, %564 : vector<16x128xf32>
    %cst_85 = arith.constant 0.000000e+00 : f32
    %cst_86 = arith.constant 1.000000e+00 : f32
    %566 = vector.broadcast %cst_85 : f32 to vector<16x128xf32>
    %567 = arith.maximumf %566, %565 : vector<16x128xf32>
    %568 = vector.broadcast %cst_86 : f32 to vector<16x128xf32>
    %569 = arith.minimumf %568, %567 : vector<16x128xf32>
    %570 = arith.subf %459, %509 : vector<16x128xf32>
    %571 = math.absf %570 : vector<16x128xf32>
    %cst_87 = arith.constant 9.99999996E-13 : f32
    %572 = vector.broadcast %cst_87 : f32 to vector<16x128xf32>
    %573 = arith.cmpf ogt, %571, %572 : vector<16x128xf32>
    %cst_88 = arith.constant 1.000000e+00 : f32
    %574 = vector.broadcast %cst_88 : f32 to vector<16x128xf32>
    %575 = arith.select %573, %570, %574 : vector<16x128xi1>, vector<16x128xf32>
    %576 = tpu.reciprocal %575 {approx = true} : vector<16x128xf32> -> vector<16x128xf32>
    %577 = arith.mulf %459, %576 : vector<16x128xf32>
    %cst_89 = arith.constant 0.000000e+00 : f32
    %cst_90 = arith.constant 1.000000e+00 : f32
    %578 = vector.broadcast %cst_89 : f32 to vector<16x128xf32>
    %579 = arith.maximumf %578, %577 : vector<16x128xf32>
    %580 = vector.broadcast %cst_90 : f32 to vector<16x128xf32>
    %581 = arith.minimumf %580, %579 : vector<16x128xf32>
    %582 = arith.subf %484, %476 : vector<16x128xf32>
    %583 = arith.subf %484, %476 : vector<16x128xf32>
    %584 = arith.subf %501, %509 : vector<16x128xf32>
    %585 = arith.addf %583, %584 : vector<16x128xf32>
    %586 = math.absf %585 : vector<16x128xf32>
    %cst_91 = arith.constant 9.99999996E-13 : f32
    %587 = vector.broadcast %cst_91 : f32 to vector<16x128xf32>
    %588 = arith.cmpf ogt, %586, %587 : vector<16x128xf32>
    %cst_92 = arith.constant 1.000000e+00 : f32
    %589 = vector.broadcast %cst_92 : f32 to vector<16x128xf32>
    %590 = arith.select %588, %585, %589 : vector<16x128xi1>, vector<16x128xf32>
    %591 = tpu.reciprocal %590 {approx = true} : vector<16x128xf32> -> vector<16x128xf32>
    %592 = arith.mulf %582, %591 : vector<16x128xf32>
    %cst_93 = arith.constant 0.000000e+00 : f32
    %cst_94 = arith.constant 1.000000e+00 : f32
    %593 = vector.broadcast %cst_93 : f32 to vector<16x128xf32>
    %594 = arith.maximumf %593, %592 : vector<16x128xf32>
    %595 = vector.broadcast %cst_94 : f32 to vector<16x128xf32>
    %596 = arith.minimumf %595, %594 : vector<16x128xf32>
    %597 = arith.addf %518, %515 : vector<16x128xf32>
    %598 = arith.addf %597, %512 : vector<16x128xf32>
    %599 = math.absf %598 : vector<16x128xf32>
    %cst_95 = arith.constant 9.99999996E-13 : f32
    %600 = vector.broadcast %cst_95 : f32 to vector<16x128xf32>
    %601 = arith.cmpf ogt, %599, %600 : vector<16x128xf32>
    %cst_96 = arith.constant 1.000000e+00 : f32
    %602 = vector.broadcast %cst_96 : f32 to vector<16x128xf32>
    %603 = arith.select %601, %598, %602 : vector<16x128xi1>, vector<16x128xf32>
    %604 = tpu.reciprocal %603 {approx = true} : vector<16x128xf32> -> vector<16x128xf32>
    %605 = arith.mulf %515, %604 : vector<16x128xf32>
    %cst_97 = arith.constant 0.000000e+00 : f32
    %cst_98 = arith.constant 1.000000e+00 : f32
    %606 = vector.broadcast %cst_97 : f32 to vector<16x128xf32>
    %607 = arith.maximumf %606, %605 : vector<16x128xf32>
    %608 = vector.broadcast %cst_98 : f32 to vector<16x128xf32>
    %609 = arith.minimumf %608, %607 : vector<16x128xf32>
    %610 = arith.mulf %512, %604 : vector<16x128xf32>
    %cst_99 = arith.constant 1.000000e+00 : f32
    %611 = vector.broadcast %cst_99 : f32 to vector<16x128xf32>
    %612 = arith.subf %611, %609 : vector<16x128xf32>
    %cst_100 = arith.constant 0.000000e+00 : f32
    %613 = vector.broadcast %cst_100 : f32 to vector<16x128xf32>
    %614 = arith.maximumf %613, %610 : vector<16x128xf32>
    %615 = arith.minimumf %612, %614 : vector<16x128xf32>
    %616 = vector.broadcast %429 : vector<16x1xf32> to vector<16x128xf32>
    %617 = arith.mulf %609, %616 : vector<16x128xf32>
    %618 = vector.broadcast %420 : vector<16x1xf32> to vector<16x128xf32>
    %619 = arith.addf %618, %617 : vector<16x128xf32>
    %620 = vector.broadcast %432 : vector<16x1xf32> to vector<16x128xf32>
    %621 = arith.mulf %615, %620 : vector<16x128xf32>
    %622 = arith.addf %619, %621 : vector<16x128xf32>
    %623 = arith.subf %426, %423 : vector<16x1xf32>
    %624 = vector.broadcast %623 : vector<16x1xf32> to vector<16x128xf32>
    %625 = arith.mulf %596, %624 : vector<16x128xf32>
    %626 = vector.broadcast %423 : vector<16x1xf32> to vector<16x128xf32>
    %627 = arith.addf %626, %625 : vector<16x128xf32>
    %628 = arith.select %557, %627, %622 : vector<16x128xi1>, vector<16x128xf32>
    %629 = vector.broadcast %432 : vector<16x1xf32> to vector<16x128xf32>
    %630 = arith.mulf %581, %629 : vector<16x128xf32>
    %631 = vector.broadcast %420 : vector<16x1xf32> to vector<16x128xf32>
    %632 = arith.addf %631, %630 : vector<16x128xf32>
    %633 = arith.select %547, %632, %628 : vector<16x128xi1>, vector<16x128xf32>
    %634 = vector.broadcast %429 : vector<16x1xf32> to vector<16x128xf32>
    %635 = arith.mulf %569, %634 : vector<16x128xf32>
    %636 = vector.broadcast %420 : vector<16x1xf32> to vector<16x128xf32>
    %637 = arith.addf %636, %635 : vector<16x128xf32>
    %638 = arith.select %539, %637, %633 : vector<16x128xi1>, vector<16x128xf32>
    %639 = vector.shape_cast %426 : vector<16x1xf32> to vector<16x1xf32>
    %640 = vector.broadcast %639 : vector<16x1xf32> to vector<16x128xf32>
    %641 = arith.select %531, %640, %638 : vector<16x128xi1>, vector<16x128xf32>
    %642 = vector.shape_cast %423 : vector<16x1xf32> to vector<16x1xf32>
    %643 = vector.broadcast %642 : vector<16x1xf32> to vector<16x128xf32>
    %644 = arith.select %527, %643, %641 : vector<16x128xi1>, vector<16x128xf32>
    %645 = vector.shape_cast %420 : vector<16x1xf32> to vector<16x1xf32>
    %646 = vector.broadcast %645 : vector<16x1xf32> to vector<16x128xf32>
    %647 = arith.select %523, %646, %644 : vector<16x128xi1>, vector<16x128xf32>
    %648 = vector.broadcast %18 : vector<1x128xf32> to vector<16x128xf32>
    %649 = arith.subf %648, %647 : vector<16x128xf32>
    %650 = vector.broadcast %430 : vector<16x1xf32> to vector<16x128xf32>
    %651 = arith.mulf %609, %650 : vector<16x128xf32>
    %652 = vector.broadcast %421 : vector<16x1xf32> to vector<16x128xf32>
    %653 = arith.addf %652, %651 : vector<16x128xf32>
    %654 = vector.broadcast %433 : vector<16x1xf32> to vector<16x128xf32>
    %655 = arith.mulf %615, %654 : vector<16x128xf32>
    %656 = arith.addf %653, %655 : vector<16x128xf32>
    %657 = arith.subf %427, %424 : vector<16x1xf32>
    %658 = vector.broadcast %657 : vector<16x1xf32> to vector<16x128xf32>
    %659 = arith.mulf %596, %658 : vector<16x128xf32>
    %660 = vector.broadcast %424 : vector<16x1xf32> to vector<16x128xf32>
    %661 = arith.addf %660, %659 : vector<16x128xf32>
    %662 = arith.select %557, %661, %656 : vector<16x128xi1>, vector<16x128xf32>
    %663 = vector.broadcast %433 : vector<16x1xf32> to vector<16x128xf32>
    %664 = arith.mulf %581, %663 : vector<16x128xf32>
    %665 = vector.broadcast %421 : vector<16x1xf32> to vector<16x128xf32>
    %666 = arith.addf %665, %664 : vector<16x128xf32>
    %667 = arith.select %547, %666, %662 : vector<16x128xi1>, vector<16x128xf32>
    %668 = vector.broadcast %430 : vector<16x1xf32> to vector<16x128xf32>
    %669 = arith.mulf %569, %668 : vector<16x128xf32>
    %670 = vector.broadcast %421 : vector<16x1xf32> to vector<16x128xf32>
    %671 = arith.addf %670, %669 : vector<16x128xf32>
    %672 = arith.select %539, %671, %667 : vector<16x128xi1>, vector<16x128xf32>
    %673 = vector.shape_cast %427 : vector<16x1xf32> to vector<16x1xf32>
    %674 = vector.broadcast %673 : vector<16x1xf32> to vector<16x128xf32>
    %675 = arith.select %531, %674, %672 : vector<16x128xi1>, vector<16x128xf32>
    %676 = vector.shape_cast %424 : vector<16x1xf32> to vector<16x1xf32>
    %677 = vector.broadcast %676 : vector<16x1xf32> to vector<16x128xf32>
    %678 = arith.select %527, %677, %675 : vector<16x128xi1>, vector<16x128xf32>
    %679 = vector.shape_cast %421 : vector<16x1xf32> to vector<16x1xf32>
    %680 = vector.broadcast %679 : vector<16x1xf32> to vector<16x128xf32>
    %681 = arith.select %523, %680, %678 : vector<16x128xi1>, vector<16x128xf32>
    %682 = vector.broadcast %30 : vector<1x128xf32> to vector<16x128xf32>
    %683 = arith.subf %682, %681 : vector<16x128xf32>
    %684 = vector.broadcast %431 : vector<16x1xf32> to vector<16x128xf32>
    %685 = arith.mulf %609, %684 : vector<16x128xf32>
    %686 = vector.broadcast %422 : vector<16x1xf32> to vector<16x128xf32>
    %687 = arith.addf %686, %685 : vector<16x128xf32>
    %688 = vector.broadcast %434 : vector<16x1xf32> to vector<16x128xf32>
    %689 = arith.mulf %615, %688 : vector<16x128xf32>
    %690 = arith.addf %687, %689 : vector<16x128xf32>
    %691 = arith.subf %428, %425 : vector<16x1xf32>
    %692 = vector.broadcast %691 : vector<16x1xf32> to vector<16x128xf32>
    %693 = arith.mulf %596, %692 : vector<16x128xf32>
    %694 = vector.broadcast %425 : vector<16x1xf32> to vector<16x128xf32>
    %695 = arith.addf %694, %693 : vector<16x128xf32>
    %696 = arith.select %557, %695, %690 : vector<16x128xi1>, vector<16x128xf32>
    %697 = vector.broadcast %434 : vector<16x1xf32> to vector<16x128xf32>
    %698 = arith.mulf %581, %697 : vector<16x128xf32>
    %699 = vector.broadcast %422 : vector<16x1xf32> to vector<16x128xf32>
    %700 = arith.addf %699, %698 : vector<16x128xf32>
    %701 = arith.select %547, %700, %696 : vector<16x128xi1>, vector<16x128xf32>
    %702 = vector.broadcast %431 : vector<16x1xf32> to vector<16x128xf32>
    %703 = arith.mulf %569, %702 : vector<16x128xf32>
    %704 = vector.broadcast %422 : vector<16x1xf32> to vector<16x128xf32>
    %705 = arith.addf %704, %703 : vector<16x128xf32>
    %706 = arith.select %539, %705, %701 : vector<16x128xi1>, vector<16x128xf32>
    %707 = vector.shape_cast %428 : vector<16x1xf32> to vector<16x1xf32>
    %708 = vector.broadcast %707 : vector<16x1xf32> to vector<16x128xf32>
    %709 = arith.select %531, %708, %706 : vector<16x128xi1>, vector<16x128xf32>
    %710 = vector.shape_cast %425 : vector<16x1xf32> to vector<16x1xf32>
    %711 = vector.broadcast %710 : vector<16x1xf32> to vector<16x128xf32>
    %712 = arith.select %527, %711, %709 : vector<16x128xi1>, vector<16x128xf32>
    %713 = vector.shape_cast %422 : vector<16x1xf32> to vector<16x1xf32>
    %714 = vector.broadcast %713 : vector<16x1xf32> to vector<16x128xf32>
    %715 = arith.select %523, %714, %712 : vector<16x128xi1>, vector<16x128xf32>
    %716 = vector.broadcast %42 : vector<1x128xf32> to vector<16x128xf32>
    %717 = arith.subf %716, %715 : vector<16x128xf32>
    %718 = arith.mulf %649, %649 : vector<16x128xf32>
    %719 = arith.mulf %683, %683 : vector<16x128xf32>
    %720 = arith.addf %718, %719 : vector<16x128xf32>
    %721 = arith.mulf %717, %717 : vector<16x128xf32>
    %722 = arith.addf %720, %721 : vector<16x128xf32>
    %cst_101 = arith.constant dense<0x7F800000> : vector<128xf32>
    %723 = vector.multi_reduction <minimumf>, %722, %cst_101 [0] : vector<16x128xf32> to vector<128xf32>
    %724 = vector.shape_cast %723 : vector<128xf32> to vector<1x128xf32>
    %725 = vector.broadcast %724 : vector<1x128xf32> to vector<16x128xf32>
    %726 = arith.cmpf ole, %722, %725 : vector<16x128xf32>
    %727 = arith.extui %726 : vector<16x128xi1> to vector<16x128xi32>
    %728 = arith.sitofp %727 : vector<16x128xi32> to vector<16x128xf32>
    %cst_102 = arith.constant dense<0.000000e+00> : vector<128xf32>
    %729 = vector.multi_reduction <add>, %728, %cst_102 [0] : vector<16x128xf32> to vector<128xf32>
    %730 = vector.shape_cast %729 : vector<128xf32> to vector<1x128xf32>
    %cst_103 = arith.constant 1.000000e+00 : f32
    %731 = vector.broadcast %cst_103 : f32 to vector<1x128xf32>
    %732 = arith.maximumf %730, %731 : vector<1x128xf32>
    %733 = tpu.reciprocal %732 {approx = true} : vector<1x128xf32> -> vector<1x128xf32>
    %734 = arith.mulf %649, %728 : vector<16x128xf32>
    %cst_104 = arith.constant dense<0.000000e+00> : vector<128xf32>
    %735 = vector.multi_reduction <add>, %734, %cst_104 [0] : vector<16x128xf32> to vector<128xf32>
    %736 = vector.shape_cast %735 : vector<128xf32> to vector<1x128xf32>
    %737 = arith.mulf %736, %733 : vector<1x128xf32>
    %738 = arith.mulf %683, %728 : vector<16x128xf32>
    %cst_105 = arith.constant dense<0.000000e+00> : vector<128xf32>
    %739 = vector.multi_reduction <add>, %738, %cst_105 [0] : vector<16x128xf32> to vector<128xf32>
    %740 = vector.shape_cast %739 : vector<128xf32> to vector<1x128xf32>
    %741 = arith.mulf %740, %733 : vector<1x128xf32>
    %742 = arith.mulf %717, %728 : vector<16x128xf32>
    %cst_106 = arith.constant dense<0.000000e+00> : vector<128xf32>
    %743 = vector.multi_reduction <add>, %742, %cst_106 [0] : vector<16x128xf32> to vector<128xf32>
    %744 = vector.shape_cast %743 : vector<128xf32> to vector<1x128xf32>
    %745 = arith.mulf %744, %733 : vector<1x128xf32>
    %746 = arith.cmpf olt, %724, %386 : vector<1x128xf32>
    %747 = arith.select %746, %737, %383 : vector<1x128xi1>, vector<1x128xf32>
    %748 = arith.select %746, %741, %384 : vector<1x128xi1>, vector<1x128xf32>
    %749 = arith.select %746, %745, %385 : vector<1x128xi1>, vector<1x128xf32>
    %750 = arith.minimumf %386, %724 : vector<1x128xf32>
    %cst_107 = arith.constant dense<0x7F800000> : vector<16xf32>
    %751 = vector.multi_reduction <minimumf>, %722, %cst_107 [1] : vector<16x128xf32> to vector<16xf32>
    %752 = vector.shape_cast %751 : vector<16xf32> to vector<16x1xf32>
    %753 = arith.mulf %752, %419 : vector<16x1xf32>
    %cst_108 = arith.constant dense<0.000000e+00> : vector<1xf32>
    %754 = vector.multi_reduction <add>, %753, %cst_108 [0] : vector<16x1xf32> to vector<1xf32>
    %755 = vector.shape_cast %754 : vector<1xf32> to vector<1x1xf32>
    %756 = arith.addf %392, %755 : vector<1x1xf32>
    %757 = vector.broadcast %752 : vector<16x1xf32> to vector<16x128xf32>
    %758 = arith.cmpf ole, %722, %757 : vector<16x128xf32>
    %759 = arith.extui %758 : vector<16x128xi1> to vector<16x128xi32>
    %760 = arith.sitofp %759 : vector<16x128xi32> to vector<16x128xf32>
    %761 = vector.broadcast %419 : vector<16x1xf32> to vector<16x128xf32>
    %762 = arith.mulf %760, %761 : vector<16x128xf32>
    %cst_109 = arith.constant dense<0.000000e+00> : vector<16xf32>
    %763 = vector.multi_reduction <add>, %762, %cst_109 [1] : vector<16x128xf32> to vector<16xf32>
    %764 = vector.shape_cast %763 : vector<16xf32> to vector<16x1xf32>
    %cst_110 = arith.constant 1.000000e+00 : f32
    %765 = vector.broadcast %cst_110 : f32 to vector<16x1xf32>
    %766 = arith.maximumf %764, %765 : vector<16x1xf32>
    %767 = tpu.reciprocal %766 {approx = true} : vector<16x1xf32> -> vector<16x1xf32>
    %768 = vector.broadcast %767 : vector<16x1xf32> to vector<16x128xf32>
    %769 = arith.mulf %762, %768 : vector<16x128xf32>
    %770 = arith.mulf %769, %649 : vector<16x128xf32>
    %cst_111 = arith.constant dense<0.000000e+00> : vector<128xf32>
    %771 = vector.multi_reduction <add>, %770, %cst_111 [0] : vector<16x128xf32> to vector<128xf32>
    %772 = vector.shape_cast %771 : vector<128xf32> to vector<1x128xf32>
    %773 = arith.addf %409, %772 : vector<1x128xf32>
    %774 = arith.mulf %769, %683 : vector<16x128xf32>
    %cst_112 = arith.constant dense<0.000000e+00> : vector<128xf32>
    %775 = vector.multi_reduction <add>, %774, %cst_112 [0] : vector<16x128xf32> to vector<128xf32>
    %776 = vector.shape_cast %775 : vector<128xf32> to vector<1x128xf32>
    %777 = arith.addf %413, %776 : vector<1x128xf32>
    %778 = arith.mulf %769, %717 : vector<16x128xf32>
    %cst_113 = arith.constant dense<0.000000e+00> : vector<128xf32>
    %779 = vector.multi_reduction <add>, %778, %cst_113 [0] : vector<16x128xf32> to vector<128xf32>
    %780 = vector.shape_cast %779 : vector<128xf32> to vector<1x128xf32>
    %781 = arith.addf %417, %780 : vector<1x128xf32>
    %c32 = arith.constant 32 : index
    %c0_114 = arith.constant 0 : index
    %782 = vector.load %arg4[%c32, %c0_114] : memref<64x16xf32, #tpu.memory_space<vmem>>, vector<16x16xf32>
    %783 = vector.extract_strided_slice %782 {offsets = [0, 15], sizes = [16, 1], strides = [1, 1]} : vector<16x16xf32> to vector<16x1xf32>
    %784 = vector.extract_strided_slice %782 {offsets = [0, 0], sizes = [16, 1], strides = [1, 1]} : vector<16x16xf32> to vector<16x1xf32>
    %785 = vector.extract_strided_slice %782 {offsets = [0, 1], sizes = [16, 1], strides = [1, 1]} : vector<16x16xf32> to vector<16x1xf32>
    %786 = vector.extract_strided_slice %782 {offsets = [0, 2], sizes = [16, 1], strides = [1, 1]} : vector<16x16xf32> to vector<16x1xf32>
    %787 = vector.extract_strided_slice %782 {offsets = [0, 3], sizes = [16, 1], strides = [1, 1]} : vector<16x16xf32> to vector<16x1xf32>
    %788 = vector.extract_strided_slice %782 {offsets = [0, 4], sizes = [16, 1], strides = [1, 1]} : vector<16x16xf32> to vector<16x1xf32>
    %789 = vector.extract_strided_slice %782 {offsets = [0, 5], sizes = [16, 1], strides = [1, 1]} : vector<16x16xf32> to vector<16x1xf32>
    %790 = vector.extract_strided_slice %782 {offsets = [0, 6], sizes = [16, 1], strides = [1, 1]} : vector<16x16xf32> to vector<16x1xf32>
    %791 = vector.extract_strided_slice %782 {offsets = [0, 7], sizes = [16, 1], strides = [1, 1]} : vector<16x16xf32> to vector<16x1xf32>
    %792 = vector.extract_strided_slice %782 {offsets = [0, 8], sizes = [16, 1], strides = [1, 1]} : vector<16x16xf32> to vector<16x1xf32>
    %793 = vector.extract_strided_slice %782 {offsets = [0, 9], sizes = [16, 1], strides = [1, 1]} : vector<16x16xf32> to vector<16x1xf32>
    %794 = vector.extract_strided_slice %782 {offsets = [0, 10], sizes = [16, 1], strides = [1, 1]} : vector<16x16xf32> to vector<16x1xf32>
    %795 = vector.extract_strided_slice %782 {offsets = [0, 11], sizes = [16, 1], strides = [1, 1]} : vector<16x16xf32> to vector<16x1xf32>
    %796 = vector.extract_strided_slice %782 {offsets = [0, 12], sizes = [16, 1], strides = [1, 1]} : vector<16x16xf32> to vector<16x1xf32>
    %797 = vector.extract_strided_slice %782 {offsets = [0, 13], sizes = [16, 1], strides = [1, 1]} : vector<16x16xf32> to vector<16x1xf32>
    %798 = vector.extract_strided_slice %782 {offsets = [0, 14], sizes = [16, 1], strides = [1, 1]} : vector<16x16xf32> to vector<16x1xf32>
    %799 = vector.broadcast %18 : vector<1x128xf32> to vector<16x128xf32>
    %800 = vector.broadcast %784 : vector<16x1xf32> to vector<16x128xf32>
    %801 = arith.subf %799, %800 : vector<16x128xf32>
    %802 = vector.broadcast %30 : vector<1x128xf32> to vector<16x128xf32>
    %803 = vector.broadcast %785 : vector<16x1xf32> to vector<16x128xf32>
    %804 = arith.subf %802, %803 : vector<16x128xf32>
    %805 = vector.broadcast %42 : vector<1x128xf32> to vector<16x128xf32>
    %806 = vector.broadcast %786 : vector<16x1xf32> to vector<16x128xf32>
    %807 = arith.subf %805, %806 : vector<16x128xf32>
    %808 = vector.broadcast %793 : vector<16x1xf32> to vector<16x128xf32>
    %809 = arith.mulf %808, %801 : vector<16x128xf32>
    %810 = vector.broadcast %794 : vector<16x1xf32> to vector<16x128xf32>
    %811 = arith.mulf %810, %804 : vector<16x128xf32>
    %812 = arith.addf %809, %811 : vector<16x128xf32>
    %813 = vector.broadcast %795 : vector<16x1xf32> to vector<16x128xf32>
    %814 = arith.mulf %813, %807 : vector<16x128xf32>
    %815 = arith.addf %812, %814 : vector<16x128xf32>
    %816 = vector.broadcast %796 : vector<16x1xf32> to vector<16x128xf32>
    %817 = arith.mulf %816, %801 : vector<16x128xf32>
    %818 = vector.broadcast %797 : vector<16x1xf32> to vector<16x128xf32>
    %819 = arith.mulf %818, %804 : vector<16x128xf32>
    %820 = arith.addf %817, %819 : vector<16x128xf32>
    %821 = vector.broadcast %798 : vector<16x1xf32> to vector<16x128xf32>
    %822 = arith.mulf %821, %807 : vector<16x128xf32>
    %823 = arith.addf %820, %822 : vector<16x128xf32>
    %824 = vector.broadcast %18 : vector<1x128xf32> to vector<16x128xf32>
    %825 = vector.broadcast %787 : vector<16x1xf32> to vector<16x128xf32>
    %826 = arith.subf %824, %825 : vector<16x128xf32>
    %827 = vector.broadcast %30 : vector<1x128xf32> to vector<16x128xf32>
    %828 = vector.broadcast %788 : vector<16x1xf32> to vector<16x128xf32>
    %829 = arith.subf %827, %828 : vector<16x128xf32>
    %830 = vector.broadcast %42 : vector<1x128xf32> to vector<16x128xf32>
    %831 = vector.broadcast %789 : vector<16x1xf32> to vector<16x128xf32>
    %832 = arith.subf %830, %831 : vector<16x128xf32>
    %833 = vector.broadcast %793 : vector<16x1xf32> to vector<16x128xf32>
    %834 = arith.mulf %833, %826 : vector<16x128xf32>
    %835 = vector.broadcast %794 : vector<16x1xf32> to vector<16x128xf32>
    %836 = arith.mulf %835, %829 : vector<16x128xf32>
    %837 = arith.addf %834, %836 : vector<16x128xf32>
    %838 = vector.broadcast %795 : vector<16x1xf32> to vector<16x128xf32>
    %839 = arith.mulf %838, %832 : vector<16x128xf32>
    %840 = arith.addf %837, %839 : vector<16x128xf32>
    %841 = vector.broadcast %796 : vector<16x1xf32> to vector<16x128xf32>
    %842 = arith.mulf %841, %826 : vector<16x128xf32>
    %843 = vector.broadcast %797 : vector<16x1xf32> to vector<16x128xf32>
    %844 = arith.mulf %843, %829 : vector<16x128xf32>
    %845 = arith.addf %842, %844 : vector<16x128xf32>
    %846 = vector.broadcast %798 : vector<16x1xf32> to vector<16x128xf32>
    %847 = arith.mulf %846, %832 : vector<16x128xf32>
    %848 = arith.addf %845, %847 : vector<16x128xf32>
    %849 = vector.broadcast %18 : vector<1x128xf32> to vector<16x128xf32>
    %850 = vector.broadcast %790 : vector<16x1xf32> to vector<16x128xf32>
    %851 = arith.subf %849, %850 : vector<16x128xf32>
    %852 = vector.broadcast %30 : vector<1x128xf32> to vector<16x128xf32>
    %853 = vector.broadcast %791 : vector<16x1xf32> to vector<16x128xf32>
    %854 = arith.subf %852, %853 : vector<16x128xf32>
    %855 = vector.broadcast %42 : vector<1x128xf32> to vector<16x128xf32>
    %856 = vector.broadcast %792 : vector<16x1xf32> to vector<16x128xf32>
    %857 = arith.subf %855, %856 : vector<16x128xf32>
    %858 = vector.broadcast %793 : vector<16x1xf32> to vector<16x128xf32>
    %859 = arith.mulf %858, %851 : vector<16x128xf32>
    %860 = vector.broadcast %794 : vector<16x1xf32> to vector<16x128xf32>
    %861 = arith.mulf %860, %854 : vector<16x128xf32>
    %862 = arith.addf %859, %861 : vector<16x128xf32>
    %863 = vector.broadcast %795 : vector<16x1xf32> to vector<16x128xf32>
    %864 = arith.mulf %863, %857 : vector<16x128xf32>
    %865 = arith.addf %862, %864 : vector<16x128xf32>
    %866 = vector.broadcast %796 : vector<16x1xf32> to vector<16x128xf32>
    %867 = arith.mulf %866, %851 : vector<16x128xf32>
    %868 = vector.broadcast %797 : vector<16x1xf32> to vector<16x128xf32>
    %869 = arith.mulf %868, %854 : vector<16x128xf32>
    %870 = arith.addf %867, %869 : vector<16x128xf32>
    %871 = vector.broadcast %798 : vector<16x1xf32> to vector<16x128xf32>
    %872 = arith.mulf %871, %857 : vector<16x128xf32>
    %873 = arith.addf %870, %872 : vector<16x128xf32>
    %874 = arith.mulf %815, %848 : vector<16x128xf32>
    %875 = arith.mulf %840, %823 : vector<16x128xf32>
    %876 = arith.subf %874, %875 : vector<16x128xf32>
    %877 = arith.mulf %865, %823 : vector<16x128xf32>
    %878 = arith.mulf %815, %873 : vector<16x128xf32>
    %879 = arith.subf %877, %878 : vector<16x128xf32>
    %880 = arith.mulf %840, %873 : vector<16x128xf32>
    %881 = arith.mulf %865, %848 : vector<16x128xf32>
    %882 = arith.subf %880, %881 : vector<16x128xf32>
    %cst_115 = arith.constant 0.000000e+00 : f32
    %883 = vector.broadcast %cst_115 : f32 to vector<16x128xf32>
    %884 = arith.cmpf ole, %815, %883 : vector<16x128xf32>
    %cst_116 = arith.constant 0.000000e+00 : f32
    %885 = vector.broadcast %cst_116 : f32 to vector<16x128xf32>
    %886 = arith.cmpf ole, %823, %885 : vector<16x128xf32>
    %887 = arith.andi %884, %886 : vector<16x128xi1>
    %cst_117 = arith.constant 0.000000e+00 : f32
    %888 = vector.broadcast %cst_117 : f32 to vector<16x128xf32>
    %889 = arith.cmpf oge, %840, %888 : vector<16x128xf32>
    %890 = arith.cmpf ole, %848, %840 : vector<16x128xf32>
    %891 = arith.andi %889, %890 : vector<16x128xi1>
    %cst_118 = arith.constant 0.000000e+00 : f32
    %892 = vector.broadcast %cst_118 : f32 to vector<16x128xf32>
    %893 = arith.cmpf oge, %873, %892 : vector<16x128xf32>
    %894 = arith.cmpf ole, %865, %873 : vector<16x128xf32>
    %895 = arith.andi %893, %894 : vector<16x128xi1>
    %cst_119 = arith.constant 0.000000e+00 : f32
    %896 = vector.broadcast %cst_119 : f32 to vector<16x128xf32>
    %897 = arith.cmpf ole, %876, %896 : vector<16x128xf32>
    %cst_120 = arith.constant 0.000000e+00 : f32
    %898 = vector.broadcast %cst_120 : f32 to vector<16x128xf32>
    %899 = arith.cmpf oge, %815, %898 : vector<16x128xf32>
    %900 = arith.andi %897, %899 : vector<16x128xi1>
    %cst_121 = arith.constant 0.000000e+00 : f32
    %901 = vector.broadcast %cst_121 : f32 to vector<16x128xf32>
    %902 = arith.cmpf ole, %840, %901 : vector<16x128xf32>
    %903 = arith.andi %900, %902 : vector<16x128xi1>
    %cst_122 = arith.constant 0.000000e+00 : f32
    %904 = vector.broadcast %cst_122 : f32 to vector<16x128xf32>
    %905 = arith.cmpf ole, %879, %904 : vector<16x128xf32>
    %cst_123 = arith.constant 0.000000e+00 : f32
    %906 = vector.broadcast %cst_123 : f32 to vector<16x128xf32>
    %907 = arith.cmpf oge, %823, %906 : vector<16x128xf32>
    %908 = arith.andi %905, %907 : vector<16x128xi1>
    %cst_124 = arith.constant 0.000000e+00 : f32
    %909 = vector.broadcast %cst_124 : f32 to vector<16x128xf32>
    %910 = arith.cmpf ole, %873, %909 : vector<16x128xf32>
    %911 = arith.andi %908, %910 : vector<16x128xi1>
    %cst_125 = arith.constant 0.000000e+00 : f32
    %912 = vector.broadcast %cst_125 : f32 to vector<16x128xf32>
    %913 = arith.cmpf ole, %882, %912 : vector<16x128xf32>
    %914 = arith.subf %848, %840 : vector<16x128xf32>
    %cst_126 = arith.constant 0.000000e+00 : f32
    %915 = vector.broadcast %cst_126 : f32 to vector<16x128xf32>
    %916 = arith.cmpf oge, %914, %915 : vector<16x128xf32>
    %917 = arith.andi %913, %916 : vector<16x128xi1>
    %918 = arith.subf %865, %873 : vector<16x128xf32>
    %cst_127 = arith.constant 0.000000e+00 : f32
    %919 = vector.broadcast %cst_127 : f32 to vector<16x128xf32>
    %920 = arith.cmpf oge, %918, %919 : vector<16x128xf32>
    %921 = arith.andi %917, %920 : vector<16x128xi1>
    %922 = arith.subf %815, %840 : vector<16x128xf32>
    %923 = math.absf %922 : vector<16x128xf32>
    %cst_128 = arith.constant 9.99999996E-13 : f32
    %924 = vector.broadcast %cst_128 : f32 to vector<16x128xf32>
    %925 = arith.cmpf ogt, %923, %924 : vector<16x128xf32>
    %cst_129 = arith.constant 1.000000e+00 : f32
    %926 = vector.broadcast %cst_129 : f32 to vector<16x128xf32>
    %927 = arith.select %925, %922, %926 : vector<16x128xi1>, vector<16x128xf32>
    %928 = tpu.reciprocal %927 {approx = true} : vector<16x128xf32> -> vector<16x128xf32>
    %929 = arith.mulf %815, %928 : vector<16x128xf32>
    %cst_130 = arith.constant 0.000000e+00 : f32
    %cst_131 = arith.constant 1.000000e+00 : f32
    %930 = vector.broadcast %cst_130 : f32 to vector<16x128xf32>
    %931 = arith.maximumf %930, %929 : vector<16x128xf32>
    %932 = vector.broadcast %cst_131 : f32 to vector<16x128xf32>
    %933 = arith.minimumf %932, %931 : vector<16x128xf32>
    %934 = arith.subf %823, %873 : vector<16x128xf32>
    %935 = math.absf %934 : vector<16x128xf32>
    %cst_132 = arith.constant 9.99999996E-13 : f32
    %936 = vector.broadcast %cst_132 : f32 to vector<16x128xf32>
    %937 = arith.cmpf ogt, %935, %936 : vector<16x128xf32>
    %cst_133 = arith.constant 1.000000e+00 : f32
    %938 = vector.broadcast %cst_133 : f32 to vector<16x128xf32>
    %939 = arith.select %937, %934, %938 : vector<16x128xi1>, vector<16x128xf32>
    %940 = tpu.reciprocal %939 {approx = true} : vector<16x128xf32> -> vector<16x128xf32>
    %941 = arith.mulf %823, %940 : vector<16x128xf32>
    %cst_134 = arith.constant 0.000000e+00 : f32
    %cst_135 = arith.constant 1.000000e+00 : f32
    %942 = vector.broadcast %cst_134 : f32 to vector<16x128xf32>
    %943 = arith.maximumf %942, %941 : vector<16x128xf32>
    %944 = vector.broadcast %cst_135 : f32 to vector<16x128xf32>
    %945 = arith.minimumf %944, %943 : vector<16x128xf32>
    %946 = arith.subf %848, %840 : vector<16x128xf32>
    %947 = arith.subf %848, %840 : vector<16x128xf32>
    %948 = arith.subf %865, %873 : vector<16x128xf32>
    %949 = arith.addf %947, %948 : vector<16x128xf32>
    %950 = math.absf %949 : vector<16x128xf32>
    %cst_136 = arith.constant 9.99999996E-13 : f32
    %951 = vector.broadcast %cst_136 : f32 to vector<16x128xf32>
    %952 = arith.cmpf ogt, %950, %951 : vector<16x128xf32>
    %cst_137 = arith.constant 1.000000e+00 : f32
    %953 = vector.broadcast %cst_137 : f32 to vector<16x128xf32>
    %954 = arith.select %952, %949, %953 : vector<16x128xi1>, vector<16x128xf32>
    %955 = tpu.reciprocal %954 {approx = true} : vector<16x128xf32> -> vector<16x128xf32>
    %956 = arith.mulf %946, %955 : vector<16x128xf32>
    %cst_138 = arith.constant 0.000000e+00 : f32
    %cst_139 = arith.constant 1.000000e+00 : f32
    %957 = vector.broadcast %cst_138 : f32 to vector<16x128xf32>
    %958 = arith.maximumf %957, %956 : vector<16x128xf32>
    %959 = vector.broadcast %cst_139 : f32 to vector<16x128xf32>
    %960 = arith.minimumf %959, %958 : vector<16x128xf32>
    %961 = arith.addf %882, %879 : vector<16x128xf32>
    %962 = arith.addf %961, %876 : vector<16x128xf32>
    %963 = math.absf %962 : vector<16x128xf32>
    %cst_140 = arith.constant 9.99999996E-13 : f32
    %964 = vector.broadcast %cst_140 : f32 to vector<16x128xf32>
    %965 = arith.cmpf ogt, %963, %964 : vector<16x128xf32>
    %cst_141 = arith.constant 1.000000e+00 : f32
    %966 = vector.broadcast %cst_141 : f32 to vector<16x128xf32>
    %967 = arith.select %965, %962, %966 : vector<16x128xi1>, vector<16x128xf32>
    %968 = tpu.reciprocal %967 {approx = true} : vector<16x128xf32> -> vector<16x128xf32>
    %969 = arith.mulf %879, %968 : vector<16x128xf32>
    %cst_142 = arith.constant 0.000000e+00 : f32
    %cst_143 = arith.constant 1.000000e+00 : f32
    %970 = vector.broadcast %cst_142 : f32 to vector<16x128xf32>
    %971 = arith.maximumf %970, %969 : vector<16x128xf32>
    %972 = vector.broadcast %cst_143 : f32 to vector<16x128xf32>
    %973 = arith.minimumf %972, %971 : vector<16x128xf32>
    %974 = arith.mulf %876, %968 : vector<16x128xf32>
    %cst_144 = arith.constant 1.000000e+00 : f32
    %975 = vector.broadcast %cst_144 : f32 to vector<16x128xf32>
    %976 = arith.subf %975, %973 : vector<16x128xf32>
    %cst_145 = arith.constant 0.000000e+00 : f32
    %977 = vector.broadcast %cst_145 : f32 to vector<16x128xf32>
    %978 = arith.maximumf %977, %974 : vector<16x128xf32>
    %979 = arith.minimumf %976, %978 : vector<16x128xf32>
    %980 = vector.broadcast %793 : vector<16x1xf32> to vector<16x128xf32>
    %981 = arith.mulf %973, %980 : vector<16x128xf32>
    %982 = vector.broadcast %784 : vector<16x1xf32> to vector<16x128xf32>
    %983 = arith.addf %982, %981 : vector<16x128xf32>
    %984 = vector.broadcast %796 : vector<16x1xf32> to vector<16x128xf32>
    %985 = arith.mulf %979, %984 : vector<16x128xf32>
    %986 = arith.addf %983, %985 : vector<16x128xf32>
    %987 = arith.subf %790, %787 : vector<16x1xf32>
    %988 = vector.broadcast %987 : vector<16x1xf32> to vector<16x128xf32>
    %989 = arith.mulf %960, %988 : vector<16x128xf32>
    %990 = vector.broadcast %787 : vector<16x1xf32> to vector<16x128xf32>
    %991 = arith.addf %990, %989 : vector<16x128xf32>
    %992 = arith.select %921, %991, %986 : vector<16x128xi1>, vector<16x128xf32>
    %993 = vector.broadcast %796 : vector<16x1xf32> to vector<16x128xf32>
    %994 = arith.mulf %945, %993 : vector<16x128xf32>
    %995 = vector.broadcast %784 : vector<16x1xf32> to vector<16x128xf32>
    %996 = arith.addf %995, %994 : vector<16x128xf32>
    %997 = arith.select %911, %996, %992 : vector<16x128xi1>, vector<16x128xf32>
    %998 = vector.broadcast %793 : vector<16x1xf32> to vector<16x128xf32>
    %999 = arith.mulf %933, %998 : vector<16x128xf32>
    %1000 = vector.broadcast %784 : vector<16x1xf32> to vector<16x128xf32>
    %1001 = arith.addf %1000, %999 : vector<16x128xf32>
    %1002 = arith.select %903, %1001, %997 : vector<16x128xi1>, vector<16x128xf32>
    %1003 = vector.shape_cast %790 : vector<16x1xf32> to vector<16x1xf32>
    %1004 = vector.broadcast %1003 : vector<16x1xf32> to vector<16x128xf32>
    %1005 = arith.select %895, %1004, %1002 : vector<16x128xi1>, vector<16x128xf32>
    %1006 = vector.shape_cast %787 : vector<16x1xf32> to vector<16x1xf32>
    %1007 = vector.broadcast %1006 : vector<16x1xf32> to vector<16x128xf32>
    %1008 = arith.select %891, %1007, %1005 : vector<16x128xi1>, vector<16x128xf32>
    %1009 = vector.shape_cast %784 : vector<16x1xf32> to vector<16x1xf32>
    %1010 = vector.broadcast %1009 : vector<16x1xf32> to vector<16x128xf32>
    %1011 = arith.select %887, %1010, %1008 : vector<16x128xi1>, vector<16x128xf32>
    %1012 = vector.broadcast %18 : vector<1x128xf32> to vector<16x128xf32>
    %1013 = arith.subf %1012, %1011 : vector<16x128xf32>
    %1014 = vector.broadcast %794 : vector<16x1xf32> to vector<16x128xf32>
    %1015 = arith.mulf %973, %1014 : vector<16x128xf32>
    %1016 = vector.broadcast %785 : vector<16x1xf32> to vector<16x128xf32>
    %1017 = arith.addf %1016, %1015 : vector<16x128xf32>
    %1018 = vector.broadcast %797 : vector<16x1xf32> to vector<16x128xf32>
    %1019 = arith.mulf %979, %1018 : vector<16x128xf32>
    %1020 = arith.addf %1017, %1019 : vector<16x128xf32>
    %1021 = arith.subf %791, %788 : vector<16x1xf32>
    %1022 = vector.broadcast %1021 : vector<16x1xf32> to vector<16x128xf32>
    %1023 = arith.mulf %960, %1022 : vector<16x128xf32>
    %1024 = vector.broadcast %788 : vector<16x1xf32> to vector<16x128xf32>
    %1025 = arith.addf %1024, %1023 : vector<16x128xf32>
    %1026 = arith.select %921, %1025, %1020 : vector<16x128xi1>, vector<16x128xf32>
    %1027 = vector.broadcast %797 : vector<16x1xf32> to vector<16x128xf32>
    %1028 = arith.mulf %945, %1027 : vector<16x128xf32>
    %1029 = vector.broadcast %785 : vector<16x1xf32> to vector<16x128xf32>
    %1030 = arith.addf %1029, %1028 : vector<16x128xf32>
    %1031 = arith.select %911, %1030, %1026 : vector<16x128xi1>, vector<16x128xf32>
    %1032 = vector.broadcast %794 : vector<16x1xf32> to vector<16x128xf32>
    %1033 = arith.mulf %933, %1032 : vector<16x128xf32>
    %1034 = vector.broadcast %785 : vector<16x1xf32> to vector<16x128xf32>
    %1035 = arith.addf %1034, %1033 : vector<16x128xf32>
    %1036 = arith.select %903, %1035, %1031 : vector<16x128xi1>, vector<16x128xf32>
    %1037 = vector.shape_cast %791 : vector<16x1xf32> to vector<16x1xf32>
    %1038 = vector.broadcast %1037 : vector<16x1xf32> to vector<16x128xf32>
    %1039 = arith.select %895, %1038, %1036 : vector<16x128xi1>, vector<16x128xf32>
    %1040 = vector.shape_cast %788 : vector<16x1xf32> to vector<16x1xf32>
    %1041 = vector.broadcast %1040 : vector<16x1xf32> to vector<16x128xf32>
    %1042 = arith.select %891, %1041, %1039 : vector<16x128xi1>, vector<16x128xf32>
    %1043 = vector.shape_cast %785 : vector<16x1xf32> to vector<16x1xf32>
    %1044 = vector.broadcast %1043 : vector<16x1xf32> to vector<16x128xf32>
    %1045 = arith.select %887, %1044, %1042 : vector<16x128xi1>, vector<16x128xf32>
    %1046 = vector.broadcast %30 : vector<1x128xf32> to vector<16x128xf32>
    %1047 = arith.subf %1046, %1045 : vector<16x128xf32>
    %1048 = vector.broadcast %795 : vector<16x1xf32> to vector<16x128xf32>
    %1049 = arith.mulf %973, %1048 : vector<16x128xf32>
    %1050 = vector.broadcast %786 : vector<16x1xf32> to vector<16x128xf32>
    %1051 = arith.addf %1050, %1049 : vector<16x128xf32>
    %1052 = vector.broadcast %798 : vector<16x1xf32> to vector<16x128xf32>
    %1053 = arith.mulf %979, %1052 : vector<16x128xf32>
    %1054 = arith.addf %1051, %1053 : vector<16x128xf32>
    %1055 = arith.subf %792, %789 : vector<16x1xf32>
    %1056 = vector.broadcast %1055 : vector<16x1xf32> to vector<16x128xf32>
    %1057 = arith.mulf %960, %1056 : vector<16x128xf32>
    %1058 = vector.broadcast %789 : vector<16x1xf32> to vector<16x128xf32>
    %1059 = arith.addf %1058, %1057 : vector<16x128xf32>
    %1060 = arith.select %921, %1059, %1054 : vector<16x128xi1>, vector<16x128xf32>
    %1061 = vector.broadcast %798 : vector<16x1xf32> to vector<16x128xf32>
    %1062 = arith.mulf %945, %1061 : vector<16x128xf32>
    %1063 = vector.broadcast %786 : vector<16x1xf32> to vector<16x128xf32>
    %1064 = arith.addf %1063, %1062 : vector<16x128xf32>
    %1065 = arith.select %911, %1064, %1060 : vector<16x128xi1>, vector<16x128xf32>
    %1066 = vector.broadcast %795 : vector<16x1xf32> to vector<16x128xf32>
    %1067 = arith.mulf %933, %1066 : vector<16x128xf32>
    %1068 = vector.broadcast %786 : vector<16x1xf32> to vector<16x128xf32>
    %1069 = arith.addf %1068, %1067 : vector<16x128xf32>
    %1070 = arith.select %903, %1069, %1065 : vector<16x128xi1>, vector<16x128xf32>
    %1071 = vector.shape_cast %792 : vector<16x1xf32> to vector<16x1xf32>
    %1072 = vector.broadcast %1071 : vector<16x1xf32> to vector<16x128xf32>
    %1073 = arith.select %895, %1072, %1070 : vector<16x128xi1>, vector<16x128xf32>
    %1074 = vector.shape_cast %789 : vector<16x1xf32> to vector<16x1xf32>
    %1075 = vector.broadcast %1074 : vector<16x1xf32> to vector<16x128xf32>
    %1076 = arith.select %891, %1075, %1073 : vector<16x128xi1>, vector<16x128xf32>
    %1077 = vector.shape_cast %786 : vector<16x1xf32> to vector<16x1xf32>
    %1078 = vector.broadcast %1077 : vector<16x1xf32> to vector<16x128xf32>
    %1079 = arith.select %887, %1078, %1076 : vector<16x128xi1>, vector<16x128xf32>
    %1080 = vector.broadcast %42 : vector<1x128xf32> to vector<16x128xf32>
    %1081 = arith.subf %1080, %1079 : vector<16x128xf32>
    %1082 = arith.mulf %1013, %1013 : vector<16x128xf32>
    %1083 = arith.mulf %1047, %1047 : vector<16x128xf32>
    %1084 = arith.addf %1082, %1083 : vector<16x128xf32>
    %1085 = arith.mulf %1081, %1081 : vector<16x128xf32>
    %1086 = arith.addf %1084, %1085 : vector<16x128xf32>
    %cst_146 = arith.constant dense<0x7F800000> : vector<128xf32>
    %1087 = vector.multi_reduction <minimumf>, %1086, %cst_146 [0] : vector<16x128xf32> to vector<128xf32>
    %1088 = vector.shape_cast %1087 : vector<128xf32> to vector<1x128xf32>
    %1089 = vector.broadcast %1088 : vector<1x128xf32> to vector<16x128xf32>
    %1090 = arith.cmpf ole, %1086, %1089 : vector<16x128xf32>
    %1091 = arith.extui %1090 : vector<16x128xi1> to vector<16x128xi32>
    %1092 = arith.sitofp %1091 : vector<16x128xi32> to vector<16x128xf32>
    %cst_147 = arith.constant dense<0.000000e+00> : vector<128xf32>
    %1093 = vector.multi_reduction <add>, %1092, %cst_147 [0] : vector<16x128xf32> to vector<128xf32>
    %1094 = vector.shape_cast %1093 : vector<128xf32> to vector<1x128xf32>
    %cst_148 = arith.constant 1.000000e+00 : f32
    %1095 = vector.broadcast %cst_148 : f32 to vector<1x128xf32>
    %1096 = arith.maximumf %1094, %1095 : vector<1x128xf32>
    %1097 = tpu.reciprocal %1096 {approx = true} : vector<1x128xf32> -> vector<1x128xf32>
    %1098 = arith.mulf %1013, %1092 : vector<16x128xf32>
    %cst_149 = arith.constant dense<0.000000e+00> : vector<128xf32>
    %1099 = vector.multi_reduction <add>, %1098, %cst_149 [0] : vector<16x128xf32> to vector<128xf32>
    %1100 = vector.shape_cast %1099 : vector<128xf32> to vector<1x128xf32>
    %1101 = arith.mulf %1100, %1097 : vector<1x128xf32>
    %1102 = arith.mulf %1047, %1092 : vector<16x128xf32>
    %cst_150 = arith.constant dense<0.000000e+00> : vector<128xf32>
    %1103 = vector.multi_reduction <add>, %1102, %cst_150 [0] : vector<16x128xf32> to vector<128xf32>
    %1104 = vector.shape_cast %1103 : vector<128xf32> to vector<1x128xf32>
    %1105 = arith.mulf %1104, %1097 : vector<1x128xf32>
    %1106 = arith.mulf %1081, %1092 : vector<16x128xf32>
    %cst_151 = arith.constant dense<0.000000e+00> : vector<128xf32>
    %1107 = vector.multi_reduction <add>, %1106, %cst_151 [0] : vector<16x128xf32> to vector<128xf32>
    %1108 = vector.shape_cast %1107 : vector<128xf32> to vector<1x128xf32>
    %1109 = arith.mulf %1108, %1097 : vector<1x128xf32>
    %1110 = arith.cmpf olt, %1088, %750 : vector<1x128xf32>
    %1111 = arith.select %1110, %1101, %747 : vector<1x128xi1>, vector<1x128xf32>
    %1112 = arith.select %1110, %1105, %748 : vector<1x128xi1>, vector<1x128xf32>
    %1113 = arith.select %1110, %1109, %749 : vector<1x128xi1>, vector<1x128xf32>
    %1114 = arith.minimumf %750, %1088 : vector<1x128xf32>
    %cst_152 = arith.constant dense<0x7F800000> : vector<16xf32>
    %1115 = vector.multi_reduction <minimumf>, %1086, %cst_152 [1] : vector<16x128xf32> to vector<16xf32>
    %1116 = vector.shape_cast %1115 : vector<16xf32> to vector<16x1xf32>
    %1117 = arith.mulf %1116, %783 : vector<16x1xf32>
    %cst_153 = arith.constant dense<0.000000e+00> : vector<1xf32>
    %1118 = vector.multi_reduction <add>, %1117, %cst_153 [0] : vector<16x1xf32> to vector<1xf32>
    %1119 = vector.shape_cast %1118 : vector<1xf32> to vector<1x1xf32>
    %1120 = arith.addf %756, %1119 : vector<1x1xf32>
    %1121 = vector.broadcast %1116 : vector<16x1xf32> to vector<16x128xf32>
    %1122 = arith.cmpf ole, %1086, %1121 : vector<16x128xf32>
    %1123 = arith.extui %1122 : vector<16x128xi1> to vector<16x128xi32>
    %1124 = arith.sitofp %1123 : vector<16x128xi32> to vector<16x128xf32>
    %1125 = vector.broadcast %783 : vector<16x1xf32> to vector<16x128xf32>
    %1126 = arith.mulf %1124, %1125 : vector<16x128xf32>
    %cst_154 = arith.constant dense<0.000000e+00> : vector<16xf32>
    %1127 = vector.multi_reduction <add>, %1126, %cst_154 [1] : vector<16x128xf32> to vector<16xf32>
    %1128 = vector.shape_cast %1127 : vector<16xf32> to vector<16x1xf32>
    %cst_155 = arith.constant 1.000000e+00 : f32
    %1129 = vector.broadcast %cst_155 : f32 to vector<16x1xf32>
    %1130 = arith.maximumf %1128, %1129 : vector<16x1xf32>
    %1131 = tpu.reciprocal %1130 {approx = true} : vector<16x1xf32> -> vector<16x1xf32>
    %1132 = vector.broadcast %1131 : vector<16x1xf32> to vector<16x128xf32>
    %1133 = arith.mulf %1126, %1132 : vector<16x128xf32>
    %1134 = arith.mulf %1133, %1013 : vector<16x128xf32>
    %cst_156 = arith.constant dense<0.000000e+00> : vector<128xf32>
    %1135 = vector.multi_reduction <add>, %1134, %cst_156 [0] : vector<16x128xf32> to vector<128xf32>
    %1136 = vector.shape_cast %1135 : vector<128xf32> to vector<1x128xf32>
    %1137 = arith.addf %773, %1136 : vector<1x128xf32>
    %1138 = arith.mulf %1133, %1047 : vector<16x128xf32>
    %cst_157 = arith.constant dense<0.000000e+00> : vector<128xf32>
    %1139 = vector.multi_reduction <add>, %1138, %cst_157 [0] : vector<16x128xf32> to vector<128xf32>
    %1140 = vector.shape_cast %1139 : vector<128xf32> to vector<1x128xf32>
    %1141 = arith.addf %777, %1140 : vector<1x128xf32>
    %1142 = arith.mulf %1133, %1081 : vector<16x128xf32>
    %cst_158 = arith.constant dense<0.000000e+00> : vector<128xf32>
    %1143 = vector.multi_reduction <add>, %1142, %cst_158 [0] : vector<16x128xf32> to vector<128xf32>
    %1144 = vector.shape_cast %1143 : vector<128xf32> to vector<1x128xf32>
    %1145 = arith.addf %781, %1144 : vector<1x128xf32>
    %c48 = arith.constant 48 : index
    %c0_159 = arith.constant 0 : index
    %1146 = vector.load %arg4[%c48, %c0_159] : memref<64x16xf32, #tpu.memory_space<vmem>>, vector<16x16xf32>
    %1147 = vector.extract_strided_slice %1146 {offsets = [0, 15], sizes = [16, 1], strides = [1, 1]} : vector<16x16xf32> to vector<16x1xf32>
    %1148 = vector.extract_strided_slice %1146 {offsets = [0, 0], sizes = [16, 1], strides = [1, 1]} : vector<16x16xf32> to vector<16x1xf32>
    %1149 = vector.extract_strided_slice %1146 {offsets = [0, 1], sizes = [16, 1], strides = [1, 1]} : vector<16x16xf32> to vector<16x1xf32>
    %1150 = vector.extract_strided_slice %1146 {offsets = [0, 2], sizes = [16, 1], strides = [1, 1]} : vector<16x16xf32> to vector<16x1xf32>
    %1151 = vector.extract_strided_slice %1146 {offsets = [0, 3], sizes = [16, 1], strides = [1, 1]} : vector<16x16xf32> to vector<16x1xf32>
    %1152 = vector.extract_strided_slice %1146 {offsets = [0, 4], sizes = [16, 1], strides = [1, 1]} : vector<16x16xf32> to vector<16x1xf32>
    %1153 = vector.extract_strided_slice %1146 {offsets = [0, 5], sizes = [16, 1], strides = [1, 1]} : vector<16x16xf32> to vector<16x1xf32>
    %1154 = vector.extract_strided_slice %1146 {offsets = [0, 6], sizes = [16, 1], strides = [1, 1]} : vector<16x16xf32> to vector<16x1xf32>
    %1155 = vector.extract_strided_slice %1146 {offsets = [0, 7], sizes = [16, 1], strides = [1, 1]} : vector<16x16xf32> to vector<16x1xf32>
    %1156 = vector.extract_strided_slice %1146 {offsets = [0, 8], sizes = [16, 1], strides = [1, 1]} : vector<16x16xf32> to vector<16x1xf32>
    %1157 = vector.extract_strided_slice %1146 {offsets = [0, 9], sizes = [16, 1], strides = [1, 1]} : vector<16x16xf32> to vector<16x1xf32>
    %1158 = vector.extract_strided_slice %1146 {offsets = [0, 10], sizes = [16, 1], strides = [1, 1]} : vector<16x16xf32> to vector<16x1xf32>
    %1159 = vector.extract_strided_slice %1146 {offsets = [0, 11], sizes = [16, 1], strides = [1, 1]} : vector<16x16xf32> to vector<16x1xf32>
    %1160 = vector.extract_strided_slice %1146 {offsets = [0, 12], sizes = [16, 1], strides = [1, 1]} : vector<16x16xf32> to vector<16x1xf32>
    %1161 = vector.extract_strided_slice %1146 {offsets = [0, 13], sizes = [16, 1], strides = [1, 1]} : vector<16x16xf32> to vector<16x1xf32>
    %1162 = vector.extract_strided_slice %1146 {offsets = [0, 14], sizes = [16, 1], strides = [1, 1]} : vector<16x16xf32> to vector<16x1xf32>
    %1163 = vector.broadcast %18 : vector<1x128xf32> to vector<16x128xf32>
    %1164 = vector.broadcast %1148 : vector<16x1xf32> to vector<16x128xf32>
    %1165 = arith.subf %1163, %1164 : vector<16x128xf32>
    %1166 = vector.broadcast %30 : vector<1x128xf32> to vector<16x128xf32>
    %1167 = vector.broadcast %1149 : vector<16x1xf32> to vector<16x128xf32>
    %1168 = arith.subf %1166, %1167 : vector<16x128xf32>
    %1169 = vector.broadcast %42 : vector<1x128xf32> to vector<16x128xf32>
    %1170 = vector.broadcast %1150 : vector<16x1xf32> to vector<16x128xf32>
    %1171 = arith.subf %1169, %1170 : vector<16x128xf32>
    %1172 = vector.broadcast %1157 : vector<16x1xf32> to vector<16x128xf32>
    %1173 = arith.mulf %1172, %1165 : vector<16x128xf32>
    %1174 = vector.broadcast %1158 : vector<16x1xf32> to vector<16x128xf32>
    %1175 = arith.mulf %1174, %1168 : vector<16x128xf32>
    %1176 = arith.addf %1173, %1175 : vector<16x128xf32>
    %1177 = vector.broadcast %1159 : vector<16x1xf32> to vector<16x128xf32>
    %1178 = arith.mulf %1177, %1171 : vector<16x128xf32>
    %1179 = arith.addf %1176, %1178 : vector<16x128xf32>
    %1180 = vector.broadcast %1160 : vector<16x1xf32> to vector<16x128xf32>
    %1181 = arith.mulf %1180, %1165 : vector<16x128xf32>
    %1182 = vector.broadcast %1161 : vector<16x1xf32> to vector<16x128xf32>
    %1183 = arith.mulf %1182, %1168 : vector<16x128xf32>
    %1184 = arith.addf %1181, %1183 : vector<16x128xf32>
    %1185 = vector.broadcast %1162 : vector<16x1xf32> to vector<16x128xf32>
    %1186 = arith.mulf %1185, %1171 : vector<16x128xf32>
    %1187 = arith.addf %1184, %1186 : vector<16x128xf32>
    %1188 = vector.broadcast %18 : vector<1x128xf32> to vector<16x128xf32>
    %1189 = vector.broadcast %1151 : vector<16x1xf32> to vector<16x128xf32>
    %1190 = arith.subf %1188, %1189 : vector<16x128xf32>
    %1191 = vector.broadcast %30 : vector<1x128xf32> to vector<16x128xf32>
    %1192 = vector.broadcast %1152 : vector<16x1xf32> to vector<16x128xf32>
    %1193 = arith.subf %1191, %1192 : vector<16x128xf32>
    %1194 = vector.broadcast %42 : vector<1x128xf32> to vector<16x128xf32>
    %1195 = vector.broadcast %1153 : vector<16x1xf32> to vector<16x128xf32>
    %1196 = arith.subf %1194, %1195 : vector<16x128xf32>
    %1197 = vector.broadcast %1157 : vector<16x1xf32> to vector<16x128xf32>
    %1198 = arith.mulf %1197, %1190 : vector<16x128xf32>
    %1199 = vector.broadcast %1158 : vector<16x1xf32> to vector<16x128xf32>
    %1200 = arith.mulf %1199, %1193 : vector<16x128xf32>
    %1201 = arith.addf %1198, %1200 : vector<16x128xf32>
    %1202 = vector.broadcast %1159 : vector<16x1xf32> to vector<16x128xf32>
    %1203 = arith.mulf %1202, %1196 : vector<16x128xf32>
    %1204 = arith.addf %1201, %1203 : vector<16x128xf32>
    %1205 = vector.broadcast %1160 : vector<16x1xf32> to vector<16x128xf32>
    %1206 = arith.mulf %1205, %1190 : vector<16x128xf32>
    %1207 = vector.broadcast %1161 : vector<16x1xf32> to vector<16x128xf32>
    %1208 = arith.mulf %1207, %1193 : vector<16x128xf32>
    %1209 = arith.addf %1206, %1208 : vector<16x128xf32>
    %1210 = vector.broadcast %1162 : vector<16x1xf32> to vector<16x128xf32>
    %1211 = arith.mulf %1210, %1196 : vector<16x128xf32>
    %1212 = arith.addf %1209, %1211 : vector<16x128xf32>
    %1213 = vector.broadcast %18 : vector<1x128xf32> to vector<16x128xf32>
    %1214 = vector.broadcast %1154 : vector<16x1xf32> to vector<16x128xf32>
    %1215 = arith.subf %1213, %1214 : vector<16x128xf32>
    %1216 = vector.broadcast %30 : vector<1x128xf32> to vector<16x128xf32>
    %1217 = vector.broadcast %1155 : vector<16x1xf32> to vector<16x128xf32>
    %1218 = arith.subf %1216, %1217 : vector<16x128xf32>
    %1219 = vector.broadcast %42 : vector<1x128xf32> to vector<16x128xf32>
    %1220 = vector.broadcast %1156 : vector<16x1xf32> to vector<16x128xf32>
    %1221 = arith.subf %1219, %1220 : vector<16x128xf32>
    %1222 = vector.broadcast %1157 : vector<16x1xf32> to vector<16x128xf32>
    %1223 = arith.mulf %1222, %1215 : vector<16x128xf32>
    %1224 = vector.broadcast %1158 : vector<16x1xf32> to vector<16x128xf32>
    %1225 = arith.mulf %1224, %1218 : vector<16x128xf32>
    %1226 = arith.addf %1223, %1225 : vector<16x128xf32>
    %1227 = vector.broadcast %1159 : vector<16x1xf32> to vector<16x128xf32>
    %1228 = arith.mulf %1227, %1221 : vector<16x128xf32>
    %1229 = arith.addf %1226, %1228 : vector<16x128xf32>
    %1230 = vector.broadcast %1160 : vector<16x1xf32> to vector<16x128xf32>
    %1231 = arith.mulf %1230, %1215 : vector<16x128xf32>
    %1232 = vector.broadcast %1161 : vector<16x1xf32> to vector<16x128xf32>
    %1233 = arith.mulf %1232, %1218 : vector<16x128xf32>
    %1234 = arith.addf %1231, %1233 : vector<16x128xf32>
    %1235 = vector.broadcast %1162 : vector<16x1xf32> to vector<16x128xf32>
    %1236 = arith.mulf %1235, %1221 : vector<16x128xf32>
    %1237 = arith.addf %1234, %1236 : vector<16x128xf32>
    %1238 = arith.mulf %1179, %1212 : vector<16x128xf32>
    %1239 = arith.mulf %1204, %1187 : vector<16x128xf32>
    %1240 = arith.subf %1238, %1239 : vector<16x128xf32>
    %1241 = arith.mulf %1229, %1187 : vector<16x128xf32>
    %1242 = arith.mulf %1179, %1237 : vector<16x128xf32>
    %1243 = arith.subf %1241, %1242 : vector<16x128xf32>
    %1244 = arith.mulf %1204, %1237 : vector<16x128xf32>
    %1245 = arith.mulf %1229, %1212 : vector<16x128xf32>
    %1246 = arith.subf %1244, %1245 : vector<16x128xf32>
    %cst_160 = arith.constant 0.000000e+00 : f32
    %1247 = vector.broadcast %cst_160 : f32 to vector<16x128xf32>
    %1248 = arith.cmpf ole, %1179, %1247 : vector<16x128xf32>
    %cst_161 = arith.constant 0.000000e+00 : f32
    %1249 = vector.broadcast %cst_161 : f32 to vector<16x128xf32>
    %1250 = arith.cmpf ole, %1187, %1249 : vector<16x128xf32>
    %1251 = arith.andi %1248, %1250 : vector<16x128xi1>
    %cst_162 = arith.constant 0.000000e+00 : f32
    %1252 = vector.broadcast %cst_162 : f32 to vector<16x128xf32>
    %1253 = arith.cmpf oge, %1204, %1252 : vector<16x128xf32>
    %1254 = arith.cmpf ole, %1212, %1204 : vector<16x128xf32>
    %1255 = arith.andi %1253, %1254 : vector<16x128xi1>
    %cst_163 = arith.constant 0.000000e+00 : f32
    %1256 = vector.broadcast %cst_163 : f32 to vector<16x128xf32>
    %1257 = arith.cmpf oge, %1237, %1256 : vector<16x128xf32>
    %1258 = arith.cmpf ole, %1229, %1237 : vector<16x128xf32>
    %1259 = arith.andi %1257, %1258 : vector<16x128xi1>
    %cst_164 = arith.constant 0.000000e+00 : f32
    %1260 = vector.broadcast %cst_164 : f32 to vector<16x128xf32>
    %1261 = arith.cmpf ole, %1240, %1260 : vector<16x128xf32>
    %cst_165 = arith.constant 0.000000e+00 : f32
    %1262 = vector.broadcast %cst_165 : f32 to vector<16x128xf32>
    %1263 = arith.cmpf oge, %1179, %1262 : vector<16x128xf32>
    %1264 = arith.andi %1261, %1263 : vector<16x128xi1>
    %cst_166 = arith.constant 0.000000e+00 : f32
    %1265 = vector.broadcast %cst_166 : f32 to vector<16x128xf32>
    %1266 = arith.cmpf ole, %1204, %1265 : vector<16x128xf32>
    %1267 = arith.andi %1264, %1266 : vector<16x128xi1>
    %cst_167 = arith.constant 0.000000e+00 : f32
    %1268 = vector.broadcast %cst_167 : f32 to vector<16x128xf32>
    %1269 = arith.cmpf ole, %1243, %1268 : vector<16x128xf32>
    %cst_168 = arith.constant 0.000000e+00 : f32
    %1270 = vector.broadcast %cst_168 : f32 to vector<16x128xf32>
    %1271 = arith.cmpf oge, %1187, %1270 : vector<16x128xf32>
    %1272 = arith.andi %1269, %1271 : vector<16x128xi1>
    %cst_169 = arith.constant 0.000000e+00 : f32
    %1273 = vector.broadcast %cst_169 : f32 to vector<16x128xf32>
    %1274 = arith.cmpf ole, %1237, %1273 : vector<16x128xf32>
    %1275 = arith.andi %1272, %1274 : vector<16x128xi1>
    %cst_170 = arith.constant 0.000000e+00 : f32
    %1276 = vector.broadcast %cst_170 : f32 to vector<16x128xf32>
    %1277 = arith.cmpf ole, %1246, %1276 : vector<16x128xf32>
    %1278 = arith.subf %1212, %1204 : vector<16x128xf32>
    %cst_171 = arith.constant 0.000000e+00 : f32
    %1279 = vector.broadcast %cst_171 : f32 to vector<16x128xf32>
    %1280 = arith.cmpf oge, %1278, %1279 : vector<16x128xf32>
    %1281 = arith.andi %1277, %1280 : vector<16x128xi1>
    %1282 = arith.subf %1229, %1237 : vector<16x128xf32>
    %cst_172 = arith.constant 0.000000e+00 : f32
    %1283 = vector.broadcast %cst_172 : f32 to vector<16x128xf32>
    %1284 = arith.cmpf oge, %1282, %1283 : vector<16x128xf32>
    %1285 = arith.andi %1281, %1284 : vector<16x128xi1>
    %1286 = arith.subf %1179, %1204 : vector<16x128xf32>
    %1287 = math.absf %1286 : vector<16x128xf32>
    %cst_173 = arith.constant 9.99999996E-13 : f32
    %1288 = vector.broadcast %cst_173 : f32 to vector<16x128xf32>
    %1289 = arith.cmpf ogt, %1287, %1288 : vector<16x128xf32>
    %cst_174 = arith.constant 1.000000e+00 : f32
    %1290 = vector.broadcast %cst_174 : f32 to vector<16x128xf32>
    %1291 = arith.select %1289, %1286, %1290 : vector<16x128xi1>, vector<16x128xf32>
    %1292 = tpu.reciprocal %1291 {approx = true} : vector<16x128xf32> -> vector<16x128xf32>
    %1293 = arith.mulf %1179, %1292 : vector<16x128xf32>
    %cst_175 = arith.constant 0.000000e+00 : f32
    %cst_176 = arith.constant 1.000000e+00 : f32
    %1294 = vector.broadcast %cst_175 : f32 to vector<16x128xf32>
    %1295 = arith.maximumf %1294, %1293 : vector<16x128xf32>
    %1296 = vector.broadcast %cst_176 : f32 to vector<16x128xf32>
    %1297 = arith.minimumf %1296, %1295 : vector<16x128xf32>
    %1298 = arith.subf %1187, %1237 : vector<16x128xf32>
    %1299 = math.absf %1298 : vector<16x128xf32>
    %cst_177 = arith.constant 9.99999996E-13 : f32
    %1300 = vector.broadcast %cst_177 : f32 to vector<16x128xf32>
    %1301 = arith.cmpf ogt, %1299, %1300 : vector<16x128xf32>
    %cst_178 = arith.constant 1.000000e+00 : f32
    %1302 = vector.broadcast %cst_178 : f32 to vector<16x128xf32>
    %1303 = arith.select %1301, %1298, %1302 : vector<16x128xi1>, vector<16x128xf32>
    %1304 = tpu.reciprocal %1303 {approx = true} : vector<16x128xf32> -> vector<16x128xf32>
    %1305 = arith.mulf %1187, %1304 : vector<16x128xf32>
    %cst_179 = arith.constant 0.000000e+00 : f32
    %cst_180 = arith.constant 1.000000e+00 : f32
    %1306 = vector.broadcast %cst_179 : f32 to vector<16x128xf32>
    %1307 = arith.maximumf %1306, %1305 : vector<16x128xf32>
    %1308 = vector.broadcast %cst_180 : f32 to vector<16x128xf32>
    %1309 = arith.minimumf %1308, %1307 : vector<16x128xf32>
    %1310 = arith.subf %1212, %1204 : vector<16x128xf32>
    %1311 = arith.subf %1212, %1204 : vector<16x128xf32>
    %1312 = arith.subf %1229, %1237 : vector<16x128xf32>
    %1313 = arith.addf %1311, %1312 : vector<16x128xf32>
    %1314 = math.absf %1313 : vector<16x128xf32>
    %cst_181 = arith.constant 9.99999996E-13 : f32
    %1315 = vector.broadcast %cst_181 : f32 to vector<16x128xf32>
    %1316 = arith.cmpf ogt, %1314, %1315 : vector<16x128xf32>
    %cst_182 = arith.constant 1.000000e+00 : f32
    %1317 = vector.broadcast %cst_182 : f32 to vector<16x128xf32>
    %1318 = arith.select %1316, %1313, %1317 : vector<16x128xi1>, vector<16x128xf32>
    %1319 = tpu.reciprocal %1318 {approx = true} : vector<16x128xf32> -> vector<16x128xf32>
    %1320 = arith.mulf %1310, %1319 : vector<16x128xf32>
    %cst_183 = arith.constant 0.000000e+00 : f32
    %cst_184 = arith.constant 1.000000e+00 : f32
    %1321 = vector.broadcast %cst_183 : f32 to vector<16x128xf32>
    %1322 = arith.maximumf %1321, %1320 : vector<16x128xf32>
    %1323 = vector.broadcast %cst_184 : f32 to vector<16x128xf32>
    %1324 = arith.minimumf %1323, %1322 : vector<16x128xf32>
    %1325 = arith.addf %1246, %1243 : vector<16x128xf32>
    %1326 = arith.addf %1325, %1240 : vector<16x128xf32>
    %1327 = math.absf %1326 : vector<16x128xf32>
    %cst_185 = arith.constant 9.99999996E-13 : f32
    %1328 = vector.broadcast %cst_185 : f32 to vector<16x128xf32>
    %1329 = arith.cmpf ogt, %1327, %1328 : vector<16x128xf32>
    %cst_186 = arith.constant 1.000000e+00 : f32
    %1330 = vector.broadcast %cst_186 : f32 to vector<16x128xf32>
    %1331 = arith.select %1329, %1326, %1330 : vector<16x128xi1>, vector<16x128xf32>
    %1332 = tpu.reciprocal %1331 {approx = true} : vector<16x128xf32> -> vector<16x128xf32>
    %1333 = arith.mulf %1243, %1332 : vector<16x128xf32>
    %cst_187 = arith.constant 0.000000e+00 : f32
    %cst_188 = arith.constant 1.000000e+00 : f32
    %1334 = vector.broadcast %cst_187 : f32 to vector<16x128xf32>
    %1335 = arith.maximumf %1334, %1333 : vector<16x128xf32>
    %1336 = vector.broadcast %cst_188 : f32 to vector<16x128xf32>
    %1337 = arith.minimumf %1336, %1335 : vector<16x128xf32>
    %1338 = arith.mulf %1240, %1332 : vector<16x128xf32>
    %cst_189 = arith.constant 1.000000e+00 : f32
    %1339 = vector.broadcast %cst_189 : f32 to vector<16x128xf32>
    %1340 = arith.subf %1339, %1337 : vector<16x128xf32>
    %cst_190 = arith.constant 0.000000e+00 : f32
    %1341 = vector.broadcast %cst_190 : f32 to vector<16x128xf32>
    %1342 = arith.maximumf %1341, %1338 : vector<16x128xf32>
    %1343 = arith.minimumf %1340, %1342 : vector<16x128xf32>
    %1344 = vector.broadcast %1157 : vector<16x1xf32> to vector<16x128xf32>
    %1345 = arith.mulf %1337, %1344 : vector<16x128xf32>
    %1346 = vector.broadcast %1148 : vector<16x1xf32> to vector<16x128xf32>
    %1347 = arith.addf %1346, %1345 : vector<16x128xf32>
    %1348 = vector.broadcast %1160 : vector<16x1xf32> to vector<16x128xf32>
    %1349 = arith.mulf %1343, %1348 : vector<16x128xf32>
    %1350 = arith.addf %1347, %1349 : vector<16x128xf32>
    %1351 = arith.subf %1154, %1151 : vector<16x1xf32>
    %1352 = vector.broadcast %1351 : vector<16x1xf32> to vector<16x128xf32>
    %1353 = arith.mulf %1324, %1352 : vector<16x128xf32>
    %1354 = vector.broadcast %1151 : vector<16x1xf32> to vector<16x128xf32>
    %1355 = arith.addf %1354, %1353 : vector<16x128xf32>
    %1356 = arith.select %1285, %1355, %1350 : vector<16x128xi1>, vector<16x128xf32>
    %1357 = vector.broadcast %1160 : vector<16x1xf32> to vector<16x128xf32>
    %1358 = arith.mulf %1309, %1357 : vector<16x128xf32>
    %1359 = vector.broadcast %1148 : vector<16x1xf32> to vector<16x128xf32>
    %1360 = arith.addf %1359, %1358 : vector<16x128xf32>
    %1361 = arith.select %1275, %1360, %1356 : vector<16x128xi1>, vector<16x128xf32>
    %1362 = vector.broadcast %1157 : vector<16x1xf32> to vector<16x128xf32>
    %1363 = arith.mulf %1297, %1362 : vector<16x128xf32>
    %1364 = vector.broadcast %1148 : vector<16x1xf32> to vector<16x128xf32>
    %1365 = arith.addf %1364, %1363 : vector<16x128xf32>
    %1366 = arith.select %1267, %1365, %1361 : vector<16x128xi1>, vector<16x128xf32>
    %1367 = vector.shape_cast %1154 : vector<16x1xf32> to vector<16x1xf32>
    %1368 = vector.broadcast %1367 : vector<16x1xf32> to vector<16x128xf32>
    %1369 = arith.select %1259, %1368, %1366 : vector<16x128xi1>, vector<16x128xf32>
    %1370 = vector.shape_cast %1151 : vector<16x1xf32> to vector<16x1xf32>
    %1371 = vector.broadcast %1370 : vector<16x1xf32> to vector<16x128xf32>
    %1372 = arith.select %1255, %1371, %1369 : vector<16x128xi1>, vector<16x128xf32>
    %1373 = vector.shape_cast %1148 : vector<16x1xf32> to vector<16x1xf32>
    %1374 = vector.broadcast %1373 : vector<16x1xf32> to vector<16x128xf32>
    %1375 = arith.select %1251, %1374, %1372 : vector<16x128xi1>, vector<16x128xf32>
    %1376 = vector.broadcast %18 : vector<1x128xf32> to vector<16x128xf32>
    %1377 = arith.subf %1376, %1375 : vector<16x128xf32>
    %1378 = vector.broadcast %1158 : vector<16x1xf32> to vector<16x128xf32>
    %1379 = arith.mulf %1337, %1378 : vector<16x128xf32>
    %1380 = vector.broadcast %1149 : vector<16x1xf32> to vector<16x128xf32>
    %1381 = arith.addf %1380, %1379 : vector<16x128xf32>
    %1382 = vector.broadcast %1161 : vector<16x1xf32> to vector<16x128xf32>
    %1383 = arith.mulf %1343, %1382 : vector<16x128xf32>
    %1384 = arith.addf %1381, %1383 : vector<16x128xf32>
    %1385 = arith.subf %1155, %1152 : vector<16x1xf32>
    %1386 = vector.broadcast %1385 : vector<16x1xf32> to vector<16x128xf32>
    %1387 = arith.mulf %1324, %1386 : vector<16x128xf32>
    %1388 = vector.broadcast %1152 : vector<16x1xf32> to vector<16x128xf32>
    %1389 = arith.addf %1388, %1387 : vector<16x128xf32>
    %1390 = arith.select %1285, %1389, %1384 : vector<16x128xi1>, vector<16x128xf32>
    %1391 = vector.broadcast %1161 : vector<16x1xf32> to vector<16x128xf32>
    %1392 = arith.mulf %1309, %1391 : vector<16x128xf32>
    %1393 = vector.broadcast %1149 : vector<16x1xf32> to vector<16x128xf32>
    %1394 = arith.addf %1393, %1392 : vector<16x128xf32>
    %1395 = arith.select %1275, %1394, %1390 : vector<16x128xi1>, vector<16x128xf32>
    %1396 = vector.broadcast %1158 : vector<16x1xf32> to vector<16x128xf32>
    %1397 = arith.mulf %1297, %1396 : vector<16x128xf32>
    %1398 = vector.broadcast %1149 : vector<16x1xf32> to vector<16x128xf32>
    %1399 = arith.addf %1398, %1397 : vector<16x128xf32>
    %1400 = arith.select %1267, %1399, %1395 : vector<16x128xi1>, vector<16x128xf32>
    %1401 = vector.shape_cast %1155 : vector<16x1xf32> to vector<16x1xf32>
    %1402 = vector.broadcast %1401 : vector<16x1xf32> to vector<16x128xf32>
    %1403 = arith.select %1259, %1402, %1400 : vector<16x128xi1>, vector<16x128xf32>
    %1404 = vector.shape_cast %1152 : vector<16x1xf32> to vector<16x1xf32>
    %1405 = vector.broadcast %1404 : vector<16x1xf32> to vector<16x128xf32>
    %1406 = arith.select %1255, %1405, %1403 : vector<16x128xi1>, vector<16x128xf32>
    %1407 = vector.shape_cast %1149 : vector<16x1xf32> to vector<16x1xf32>
    %1408 = vector.broadcast %1407 : vector<16x1xf32> to vector<16x128xf32>
    %1409 = arith.select %1251, %1408, %1406 : vector<16x128xi1>, vector<16x128xf32>
    %1410 = vector.broadcast %30 : vector<1x128xf32> to vector<16x128xf32>
    %1411 = arith.subf %1410, %1409 : vector<16x128xf32>
    %1412 = vector.broadcast %1159 : vector<16x1xf32> to vector<16x128xf32>
    %1413 = arith.mulf %1337, %1412 : vector<16x128xf32>
    %1414 = vector.broadcast %1150 : vector<16x1xf32> to vector<16x128xf32>
    %1415 = arith.addf %1414, %1413 : vector<16x128xf32>
    %1416 = vector.broadcast %1162 : vector<16x1xf32> to vector<16x128xf32>
    %1417 = arith.mulf %1343, %1416 : vector<16x128xf32>
    %1418 = arith.addf %1415, %1417 : vector<16x128xf32>
    %1419 = arith.subf %1156, %1153 : vector<16x1xf32>
    %1420 = vector.broadcast %1419 : vector<16x1xf32> to vector<16x128xf32>
    %1421 = arith.mulf %1324, %1420 : vector<16x128xf32>
    %1422 = vector.broadcast %1153 : vector<16x1xf32> to vector<16x128xf32>
    %1423 = arith.addf %1422, %1421 : vector<16x128xf32>
    %1424 = arith.select %1285, %1423, %1418 : vector<16x128xi1>, vector<16x128xf32>
    %1425 = vector.broadcast %1162 : vector<16x1xf32> to vector<16x128xf32>
    %1426 = arith.mulf %1309, %1425 : vector<16x128xf32>
    %1427 = vector.broadcast %1150 : vector<16x1xf32> to vector<16x128xf32>
    %1428 = arith.addf %1427, %1426 : vector<16x128xf32>
    %1429 = arith.select %1275, %1428, %1424 : vector<16x128xi1>, vector<16x128xf32>
    %1430 = vector.broadcast %1159 : vector<16x1xf32> to vector<16x128xf32>
    %1431 = arith.mulf %1297, %1430 : vector<16x128xf32>
    %1432 = vector.broadcast %1150 : vector<16x1xf32> to vector<16x128xf32>
    %1433 = arith.addf %1432, %1431 : vector<16x128xf32>
    %1434 = arith.select %1267, %1433, %1429 : vector<16x128xi1>, vector<16x128xf32>
    %1435 = vector.shape_cast %1156 : vector<16x1xf32> to vector<16x1xf32>
    %1436 = vector.broadcast %1435 : vector<16x1xf32> to vector<16x128xf32>
    %1437 = arith.select %1259, %1436, %1434 : vector<16x128xi1>, vector<16x128xf32>
    %1438 = vector.shape_cast %1153 : vector<16x1xf32> to vector<16x1xf32>
    %1439 = vector.broadcast %1438 : vector<16x1xf32> to vector<16x128xf32>
    %1440 = arith.select %1255, %1439, %1437 : vector<16x128xi1>, vector<16x128xf32>
    %1441 = vector.shape_cast %1150 : vector<16x1xf32> to vector<16x1xf32>
    %1442 = vector.broadcast %1441 : vector<16x1xf32> to vector<16x128xf32>
    %1443 = arith.select %1251, %1442, %1440 : vector<16x128xi1>, vector<16x128xf32>
    %1444 = vector.broadcast %42 : vector<1x128xf32> to vector<16x128xf32>
    %1445 = arith.subf %1444, %1443 : vector<16x128xf32>
    %1446 = arith.mulf %1377, %1377 : vector<16x128xf32>
    %1447 = arith.mulf %1411, %1411 : vector<16x128xf32>
    %1448 = arith.addf %1446, %1447 : vector<16x128xf32>
    %1449 = arith.mulf %1445, %1445 : vector<16x128xf32>
    %1450 = arith.addf %1448, %1449 : vector<16x128xf32>
    %cst_191 = arith.constant dense<0x7F800000> : vector<128xf32>
    %1451 = vector.multi_reduction <minimumf>, %1450, %cst_191 [0] : vector<16x128xf32> to vector<128xf32>
    %1452 = vector.shape_cast %1451 : vector<128xf32> to vector<1x128xf32>
    %1453 = vector.broadcast %1452 : vector<1x128xf32> to vector<16x128xf32>
    %1454 = arith.cmpf ole, %1450, %1453 : vector<16x128xf32>
    %1455 = arith.extui %1454 : vector<16x128xi1> to vector<16x128xi32>
    %1456 = arith.sitofp %1455 : vector<16x128xi32> to vector<16x128xf32>
    %cst_192 = arith.constant dense<0.000000e+00> : vector<128xf32>
    %1457 = vector.multi_reduction <add>, %1456, %cst_192 [0] : vector<16x128xf32> to vector<128xf32>
    %1458 = vector.shape_cast %1457 : vector<128xf32> to vector<1x128xf32>
    %cst_193 = arith.constant 1.000000e+00 : f32
    %1459 = vector.broadcast %cst_193 : f32 to vector<1x128xf32>
    %1460 = arith.maximumf %1458, %1459 : vector<1x128xf32>
    %1461 = tpu.reciprocal %1460 {approx = true} : vector<1x128xf32> -> vector<1x128xf32>
    %1462 = arith.mulf %1377, %1456 : vector<16x128xf32>
    %cst_194 = arith.constant dense<0.000000e+00> : vector<128xf32>
    %1463 = vector.multi_reduction <add>, %1462, %cst_194 [0] : vector<16x128xf32> to vector<128xf32>
    %1464 = vector.shape_cast %1463 : vector<128xf32> to vector<1x128xf32>
    %1465 = arith.mulf %1464, %1461 : vector<1x128xf32>
    %1466 = arith.mulf %1411, %1456 : vector<16x128xf32>
    %cst_195 = arith.constant dense<0.000000e+00> : vector<128xf32>
    %1467 = vector.multi_reduction <add>, %1466, %cst_195 [0] : vector<16x128xf32> to vector<128xf32>
    %1468 = vector.shape_cast %1467 : vector<128xf32> to vector<1x128xf32>
    %1469 = arith.mulf %1468, %1461 : vector<1x128xf32>
    %1470 = arith.mulf %1445, %1456 : vector<16x128xf32>
    %cst_196 = arith.constant dense<0.000000e+00> : vector<128xf32>
    %1471 = vector.multi_reduction <add>, %1470, %cst_196 [0] : vector<16x128xf32> to vector<128xf32>
    %1472 = vector.shape_cast %1471 : vector<128xf32> to vector<1x128xf32>
    %1473 = arith.mulf %1472, %1461 : vector<1x128xf32>
    %1474 = arith.cmpf olt, %1452, %1114 : vector<1x128xf32>
    %1475 = arith.select %1474, %1465, %1111 : vector<1x128xi1>, vector<1x128xf32>
    %1476 = arith.select %1474, %1469, %1112 : vector<1x128xi1>, vector<1x128xf32>
    %1477 = arith.select %1474, %1473, %1113 : vector<1x128xi1>, vector<1x128xf32>
    %1478 = arith.minimumf %1114, %1452 : vector<1x128xf32>
    %cst_197 = arith.constant dense<0x7F800000> : vector<16xf32>
    %1479 = vector.multi_reduction <minimumf>, %1450, %cst_197 [1] : vector<16x128xf32> to vector<16xf32>
    %1480 = vector.shape_cast %1479 : vector<16xf32> to vector<16x1xf32>
    %1481 = arith.mulf %1480, %1147 : vector<16x1xf32>
    %cst_198 = arith.constant dense<0.000000e+00> : vector<1xf32>
    %1482 = vector.multi_reduction <add>, %1481, %cst_198 [0] : vector<16x1xf32> to vector<1xf32>
    %1483 = vector.shape_cast %1482 : vector<1xf32> to vector<1x1xf32>
    %1484 = arith.addf %1120, %1483 : vector<1x1xf32>
    %1485 = vector.broadcast %1480 : vector<16x1xf32> to vector<16x128xf32>
    %1486 = arith.cmpf ole, %1450, %1485 : vector<16x128xf32>
    %1487 = arith.extui %1486 : vector<16x128xi1> to vector<16x128xi32>
    %1488 = arith.sitofp %1487 : vector<16x128xi32> to vector<16x128xf32>
    %1489 = vector.broadcast %1147 : vector<16x1xf32> to vector<16x128xf32>
    %1490 = arith.mulf %1488, %1489 : vector<16x128xf32>
    %cst_199 = arith.constant dense<0.000000e+00> : vector<16xf32>
    %1491 = vector.multi_reduction <add>, %1490, %cst_199 [1] : vector<16x128xf32> to vector<16xf32>
    %1492 = vector.shape_cast %1491 : vector<16xf32> to vector<16x1xf32>
    %cst_200 = arith.constant 1.000000e+00 : f32
    %1493 = vector.broadcast %cst_200 : f32 to vector<16x1xf32>
    %1494 = arith.maximumf %1492, %1493 : vector<16x1xf32>
    %1495 = tpu.reciprocal %1494 {approx = true} : vector<16x1xf32> -> vector<16x1xf32>
    %1496 = vector.broadcast %1495 : vector<16x1xf32> to vector<16x128xf32>
    %1497 = arith.mulf %1490, %1496 : vector<16x128xf32>
    %1498 = arith.mulf %1497, %1377 : vector<16x128xf32>
    %cst_201 = arith.constant dense<0.000000e+00> : vector<128xf32>
    %1499 = vector.multi_reduction <add>, %1498, %cst_201 [0] : vector<16x128xf32> to vector<128xf32>
    %1500 = vector.shape_cast %1499 : vector<128xf32> to vector<1x128xf32>
    %1501 = arith.addf %1137, %1500 : vector<1x128xf32>
    %1502 = arith.mulf %1497, %1411 : vector<16x128xf32>
    %cst_202 = arith.constant dense<0.000000e+00> : vector<128xf32>
    %1503 = vector.multi_reduction <add>, %1502, %cst_202 [0] : vector<16x128xf32> to vector<128xf32>
    %1504 = vector.shape_cast %1503 : vector<128xf32> to vector<1x128xf32>
    %1505 = arith.addf %1141, %1504 : vector<1x128xf32>
    %1506 = arith.mulf %1497, %1445 : vector<16x128xf32>
    %cst_203 = arith.constant dense<0.000000e+00> : vector<128xf32>
    %1507 = vector.multi_reduction <add>, %1506, %cst_203 [0] : vector<16x128xf32> to vector<128xf32>
    %1508 = vector.shape_cast %1507 : vector<128xf32> to vector<1x128xf32>
    %1509 = arith.addf %1145, %1508 : vector<1x128xf32>
    %cst_204 = arith.constant dense<0.000000e+00> : vector<1xf32>
    %1510 = vector.multi_reduction <add>, %1478, %cst_204 [1] : vector<1x128xf32> to vector<1xf32>
    %1511 = vector.shape_cast %1510 : vector<1xf32> to vector<1x1xf32>
    %cst_205 = arith.constant 7.812500e-03 : f32
    %1512 = vector.broadcast %cst_205 : f32 to vector<1x1xf32>
    %1513 = arith.mulf %1511, %1512 : vector<1x1xf32>
    %cst_206 = arith.constant 1.562500e-02 : f32
    %1514 = vector.broadcast %cst_206 : f32 to vector<1x1xf32>
    %1515 = arith.mulf %1484, %1514 : vector<1x1xf32>
    %1516 = arith.addf %1513, %1515 : vector<1x1xf32>
    %c0_207 = arith.constant 0 : index
    %c0_208 = arith.constant 0 : index
    %1517 = vector.load %arg5[%c0_207, %c0_208] : memref<1x1xf32, #tpu.memory_space<vmem>>, vector<1x1xf32>
    tpu.vector_store %arg5[%c0_207, %c0_208], %1516 {strides = array<i32>} : memref<1x1xf32, #tpu.memory_space<vmem>>, vector<1x1xf32>,
    %cst_209 = arith.constant 1.562500e-02 : f32
    %1518 = vector.broadcast %cst_209 : f32 to vector<1x128xf32>
    %1519 = arith.mulf %1475, %1518 : vector<1x128xf32>
    %cst_210 = arith.constant 3.125000e-02 : f32
    %1520 = vector.broadcast %cst_210 : f32 to vector<1x128xf32>
    %1521 = arith.mulf %1501, %1520 : vector<1x128xf32>
    %1522 = arith.addf %1519, %1521 : vector<1x128xf32>
    %c0_211 = arith.constant 0 : index
    %c0_212 = arith.constant 0 : index
    %1523 = vector.load %arg7[%c0_211, %c0_212] : memref<3x128xf32, #tpu.memory_space<vmem>>, vector<1x128xf32>
    tpu.vector_store %arg7[%c0_211, %c0_212], %1522 {strides = array<i32>} : memref<3x128xf32, #tpu.memory_space<vmem>>, vector<1x128xf32>,
    %cst_213 = arith.constant 1.562500e-02 : f32
    %1524 = vector.broadcast %cst_213 : f32 to vector<1x128xf32>
    %1525 = arith.mulf %1476, %1524 : vector<1x128xf32>
    %cst_214 = arith.constant 3.125000e-02 : f32
    %1526 = vector.broadcast %cst_214 : f32 to vector<1x128xf32>
    %1527 = arith.mulf %1505, %1526 : vector<1x128xf32>
    %1528 = arith.addf %1525, %1527 : vector<1x128xf32>
    %c1_215 = arith.constant 1 : index
    %c0_216 = arith.constant 0 : index
    %1529 = vector.load %arg7[%c1_215, %c0_216] : memref<3x128xf32, #tpu.memory_space<vmem>>, vector<1x128xf32>
    tpu.vector_store %arg7[%c1_215, %c0_216], %1528 {strides = array<i32>} : memref<3x128xf32, #tpu.memory_space<vmem>>, vector<1x128xf32>,
    %cst_217 = arith.constant 1.562500e-02 : f32
    %1530 = vector.broadcast %cst_217 : f32 to vector<1x128xf32>
    %1531 = arith.mulf %1477, %1530 : vector<1x128xf32>
    %cst_218 = arith.constant 3.125000e-02 : f32
    %1532 = vector.broadcast %cst_218 : f32 to vector<1x128xf32>
    %1533 = arith.mulf %1509, %1532 : vector<1x128xf32>
    %1534 = arith.addf %1531, %1533 : vector<1x128xf32>
    %c2_219 = arith.constant 2 : index
    %c0_220 = arith.constant 0 : index
    %1535 = vector.load %arg7[%c2_219, %c0_220] : memref<3x128xf32, #tpu.memory_space<vmem>>, vector<1x128xf32>
    tpu.vector_store %arg7[%c2_219, %c0_220], %1534 {strides = array<i32>} : memref<3x128xf32, #tpu.memory_space<vmem>>, vector<1x128xf32>,
    return
  }
}

</mosaic_0001>

<bundles_post_ra>
// kernel: custom-call.3
= control target key start
LH: loop header
LB: loop body
LE: loop exit
PB: predicated region body
PF: predicated region fallthrough
CT: control target
= control target key end

     0   :  { %s6_s0 = inlined_call_operand.vmem [shape: f32[5], index: 0, kind: output, shape index: {}]  }

// kernel: custom-call
= control target key start
LH: loop header
LB: loop body
LE: loop exit
PB: predicated region body
PF: predicated region fallthrough
CT: control target
= control target key end

     0   :  { %s6_s0 = inlined_call_operand.vmem [shape: f32[1,63], index: 0, kind: output, shape index: {}]  }

// kernel: run_opt.1
= control target key start
LH: loop header
LB: loop body
LE: loop exit
PB: predicated region body
PF: predicated region fallthrough
CT: control target
= control target key end

     0   :  { %11 = vsyncpa [#allocation3], 0  ;;  %s313_s18 = smov [#allocation2]   ;;  %s397_s0 = inlined_call_operand.vmem [shape: f32[3,30], index: 0, kind: input, shape index: {}]   ;;  %s398_s1 = inlined_call_operand.vmem [shape: f32[30,128], index: 1, kind: input, shape index: {}]   ;;  %s399_s2 = inlined_call_operand.vmem [shape: f32[3,128], index: 2, kind: input, shape index: {}]   ;;  %s400_s3 = inlined_call_operand.hbm [shape: f32[128,22], index: 3, kind: input, shape index: {}]   ;;  %s401_s4 = inlined_call_operand.vmem [shape: f32[3,128], index: 4, kind: output, shape index: {0}]   ;;  %s402_s5 = inlined_call_operand.vmem [shape: f32[3,22], index: 5, kind: output, shape index: {1}]  }
   0x1   :  { %s23_s19 = sshll.u32 %s313_s18, 4  ;;  %s24_s19 = int_to_ptr.vmem [resolvable:$true] %s23_s19 }
   0x2   :  { %s299_s20 = scalar_lea.vmem %s24_s19, 2048  ;;  %p304_p1 = scmp.lt.s32.totalorder %s24_s19, %s24_s19 }
   0x3   :  { %p300_p0 = scmp.ne.s32.totalorder %s24_s19, %s299_s20  ;;  %p305_p2 = scmp.lt.s32.totalorder %s299_s20, %s299_s20 }
   0x5   :  { %p306_p3 = por %p305_p2, %p304_p1 }
   0x7   :  { %p307_p4 = pnand %p306_p3, %p300_p0 }
   0x9   :  { %310 = shalt.err (!%p307_p4)
}
   0xa   :  { %s314_s21 = smov 128   ;;  %s315_s22 = smov 8  }
   0xb   :  { %29 = dma.hbm_to_vmem [thread:$0]  %s400_s3, 2048, %s24_s19, [#allocation3], %s314_s21, %s314_s21, %s315_s22  }
   0xc   :  { %311 = dma.done.wait [#allocation3], 2048  }
   0xd   :  { %312 = vsyncadd [#allocation3], 4294965248  ;;  %v316_v0 = vmov 0.0   ;;  %vm317_vm0 = vmmov 0   ;;  %vm43_vm1 = vcmask 1045504   ;;  %v37_v2 = vld [vmem:[%s398_s1 + $0x10] sm:$0xff] }
   0xe   :  { %240 = vmatprep.subr.mxu0 %v316_v0  ;;  %248 = vmatprep.mubr.msk.f32.mxu0 %vm317_vm0, %v316_v0  ;;  %v38_v1 = vld [vmem:[%s398_s1 + $0x18] sm:$0x3f]  ;;  %v36_v4 = vld [vmem:[%s398_s1 + $0x8] sm:$0xff]  ;;  %v133_v5 = vld [vmem:[#allocation2 + $0x70] sm:$0xff]  ;;  %vm39_vm2 = vcmask 244736   ;;  %vm205_vm3 = vcmask 174080  }
   0xf   :  { %251 = vmatprep.subr.mxu1 %v316_v0  ;;  %283 = vmatprep.mubr.msk.f32.mxu1 %vm317_vm0, %v316_v0  ;;  %v134_v3 = vld [vmem:[#allocation2 + $0x78] sm:$0xff]  ;;  %v132_v6 = vld [vmem:[#allocation2 + $0x68] sm:$0xff]  ;;  %v35_v7 = vld [vmem:[%s398_s1] sm:$0xff] }
  0x10   :  { %241 = vmatpush3.msk.msra.mxu0 %vm43_vm1, %v38_v1  ;;  %252 = vmatpush3.msra.mxu1 %v134_v3  ;;  %v34_v8 = vld [vmem:[%s397_s0] sm:$0x7]  ;;  %v130_v10 = vld [vmem:[#allocation2 + $0x58] sm:$0xff]  ;;  %v129_v11 = vld [vmem:[#allocation2 + $0x50] sm:$0xff] }
  0x11   :  { %242 = vmatprep.subr.mxu0 %v316_v0  ;;  %253 = vmatprep.subr.mxu1 %v316_v0  ;;  %v131_v9 = vld [vmem:[#allocation2 + $0x60] sm:$0xff]  ;;  %v128_v12 = vld [vmem:[#allocation2 + $0x48] sm:$0xff]  ;;  %v126_v14 = vld [vmem:[#allocation2 + $0x38] sm:$0xff] }
  0x12   :  { %243 = vmatpush3.msra.mxu0 %v37_v2  ;;  %254 = vmatpush3.msra.mxu1 %v133_v5  ;;  %v127_v13 = vld [vmem:[#allocation2 + $0x40] sm:$0xff]  ;;  %v125_v15 = vld [vmem:[#allocation2 + $0x30] sm:$0xff]  ;;  %v124_v16 = vld [vmem:[#allocation2 + $0x28] sm:$0xff] }
  0x13   :  { %244 = vmatprep.subr.mxu0 %v316_v0  ;;  %255 = vmatprep.subr.mxu1 %v316_v0  ;;  %v123_v17 = vld [vmem:[#allocation2 + $0x20] sm:$0xff]  ;;  %v122_v18 = vld [vmem:[#allocation2 + $0x18] sm:$0xff]  ;;  %v121_v19 = vld [vmem:[#allocation2 + $0x10] sm:$0xff] }
  0x14   :  { %245 = vmatpush3.msra.mxu0 %v36_v4  ;;  %256 = vmatpush3.msra.mxu1 %v132_v6  ;;  %v120_v20 = vld [vmem:[#allocation2 + $0x8] sm:$0xff]  ;;  %v119_v21 = vld [vmem:[#allocation2] sm:$0xff] }
  0x15   :  { %246 = vmatprep.subr.mxu0 %v316_v0  ;;  %257 = vmatprep.subr.mxu1 %v316_v0  ;;  %v33_v22 = vld [vmem:[%s399_s2] sm:$0x7] }
  0x16   :  { %247 = vmatpush3.msra.mxu0 %v35_v7  ;;  %258 = vmatpush3.msra.mxu1 %v131_v9 }
  0x17   :  { %249 = vmatmul.mubr.msk.f32.vlgmr.msra.gmra.mxu0 %vm39_vm2, %v34_v8  ;;  %259 = vmatprep.subr.mxu1 %v316_v0 }
  0x18   :  { %260 = vmatpush3.msra.mxu1 %v130_v10 }
  0x19   :  { %261 = vmatprep.subr.mxu1 %v316_v0 }
  0x1a   :  { %262 = vmatpush3.msra.mxu1 %v129_v11 }
  0x1b   :  { %263 = vmatprep.subr.mxu1 %v316_v0 }
  0x1c   :  { %264 = vmatpush3.msra.mxu1 %v128_v12 }
  0x1d   :  { %265 = vmatprep.subr.mxu1 %v316_v0 }
  0x1e   :  { %266 = vmatpush3.msra.mxu1 %v127_v13 }
  0x1f   :  { %267 = vmatprep.subr.mxu1 %v316_v0 }
  0x20   :  { %268 = vmatpush3.msra.mxu1 %v126_v14 }
  0x21   :  { %269 = vmatprep.subr.mxu1 %v316_v0 }
  0x22   :  { %270 = vmatpush3.msra.mxu1 %v125_v15 }
  0x23   :  { %271 = vmatprep.subr.mxu1 %v316_v0 }
  0x24   :  { %272 = vmatpush3.msra.mxu1 %v124_v16 }
  0x25   :  { %273 = vmatprep.subr.mxu1 %v316_v0 }
  0x26   :  { %274 = vmatpush3.msra.mxu1 %v123_v17 }
  0x27   :  { %275 = vmatprep.subr.mxu1 %v316_v0 }
  0x28   :  { %276 = vmatpush3.msra.mxu1 %v122_v18 }
  0x29   :  { %277 = vmatprep.subr.mxu1 %v316_v0 }
  0x2a   :  { %278 = vmatpush3.msra.mxu1 %v121_v19 }
  0x2b   :  { %279 = vmatprep.subr.mxu1 %v316_v0 }
  0x2c   :  { %280 = vmatpush3.msra.mxu1 %v120_v20 }
  0x2d   :  { %281 = vmatprep.subr.mxu1 %v316_v0 }
  0x2e   :  { %282 = vmatpush3.msra.mxu1 %v119_v21 }
  0xd7   :  { %v113_v23 = vpop.f32.mrf.mxu0 }
  0xd8   :  { %v117_v24 = vadd.f32 %v113_v23, %v33_v22 }
  0xd9   :  { %v250_v25 = vpop.f32.mrf.mxu0 }
  0xda   :  { %118 = vst [vmem:[%s401_s4] sm:$0x7] %v117_v24  ;;  %284 = vmatmul.mubr.f32.vlgmr.msra.gmra.mxu1 %v117_v24 }
 0x19a   :  { %v201_v26 = vpop.f32.mrf.mxu1 }
 0x19b   :  { %206 = vst.msk [vmem:[%s402_s5] sm:$0x7] %vm205_vm3, %v201_v26 }
 0x19c   :  { %v285_v27 = vpop.f32.mrf.mxu1 }
 0x19d   :  { %215 = vsyncpa [#allocation3], 1 }

// kernel: neg.156
= control target key start
LH: loop header
LB: loop body
LE: loop exit
PB: predicated region body
PF: predicated region fallthrough
CT: control target
= control target key end

     0   :  { %s24_s0 = inlined_call_operand.vmem [shape: f32[22,4], index: 0, kind: input, shape index: {}]   ;;  %s25_s1 = inlined_call_operand.vmem [shape: f32[22,4], index: 1, kind: output, shape index: {}]  }
   0x1   :  { %v2_v0 = vld [vmem:[%s24_s0] sm:$0xf] }
   0x2   :  { %v5_v1 = vxor.u32 2147483648, %v2_v0 }
   0x4   :  { %7 = vst [vmem:[%s25_s1] sm:$0xf] %v5_v1 }

// kernel: split.193
= control target key start
LH: loop header
LB: loop body
LE: loop exit
PB: predicated region body
PF: predicated region fallthrough
CT: control target
= control target key end

     0   :  { %v3_v0 = vlaneseq  ;;  %v67_v15 = vmov 0.0   ;;  %s102_s0 = inlined_call_operand.vmem [shape: f32[11,4,4], index: 0, kind: input, shape index: {}]   ;;  %s103_s1 = inlined_call_operand.vmem [shape: bf16[10,4,4], index: 1, kind: output, shape index: {}]  }
   0x1   :  { %v2_v1 = vld [vmem:[%s102_s0] sm:$0xf]  ;;  %v48_v2 = vld [vmem:[%s102_s0 + $0x4] sm:$0xf]  ;;  %v50_v4 = vld [vmem:[%s102_s0 + $0x8] sm:$0xf] }
   0x2   :  { %v4_v3 = vand.u32 127, %v3_v0  ;;  %v52_v5 = vld [vmem:[%s102_s0 + $0xc] sm:$0xf]  ;;  %s66_s0 = smov 127  }
   0x4   :  { %vm5_vm0 = vcmp.lt.s32.totalorder %v4_v3, 1 }
   0x5   :  { %v6_v6 = vsel %vm5_vm0, 0, %v2_v1  ;;  %v17_v7 = vsel %vm5_vm0, 0, %v48_v2  ;;  %v29_v8 = vsel %vm5_vm0, 0, %v50_v4  ;;  %v41_v9 = vsel %vm5_vm0, 0, %v52_v5 }
   0x6   :  { %v56_v10 = vpack.i.bf16 %v17_v7, %v6_v6  ;;  %v61_v11 = vpack.i.bf16 %v41_v9, %v29_v8 }
   0x8   :  { %57 = vrot.lane.b32.xlu0 %v56_v10, %s66_s0 }
   0xc   :  { %62 = vrot.lane.b32.xlu0 %v61_v11, %s66_s0 }
  0x7a   :  { %v58_v12 = vpop.permute.xlu0 %57 }
  0x7b   :  { %v60_v13 = vunpack.i.h.bf16 %v58_v12  ;;  %v59_v14 = vunpack.i.l.bf16 %v58_v12 }
  0x7d   :  { %v22_v16 = vpack.c.bf16 %v67_v15, %v60_v13  ;;  %v10_v17 = vpack.c.bf16 %v67_v15, %v59_v14 }
  0x7e   :  { %v63_v18 = vpop.permute.xlu0 %62 }
  0x7f   :  { %49 = vst [vmem:[%s103_s1 + $0x2] sm:$0x3] %v22_v16  ;;  %11 = vst [vmem:[%s103_s1] sm:$0x3] %v10_v17  ;;  %v65_v19 = vunpack.i.h.bf16 %v63_v18  ;;  %v64_v20 = vunpack.i.l.bf16 %v63_v18 }
  0x81   :  { %v46_v21 = vpack.c.bf16 %v67_v15, %v65_v19  ;;  %v34_v22 = vpack.c.bf16 %v67_v15, %v64_v20 }
  0x83   :  { %53 = vst [vmem:[%s103_s1 + $0x6] sm:$0x3] %v46_v21  ;;  %51 = vst [vmem:[%s103_s1 + $0x4] sm:$0x3] %v34_v22 }

// kernel: split.194
= control target key start
LH: loop header
LB: loop body
LE: loop exit
PB: predicated region body
PF: predicated region fallthrough
CT: control target
= control target key end

     0   :  { %v3_v0 = vlaneseq  ;;  %v67_v15 = vmov 0.0   ;;  %s102_s0 = inlined_call_operand.vmem [shape: f32[6,4,4], index: 0, kind: input, shape index: {}]   ;;  %s103_s1 = inlined_call_operand.vmem [shape: bf16[5,4,4], index: 1, kind: output, shape index: {}]  }
   0x1   :  { %v2_v1 = vld [vmem:[%s102_s0] sm:$0xf]  ;;  %v48_v2 = vld [vmem:[%s102_s0 + $0x4] sm:$0xf]  ;;  %v50_v4 = vld [vmem:[%s102_s0 + $0x8] sm:$0xf] }
   0x2   :  { %v4_v3 = vand.u32 127, %v3_v0  ;;  %v52_v5 = vld [vmem:[%s102_s0 + $0xc] sm:$0xf]  ;;  %s66_s0 = smov 127  }
   0x4   :  { %vm5_vm0 = vcmp.lt.s32.totalorder %v4_v3, 1 }
   0x5   :  { %v6_v6 = vsel %vm5_vm0, 0, %v2_v1  ;;  %v17_v7 = vsel %vm5_vm0, 0, %v48_v2  ;;  %v29_v8 = vsel %vm5_vm0, 0, %v50_v4  ;;  %v41_v9 = vsel %vm5_vm0, 0, %v52_v5 }
   0x6   :  { %v56_v10 = vpack.i.bf16 %v17_v7, %v6_v6  ;;  %v61_v11 = vpack.i.bf16 %v41_v9, %v29_v8 }
   0x8   :  { %57 = vrot.lane.b32.xlu0 %v56_v10, %s66_s0 }
   0xc   :  { %62 = vrot.lane.b32.xlu0 %v61_v11, %s66_s0 }
  0x7a   :  { %v58_v12 = vpop.permute.xlu0 %57 }
  0x7b   :  { %v60_v13 = vunpack.i.h.bf16 %v58_v12  ;;  %v59_v14 = vunpack.i.l.bf16 %v58_v12 }
  0x7d   :  { %v22_v16 = vpack.c.bf16 %v67_v15, %v60_v13  ;;  %v10_v17 = vpack.c.bf16 %v67_v15, %v59_v14 }
  0x7e   :  { %v63_v18 = vpop.permute.xlu0 %62 }
  0x7f   :  { %49 = vst [vmem:[%s103_s1 + $0x2] sm:$0x3] %v22_v16  ;;  %11 = vst [vmem:[%s103_s1] sm:$0x3] %v10_v17  ;;  %v65_v19 = vunpack.i.h.bf16 %v63_v18  ;;  %v64_v20 = vunpack.i.l.bf16 %v63_v18 }
  0x81   :  { %v46_v21 = vpack.c.bf16 %v67_v15, %v65_v19  ;;  %v34_v22 = vpack.c.bf16 %v67_v15, %v64_v20 }
  0x83   :  { %53 = vst [vmem:[%s103_s1 + $0x6] sm:$0x3] %v46_v21  ;;  %51 = vst [vmem:[%s103_s1 + $0x4] sm:$0x3] %v34_v22 }

// kernel: split.195
= control target key start
LH: loop header
LB: loop body
LE: loop exit
PB: predicated region body
PF: predicated region fallthrough
CT: control target
= control target key end

     0   :  { %v3_v0 = vlaneseq  ;;  %v67_v15 = vmov 0.0   ;;  %s102_s0 = inlined_call_operand.vmem [shape: f32[3,4,4], index: 0, kind: input, shape index: {}]   ;;  %s103_s1 = inlined_call_operand.vmem [shape: bf16[2,4,4], index: 1, kind: output, shape index: {}]  }
   0x1   :  { %v2_v1 = vld [vmem:[%s102_s0] sm:$0xf]  ;;  %v48_v2 = vld [vmem:[%s102_s0 + $0x4] sm:$0xf]  ;;  %v50_v4 = vld [vmem:[%s102_s0 + $0x8] sm:$0xf] }
   0x2   :  { %v4_v3 = vand.u32 127, %v3_v0  ;;  %v52_v5 = vld [vmem:[%s102_s0 + $0xc] sm:$0xf]  ;;  %s66_s0 = smov 127  }
   0x4   :  { %vm5_vm0 = vcmp.lt.s32.totalorder %v4_v3, 1 }
   0x5   :  { %v6_v6 = vsel %vm5_vm0, 0, %v2_v1  ;;  %v17_v7 = vsel %vm5_vm0, 0, %v48_v2  ;;  %v29_v8 = vsel %vm5_vm0, 0, %v50_v4  ;;  %v41_v9 = vsel %vm5_vm0, 0, %v52_v5 }
   0x6   :  { %v56_v10 = vpack.i.bf16 %v17_v7, %v6_v6  ;;  %v61_v11 = vpack.i.bf16 %v41_v9, %v29_v8 }
   0x8   :  { %57 = vrot.lane.b32.xlu0 %v56_v10, %s66_s0 }
   0xc   :  { %62 = vrot.lane.b32.xlu0 %v61_v11, %s66_s0 }
  0x7a   :  { %v58_v12 = vpop.permute.xlu0 %57 }
  0x7b   :  { %v60_v13 = vunpack.i.h.bf16 %v58_v12  ;;  %v59_v14 = vunpack.i.l.bf16 %v58_v12 }
  0x7d   :  { %v22_v16 = vpack.c.bf16 %v67_v15, %v60_v13  ;;  %v10_v17 = vpack.c.bf16 %v67_v15, %v59_v14 }
  0x7e   :  { %v63_v18 = vpop.permute.xlu0 %62 }
  0x7f   :  { %49 = vst [vmem:[%s103_s1 + $0x2] sm:$0x3] %v22_v16  ;;  %11 = vst [vmem:[%s103_s1] sm:$0x3] %v10_v17  ;;  %v65_v19 = vunpack.i.h.bf16 %v63_v18  ;;  %v64_v20 = vunpack.i.l.bf16 %v63_v18 }
  0x81   :  { %v46_v21 = vpack.c.bf16 %v67_v15, %v65_v19  ;;  %v34_v22 = vpack.c.bf16 %v67_v15, %v64_v20 }
  0x83   :  { %53 = vst [vmem:[%s103_s1 + $0x6] sm:$0x3] %v46_v21  ;;  %51 = vst [vmem:[%s103_s1 + $0x4] sm:$0x3] %v34_v22 }

// kernel: split.196
= control target key start
LH: loop header
LB: loop body
LE: loop exit
PB: predicated region body
PF: predicated region fallthrough
CT: control target
= control target key end

     0   :  { %v3_v0 = vlaneseq  ;;  %s28_s0 = inlined_call_operand.vmem [shape: f32[22,3], index: 0, kind: input, shape index: {}]   ;;  %s29_s1 = inlined_call_operand.vmem [shape: f32[21,3], index: 1, kind: output, shape index: {}]  }
   0x1   :  { %v2_v1 = vld [vmem:[%s28_s0] sm:$0x7]  ;;  %s11_s0 = smov 127  }
   0x2   :  { %v4_v2 = vand.u32 127, %v3_v0 }
   0x4   :  { %vm5_vm0 = vcmp.lt.s32.totalorder %v4_v2, 1 }
   0x5   :  { %v6_v3 = vsel %vm5_vm0, 0, %v2_v1 }
   0x6   :  { %7 = vrot.lane.b32.xlu0 %v6_v3, %s11_s0 }
  0x78   :  { %v8_v4 = vpop.permute.xlu0 %7 }
  0x79   :  { %9 = vst [vmem:[%s29_s1] sm:$0xf] %v8_v4 }

// kernel: jvp__.10
= control target key start
LH: loop header
LB: loop body
LE: loop exit
PB: predicated region body
PF: predicated region fallthrough
CT: control target
= control target key end

     0   :  { %14 = vsyncpa [#allocation4], 0  ;;  %vm42_vm0 = vcmask 1045504   ;;  %v6339_v3 = vmov 1   ;;  %vm35_vm1 = vcmask 179200   ;;  %v6341_v8 = vmov 0   ;;  %s6309_s0 = inlined_call_operand.<no memory space> [shape: f32[1,1], index: 0, kind: input, shape index: {}]   ;;  %s6310_s1 = inlined_call_operand.vmem [shape: f32[3,128], index: 1, kind: input, shape index: {}]   ;;  %s6311_s2 = inlined_call_operand.vmem [shape: f32[16,22], index: 2, kind: input, shape index: {}]   ;;  %s6312_s3 = inlined_call_operand.vmem [shape: f32[22,128], index: 3, kind: input, shape index: {}]   ;;  %s6313_s4 = inlined_call_operand.vmem [shape: f32[64,16], index: 4, kind: input, shape index: {}]   ;;  %s6314_s5 = inlined_call_operand.hbm [shape: f32[1,1], index: 5, kind: output, shape index: {0}]   ;;  %s6315_s6 = inlined_call_operand.hbm [shape: f32[3,128], index: 6, kind: output, shape index: {1}]   ;;  %s6316_s7 = inlined_call_operand.vmem [shape: f32[3,128], index: 7, kind: output, shape index: {2}]  }
   0x1   :  { %v34_v0 = vld [vmem:[%s6312_s3 + $0x10] sm:$0x3f]  ;;  %v3104_v1 = vld [vmem:[%s6313_s4] sm:$0xff]  ;;  %v33_v2 = vld [vmem:[%s6312_s3 + $0x8] sm:$0xff]  ;;  %2790 = vset.pattern.permute.xlu1 %v6339_v3  ;;  %2789 = vset.pattern.permute.xlu0 %v6341_v8 }
   0x2   :  { %2759 = vmatprep.subr.msk.mxu0 %vm42_vm0, %v34_v0  ;;  %v30_v4 = vld [vmem:[%s6311_s2] sm:$0xff]  ;;  %206 = vperm.xlu1 %2790, %v3104_v1   ;;  %v3120_v6 = vld [vmem:[%s6313_s4 + $0x8] sm:$0xff] }
   0x3   :  { %2760 = vmatpush3.msk.msra.mxu0 %vm42_vm0, %v34_v0  ;;  %v32_v5 = vld [vmem:[%s6312_s3] sm:$0xff]  ;;  %2765 = vmatprep.mubr.msk.f32.mxu0 %vm35_vm1, %v30_v4  ;;  %v31_v7 = vld [vmem:[%s6311_s2 + $0x8] sm:$0xff] }
   0x4   :  { %2761 = vmatprep.subr.mxu0 %v33_v2 }
   0x5   :  { %2762 = vmatpush3.msra.mxu0 %v33_v2 }
   0x6   :  { %15 = vsyncpa [#allocation6], 0  ;;  %2763 = vmatprep.subr.mxu0 %v32_v5  ;;  %191 = vperm.xlu0 %2789, %v3104_v1   ;;  %v6331_v9 = vmov 2   ;;  %v6325_v10 = vmov 9   ;;  %v6323_v11 = vmov 10   ;;  %v6321_v12 = vmov 11  }
   0x7   :  { %210 = vperm.xlu1 %2790, %v3120_v6   ;;  %2764 = vmatpush3.msra.mxu0 %v32_v5  ;;  %v6319_v13 = vmov 12   ;;  %v6335_v14 = vmov 3   ;;  %s3045_s2 = smov 3   ;;  %v6317_v15 = vmov 13   ;;  %v3159_v16 = vld [vmem:[%s6313_s4 + $0x10] sm:$0xff]  ;;  %v6337_v17 = vmov 14  }
   0x8   :  { %2766 = vmatmul.mubr.msk.f32.vlgmr.msra.gmra.mxu0 %vm35_vm1, %v31_v7  ;;  %v3174_v18 = vld [vmem:[%s6313_s4 + $0x18] sm:$0xff]  ;;  %v6329_v19 = vmov 4   ;;  %v6333_v20 = vmov 5   ;;  %v6327_v21 = vmov 6   ;;  %v6343_v22 = vmov 8   ;;  %s3056_s29 = smov [#allocation5]  }
   0x9   :  { %v6345_v23 = vmov 7   ;;  %v28_v37 = vld [vmem:[%s6310_s1 + $0x1] sm:$0x1]  ;;  %v29_v38 = vld [vmem:[%s6310_s1 + $0x2] sm:$0x1]  ;;  %s2719_s30 = sshll.u32 %s3056_s29, 4  ;;  %s2720_s30 = int_to_ptr.vmem [resolvable:$true] %s2719_s30 }
   0xa   :  { %196 = vperm.xlu0 %2789, %v3120_v6   ;;  %v27_v40 = vld [vmem:[%s6310_s1] sm:$0x1]  ;;  %v123_v41 = vrot.slane %v28_v37, 7  ;;  %v131_v42 = vrot.slane %v29_v38, 6  ;;  %v148_v46 = vrot.slane %v28_v37, 3  ;;  %v155_v47 = vrot.slane %v29_v38, 2  ;;  %p2998_p1 = scmp.lt.s32.totalorder %s2720_s30, %s2720_s30 }
   0xb   :  { %2792 = vset.pattern.permute.xlu1 %v6331_v9  ;;  %v145_v45 = vrot.slane %v27_v40, 4  ;;  %s2993_s8 = scalar_lea.vmem %s2720_s30, 64 }
   0xc   :  { %224 = vperm.xlu1 %2792, %v3120_v6   ;;  %p2994_p0 = scmp.ne.s32.totalorder %s2720_s30, %s2993_s8  ;;  %p2999_p2 = scmp.lt.s32.totalorder %s2993_s8, %s2993_s8 }
   0xe   :  { %2791 = vset.pattern.permute.xlu0 %v6331_v9  ;;  %p3000_p3 = por %p2999_p2, %p2998_p1 }
   0xf   :  { %220 = vperm.xlu0 %2791, %v3104_v1  }
  0x10   :  { %2793 = vset.pattern.permute.xlu1 %v6325_v10  ;;  %p3001_p4 = pnand %p3000_p3, %p2994_p0 }
  0x11   :  { %230 = vperm.xlu1 %2793, %v3104_v1  }
  0x13   :  { %2794 = vset.pattern.permute.xlu0 %v6325_v10 }
  0x14   :  { %234 = vperm.xlu0 %2794, %v3120_v6  }
  0x15   :  { %2795 = vset.pattern.permute.xlu1 %v6323_v11 }
  0x16   :  { %240 = vperm.xlu1 %2795, %v3104_v1  }
  0x18   :  { %2796 = vset.pattern.permute.xlu0 %v6321_v12 }
  0x19   :  { %252 = vperm.xlu0 %2796, %v3104_v1  }
  0x1a   :  { %244 = vperm.xlu1 %2795, %v3120_v6  }
  0x1d   :  { %2799 = vset.pattern.permute.xlu0 %v6319_v13 }
  0x1e   :  { %2797 = vset.pattern.permute.xlu1 %v6321_v12  ;;  %268 = vperm.xlu0 %2799, %v3120_v6  }
  0x1f   :  { %256 = vperm.xlu1 %2797, %v3120_v6  }
  0x22   :  { %2803 = vset.pattern.permute.xlu0 %v6335_v14 }
  0x23   :  { %2798 = vset.pattern.permute.xlu1 %v6319_v13  ;;  %302 = vperm.xlu0 %2803, %v3120_v6  }
  0x24   :  { %264 = vperm.xlu1 %2798, %v3104_v1  }
  0x27   :  { %551 = vrot.lane.b32.xlu0 %v3120_v6, %s3045_s2 }
  0x28   :  { %2800 = vset.pattern.permute.xlu1 %v6317_v15  ;;  %2810 = vset.pattern.permute.xlu0 %v6339_v3 }
  0x29   :  { %274 = vperm.xlu1 %2800, %v3104_v1  }
  0x2b   :  { %832 = vperm.xlu0 %2810, %v3159_v16  }
  0x2d   :  { %278 = vperm.xlu1 %2800, %v3120_v6  }
  0x2f   :  { %2820 = vset.pattern.permute.xlu0 %v6317_v15 }
  0x30   :  { %896 = vperm.xlu0 %2820, %v3159_v16  }
  0x31   :  { %2801 = vset.pattern.permute.xlu1 %v6337_v17 }
  0x32   :  { %290 = vperm.xlu1 %2801, %v3120_v6  }
  0x34   :  { %2821 = vset.pattern.permute.xlu0 %v6337_v17 }
  0x35   :  { %286 = vperm.xlu0 %2821, %v3104_v1  }
  0x36   :  { %2802 = vset.pattern.permute.xlu1 %v6335_v14 }
  0x37   :  { %298 = vperm.xlu1 %2802, %v3104_v1  }
  0x39   :  { %912 = vperm.xlu0 %2821, %v3174_v18  }
  0x3b   :  { %2804 = vset.pattern.permute.xlu1 %v6329_v19 }
  0x3c   :  { %308 = vperm.xlu1 %2804, %v3104_v1  }
  0x3d   :  { %2825 = vset.pattern.permute.xlu0 %v6329_v19 }
  0x3e   :  { %930 = vperm.xlu0 %2825, %v3159_v16  }
  0x40   :  { %312 = vperm.xlu1 %2804, %v3120_v6  }
  0x42   :  { %2826 = vset.pattern.permute.xlu0 %v6333_v20 }
  0x43   :  { %318 = vperm.xlu0 %2826, %v3104_v1  }
  0x44   :  { %2805 = vset.pattern.permute.xlu1 %v6333_v20 }
  0x45   :  { %322 = vperm.xlu1 %2805, %v3120_v6  }
  0x47   :  { %944 = vperm.xlu0 %2826, %v3174_v18  }
  0x49   :  { %2806 = vset.pattern.permute.xlu1 %v6327_v21 }
  0x4a   :  { %348 = vperm.xlu1 %2806, %v3104_v1  }
  0x4b   :  { %2829 = vset.pattern.permute.xlu0 %v6343_v22 }
  0x4c   :  { %368 = vperm.xlu0 %2829, %v3104_v1  }
  0x4e   :  { %2807 = vset.pattern.permute.xlu1 %v6345_v23 }
  0x4f   :  { %358 = vperm.xlu1 %2807, %v3104_v1  }
  0x53   :  { %362 = vperm.xlu1 %2807, %v3120_v6  }
  0x57   :  { %2808 = vset.pattern.permute.xlu1 %v6343_v22 }
  0x58   :  { %372 = vperm.xlu1 %2808, %v3120_v6  }
  0x5c   :  { %549 = vrot.lane.b32.xlu1 %v3104_v1, %s3045_s2 }
  0x5d   :  { %2809 = vset.pattern.permute.xlu1 %v6341_v8 }
  0x60   :  { %821 = vperm.xlu1 %2809, %v3159_v16  }
  0x64   :  { %826 = vperm.xlu1 %2809, %v3174_v18  }
  0x68   :  { %2811 = vset.pattern.permute.xlu1 %v6339_v3 }
  0x69   :  { %836 = vperm.xlu1 %2811, %v3174_v18  }
  0x6d   :  { %2812 = vset.pattern.permute.xlu1 %v6327_v21 }
  0x7d   :  { %v3205_v24 = vpop.permute.xlu1 %206 }
  0x7e   :  { %6555 = vst [vmem:[#allocation9_spill] sm:$0xff] %v3205_v24 }
  0x81   :  { %v3242_v43 = vpop.permute.xlu0 %191 }
  0x82   :  { %v3207_v25 = vpop.permute.xlu1 %210  ;;  %6560 = vst [vmem:[#allocation14_spill] sm:$0xff] %v3242_v43 }
  0x85   :  { %v3246_v0 = vpop.permute.xlu0 %196 }
  0x87   :  { %v3209_v26 = vpop.permute.xlu1 %224 }
  0x8c   :  { %v3211_v27 = vpop.permute.xlu1 %230 }
  0x91   :  { %v3213_v28 = vpop.permute.xlu1 %240 }
  0x95   :  { %v3215_v29 = vpop.permute.xlu1 %244 }
  0x9a   :  { %v3217_v30 = vpop.permute.xlu1 %256 }
  0x9f   :  { %v3219_v31 = vpop.permute.xlu1 %264 }
  0xa0   :  { %6556 = vst [vmem:[#allocation10_spill] sm:$0xff] %v3219_v31 }
  0xa4   :  { %v3221_v32 = vpop.permute.xlu1 %274 }
  0xa5   :  { %6557 = vst [vmem:[#allocation11_spill] sm:$0xff] %v3221_v32 }
  0xa8   :  { %v3223_v33 = vpop.permute.xlu1 %278 }
  0xad   :  { %v3225_v34 = vpop.permute.xlu1 %290 }
  0xb2   :  { %v3227_v35 = vpop.permute.xlu1 %298 }
  0xb3   :  { %6558 = vst [vmem:[#allocation12_spill] sm:$0xff] %v3227_v35 }
  0xb7   :  { %v3229_v36 = vpop.permute.xlu1 %308 }
  0xb8   :  { %6559 = vst [vmem:[#allocation13_spill] sm:$0xff] %v3229_v36 }
  0xbb   :  { %v3237_v39 = vpop.permute.xlu1 %312 }
  0xc0   :  { %v3244_v52 = vpop.permute.xlu1 %322 }
  0xc8   :  { %v2767_v44 = vpop.f32.mrf.mxu0 }
  0xc9   :  { %v164_v48 = vmul.f32 %v2767_v44, %v27_v40  ;;  %v165_v49 = vmul.f32 %v2767_v44, %v123_v41  ;;  %v170_v50 = vmul.f32 %v2767_v44, %v131_v42  ;;  %v176_v61 = vrot.slane %v2767_v44, 3 }
  0xca   :  { %v112_v51 = vpop.f32.mrf.mxu0 }
  0xcb   :  { %v167_v53 = vrot.slane %v165_v49, 1  ;;  %v172_v54 = vrot.slane %v170_v50, 2  ;;  %v121_v55 = vmul.f32 %v112_v51, %v27_v40  ;;  %v125_v56 = vmul.f32 %v123_v41, %v112_v51  ;;  %v3255_v49 = vpop.permute.xlu0 %220 }
  0xcc   :  { %v133_v57 = vmul.f32 %v131_v42, %v112_v51  ;;  %v147_v58 = vmul.f32 %v145_v45, %v112_v51  ;;  %v150_v59 = vmul.f32 %v148_v46, %v112_v51  ;;  %v157_v63 = vmul.f32 %v155_v47, %v112_v51  ;;  %v3251_v42 = vpop.permute.xlu1 %348  ;;  %6562 = vst [vmem:[#allocation16_spill] sm:$0xff] %v3255_v49 }
  0xcd   :  { %v169_v60 = vadd.f32 %v167_v53, %v164_v48  ;;  %v127_v62 = vrot.slane %v125_v56, 1  ;;  %v139_v37 = vrot.slane %v112_v51, 3  ;;  %v142_v40 = vstv %s6309_s0  ;;  %6561 = vst [vmem:[#allocation15_spill] sm:$0xff] %v3251_v42 }
  0xce   :  { %v135_v2 = vrot.slane %v133_v57, 2  ;;  %v152_v4 = vrot.slane %v150_v59, 1  ;;  %v159_v38 = vrot.slane %v157_v63, 2 }
  0xcf   :  { %v174_v5 = vadd.f32 %v172_v54, %v169_v60  ;;  %v129_v7 = vadd.f32 %v127_v62, %v121_v55  ;;  %v3266_v55 = vpop.permute.xlu0 %234 }
  0xd0   :  { %v154_v41 = vadd.f32 %v152_v4, %v147_v58  ;;  %v3262_v54 = vpop.permute.xlu1 %358 }
  0xd1   :  { %v178_v45 = vadd.f32 %v176_v61, %v174_v5  ;;  %v137_v46 = vadd.f32 %v135_v2, %v129_v7  ;;  %6563 = vst [vmem:[#allocation17_spill] sm:$0xff] %v3262_v54 }
  0xd2   :  { %v161_v44 = vadd.f32 %v159_v38, %v154_v41 }
  0xd3   :  { %v3253_v48 = vmul.f32 %v178_v45, %v142_v40  ;;  %v141_v47 = vadd.f32 %v139_v37, %v137_v46  ;;  %v3270_v57 = vpop.permute.xlu0 %252 }
  0xd4   :  { %v162_v50 = vadd.f32 %v161_v44, %v139_v37  ;;  %v3268_v56 = vpop.permute.xlu1 %362  ;;  %6565 = vst [vmem:[#allocation19_spill] sm:$0xff] %v3270_v57 }
  0xd5   :  { %182 = vst [vmem:[#allocation5 + $0x2] sm:$0x1] %v3253_v48  ;;  %v3258_v51 = vmul.f32 %v142_v40, %v141_v47  ;;  %6564 = vst [vmem:[#allocation18_spill] sm:$0xff] %v3268_v56 }
  0xd6   :  { %v3260_v53 = vmul.f32 %v162_v50, %v142_v40 }
  0xd7   :  { %180 = vst [vmem:[#allocation5] sm:$0x1] %v3258_v51  ;;  %v3274_v59 = vpop.permute.xlu0 %268 }
  0xd8   :  { %181 = vst [vmem:[#allocation5 - $0x3] sm:$0x10] %v3260_v53  ;;  %v3272_v58 = vpop.permute.xlu1 %372 }
  0xd9   :  { %6566 = vst [vmem:[#allocation20_spill] sm:$0xff] %v3272_v58 }
  0xdb   :  { %v3276_v61 = vpop.permute.xlu0 %302 }
  0xdc   :  { %v550_v60 = vpop.permute.xlu1 %549 }
  0xdd   :  { %v555_v62 = vsub.f32 %v3104_v1, %v550_v60 }
  0xdf   :  { %559 = vperm.xlu1 %2812, %v555_v62   ;;  %644 = vperm.xlu0 %2829, %v555_v62   ;;  %v552_v63 = vpop.permute.xlu0 %551 }
  0xe0   :  { %v556_v2 = vsub.f32 %v3120_v6, %v552_v63  ;;  %v3321_v4 = vpop.permute.xlu1 %821 }
  0xe1   :  { %6569 = vst [vmem:[#allocation23_spill] sm:$0xff] %v3321_v4 }
  0xe3   :  { %2813 = vset.pattern.permute.xlu1 %v6345_v23  ;;  %994 = vperm.xlu0 %2829, %v3174_v18   ;;  %v3314_v1 = vpop.permute.xlu0 %832 }
  0xe4   :  { %602 = vperm.xlu1 %2813, %v555_v62   ;;  %6567 = vst [vmem:[#allocation21_spill] sm:$0xff] %v3314_v1  ;;  %v3329_v7 = vpop.permute.xlu1 %826 }
  0xe5   :  { %6571 = vst [vmem:[#allocation25_spill] sm:$0xff] %v3329_v7 }
  0xe7   :  { %2833 = vset.pattern.permute.xlu0 %v6327_v21 }
  0xe8   :  { %352 = vperm.xlu0 %2833, %v3120_v6   ;;  %606 = vperm.xlu1 %2813, %v556_v2   ;;  %v3318_v6 = vpop.permute.xlu0 %896  ;;  %v3335_v38 = vpop.permute.xlu1 %836 }
  0xe9   :  { %6568 = vst [vmem:[#allocation22_spill] sm:$0xff] %v3318_v6  ;;  %6573 = vst [vmem:[#allocation27_spill] sm:$0xff] %v3335_v38 }
  0xec   :  { %564 = vperm.xlu0 %2833, %v556_v2   ;;  %2814 = vset.pattern.permute.xlu1 %v6343_v22  ;;  %v3324_v5 = vpop.permute.xlu0 %286 }
  0xed   :  { %648 = vperm.xlu1 %2814, %v556_v2   ;;  %6570 = vst [vmem:[#allocation24_spill] sm:$0xff] %v3324_v5  ;;  %v185_v2 = vlaneseq }
  0xf0   :  { %v3333_v37 = vpop.permute.xlu0 %912 }
  0xf1   :  { %2815 = vset.pattern.permute.xlu1 %v6331_v9  ;;  %6572 = vst [vmem:[#allocation26_spill] sm:$0xff] %v3333_v37 }
  0xf2   :  { %842 = vperm.xlu1 %2815, %v3159_v16  }
  0xf4   :  { %v3337_v40 = vpop.permute.xlu0 %930 }
  0xf5   :  { %6574 = vst [vmem:[#allocation28_spill] sm:$0xff] %v3337_v40 }
  0xf6   :  { %846 = vperm.xlu1 %2815, %v3174_v18  }
  0xf8   :  { %v3341_v45 = vpop.permute.xlu0 %318 }
  0xf9   :  { %6576 = vst [vmem:[#allocation30_spill] sm:$0xff] %v3341_v45 }
  0xfa   :  { %2816 = vset.pattern.permute.xlu1 %v6325_v10 }
  0xfb   :  { %852 = vperm.xlu1 %2816, %v3159_v16  }
  0xfc   :  { %v3347_v47 = vpop.permute.xlu0 %944 }
  0xfd   :  { %6577 = vst [vmem:[#allocation31_spill] sm:$0xff] %v3347_v47 }
  0xff   :  { %856 = vperm.xlu1 %2816, %v3174_v18  }
 0x100   :  { %v3351_v60 = vpop.permute.xlu0 %368 }
 0x101   :  { %6578 = vst [vmem:[#allocation32_spill] sm:$0xff] %v3351_v60 }
 0x103   :  { %2817 = vset.pattern.permute.xlu1 %v6323_v11 }
 0x104   :  { %862 = vperm.xlu1 %2817, %v3159_v16  }
 0x108   :  { %866 = vperm.xlu1 %2817, %v3174_v18  }
 0x10c   :  { %2818 = vset.pattern.permute.xlu1 %v6321_v12 }
 0x10d   :  { %874 = vperm.xlu1 %2818, %v3159_v16  }
 0x111   :  { %878 = vperm.xlu1 %2818, %v3174_v18  }
 0x115   :  { %2819 = vset.pattern.permute.xlu1 %v6319_v13  ;;  %v186_v13 = vshrl.u32 %v185_v2, 7 }
 0x116   :  { %886 = vperm.xlu1 %2819, %v3159_v16  }
 0x117   :  { %v203_v11 = vsub.s32 4, %v186_v13 }
 0x119   :  { %v3367_v9 = vrot.slane %v3260_v53, %v203_v11 }
 0x11a   :  { %890 = vperm.xlu1 %2819, %v3174_v18  }
 0x11b   :  { %6585 = vst [vmem:[#allocation39_spill] sm:$0xff] %v3367_v9  ;;  %v214_v3 = vsub.f32 %v3367_v9, %v3207_v25 }
 0x11d   :  { %v282_v4 = vmul.f32 %v3223_v33, %v214_v3 }
 0x11e   :  { %2822 = vset.pattern.permute.xlu1 %v6317_v15 }
 0x11f   :  { %900 = vperm.xlu1 %2822, %v3174_v18  }
 0x123   :  { %2823 = vset.pattern.permute.xlu1 %v6337_v17 }
 0x124   :  { %908 = vperm.xlu1 %2823, %v3159_v16  }
 0x128   :  { %2824 = vset.pattern.permute.xlu1 %v6335_v14 }
 0x129   :  { %920 = vperm.xlu1 %2824, %v3159_v16  }
 0x12d   :  { %924 = vperm.xlu1 %2824, %v3174_v18  }
 0x131   :  { %2827 = vset.pattern.permute.xlu1 %v6329_v19 }
 0x132   :  { %934 = vperm.xlu1 %2827, %v3174_v18  }
 0x136   :  { %2828 = vset.pattern.permute.xlu1 %v6333_v20 }
 0x137   :  { %940 = vperm.xlu1 %2828, %v3159_v16  }
 0x13b   :  { %2830 = vset.pattern.permute.xlu1 %v6327_v21 }
 0x13c   :  { %970 = vperm.xlu1 %2830, %v3159_v16  }
 0x140   :  { %974 = vperm.xlu1 %2830, %v3174_v18  }
 0x144   :  { %2831 = vset.pattern.permute.xlu1 %v6345_v23 }
 0x145   :  { %984 = vperm.xlu1 %2831, %v3174_v18  }
 0x149   :  { %2832 = vset.pattern.permute.xlu1 %v6343_v22  ;;  %v248_v22 = vmul.f32 %v3215_v29, %v214_v3 }
 0x14a   :  { %990 = vperm.xlu1 %2832, %v3159_v16  }
 0x14e   :  { %1171 = vrot.lane.b32.xlu1 %v3159_v16, %s3045_s2 }
 0x14f   :  { %2835 = vset.pattern.permute.xlu1 %v6327_v21  ;;  %v187_v21 = vsub.s32 0, %v186_v13 }
 0x151   :  { %v3364_v19 = vrot.slane %v3258_v51, %v187_v21  ;;  %v3374_v17 = vrot.slane %v3253_v48, %v187_v21  ;;  %v316_v51 = vsub.f32 %v3367_v9, %v3237_v39  ;;  %v366_v21 = vsub.f32 %v3367_v9, %v3268_v56 }
 0x152   :  { %1173 = vrot.lane.b32.xlu1 %v3174_v18, %s3045_s2 }
 0x153   :  { %6584 = vst [vmem:[#allocation38_spill] sm:$0xff] %v3364_v19  ;;  %6588 = vst [vmem:[#allocation42_spill] sm:$0xff] %v3374_v17  ;;  %v200_v2 = vsub.f32 %v3364_v19, %v3246_v0  ;;  %v306_v11 = vsub.f32 %v3364_v19, %v3276_v61  ;;  %v376_v48 = vsub.f32 %v3374_v17, %v3272_v58 }
 0x154   :  { %v380_v37 = vmul.f32 %v366_v21, %v3215_v29  ;;  %v326_v3 = vsub.f32 %v3374_v17, %v3244_v52 }
 0x155   :  { %v238_v8 = vmul.f32 %v3266_v55, %v200_v2  ;;  %v338_v1 = vmul.f32 %v306_v11, %v3274_v59 }
 0x156   :  { %v334_v56 = vmul.f32 %v326_v3, %v3217_v30 }
 0x157   :  { %v250_v7 = vadd.f32 %v248_v22, %v238_v8  ;;  %v365_v22 = vsub.f32 %v3367_v9, %v3262_v54 }
 0x15a   :  { %v3339_v41 = vpop.permute.xlu1 %559  ;;  %v3355_v63 = vpop.permute.xlu0 %644 }
 0x15b   :  { %6575 = vst [vmem:[#allocation29_spill] sm:$0xff] %v3339_v41  ;;  %6580 = vst [vmem:[#allocation34_spill] sm:$0xff] %v3355_v63 }
 0x15e   :  { %v3359_v12 = vpop.permute.xlu0 %994 }
 0x15f   :  { %v3343_v46 = vpop.permute.xlu1 %602  ;;  %6582 = vst [vmem:[#allocation36_spill] sm:$0xff] %v3359_v12 }
 0x163   :  { %v3345_v44 = vpop.permute.xlu1 %606  ;;  %v3371_v14 = vpop.permute.xlu0 %352 }
 0x164   :  { %6587 = vst [vmem:[#allocation41_spill] sm:$0xff] %v3371_v14  ;;  %v356_v13 = vsub.f32 %v3364_v19, %v3371_v14  ;;  %v344_v14 = vmul.f32 %v326_v3, %v3225_v34  ;;  %v379_v3 = vmul.f32 %v365_v22, %v3213_v28 }
 0x166   :  { %v378_v23 = vmul.f32 %v356_v13, %v3266_v55  ;;  %v388_v6 = vmul.f32 %v356_v13, %v3274_v59  ;;  %v228_v13 = vsub.f32 %v3374_v17, %v3209_v26 }
 0x168   :  { %v3349_v50 = vpop.permute.xlu1 %648  ;;  %v294_v63 = vmul.f32 %v3225_v34, %v228_v13 }
 0x16d   :  { %v3353_v62 = vpop.permute.xlu1 %842 }
 0x16e   :  { %6579 = vst [vmem:[#allocation33_spill] sm:$0xff] %v3353_v62  ;;  %v272_v62 = vmul.f32 %v3274_v59, %v200_v2  ;;  %v382_v2 = vadd.f32 %v380_v37, %v378_v23 }
 0x170   :  { %v284_v38 = vadd.f32 %v282_v4, %v272_v62  ;;  %v305_v62 = vsub.f32 %v3364_v19, %v3227_v35 }
 0x171   :  { %v3357_v15 = vpop.permute.xlu1 %846 }
 0x172   :  { %6581 = vst [vmem:[#allocation35_spill] sm:$0xff] %v3357_v15  ;;  %v340_v15 = vmul.f32 %v316_v51, %v3223_v33 }
 0x176   :  { %v3361_v10 = vpop.permute.xlu1 %852 }
 0x177   :  { %6583 = vst [vmem:[#allocation37_spill] sm:$0xff] %v3361_v10  ;;  %v330_v10 = vmul.f32 %v316_v51, %v3215_v29  ;;  %v394_v51 = vmul.f32 %v376_v48, %v3225_v34 }
 0x17a   :  { %v3369_v20 = vpop.permute.xlu1 %856 }
 0x17b   :  { %6586 = vst [vmem:[#allocation40_spill] sm:$0xff] %v3369_v20  ;;  %v390_v20 = vmul.f32 %v366_v21, %v3223_v33  ;;  %v260_v21 = vmul.f32 %v3217_v30, %v228_v13 }
 0x17d   :  { %v392_v12 = vadd.f32 %v390_v20, %v388_v6  ;;  %v355_v20 = vsub.f32 %v3364_v19, %v3251_v42  ;;  %v3432_v6 = vadd.f32 %v294_v63, %v284_v38 }
 0x17f   :  { %v3386_v53 = vpop.permute.xlu1 %862  ;;  %v3420_v8 = vadd.f32 %v394_v51, %v392_v12  ;;  %v377_v13 = vmul.f32 %v355_v20, %v3211_v27  ;;  %v327_v51 = vmul.f32 %v305_v62, %v3211_v27  ;;  %vm446_vm0 = vcmp.ge.f32.partialorder %v3432_v6, 0.0 }
 0x180   :  { %6589 = vst [vmem:[#allocation43_spill] sm:$0xff] %v3386_v53  ;;  %v328_v53 = vmul.f32 %v306_v11, %v3266_v55  ;;  %v384_v11 = vmul.f32 %v376_v48, %v3217_v30 }
 0x182   :  { %v332_v47 = vadd.f32 %v330_v10, %v328_v53  ;;  %v3418_v23 = vadd.f32 %v384_v11, %v382_v2  ;;  %v199_v10 = vsub.f32 %v3364_v19, %v3242_v43  ;;  %v315_v53 = vsub.f32 %v3367_v9, %v3229_v36 }
 0x183   :  { %v3400_v40 = vpop.permute.xlu1 %866  ;;  %v387_v2 = vmul.f32 %v355_v20, %v3219_v31  ;;  %v389_v11 = vmul.f32 %v365_v22, %v3221_v32  ;;  %v325_v22 = vsub.f32 %v3374_v17, %v3341_v45  ;;  %v375_v19 = vsub.f32 %v3374_v17, %v3351_v60 }
 0x184   :  { %6590 = vst [vmem:[#allocation44_spill] sm:$0xff] %v3400_v40  ;;  %v342_v40 = vadd.f32 %v340_v15, %v338_v1  ;;  %v213_v15 = vsub.f32 %v3367_v9, %v3205_v24  ;;  %v3430_v1 = vadd.f32 %v260_v21, %v250_v7  ;;  %v3434_v4 = vadd.f32 %v334_v56, %v332_v47 }
 0x185   :  { %v404_v48 = vmul.f32 %v3418_v23, %v3432_v6  ;;  %v237_v38 = vmul.f32 %v3211_v27, %v199_v10  ;;  %v271_v47 = vmul.f32 %v3219_v31, %v199_v10  ;;  %v329_v21 = vmul.f32 %v315_v53, %v3213_v28 }
 0x186   :  { %v3436_v12 = vadd.f32 %v344_v14, %v342_v40  ;;  %v406_v7 = vmul.f32 %v3420_v8, %v3430_v1  ;;  %v410_v56 = vmul.f32 %v3420_v8, %v3434_v4  ;;  %v247_v40 = vmul.f32 %v3213_v28, %v213_v15 }
 0x187   :  { %v281_v63 = vmul.f32 %v3221_v32, %v213_v15  ;;  %v227_v10 = vsub.f32 %v3374_v17, %v3255_v49  ;;  %v391_v35 = vadd.f32 %v389_v11, %v387_v2  ;;  %vm436_vm11 = vcmp.ge.f32.partialorder %v3430_v1, 0.0 }
 0x188   :  { %v3412_v58 = vpop.permute.xlu1 %874  ;;  %v412_v14 = vmul.f32 %v3418_v23, %v3436_v12  ;;  %v3468_v15 = vsub.f32 %v404_v48, %v406_v7  ;;  %v249_v20 = vadd.f32 %v247_v40, %v237_v38  ;;  %v331_v48 = vadd.f32 %v329_v21, %v327_v51 }
 0x189   :  { %6591 = vst [vmem:[#allocation45_spill] sm:$0xff] %v3412_v58  ;;  %v337_v58 = vmul.f32 %v305_v62, %v3219_v31  ;;  %v283_v9 = vadd.f32 %v281_v63, %v271_v47  ;;  %v381_v62 = vadd.f32 %v379_v3, %v377_v13  ;;  %v259_v40 = vmul.f32 %v3270_v57, %v227_v10 }
 0x18a   :  { %v3470_v54 = vsub.f32 %v410_v56, %v412_v14  ;;  %v343_v56 = vmul.f32 %v325_v22, %v3324_v5  ;;  %v393_v14 = vmul.f32 %v375_v19, %v3324_v5  ;;  %v293_v47 = vmul.f32 %v3324_v5, %v227_v10 }
 0x18b   :  { %v333_v13 = vmul.f32 %v325_v22, %v3270_v57  ;;  %v383_v3 = vmul.f32 %v375_v19, %v3270_v57  ;;  %v3490_v2 = vadd.f32 %v259_v40, %v249_v20  ;;  %vm444_vm14 = vcmp.le.f32.partialorder %v3468_v15, 0.0 }
 0x18c   :  { %v3438_v37 = vpop.permute.xlu1 %878  ;;  %v516_v63 = vadd.f32 %v3470_v54, %v3468_v15  ;;  %v3502_v10 = vadd.f32 %v393_v14, %v391_v35  ;;  %v3517_v35 = vsub.f32 %v3418_v23, %v3420_v8  ;;  %vm454_vm13 = vcmp.le.f32.partialorder %v3470_v54, 0.0 }
 0x18d   :  { %6592 = vst [vmem:[#allocation46_spill] sm:$0xff] %v3438_v37  ;;  %v339_v37 = vmul.f32 %v315_v53, %v3221_v32  ;;  %v398_v53 = vmul.f32 %v3436_v12, %v3430_v1  ;;  %v3496_v11 = vadd.f32 %v333_v13, %v331_v48  ;;  %v3500_v21 = vadd.f32 %v383_v3, %v381_v62 }
 0x18e   :  { %vm440_vm15 = vcmp.le.f32.partialorder %v3434_v4, 0.0 }
 0x18f   :  { %v341_v7 = vadd.f32 %v339_v37, %v337_v58  ;;  %v3492_v58 = vadd.f32 %v293_v47, %v283_v9  ;;  %6595 = vst [vmem:[#allocation49_spill] sm:$0xff] %v3496_v11  ;;  %6597 = vst [vmem:[#allocation51_spill] sm:$0xff] %v3500_v21  ;;  %v405_v9 = vmul.f32 %v3502_v10, %v3490_v2 }
 0x190   :  { %v409_v20 = vmul.f32 %v3502_v10, %v3496_v11 }
 0x191   :  { %v3464_v42 = vpop.permute.xlu1 %886  ;;  %v3498_v51 = vadd.f32 %v343_v56, %v341_v7  ;;  %v403_v19 = vmul.f32 %v3500_v21, %v3492_v58  ;;  %v3527_v7 = vsub.f32 %v3436_v12, %v3434_v4  ;;  %v399_v14 = vmul.f32 %v3496_v11, %v3492_v58 }
 0x192   :  { %6593 = vst [vmem:[#allocation47_spill] sm:$0xff] %v3464_v42  ;;  %v400_v42 = vmul.f32 %v3434_v4, %v3432_v6  ;;  %v483_v17 = vsub.f32 %v3492_v58, %v3502_v10 }
 0x193   :  { %6596 = vst [vmem:[#allocation50_spill] sm:$0xff] %v3498_v51  ;;  %v397_v56 = vmul.f32 %v3498_v51, %v3490_v2  ;;  %v500_v40 = vadd.f32 %v3517_v35, %v3527_v7  ;;  %vm458_vm12 = vcmp.ge.f32.partialorder %v3527_v7, 0.0 }
 0x194   :  { %v3494_v37 = vsub.f32 %v398_v53, %v400_v42  ;;  %v411_v42 = vmul.f32 %v3500_v21, %v3498_v51  ;;  %v3521_v53 = vsub.f32 %v403_v19, %v405_v9  ;;  %v484_v19 = vsub.f32 %v3432_v6, %v3420_v8  ;;  %vm3612_vm1 = vmand %vm454_vm13, %vm458_vm12 }
 0x195   :  { %v3482_v38 = vpop.permute.xlu1 %890  ;;  %v3539_v3 = vsub.f32 %v397_v56, %v399_v14  ;;  %v502_v9 = vand.u32 2147483647, %v500_v40  ;;  %vm450_vm13 = vcmp.le.f32.partialorder %v3420_v8, 0.0 }
 0x196   :  { %6594 = vst [vmem:[#allocation48_spill] sm:$0xff] %v3482_v38  ;;  %v518_v38 = vadd.f32 %v516_v63, %v3494_v37  ;;  %v3523_v48 = vsub.f32 %v409_v20, %v411_v42  ;;  %v468_v42 = vsub.f32 %v3430_v1, %v3434_v4  ;;  %v486_v56 = vand.u32 2147483647, %v484_v19 }
 0x197   :  { %vm504_vm3 = vcmp.gt.f32.partialorder %v502_v9, 1e-12  ;;  %vm434_vm10 = vcmp.le.f32.partialorder %v3494_v37, 0.0 }
 0x198   :  { %v520_v22 = vand.u32 2147483647, %v518_v38  ;;  %v515_v63 = vadd.f32 %v3523_v48, %v3521_v53  ;;  %v470_v14 = vand.u32 2147483647, %v468_v42  ;;  %vm488_vm4 = vcmp.gt.f32.partialorder %v486_v56, 1e-12  ;;  %vm3659_vm12 = vmand %vm434_vm10, %vm436_vm11 }
 0x199   :  { %v490_v9 = vsel %vm488_vm4, %v484_v19, 1.0  ;;  %vm424_vm4 = vcmp.le.f32.partialorder %v3436_v12, %v3434_v4 }
 0x19a   :  { %v3505_v60 = vpop.permute.xlu1 %900  ;;  %vm522_vm2 = vcmp.gt.f32.partialorder %v520_v22, 1e-12  ;;  %v517_v22 = vadd.f32 %v515_v63, %v3539_v3  ;;  %vm472_vm5 = vcmp.gt.f32.partialorder %v470_v14, 1e-12 }
 0x19b   :  { %6598 = vst [vmem:[#allocation52_spill] sm:$0xff] %v3505_v60  ;;  %v524_v13 = vsel %vm522_vm2, %v518_v38, 1.0  ;;  %v3554_v38 = vsub.f32 %v3500_v21, %v3502_v10  ;;  %v474_v45 = vsel %vm472_vm5, %v468_v42, 1.0  ;;  %vm3625_vm2 = vmand %vm444_vm14, %vm446_vm0  ;;  %vm453_vm5 = vcmp.le.f32.partialorder %v3523_v48, 0.0 }
 0x19c   :  { %2893 = vrcp.f32 %v524_v13  ;;  %v467_v13 = vsub.f32 %v3490_v2, %v3496_v11  ;;  %vm445_vm0 = vcmp.ge.f32.partialorder %v3492_v58, 0.0  ;;  %vm3674_vm10 = vmand %vm3625_vm2, %vm450_vm13  ;;  %vm430_vm2 = vcmp.le.f32.partialorder %v3418_v23, %v3420_v8 }
 0x19d   :  { %vm463_vm11 = vcmp.ge.f32.partialorder %v3554_v38, 0.0  ;;  %vm3698_vm13 = vmand %vm3659_vm12, %vm440_vm15  ;;  %vm449_vm14 = vcmp.le.f32.partialorder %v3502_v10, 0.0 }
 0x19f   :  { %v3519_v62 = vpop.permute.xlu1 %908 }
 0x1a0   :  { %6599 = vst [vmem:[#allocation53_spill] sm:$0xff] %v3519_v62  ;;  %v3550_v62 = vsub.f32 %v3498_v51, %v3496_v11  ;;  %v469_v51 = vand.u32 2147483647, %v467_v13  ;;  %v485_v11 = vand.u32 2147483647, %v483_v17 }
 0x1a2   :  { %v499_v63 = vadd.f32 %v3554_v38, %v3550_v62  ;;  %vm471_vm7 = vcmp.gt.f32.partialorder %v469_v51, 1e-12  ;;  %vm487_vm9 = vcmp.gt.f32.partialorder %v485_v11, 1e-12 }
 0x1a3   :  { %v489_v42 = vsel %vm487_vm9, %v483_v17, 1.0  ;;  %vm457_vm9 = vcmp.ge.f32.partialorder %v3550_v62, 0.0 }
 0x1a4   :  { %v3535_v47 = vpop.permute.xlu1 %920  ;;  %vm3733_vm12 = vmand %vm453_vm5, %vm457_vm9 }
 0x1a5   :  { %6600 = vst [vmem:[#allocation54_spill] sm:$0xff] %v3535_v47  ;;  %v519_v47 = vand.u32 2147483647, %v517_v22 }
 0x1a7   :  { %vm521_vm6 = vcmp.gt.f32.partialorder %v519_v47, 1e-12  ;;  %v473_v47 = vsel %vm471_vm7, %v467_v13, 1.0 }
 0x1a8   :  { %v3545_v20 = vpop.permute.xlu1 %924  ;;  %v523_v49 = vsel %vm521_vm6, %v517_v22, 1.0  ;;  %vm422_vm6 = vcmp.ge.f32.partialorder %v3434_v4, 0.0 }
 0x1a9   :  { %6601 = vst [vmem:[#allocation55_spill] sm:$0xff] %v3545_v20  ;;  %v506_v20 = vsel %vm504_vm3, %v500_v40, 1.0  ;;  %v2894_v5 = vpop.eup %2893  ;;  %vm464_vm3 = vcmp.ge.f32.partialorder %v3517_v35, 0.0  ;;  %vm3755_vm5 = vmand %vm422_vm6, %vm424_vm4  ;;  %vm418_vm4 = vcmp.le.f32.partialorder %v3432_v6, 0.0 }
 0x1aa   :  { %2895 = vrcp.f32 %v506_v20  ;;  %v528_v56 = vmul.f32 %v2894_v5, %v3468_v15  ;;  %vm3640_vm7 = vmand %vm3612_vm1, %vm464_vm3  ;;  %vm435_vm1 = vcmp.ge.f32.partialorder %v3490_v2, 0.0  ;;  %vm428_vm3 = vcmp.ge.f32.partialorder %v3420_v8, 0.0  ;;  %v6632_v8 = vld [vmem:[#allocation18_spill] sm:$0xff] }
 0x1ab   :  { %2897 = vrcp.f32 %v490_v9  ;;  %vm3724_vm15 = vmand %vm428_vm3, %vm430_vm2 }
 0x1ac   :  { %2899 = vrcp.f32 %v474_v45  ;;  %v530_v14 = vmax.f32 %v528_v56, 0.0  ;;  %vm3776_vm6 = vmand %vm3733_vm12, %vm463_vm11 }
 0x1ad   :  { %v3556_v60 = vpop.permute.xlu1 %934  ;;  %2901 = vrcp.f32 %v523_v49 }
 0x1ae   :  { %6602 = vst [vmem:[#allocation56_spill] sm:$0xff] %v3556_v60  ;;  %v501_v60 = vand.u32 2147483647, %v499_v63  ;;  %2903 = vrcp.f32 %v473_v47  ;;  %v532_v9 = vmin.f32 %v530_v14, 1.0 }
 0x1b0   :  { %vm503_vm8 = vcmp.gt.f32.partialorder %v501_v60, 1e-12  ;;  %v534_v60 = vmul.f32 %v2894_v5, %v3494_v37  ;;  %v536_v11 = vsub.f32 1.0, %v532_v9  ;;  %v542_v5 = vmul.f32 %v532_v9, %v3266_v55 }
 0x1b1   :  { %v505_v20 = vsel %vm503_vm8, %v499_v63, 1.0  ;;  %v594_v57 = vmul.f32 %v532_v9, %v3215_v29  ;;  %vm443_vm8 = vcmp.le.f32.partialorder %v3521_v53, 0.0 }
 0x1b2   :  { %v3564_v21 = vpop.permute.xlu1 %940  ;;  %2905 = vrcp.f32 %v505_v20  ;;  %v538_v17 = vmax.f32 %v534_v60, 0.0  ;;  %vm3765_vm9 = vmand %vm443_vm8, %vm445_vm0  ;;  %vm6643_vm8 = vcmp.le.f32.partialorder %v3539_v3, 0.0 }
 0x1b3   :  { %6603 = vst [vmem:[#allocation57_spill] sm:$0xff] %v3564_v21  ;;  %2907 = vrcp.f32 %v489_v42  ;;  %v596_v36 = vadd.f32 %v594_v57, %v3207_v25  ;;  %vm3793_vm0 = vmand %vm6643_vm8, %vm435_vm1  ;;  %vm427_vm1 = vcmp.ge.f32.partialorder %v3502_v10, 0.0 }
 0x1b4   :  { %v540_v42 = vmin.f32 %v536_v11, %v538_v17  ;;  %v565_v11 = vpop.permute.xlu0 %564  ;;  %vm3817_vm11 = vmand %vm3765_vm9, %vm449_vm14  ;;  %vm417_vm9 = vcmp.le.f32.partialorder %v3492_v58, 0.0 }
 0x1b7   :  { %v3566_v40 = vpop.permute.xlu1 %970  ;;  %v2896_v22 = vpop.eup %2895 }
 0x1b8   :  { %6604 = vst [vmem:[#allocation58_spill] sm:$0xff] %v3566_v40  ;;  %v510_v49 = vmul.f32 %v2896_v22, %v3527_v7  ;;  %v2898_v45 = vpop.eup %2897 }
 0x1b9   :  { %v2900_v40 = vpop.eup %2899  ;;  %v494_v63 = vmul.f32 %v2898_v45, %v3432_v6 }
 0x1ba   :  { %v2902_v13 = vpop.eup %2901  ;;  %v512_v21 = vmax.f32 %v510_v49, 0.0  ;;  %v478_v20 = vmul.f32 %v2900_v40, %v3430_v1 }
 0x1bb   :  { %v3569_v19 = vpop.permute.xlu1 %974  ;;  %v527_v56 = vmul.f32 %v2902_v13, %v3521_v53  ;;  %v2904_v14 = vpop.eup %2903 }
 0x1bc   :  { %6605 = vst [vmem:[#allocation59_spill] sm:$0xff] %v3569_v19  ;;  %v496_v19 = vmax.f32 %v494_v63, 0.0  ;;  %v514_v22 = vmin.f32 %v512_v21, 1.0  ;;  %v480_v60 = vmax.f32 %v478_v20, 0.0  ;;  %v3587_v40 = vmul.f32 %v2904_v14, %v3490_v2 }
 0x1bd   :  { %v529_v49 = vmax.f32 %v527_v56, 0.0  ;;  %v546_v21 = vmul.f32 %v540_v42, %v3274_v59  ;;  %v598_v63 = vmul.f32 %v540_v42, %v3223_v33  ;;  %v544_v14 = vadd.f32 %v542_v5, %v3246_v0 }
 0x1be   :  { %v498_v17 = vmin.f32 %v496_v19, 1.0  ;;  %v568_v56 = vmul.f32 %v565_v11, %v514_v22  ;;  %v610_v24 = vmul.f32 %v3345_v44, %v514_v22  ;;  %v636_v44 = vmul.f32 %v532_v9, %v3217_v30 }
 0x1bf   :  { %v2906_v43 = vpop.eup %2905  ;;  %v3605_v41 = vmin.f32 %v529_v49, 1.0  ;;  %v600_v57 = vadd.f32 %v598_v63, %v596_v36  ;;  %v6610_v19 = vmov 7   ;;  %v533_v5 = vmul.f32 %v2902_v13, %v3539_v3 }
 0x1c0   :  { %v3571_v51 = vpop.permute.xlu1 %984  ;;  %v574_v49 = vmul.f32 %v498_v17, %v3274_v59  ;;  %v570_v36 = vadd.f32 %v568_v56, %v3276_v61  ;;  %v612_v9 = vadd.f32 %v610_v24, %v3237_v39  ;;  %v640_v13 = vmul.f32 %v540_v42, %v3225_v34 }
 0x1c1   :  { %6606 = vst [vmem:[#allocation60_spill] sm:$0xff] %v3571_v51  ;;  %v638_v42 = vadd.f32 %v636_v44, %v3209_v26  ;;  %v652_v11 = vmul.f32 %v3349_v50, %v514_v22  ;;  %v479_v50 = vmax.f32 %v3587_v40, 0.0  ;;  %v658_v40 = vmul.f32 %v498_v17, %v3225_v34 }
 0x1c2   :  { %v614_v35 = vsel %vm3640_vm7, %v612_v9, %v600_v57  ;;  %v6623_v9 = vld [vmem:[#allocation11_spill] sm:$0xff] }
 0x1c3   :  { %v642_v56 = vadd.f32 %v640_v13, %v638_v42  ;;  %v654_v44 = vadd.f32 %v652_v11, %v3244_v52  ;;  %v6630_v11 = vld [vmem:[#allocation13_spill] sm:$0xff] }
 0x1c5   :  { %v3576_v47 = vpop.permute.xlu1 %990  ;;  %v656_v7 = vsel %vm3640_vm7, %v654_v44, %v642_v56 }
 0x1c6   :  { %6607 = vst [vmem:[#allocation61_spill] sm:$0xff] %v3576_v47  ;;  %v2908_v47 = vpop.eup %2907 }
 0x1c7   :  { %v3603_v32 = vmul.f32 %v2908_v47, %v3492_v58 }
 0x1c9   :  { %v1172_v51 = vpop.permute.xlu1 %1171  ;;  %v495_v37 = vmax.f32 %v3603_v32, 0.0  ;;  %v593_v32 = vmul.f32 %v3605_v41, %v3213_v28 }
 0x1ca   :  { %v3583_v45 = vsub.f32 %v3159_v16, %v1172_v51  ;;  %v509_v51 = vmul.f32 %v2906_v43, %v3550_v62  ;;  %v482_v43 = vmin.f32 %v480_v60, 1.0  ;;  %v616_v60 = vmul.f32 %v498_v17, %v3223_v33  ;;  %v6633_v62 = vld [vmem:[#allocation19_spill] sm:$0xff] }
 0x1cb   :  { %v635_v48 = vmul.f32 %v3605_v41, %v6633_v62 }
 0x1cc   :  { %1181 = vperm.xlu0 %2833, %v3583_v45   ;;  %v511_v47 = vmax.f32 %v509_v51, 0.0  ;;  %v580_v59 = vmul.f32 %v482_v43, %v3266_v55  ;;  %v622_v24 = vmul.f32 %v482_v43, %v3215_v29  ;;  %v576_v55 = vadd.f32 %v574_v49, %v3246_v0  ;;  %v6631_v29 = vld [vmem:[#allocation41_spill] sm:$0xff]  ;;  %v6640_v51 = vld [vmem:[#allocation12_spill] sm:$0xff] }
 0x1cd   :  { %v1174_v20 = vpop.permute.xlu1 %1173  ;;  %v618_v63 = vadd.f32 %v616_v60, %v3207_v25  ;;  %v664_v17 = vmul.f32 %v482_v43, %v3217_v30  ;;  %v6622_v30 = vld [vmem:[#allocation29_spill] sm:$0xff] }
 0x1ce   :  { %v3600_v31 = vsub.f32 %v3174_v18, %v1174_v20  ;;  %v548_v18 = vadd.f32 %v546_v21, %v544_v14  ;;  %v537_v21 = vmax.f32 %v533_v5, 0.0  ;;  %v513_v22 = vmin.f32 %v511_v47, 1.0 }
 0x1cf   :  { %v620_v54 = vsel %vm3674_vm10, %v618_v63, %v614_v35  ;;  %v624_v57 = vadd.f32 %v622_v24, %v3207_v25  ;;  %v6621_v5 = vmov 8   ;;  %v6624_v24 = vld [vmem:[#allocation10_spill] sm:$0xff]  ;;  %v6625_v35 = vld [vmem:[#allocation9_spill] sm:$0xff] }
 0x1d0   :  { %2834 = vset.pattern.permute.xlu0 %v6610_v19  ;;  %1186 = vperm.xlu1 %2835, %v3600_v31   ;;  %v572_v15 = vsel %vm3640_vm7, %v570_v36, %v548_v18  ;;  %v582_v18 = vadd.f32 %v580_v59, %v3246_v0  ;;  %v609_v47 = vmul.f32 %v3343_v46, %v513_v22  ;;  %v497_v46 = vmin.f32 %v495_v37, 1.0 }
 0x1d1   :  { %980 = vperm.xlu0 %2834, %v3159_v16   ;;  %v535_v16 = vsub.f32 1.0, %v3605_v41  ;;  %v578_v14 = vsel %vm3674_vm10, %v576_v55, %v572_v15  ;;  %v626_v60 = vsel %vm3698_vm13, %v624_v57, %v620_v54  ;;  %v541_v36 = vmul.f32 %v3605_v41, %v3211_v27 }
 0x1d2   :  { %v584_v49 = vsel %vm3698_vm13, %v582_v18, %v578_v14  ;;  %v567_v43 = vmul.f32 %v6622_v30, %v513_v22  ;;  %v481_v59 = vmin.f32 %v479_v50, 1.0  ;;  %v595_v42 = vadd.f32 %v593_v32, %v6625_v35  ;;  %v6634_v50 = vld [vmem:[#allocation34_spill] sm:$0xff]  ;;  %v6665_v14 = vld [vmem:[#allocation17_spill] sm:$0xff] }
 0x1d3   :  { %v539_v20 = vmin.f32 %v535_v16, %v537_v21  ;;  %v660_v16 = vadd.f32 %v658_v40, %v3209_v26  ;;  %vm416_vm7 = vcmp.le.f32.partialorder %v3430_v1, 0.0  ;;  %v611_v21 = vadd.f32 %v609_v47, %v6630_v11  ;;  %v6646_v47 = vld [vmem:[#allocation24_spill] sm:$0xff] }
 0x1d4   :  { %2836 = vset.pattern.permute.xlu1 %v6610_v19  ;;  %v586_v23 = vsel %vm3724_vm15, %v6631_v29, %v584_v49  ;;  %v628_v55 = vsel %vm3724_vm15, %v6632_v8, %v626_v60  ;;  %v651_v37 = vmul.f32 %v6634_v50, %v513_v22  ;;  %v615_v56 = vmul.f32 %v497_v46, %v6623_v9  ;;  %v6639_v22 = vld [vmem:[#allocation14_spill] sm:$0xff]  ;;  %v6647_v60 = vld [vmem:[#allocation16_spill] sm:$0xff] }
 0x1d5   :  { %1228 = vperm.xlu0 %2834, %v3600_v31   ;;  %1224 = vperm.xlu1 %2836, %v3583_v45   ;;  %v597_v13 = vmul.f32 %v539_v20, %v6623_v9  ;;  %v545_v15 = vmul.f32 %v539_v20, %v6624_v24  ;;  %v662_v63 = vsel %vm3674_vm10, %v660_v16, %v656_v7  ;;  %v6648_v7 = vld [vmem:[#allocation30_spill] sm:$0xff]  ;;  %vm3809_vm10 = vmand %vm416_vm7, %vm418_vm4  ;;  %v6654_v9 = vld [vmem:[#allocation49_spill] sm:$0xff] }
 0x1d6   :  { %v666_v54 = vadd.f32 %v664_v17, %v3209_v26  ;;  %v543_v12 = vadd.f32 %v541_v36, %v6639_v22  ;;  %v569_v4 = vadd.f32 %v567_v43, %v6640_v51  ;;  %v573_v53 = vmul.f32 %v497_v46, %v6624_v24 }
 0x1d7   :  { %v599_v40 = vadd.f32 %v597_v13, %v595_v42  ;;  %v588_v32 = vsel %vm3755_vm5, %v3276_v61, %v586_v23  ;;  %v630_v57 = vsel %vm3755_vm5, %v3237_v39, %v628_v55  ;;  %v639_v17 = vmul.f32 %v539_v20, %v6646_v47  ;;  %v6653_v20 = vld [vmem:[#allocation20_spill] sm:$0xff] }
 0x1d8   :  { %v668_v18 = vsel %vm3698_vm13, %v666_v54, %v662_v63  ;;  %v547_v44 = vadd.f32 %v545_v15, %v543_v12  ;;  %v621_v34 = vmul.f32 %v481_v59, %v3213_v28  ;;  %v579_v49 = vmul.f32 %v481_v59, %v3211_v27  ;;  %v6655_v15 = vld [vmem:[#allocation51_spill] sm:$0xff]  ;;  %v6677_v27 = vld [vmem:[#allocation56_spill] sm:$0xff] }
 0x1d9   :  { %2837 = vset.pattern.permute.xlu1 %v6621_v5  ;;  %v613_v61 = vsel %vm3776_vm6, %v611_v21, %v599_v40  ;;  %v637_v39 = vadd.f32 %v635_v48, %v6647_v60  ;;  %v653_v36 = vadd.f32 %v651_v37, %v6648_v7  ;;  %v617_v3 = vadd.f32 %v615_v56, %v6625_v35  ;;  %v6660_v21 = vld [vmem:[#allocation39_spill] sm:$0xff]  ;;  %v6662_v37 = vld [vmem:[#allocation50_spill] sm:$0xff] }
 0x1da   :  { %1266 = vperm.xlu1 %2837, %v3583_v45   ;;  %v571_v28 = vsel %vm3776_vm6, %v569_v4, %v547_v44  ;;  %v670_v6 = vsel %vm3724_vm15, %v6653_v20, %v668_v18  ;;  %v590_v1 = vsel %vm3809_vm10, %v3246_v0, %v588_v32  ;;  %v632_v43 = vsel %vm3809_vm10, %v3207_v25, %v630_v57  ;;  %v6658_v45 = vld [vmem:[#allocation38_spill] sm:$0xff]  ;;  %v6671_v44 = vld [vmem:[#allocation32_spill] sm:$0xff] }
 0x1db   :  { %vm439_vm14 = vcmp.le.f32.partialorder %v6654_v9, 0.0  ;;  %v575_v13 = vadd.f32 %v573_v53, %v6639_v22  ;;  %v657_v16 = vmul.f32 %v497_v46, %v6646_v47  ;;  %v619_v24 = vsel %vm3817_vm11, %v617_v3, %v613_v61 }
 0x1dc   :  { %vm429_vm2 = vcmp.le.f32.partialorder %v6655_v15, %v3502_v10  ;;  %v641_v42 = vadd.f32 %v639_v17, %v637_v39  ;;  %v623_v0 = vadd.f32 %v621_v34, %v6625_v35  ;;  %vm3843_vm3 = vmand %vm3793_vm0, %vm439_vm14  ;;  %v3850_v33 = vsub.f32 %v6658_v45, %v590_v1  ;;  %v6682_v15 = vld [vmem:[#allocation44_spill] sm:$0xff] }
 0x1dd   :  { %v577_v46 = vsel %vm3817_vm11, %v575_v13, %v571_v28  ;;  %v3853_v29 = vsub.f32 %v6660_v21, %v632_v43  ;;  %v672_v23 = vsel %vm3755_vm5, %v3244_v52, %v670_v6  ;;  %v581_v8 = vadd.f32 %v579_v49, %v6639_v22  ;;  %vm3873_vm7 = vmand %vm427_vm1, %vm429_vm2  ;;  %v6679_v6 = vld [vmem:[#allocation31_spill] sm:$0xff]  ;;  %v6686_v52 = vld [vmem:[#allocation40_spill] sm:$0xff] }
 0x1de   :  { %1270 = vperm.xlu1 %2837, %v3600_v31   ;;  %6659 = vst [vmem:[#allocation29_spill] sm:$0xff] %v3850_v33  ;;  %v655_v55 = vsel %vm3776_vm6, %v653_v36, %v641_v42  ;;  %v663_v63 = vmul.f32 %v481_v59, %v6633_v62  ;;  %v625_v48 = vsel %vm3843_vm3, %v623_v0, %v619_v24  ;;  %vm421_vm13 = vcmp.ge.f32.partialorder %v6654_v9, 0.0  ;;  %v6669_v31 = vld [vmem:[#allocation42_spill] sm:$0xff]  ;;  %v6676_v36 = vld [vmem:[#allocation60_spill] sm:$0xff]  ;;  %v6680_v43 = vld [vmem:[#allocation27_spill] sm:$0xff] }
 0x1df   :  { %6661 = vst [vmem:[#allocation11_spill] sm:$0xff] %v3853_v29  ;;  %v659_v50 = vadd.f32 %v657_v16, %v6647_v60  ;;  %vm423_vm15 = vcmp.le.f32.partialorder %v6662_v37, %v6654_v9  ;;  %v583_v59 = vsel %vm3843_vm3, %v581_v8, %v577_v46  ;;  %v674_v62 = vsel %vm3809_vm10, %v3209_v26, %v672_v23  ;;  %v6668_v26 = vld [vmem:[#allocation15_spill] sm:$0xff]  ;;  %v6683_v0 = vld [vmem:[#allocation52_spill] sm:$0xff]  ;;  %v6684_v46 = vld [vmem:[#allocation25_spill] sm:$0xff] }
 0x1e0   :  { %v627_v54 = vsel %vm3873_vm7, %v6665_v14, %v625_v48  ;;  %v678_v10 = vmul.f32 %v3850_v33, %v3850_v33  ;;  %v680_v41 = vmul.f32 %v3853_v29, %v3853_v29  ;;  %v665_v12 = vadd.f32 %v663_v63, %v6647_v60  ;;  %vm3892_vm12 = vmand %vm421_vm13, %vm423_vm15  ;;  %v6681_v16 = vld [vmem:[#allocation55_spill] sm:$0xff]  ;;  %v6685_v8 = vld [vmem:[#allocation36_spill] sm:$0xff] }
 0x1e1   :  { %v661_v56 = vsel %vm3817_vm11, %v659_v50, %v655_v55  ;;  %v585_v40 = vsel %vm3873_vm7, %v6668_v26, %v583_v59  ;;  %v3900_v53 = vsub.f32 %v6669_v31, %v674_v62  ;;  %vm415_vm5 = vcmp.le.f32.partialorder %v3490_v2, 0.0  ;;  %v6687_v62 = vld [vmem:[#allocation48_spill] sm:$0xff]  ;;  %v6688_v14 = vld [vmem:[#allocation26_spill] sm:$0xff] }
 0x1e2   :  { %v667_v32 = vsel %vm3843_vm3, %v665_v12, %v661_v56  ;;  %v629_v18 = vsel %vm3892_vm12, %v6630_v11, %v627_v54  ;;  %v682_v57 = vadd.f32 %v680_v41, %v678_v10  ;;  %v587_v38 = vsel %vm3892_vm12, %v6640_v51, %v585_v40  ;;  %vm419_vm4 = vmand %vm415_vm5, %vm417_vm9  ;;  %v6689_v10 = vld [vmem:[#allocation35_spill] sm:$0xff]  ;;  %v6700_v33 = vld [vmem:[#allocation22_spill] sm:$0xff] }
 0x1e3   :  { %6670 = vst [vmem:[#allocation10_spill] sm:$0xff] %v3900_v53  ;;  %v669_v47 = vsel %vm3873_vm7, %v6671_v44, %v667_v32  ;;  %v684_v2 = vmul.f32 %v3900_v53, %v3900_v53  ;;  %v631_v58 = vsel %vm419_vm4, %v6625_v35, %v629_v18  ;;  %v589_v61 = vsel %vm419_vm4, %v6639_v22, %v587_v38  ;;  %v6690_v44 = vld [vmem:[#allocation46_spill] sm:$0xff]  ;;  %v6701_v53 = vld [vmem:[#allocation47_spill] sm:$0xff] }
 0x1e4   :  { %v671_v11 = vsel %vm3892_vm12, %v6648_v7, %v669_v47  ;;  %v3925_v51 = vsub.f32 %v6660_v21, %v631_v58  ;;  %v3929_v34 = vsub.f32 %v6658_v45, %v589_v61  ;;  %v988_v3 = vsub.f32 %v6660_v21, %v6676_v36 }
 0x1e5   :  { %v3918_v17 = vadd.f32 %v684_v2, %v682_v57  ;;  %v673_v49 = vsel %vm419_vm4, %v6647_v60, %v671_v11  ;;  %v938_v28 = vsub.f32 %v6660_v21, %v6677_v27  ;;  %v6678_v60 = vld [vmem:[#allocation59_spill] sm:$0xff]  ;;  %v948_v1 = vsub.f32 %v6669_v31, %v6679_v6 }
 0x1e6   :  { %6673 = vst [vmem:[#allocation13_spill] sm:$0xff] %v3925_v51  ;;  %6674 = vst [vmem:[#allocation41_spill] sm:$0xff] %v3929_v34  ;;  %v679_v35 = vmul.f32 %v3925_v51, %v3925_v51  ;;  %v3935_v39 = vsub.f32 %v6669_v31, %v673_v49  ;;  %v677_v22 = vmul.f32 %v3929_v34, %v3929_v34  ;;  %v6413_v48 = vmov 15  }
 0x1e7   :  { %6672 = vst [vmem:[#allocation9_spill] sm:$0xff] %v3918_v17  ;;  %v978_v20 = vsub.f32 %v6658_v45, %v6678_v60  ;;  %v840_v9 = vsub.f32 %v6660_v21, %v6680_v43  ;;  %v928_v24 = vsub.f32 %v6658_v45, %v6681_v16  ;;  %v1002_v42 = vmul.f32 %v988_v3, %v6682_v15 }
 0x1e8   :  { %6675 = vst [vmem:[#allocation18_spill] sm:$0xff] %v3935_v39  ;;  %v681_v7 = vadd.f32 %v679_v35, %v677_v22  ;;  %v683_v30 = vmul.f32 %v3935_v39, %v3935_v39  ;;  %v1012_v25 = vmul.f32 %v988_v3, %v6683_v0  ;;  %v830_v23 = vsub.f32 %v6658_v45, %v6684_v46 }
 0x1e9   :  { %v998_v55 = vsub.f32 %v6669_v31, %v6685_v8  ;;  %v904_v63 = vmul.f32 %v6683_v0, %v840_v9  ;;  %2839 = vset.pattern.permute.xlu1 %v6413_v48  ;;  %2838 = vset.pattern.permute.xlu0 %v6413_v48  ;;  %v952_v50 = vmul.f32 %v938_v28, %v6682_v15 }
 0x1ea   :  { %v3951_v13 = vadd.f32 %v683_v30, %v681_v7  ;;  %v962_v37 = vmul.f32 %v938_v28, %v6683_v0  ;;  %v1000_v59 = vmul.f32 %v978_v20, %v6686_v52  ;;  %v1010_v56 = vmul.f32 %v978_v20, %v6687_v62 }
 0x1eb   :  { %v1016_v54 = vmul.f32 %v998_v55, %v6688_v14  ;;  %v850_v41 = vsub.f32 %v6669_v31, %v6689_v10  ;;  %v870_v12 = vmul.f32 %v6682_v15, %v840_v9  ;;  %v894_v4 = vmul.f32 %v6687_v62, %v830_v23 }
 0x1ec   :  { %v950_v26 = vmul.f32 %v928_v24, %v6686_v52  ;;  %v960_v40 = vmul.f32 %v928_v24, %v6687_v62  ;;  %v1004_v32 = vadd.f32 %v1002_v42, %v1000_v59  ;;  %v1014_v18 = vadd.f32 %v1012_v25, %v1010_v56 }
 0x1ed   :  { %v966_v57 = vmul.f32 %v948_v1, %v6688_v14  ;;  %v860_v38 = vmul.f32 %v6686_v52, %v830_v23  ;;  %v882_v47 = vmul.f32 %v6690_v44, %v850_v41  ;;  %v906_v2 = vadd.f32 %v904_v63, %v894_v4 }
 0x1ee   :  { %v954_v58 = vadd.f32 %v952_v50, %v950_v26  ;;  %v964_v61 = vadd.f32 %v962_v37, %v960_v40  ;;  %v1006_v11 = vmul.f32 %v998_v55, %v6690_v44  ;;  %v916_v49 = vmul.f32 %v6688_v14, %v850_v41 }
 0x1ef   :  { %v872_v35 = vadd.f32 %v870_v12, %v860_v38  ;;  %v956_v22 = vmul.f32 %v948_v1, %v6690_v44  ;;  %v3984_v3 = vadd.f32 %v1016_v54, %v1014_v18 }
 0x1f0   :  { %v3982_v7 = vadd.f32 %v1006_v11, %v1004_v32  ;;  %v3988_v28 = vadd.f32 %v916_v49, %v906_v2  ;;  %v3992_v9 = vadd.f32 %v966_v57, %v964_v61  ;;  %v6691_v61 = vld [vmem:[#allocation54_spill] sm:$0xff]  ;;  %v6692_v49 = vld [vmem:[#allocation21_spill] sm:$0xff] }
 0x1f1   :  { %v3986_v30 = vadd.f32 %v882_v47, %v872_v35  ;;  %v3990_v20 = vadd.f32 %v956_v22, %v954_v58  ;;  %v927_v11 = vsub.f32 %v6658_v45, %v6691_v61  ;;  %v839_v35 = vsub.f32 %v6660_v21, %v6692_v49  ;;  %v6693_v22 = vld [vmem:[#allocation28_spill] sm:$0xff] }
 0x1f2   :  { %v1026_v24 = vmul.f32 %v3982_v7, %v3988_v28  ;;  %v1034_v25 = vmul.f32 %v3982_v7, %v3992_v9  ;;  %v4017_v41 = vsub.f32 %v3982_v7, %v3984_v3  ;;  %v1106_v12 = vsub.f32 %v3988_v28, %v3984_v3 }
 0x1f3   :  { %v1028_v42 = vmul.f32 %v3984_v3, %v3986_v30  ;;  %v1032_v1 = vmul.f32 %v3984_v3, %v3990_v20  ;;  %v1020_v63 = vmul.f32 %v3992_v9, %v3986_v30  ;;  %v1022_v50 = vmul.f32 %v3990_v20, %v3988_v28 }
 0x1f4   :  { %746 = vmin.xlane.f32.xlu0 %v3918_v17  ;;  %v4023_v4 = vsub.f32 %v3992_v9, %v3990_v20  ;;  %v1090_v26 = vsub.f32 %v3986_v30, %v3990_v20  ;;  %v1108_v18 = vand.u32 2147483647, %v1106_v12  ;;  %v959_v39 = vmul.f32 %v927_v11, %v6701_v53 }
 0x1f5   :  { %v4002_v23 = vsub.f32 %v1026_v24, %v1028_v42  ;;  %v4004_v55 = vsub.f32 %v1032_v1, %v1034_v25  ;;  %v4012_v59 = vsub.f32 %v1020_v63, %v1022_v50  ;;  %v937_v24 = vsub.f32 %v6660_v21, %v6693_v22  ;;  %v6694_v42 = vld [vmem:[#allocation57_spill] sm:$0xff] }
 0x1f6   :  { %v1122_v32 = vadd.f32 %v4017_v41, %v4023_v4  ;;  %v1092_v57 = vand.u32 2147483647, %v1090_v26  ;;  %vm1110_vm8 = vcmp.gt.f32.partialorder %v1108_v18, 1e-12  ;;  %v947_v1 = vsub.f32 %v6669_v31, %v6694_v42  ;;  %v6695_v63 = vld [vmem:[#allocation37_spill] sm:$0xff] }
 0x1f7   :  { %v1138_v37 = vadd.f32 %v4004_v55, %v4002_v23  ;;  %v1112_v47 = vsel %vm1110_vm8, %v1106_v12, 1.0  ;;  %v949_v50 = vmul.f32 %v927_v11, %v6695_v63  ;;  %v6699_v18 = vld [vmem:[#allocation45_spill] sm:$0xff]  ;;  %v961_v34 = vmul.f32 %v937_v24, %v6700_v33 }
 0x1f8   :  { %v1124_v38 = vand.u32 2147483647, %v1122_v32  ;;  %vm1094_vm0 = vcmp.gt.f32.partialorder %v1092_v57, 1e-12  ;;  %v955_v57 = vmul.f32 %v947_v1, %v6699_v18  ;;  %vm1058_vm14 = vcmp.ge.f32.partialorder %v3986_v30, 0.0 }
 0x1f9   :  { %v1140_v56 = vadd.f32 %v1138_v37, %v4012_v59  ;;  %v1096_v2 = vsel %vm1094_vm0, %v1090_v26, 1.0  ;;  %v6696_v37 = vld [vmem:[#allocation23_spill] sm:$0xff]  ;;  %v963_v11 = vadd.f32 %v961_v34, %v959_v39  ;;  %vm1068_vm1 = vcmp.ge.f32.partialorder %v3988_v28, 0.0 }
 0x1fa   :  { %vm1126_vm10 = vcmp.gt.f32.partialorder %v1124_v38, 1e-12  ;;  %v6698_v26 = vld [vmem:[#allocation43_spill] sm:$0xff]  ;;  %vm1076_vm2 = vcmp.le.f32.partialorder %v4004_v55, 0.0  ;;  %vm1066_vm3 = vcmp.le.f32.partialorder %v4002_v23, 0.0  ;;  %vm1056_vm13 = vcmp.le.f32.partialorder %v4012_v59, 0.0 }
 0x1fb   :  { %v1142_v54 = vand.u32 2147483647, %v1140_v56  ;;  %v1128_v58 = vsel %vm1126_vm10, %v1122_v32, 1.0  ;;  %v951_v32 = vmul.f32 %v937_v24, %v6698_v26  ;;  %vm1080_vm15 = vcmp.ge.f32.partialorder %v4023_v4, 0.0  ;;  %vm4127_vm5 = vmand %vm1066_vm3, %vm1068_vm1 }
 0x1fc   :  { %vm1062_vm7 = vcmp.le.f32.partialorder %v3990_v20, 0.0  ;;  %vm4114_vm12 = vmand %vm1076_vm2, %vm1080_vm15  ;;  %vm1072_vm9 = vcmp.le.f32.partialorder %v3984_v3, 0.0  ;;  %vm1046_vm4 = vcmp.le.f32.partialorder %v3992_v9, %v3990_v20  ;;  %vm1086_vm0 = vcmp.ge.f32.partialorder %v4017_v41, 0.0 }
 0x1fd   :  { %vm1144_vm6 = vcmp.gt.f32.partialorder %v1142_v54, 1e-12  ;;  %v6697_v54 = vld [vmem:[#allocation33_spill] sm:$0xff]  ;;  %vm4141_vm8 = vmand %vm1056_vm13, %vm1058_vm14  ;;  %vm1040_vm1 = vcmp.le.f32.partialorder %v3988_v28, 0.0  ;;  %vm1050_vm2 = vcmp.ge.f32.partialorder %v3984_v3, 0.0  ;;  %vm1038_vm3 = vcmp.le.f32.partialorder %v3986_v30, 0.0 }
 0x1fe   :  { %v1146_v40 = vsel %vm1144_vm6, %v1140_v56, 1.0  ;;  %v829_v56 = vsub.f32 %v6658_v45, %v6696_v37  ;;  %v849_v12 = vsub.f32 %v6669_v31, %v6697_v54  ;;  %vm1044_vm6 = vcmp.ge.f32.partialorder %v3990_v20, 0.0  ;;  %vm4150_vm10 = vmand %vm4114_vm12, %vm1086_vm0 }
 0x1ff   :  { %2909 = vrcp.f32 %v1146_v40  ;;  %v869_v40 = vmul.f32 %v6698_v26, %v839_v35  ;;  %vm4166_vm14 = vmand %vm4127_vm5, %vm1072_vm9 }
 0x200   :  { %2911 = vrcp.f32 %v1112_v47  ;;  %v859_v47 = vmul.f32 %v6695_v63, %v829_v56  ;;  %vm4190_vm13 = vmand %vm4141_vm8, %vm1062_vm7 }
 0x201   :  { %2913 = vrcp.f32 %v1096_v2  ;;  %v881_v2 = vmul.f32 %v6699_v18, %v849_v12  ;;  %vm4254_vm7 = vmand %vm1044_vm6, %vm1046_vm4 }
 0x202   :  { %744 = vmin.xlane.f32.xlu1 %v3951_v13  ;;  %2915 = vrcp.f32 %v1128_v58  ;;  %v953_v58 = vadd.f32 %v951_v32, %v949_v50  ;;  %v871_v48 = vadd.f32 %v869_v40, %v859_v47  ;;  %v903_v50 = vmul.f32 %v6700_v33, %v839_v35  ;;  %vm4281_vm5 = vmand %vm1038_vm3, %vm1040_vm1 }
 0x203   :  { %v893_v40 = vmul.f32 %v6701_v53, %v829_v56 }
 0x204   :  { %v4048_v5 = vadd.f32 %v955_v57, %v953_v58  ;;  %v4050_v51 = vadd.f32 %v881_v2, %v871_v48  ;;  %v6702_v57 = vld [vmem:[#allocation53_spill] sm:$0xff] }
 0x205   :  { %v965_v48 = vmul.f32 %v947_v1, %v6702_v57  ;;  %v915_v24 = vmul.f32 %v6702_v57, %v849_v12  ;;  %v905_v49 = vadd.f32 %v903_v50, %v893_v40  ;;  %v6703_v1 = vld [vmem:[#allocation58_spill] sm:$0xff] }
 0x206   :  { %v1089_v22 = vsub.f32 %v4050_v51, %v4048_v5  ;;  %vm1057_vm6 = vcmp.ge.f32.partialorder %v4050_v51, 0.0  ;;  %vm1061_vm1 = vcmp.le.f32.partialorder %v4048_v5, 0.0 }
 0x207   :  { %v4067_v37 = vadd.f32 %v965_v48, %v963_v11  ;;  %v6706_v11 = vld [vmem:[#allocation61_spill] sm:$0xff] }
 0x208   :  { %v1091_v47 = vand.u32 2147483647, %v1089_v22 }
 0x20a   :  { %vm4073_vm11 = vcmp.gt.f32.partialorder %v1091_v47, 1e-12  ;;  %v997_v47 = vsub.f32 %v6669_v31, %v6706_v11 }
 0x20c   :  { %v2910_v25 = vpop.eup %2909 }
 0x20d   :  { %v1150_v38 = vmul.f32 %v2910_v25, %v4002_v23  ;;  %v2912_v29 = vpop.eup %2911 }
 0x20e   :  { %v2914_v42 = vpop.eup %2913  ;;  %v1116_v32 = vmul.f32 %v2912_v29, %v3988_v28  ;;  %v4069_v29 = vadd.f32 %v915_v24, %v905_v49  ;;  %v1019_v49 = vmul.f32 %v4067_v37, %v4050_v51 }
 0x20f   :  { %v1152_v19 = vmax.f32 %v1150_v38, 0.0  ;;  %v2916_v54 = vpop.eup %2915  ;;  %v1156_v38 = vmul.f32 %v2910_v25, %v4012_v59  ;;  %v1100_v2 = vmul.f32 %v2914_v42, %v3986_v30  ;;  %v977_v25 = vsub.f32 %v6658_v45, %v6703_v1 }
 0x210   :  { %v1118_v35 = vmax.f32 %v1116_v32, 0.0  ;;  %v1021_v40 = vmul.f32 %v4048_v5, %v4069_v29  ;;  %v4091_v32 = vmin.f32 %v3951_v13, %v3918_v17  ;;  %vm1067_vm8 = vcmp.ge.f32.partialorder %v4069_v29, 0.0 }
 0x211   :  { %v4056_v61 = vmin.f32 %v1152_v19, 1.0  ;;  %v1132_v19 = vmul.f32 %v2916_v54, %v4023_v4  ;;  %v1160_v56 = vmax.f32 %v1156_v38, 0.0  ;;  %v1102_v34 = vmax.f32 %v1100_v2, 0.0 }
 0x212   :  { %v4083_v50 = vmin.f32 %v1118_v35, 1.0  ;;  %v1095_v38 = vsel %vm4073_vm11, %v1089_v22, 1.0  ;;  %v999_v24 = vmul.f32 %v977_v25, %v6695_v63  ;;  %v1009_v35 = vmul.f32 %v977_v25, %v6701_v53 }
 0x213   :  { %v1158_v58 = vsub.f32 1.0, %v4056_v61  ;;  %v1134_v39 = vmax.f32 %v1132_v19, 0.0  ;;  %v1164_v48 = vmul.f32 %v4056_v61, %v6686_v52  ;;  %v1104_v2 = vmin.f32 %v1102_v34, 1.0 }
 0x214   :  { %v1196_v22 = vmul.f32 %v4083_v50, %v6687_v62  ;;  %v4111_v12 = vsub.f32 %v1019_v49, %v1021_v40  ;;  %2917 = vrcp.f32 %v1095_v38  ;;  %v1005_v4 = vmul.f32 %v997_v47, %v6699_v18 }
 0x215   :  { %v4077_v42 = vmin.f32 %v1158_v58, %v1160_v56  ;;  %v4102_v19 = vmin.f32 %v1134_v39, 1.0  ;;  %v1166_v34 = vadd.f32 %v1164_v48, %v6684_v46  ;;  %v1202_v38 = vmul.f32 %v1104_v2, %v6686_v52 }
 0x216   :  { %v1198_v11 = vadd.f32 %v1196_v22, %v6684_v46  ;;  %v1216_v41 = vmul.f32 %v4056_v61, %v6682_v15  ;;  %vm1052_vm11 = vcmp.le.f32.partialorder %v3982_v7, %v3984_v3  ;;  %v1015_v52 = vmul.f32 %v997_v47, %v6702_v57 }
 0x217   :  { %v1168_v58 = vmul.f32 %v4077_v42, %v6687_v62  ;;  %v1204_v17 = vadd.f32 %v1202_v38, %v6684_v46  ;;  %v4204_v38 = vsub.f32 %v4067_v37, %v4048_v5  ;;  %v1258_v23 = vmul.f32 %v4056_v61, %v6690_v44  ;;  %vm4222_vm15 = vmand %vm1050_vm2, %vm1052_vm11 }
 0x218   :  { %vm1055_vm0 = vcmp.le.f32.partialorder %v4111_v12, 0.0  ;;  %vm1043_vm11 = vcmp.ge.f32.partialorder %v4048_v5, 0.0 }
 0x219   :  { %v1170_v40 = vadd.f32 %v1168_v58, %v1166_v34 }
 0x247   :  { %v4079_v54 = vpop.permute.xlu0 %1181 }
 0x24b   :  { %v1187_v56 = vpop.permute.xlu1 %1186 }
 0x24c   :  { %v1190_v25 = vmul.f32 %v1187_v56, %v4102_v19  ;;  %v4120_v39 = vpop.permute.xlu0 %980 }
 0x24d   :  { %6709 = vst [vmem:[#allocation19_spill] sm:$0xff] %v4120_v39  ;;  %v987_v49 = vsub.f32 %v6660_v21, %v4120_v39 }
 0x24e   :  { %v1192_v48 = vadd.f32 %v1190_v25, %v6681_v16  ;;  %v1220_v25 = vmul.f32 %v4077_v42, %v6683_v0 }
 0x24f   :  { %v1001_v59 = vmul.f32 %v987_v49, %v6698_v26  ;;  %v1011_v39 = vmul.f32 %v987_v49, %v6700_v33 }
 0x250   :  { %v1194_v22 = vsel %vm4150_vm10, %v1192_v48, %v1170_v40  ;;  %v4172_v55 = vpop.permute.xlu1 %1224  ;;  %v1229_v34 = vpop.permute.xlu0 %1228  ;;  %v1238_v40 = vmul.f32 %v4083_v50, %v6683_v0  ;;  %v1244_v48 = vmul.f32 %v1104_v2, %v6682_v15 }
 0x251   :  { %v1200_v47 = vsel %vm4166_vm14, %v1198_v11, %v1194_v22  ;;  %v1003_v49 = vadd.f32 %v1001_v59, %v999_v24  ;;  %v1013_v62 = vadd.f32 %v1011_v39, %v1009_v35  ;;  %v1232_v1 = vmul.f32 %v1229_v34, %v4102_v19 }
 0x252   :  { %v1218_v39 = vadd.f32 %v1216_v41, %v6680_v43  ;;  %v1206_v15 = vsel %vm4190_vm13, %v1204_v17, %v1200_v47  ;;  %v1286_v59 = vmul.f32 %v1104_v2, %v6690_v44  ;;  %v1240_v22 = vadd.f32 %v1238_v40, %v6680_v43 }
 0x253   :  { %v4194_v11 = vadd.f32 %v1005_v4, %v1003_v49  ;;  %v4196_v35 = vadd.f32 %v1015_v52, %v1013_v62  ;;  %v1234_v0 = vadd.f32 %v1232_v1, %v6677_v27  ;;  %v1246_v34 = vadd.f32 %v1244_v48, %v6680_v43 }
 0x254   :  { %v1222_v52 = vadd.f32 %v1220_v25, %v1218_v39  ;;  %v1208_v7 = vsel %vm4222_vm15, %v6678_v60, %v1206_v15  ;;  %v1280_v48 = vmul.f32 %v4083_v50, %v6688_v14  ;;  %v1262_v50 = vmul.f32 %v4077_v42, %v6688_v14 }
 0x255   :  { %v1025_v4 = vmul.f32 %v4194_v11, %v4069_v29  ;;  %v1027_v41 = vmul.f32 %v4196_v35, %v4050_v51  ;;  %v1033_v1 = vmul.f32 %v4194_v11, %v4067_v37  ;;  %v4215_v17 = vpop.permute.xlu1 %1266  ;;  %v1105_v44 = vsub.f32 %v4069_v29, %v4196_v35 }
 0x256   :  { %v1031_v2 = vmul.f32 %v4196_v35, %v4048_v5  ;;  %v4239_v3 = vsub.f32 %v4194_v11, %v4196_v35  ;;  %v1236_v47 = vsel %vm4150_vm10, %v1234_v0, %v1222_v52  ;;  %v1210_v20 = vsel %vm4254_vm7, %v6681_v16, %v1208_v7 }
 0x257   :  { %v4235_v25 = vsub.f32 %v1025_v4, %v1027_v41  ;;  %v1107_v49 = vand.u32 2147483647, %v1105_v44  ;;  %v1242_v40 = vsel %vm4166_vm14, %v1240_v22, %v1236_v47  ;;  %v1260_v4 = vadd.f32 %v1258_v23, %v6689_v10  ;;  %v2918_v41 = vpop.eup %2917 }
 0x258   :  { %v4243_v62 = vsub.f32 %v1031_v2, %v1033_v1  ;;  %v1121_v39 = vadd.f32 %v4239_v3, %v4204_v38  ;;  %v1248_v0 = vsel %vm4190_vm13, %v1246_v34, %v1242_v40  ;;  %v1282_v30 = vadd.f32 %v1280_v48, %v6689_v10 }
 0x259   :  { %v1271_v15 = vpop.permute.xlu1 %1270  ;;  %vm1109_vm12 = vcmp.gt.f32.partialorder %v1107_v49, 1e-12  ;;  %v1250_v1 = vsel %vm4222_vm15, %v6676_v36, %v1248_v0  ;;  %v1212_v34 = vsel %vm4281_vm5, %v6684_v46, %v1210_v20  ;;  %v1099_v0 = vmul.f32 %v2918_v41, %v4050_v51 }
 0x25a   :  { %v1137_v9 = vadd.f32 %v4243_v62, %v4235_v25  ;;  %v1111_v52 = vsel %vm1109_vm12, %v1105_v44, 1.0  ;;  %v1123_v2 = vand.u32 2147483647, %v1121_v39  ;;  %v1252_v23 = vsel %vm4254_vm7, %v6677_v27, %v1250_v1 }
 0x25b   :  { %v1274_v14 = vmul.f32 %v1271_v15, %v4102_v19  ;;  %2919 = vrcp.f32 %v1111_v52  ;;  %v1254_v36 = vsel %vm4281_vm5, %v6680_v43, %v1252_v23  ;;  %v688_v44 = vrot.slane %v4091_v32, 4 }
 0x25c   :  { %v1139_v42 = vadd.f32 %v1137_v9, %v4111_v12  ;;  %vm1125_vm9 = vcmp.gt.f32.partialorder %v1123_v2, 1e-12  ;;  %v1264_v27 = vadd.f32 %v1262_v50, %v1260_v4  ;;  %v1288_v43 = vadd.f32 %v1286_v59, %v6689_v10 }
 0x25d   :  { %v1276_v19 = vadd.f32 %v1274_v14, %v6679_v6  ;;  %v1127_v28 = vsel %vm1125_vm9, %v1121_v39, 1.0  ;;  %v4299_v47 = vsub.f32 %v6660_v21, %v1254_v36  ;;  %v4306_v39 = vsub.f32 %v6658_v45, %v1212_v34 }
 0x25e   :  { %v1141_v22 = vand.u32 2147483647, %v1139_v42  ;;  %2921 = vrcp.f32 %v1127_v28  ;;  %v689_v56 = vmin.f32 %v4091_v32, %v688_v44  ;;  %v1101_v4 = vmax.f32 %v1099_v0, 0.0 }
 0x25f   :  { %v1278_v7 = vsel %vm4150_vm10, %v1276_v19, %v1264_v27  ;;  %v1302_v58 = vmul.f32 %v4299_v47, %v4299_v47  ;;  %vm1079_vm10 = vcmp.ge.f32.partialorder %v4204_v38, 0.0  ;;  %vm1049_vm2 = vcmp.ge.f32.partialorder %v4196_v35, 0.0 }
 0x260   :  { %vm1143_vm4 = vcmp.gt.f32.partialorder %v1141_v22, 1e-12  ;;  %v1284_v49 = vsel %vm4166_vm14, %v1282_v30, %v1278_v7  ;;  %v690_v32 = vrot.slane %v689_v56, 2  ;;  %v1103_v9 = vmin.f32 %v1101_v4, 1.0  ;;  %v6727_v7 = vld [vmem:[#allocation23_spill] sm:$0xff] }
 0x261   :  { %v1145_v40 = vsel %vm1143_vm4, %v1139_v42, 1.0  ;;  %v1290_v48 = vsel %vm4190_vm13, %v1288_v43, %v1284_v49  ;;  %v6728_v49 = vld [vmem:[#allocation21_spill] sm:$0xff]  ;;  %vm1045_vm14 = vcmp.le.f32.partialorder %v4067_v37, %v4048_v5  ;;  %vm1075_vm3 = vcmp.le.f32.partialorder %v4243_v62, 0.0  ;;  %vm4396_vm4 = vmand %vm1055_vm0, %vm1057_vm6 }
 0x262   :  { %2923 = vrcp.f32 %v1145_v40  ;;  %v1292_v46 = vsel %vm4222_vm15, %v6685_v8, %v1290_v48  ;;  %v1300_v8 = vmul.f32 %v4306_v39, %v4306_v39  ;;  %v691_v20 = vmin.f32 %v689_v56, %v690_v32  ;;  %v6731_v62 = vld [vmem:[#allocation33_spill] sm:$0xff]  ;;  %vm4417_vm0 = vmand %vm4396_vm4, %vm1061_vm1 }
 0x263   :  { %v1294_v59 = vsel %vm4254_vm7, %v6679_v6, %v1292_v46  ;;  %v1201_v36 = vmul.f32 %v1103_v9, %v6695_v63  ;;  %v1243_v44 = vmul.f32 %v1103_v9, %v6698_v26  ;;  %v1285_v48 = vmul.f32 %v1103_v9, %v6699_v18  ;;  %vm4371_vm7 = vmand %vm1075_vm3, %vm1079_vm10 }
 0x264   :  { %v1296_v24 = vsel %vm4281_vm5, %v6689_v10, %v1294_v59  ;;  %v1304_v61 = vadd.f32 %v1302_v58, %v1300_v8  ;;  %v692_v2 = vrot.slane %v691_v20, 1  ;;  %vm1065_vm13 = vcmp.le.f32.partialorder %v4235_v25, 0.0  ;;  %vm1047_vm1 = vmand %vm1043_vm11, %vm1045_vm14 }
 0x265   :  { %v4322_v15 = vsub.f32 %v6669_v31, %v1296_v24  ;;  %v4344_v43 = vadd.f32 %v1201_v36, %v6727_v7  ;;  %v4347_v40 = vadd.f32 %v1243_v44, %v6728_v49  ;;  %vm1037_vm15 = vcmp.le.f32.partialorder %v4050_v51, 0.0  ;;  %vm4385_vm5 = vmand %vm1065_vm13, %vm1067_vm8 }
 0x266   :  { %v4337_v19 = vmin.f32 %v691_v20, %v692_v2  ;;  %vm1051_vm12 = vcmp.le.f32.partialorder %v4194_v11, %v4196_v35  ;;  %vm1085_vm9 = vcmp.ge.f32.partialorder %v4239_v3, 0.0  ;;  %v2981_v3 = vld [vmem:[%s6313_s4 + $0x8] sm:$0xff]  ;;  %vm1071_vm8 = vcmp.le.f32.partialorder %v4196_v35, 0.0 }
 0x267   :  { %v1306_v6 = vmul.f32 %v4322_v15, %v4322_v15  ;;  %vm1087_vm10 = vmand %vm4371_vm7, %vm1085_vm9  ;;  %v1287_v36 = vadd.f32 %v1285_v48, %v6731_v62  ;;  %vm1039_vm3 = vcmp.le.f32.partialorder %v4069_v29, 0.0  ;;  %v6741_v11 = vld [vmem:[#allocation9_spill] sm:$0xff]  ;;  %v6742_v35 = vld [vmem:[#allocation58_spill] sm:$0xff]  ;;  %v6745_v51 = vmov 0  }
 0x268   :  { %v2920_v60 = vpop.eup %2919  ;;  %6726 = vst [vmem:[#allocation34_spill] sm:$0xff] %v4337_v19  ;;  %vm1073_vm6 = vmand %vm4385_vm5, %vm1071_vm8  ;;  %vm694_vm13 = vcmp.le.f32.partialorder %v3951_v13, %v4337_v19  ;;  %v6433_v44 = vmin.f32 %v4337_v19, 1e+30  ;;  %vm739_vm5 = vcmp.lt.f32.partialorder %v4337_v19, 1e+30 }
 0x269   :  { %v4328_v50 = vadd.f32 %v1306_v6, %v1304_v61  ;;  %v1115_v41 = vmul.f32 %v2920_v60, %v4069_v29  ;;  %vm1053_vm7 = vmand %vm1049_vm2, %vm1051_vm12  ;;  %vm695_vm2 = vcmp.le.f32.partialorder %v6741_v11, %v4337_v19 }
 0x26a   :  { %vm1041_vm11 = vmand %vm1037_vm15, %vm1039_vm3 }
 0x26b   :  { %1368 = vmin.xlane.f32.xlu1 %v4328_v50  ;;  %v2922_v10 = vpop.eup %2921  ;;  %v1117_v14 = vmax.f32 %v1115_v41, 0.0 }
 0x26c   :  { %v1131_v1 = vmul.f32 %v2922_v10, %v4204_v38 }
 0x26d   :  { %v1119_v22 = vmin.f32 %v1117_v14, 1.0 }
 0x26e   :  { %v1133_v23 = vmax.f32 %v1131_v1, 0.0  ;;  %v6738_v1 = vld [vmem:[#allocation57_spill] sm:$0xff] }
 0x26f   :  { %v2924_v52 = vpop.eup %2923  ;;  %v1195_v32 = vmul.f32 %v1119_v22, %v6701_v53  ;;  %v1279_v6 = vmul.f32 %v1119_v22, %v6702_v57 }
 0x270   :  { %v1149_v16 = vmul.f32 %v2924_v52, %v4235_v25  ;;  %v1155_v42 = vmul.f32 %v2924_v52, %v4111_v12  ;;  %v1135_v28 = vmin.f32 %v1133_v23, 1.0 }
 0x271   :  { %v1197_v12 = vadd.f32 %v1195_v32, %v6727_v7  ;;  %v1281_v23 = vadd.f32 %v1279_v6, %v6731_v62 }
 0x272   :  { %v1151_v27 = vmax.f32 %v1149_v16, 0.0  ;;  %v1159_v34 = vmax.f32 %v1155_v42, 0.0  ;;  %v1189_v24 = vmul.f32 %v4079_v54, %v1135_v28  ;;  %v1231_v0 = vmul.f32 %v4172_v55, %v1135_v28 }
 0x273   :  { %v1273_v61 = vmul.f32 %v4215_v17, %v1135_v28 }
 0x274   :  { %v1153_v30 = vmin.f32 %v1151_v27, 1.0 }
 0x275   :  { %v1275_v52 = vadd.f32 %v1273_v61, %v6738_v1 }
 0x276   :  { %v1157_v46 = vsub.f32 1.0, %v1153_v30  ;;  %v1163_v56 = vmul.f32 %v1153_v30, %v6695_v63  ;;  %v1215_v59 = vmul.f32 %v1153_v30, %v6698_v26  ;;  %v1257_v58 = vmul.f32 %v1153_v30, %v6699_v18 }
 0x277   :  { %v1237_v18 = vmul.f32 %v1119_v22, %v6700_v33 }
 0x278   :  { %v1161_v8 = vmin.f32 %v1157_v46, %v1159_v34  ;;  %v1165_v63 = vadd.f32 %v1163_v56, %v6727_v7  ;;  %v1217_v26 = vadd.f32 %v1215_v59, %v6728_v49  ;;  %v1259_v60 = vadd.f32 %v1257_v58, %v6731_v62  ;;  %v2982_v46 = vld [vmem:[%s6313_s4 + $0x18] sm:$0xff]  ;;  %v6744_v59 = vld [vmem:[#allocation61_spill] sm:$0xff] }
 0x279   :  { %v1239_v2 = vadd.f32 %v1237_v18, %v6728_v49 }
 0x27a   :  { %v1167_v55 = vmul.f32 %v1161_v8, %v6701_v53  ;;  %v1219_v17 = vmul.f32 %v1161_v8, %v6700_v33  ;;  %v1261_v4 = vmul.f32 %v1161_v8, %v6702_v57  ;;  %v6734_v53 = vld [vmem:[#allocation54_spill] sm:$0xff]  ;;  %v6735_v33 = vld [vmem:[#allocation28_spill] sm:$0xff]  ;;  %v6431_v8 = vmov 0.0  }
 0x27b   :  { %v1191_v20 = vadd.f32 %v1189_v24, %v6734_v53  ;;  %v1233_v10 = vadd.f32 %v1231_v0, %v6735_v33  ;;  %v4454_v0 = vld [vmem:[%s6313_s4 + $0x20] sm:$0xff]  ;;  %v2738_v32 = vsel %vm694_vm13, 1.0, %v6431_v8  ;;  %v2739_v29 = vsel %vm695_vm2, 1.0, %v6431_v8 }
 0x27c   :  { %v1169_v41 = vadd.f32 %v1167_v55, %v1165_v63  ;;  %v1221_v25 = vadd.f32 %v1219_v17, %v1217_v26  ;;  %v1263_v9 = vadd.f32 %v1261_v4, %v1259_v60  ;;  %772 = vperm.xlu1 %2839, %v2981_v3   ;;  %v700_v55 = vadd.f32 %v2739_v29, %v2738_v32 }
 0x27d   :  { %v6746_v60 = vmov 1  }
 0x27e   :  { %v1193_v14 = vsel %vm1087_vm10, %v1191_v20, %v1169_v41  ;;  %v1235_v16 = vsel %vm1087_vm10, %v1233_v10, %v1221_v25  ;;  %v1277_v42 = vsel %vm1087_vm10, %v1275_v52, %v1263_v9  ;;  %v701_v38 = vrot.slane %v700_v55, 4  ;;  %v6747_v9 = vld [vmem:[#allocation18_spill] sm:$0xff] }
 0x27f   :  { %v1199_v27 = vsel %vm1073_vm6, %v1197_v12, %v1193_v14  ;;  %v1241_v28 = vsel %vm1073_vm6, %v1239_v2, %v1235_v16  ;;  %v1283_v22 = vsel %vm1073_vm6, %v1281_v23, %v1277_v42  ;;  %v6748_v52 = vld [vmem:[#allocation10_spill] sm:$0xff]  ;;  %v6749_v23 = vld [vmem:[#allocation41_spill] sm:$0xff] }
 0x280   :  { %v1205_v30 = vsel %vm4417_vm0, %v4344_v43, %v1199_v27  ;;  %v1247_v34 = vsel %vm4417_vm0, %v4347_v40, %v1241_v28  ;;  %v1289_v48 = vsel %vm4417_vm0, %v1287_v36, %v1283_v22  ;;  %1393 = vperm.xlu1 %2839, %v2982_v46   ;;  %v6743_v40 = vld [vmem:[#allocation19_spill] sm:$0xff]  ;;  %v730_v3 = vmul.f32 %v2739_v29, %v6748_v52  ;;  %v6750_v16 = vld [vmem:[#allocation29_spill] sm:$0xff] }
 0x281   :  { %v1207_v43 = vsel %vm1053_vm7, %v6742_v35, %v1205_v30  ;;  %v1249_v56 = vsel %vm1053_vm7, %v6743_v40, %v1247_v34  ;;  %v1291_v58 = vsel %vm1053_vm7, %v6744_v59, %v1289_v48  ;;  %v709_v14 = vmul.f32 %v2738_v32, %v6749_v23  ;;  %v6752_v27 = vld [vmem:[#allocation13_spill] sm:$0xff]  ;;  %v6753_v22 = vld [vmem:[#allocation11_spill] sm:$0xff] }
 0x282   :  { %v1251_v24 = vsel %vm1047_vm1, %v6735_v33, %v1249_v56  ;;  %v1209_v5 = vsel %vm1047_vm1, %v6734_v53, %v1207_v43  ;;  %v1293_v37 = vsel %vm1047_vm1, %v6738_v1, %v1291_v58  ;;  %v702_v33 = vadd.f32 %v701_v38, %v700_v55 }
 0x283   :  { %v1211_v61 = vsel %vm1041_vm11, %v6727_v7, %v1209_v5  ;;  %v1253_v63 = vsel %vm1041_vm11, %v6728_v49, %v1251_v24  ;;  %v1295_v26 = vsel %vm1041_vm11, %v6731_v62, %v1293_v37  ;;  %v729_v1 = vmul.f32 %v2738_v32, %v6747_v9 }
 0x284   :  { %2840 = vset.pattern.permute.xlu1 %v6745_v51  ;;  %v4472_v18 = vsub.f32 %v6658_v45, %v1211_v61  ;;  %v4475_v6 = vsub.f32 %v6660_v21, %v1253_v63  ;;  %v4478_v54 = vsub.f32 %v6669_v31, %v1295_v26  ;;  %v703_v41 = vrot.slane %v702_v33, 2 }
 0x285   :  { %1442 = vperm.xlu1 %2840, %v4454_v0   ;;  %v710_v42 = vmul.f32 %v2739_v29, %v6750_v16  ;;  %v719_v28 = vmul.f32 %v2738_v32, %v6752_v27  ;;  %v720_v30 = vmul.f32 %v2739_v29, %v6753_v22  ;;  %v731_v34 = vadd.f32 %v730_v3, %v729_v1 }
 0x286   :  { %v1299_v7 = vmul.f32 %v4472_v18, %v4472_v18  ;;  %v1301_v49 = vmul.f32 %v4475_v6, %v4475_v6  ;;  %v1305_v62 = vmul.f32 %v4478_v54, %v4478_v54  ;;  %v704_v2 = vadd.f32 %v703_v41, %v702_v33 }
 0x287   :  { %v6754_v48 = vmov 0  ;;  %v711_v40 = vadd.f32 %v710_v42, %v709_v14  ;;  %v721_v61 = vadd.f32 %v720_v30, %v719_v28  ;;  %v2984_v14 = vld [vmem:[%s6313_s4 + $0x10] sm:$0xff] }
 0x288   :  { %v1303_v17 = vadd.f32 %v1301_v49, %v1299_v7  ;;  %v705_v46 = vrot.slane %v704_v2, 1 }
 0x289   :  { %2841 = vset.pattern.permute.xlu1 %v6746_v60  ;;  %v722_v38 = vrot.slane %v721_v61, 4 }
 0x28a   :  { %1453 = vperm.xlu1 %2841, %v4454_v0   ;;  %v4489_v4 = vadd.f32 %v1305_v62, %v1303_v17  ;;  %v706_v26 = vadd.f32 %v705_v46, %v704_v2  ;;  %v732_v17 = vrot.slane %v731_v34, 4  ;;  %v712_v62 = vrot.slane %v711_v40, 4 }
 0x28c   :  { %v1309_v53 = vmin.f32 %v4489_v4, %v4328_v50  ;;  %1366 = vmin.xlane.f32.xlu0 %v4489_v4  ;;  %v707_v33 = vmax.f32 %v706_v26, 1.0  ;;  %v733_v1 = vadd.f32 %v732_v17, %v731_v34  ;;  %v713_v3 = vadd.f32 %v712_v62, %v711_v40 }
 0x28e   :  { %v1310_v20 = vrot.slane %v1309_v53, 4  ;;  %2925 = vrcp.f32 %v707_v33 }
 0x290   :  { %v1311_v10 = vmin.f32 %v1309_v53, %v1310_v20  ;;  %v2983_v20 = vld [vmem:[%s6313_s4] sm:$0xff] }
 0x292   :  { %v1312_v57 = vrot.slane %v1311_v10, 2 }
 0x294   :  { %v1313_v25 = vmin.f32 %v1311_v10, %v1312_v57 }
 0x296   :  { %v1314_v12 = vrot.slane %v1313_v25, 1 }
 0x298   :  { %v4498_v36 = vmin.f32 %v1313_v25, %v1314_v12  ;;  %v723_v12 = vadd.f32 %v722_v38, %v721_v61 }
 0x29a   :  { %6751 = vst [vmem:[#allocation14_spill] sm:$0xff] %v4498_v36  ;;  %vm1316_vm14 = vcmp.le.f32.partialorder %v4489_v4, %v4498_v36  ;;  %vm1317_vm15 = vcmp.le.f32.partialorder %v4328_v50, %v4498_v36  ;;  %vm4510_vm12 = vcmp.lt.f32.partialorder %v4498_v36, %v6433_v44 }
 0x29b   :  { %v6755_v48 = vsel %vm4510_vm12, 4294967295, %v6754_v48  ;;  %v2742_v35 = vsel %vm1316_vm14, 1.0, %v6431_v8  ;;  %v2743_v43 = vsel %vm1317_vm15, 1.0, %v6431_v8 }
 0x29c   :  { %6756 = vst [vmem:[#allocation12_spill] sm:$0xff] %v6755_v48  ;;  %v1322_v56 = vadd.f32 %v2743_v43, %v2742_v35  ;;  %v1331_v59 = vmul.f32 %v2742_v35, %v4472_v18  ;;  %v1341_v58 = vmul.f32 %v2742_v35, %v4475_v6  ;;  %v1351_v24 = vmul.f32 %v2742_v35, %v4478_v54 }
 0x29d   :  { %v1352_v5 = vmul.f32 %v2743_v43, %v4322_v15  ;;  %v1332_v37 = vmul.f32 %v2743_v43, %v4306_v39  ;;  %v1342_v32 = vmul.f32 %v2743_v43, %v4299_v47  ;;  %v714_v35 = vrot.slane %v713_v3, 2 }
 0x29e   :  { %v1323_v63 = vrot.slane %v1322_v56, 4  ;;  %v724_v43 = vrot.slane %v723_v12, 2 }
 0x29f   :  { %v1353_v7 = vadd.f32 %v1352_v5, %v1351_v24  ;;  %v1333_v49 = vadd.f32 %v1332_v37, %v1331_v59  ;;  %v1343_v55 = vadd.f32 %v1342_v32, %v1341_v58  ;;  %v6757_v58 = vmov 14  }
 0x2a0   :  { %v1324_v29 = vadd.f32 %v1323_v63, %v1322_v56  ;;  %v734_v56 = vrot.slane %v733_v1, 2  ;;  %v715_v5 = vadd.f32 %v714_v35, %v713_v3  ;;  %v725_v37 = vadd.f32 %v724_v43, %v723_v12 }
 0x2a1   :  { %v1354_v57 = vrot.slane %v1353_v7, 4  ;;  %v1334_v41 = vrot.slane %v1333_v49, 4  ;;  %v1344_v25 = vrot.slane %v1343_v55, 4 }
 0x2a2   :  { %v1325_v53 = vrot.slane %v1324_v29, 2  ;;  %768 = vperm.xlu0 %2838, %v2983_v20   ;;  %v735_v32 = vadd.f32 %v734_v56, %v733_v1 }
 0x2a3   :  { %v1355_v28 = vadd.f32 %v1354_v57, %v1353_v7  ;;  %v1335_v30 = vadd.f32 %v1334_v41, %v1333_v49  ;;  %v1345_v46 = vadd.f32 %v1344_v25, %v1343_v55  ;;  %v726_v7 = vrot.slane %v725_v37, 1  ;;  %v2926_v55 = vpop.eup %2925 }
 0x2a4   :  { %v1326_v10 = vadd.f32 %v1325_v53, %v1324_v29  ;;  %v716_v29 = vrot.slane %v715_v5, 1  ;;  %v736_v49 = vrot.slane %v735_v32, 1 }
 0x2a5   :  { %v1356_v34 = vrot.slane %v1355_v28, 2  ;;  %v1336_v40 = vrot.slane %v1335_v30, 2  ;;  %v1346_v24 = vrot.slane %v1345_v46, 2  ;;  %v727_v20 = vadd.f32 %v726_v7, %v725_v37 }
 0x2a6   :  { %v1327_v2 = vrot.slane %v1326_v10, 1  ;;  %1389 = vperm.xlu0 %2838, %v2984_v14   ;;  %v717_v53 = vadd.f32 %v716_v29, %v715_v5  ;;  %v737_v33 = vadd.f32 %v736_v49, %v735_v32  ;;  %v6768_v29 = vmov 3  }
 0x2a7   :  { %v1337_v61 = vadd.f32 %v1336_v40, %v1335_v30  ;;  %v1347_v63 = vadd.f32 %v1346_v24, %v1345_v46  ;;  %v1357_v26 = vadd.f32 %v1356_v34, %v1355_v28  ;;  %v728_v57 = vmul.f32 %v2926_v55, %v727_v20  ;;  %v4556_v34 = vpop.xlane.xlu0 %746 }
 0x2a8   :  { %v1328_v42 = vadd.f32 %v1327_v2, %v1326_v10  ;;  %v718_v10 = vmul.f32 %v2926_v55, %v717_v53  ;;  %v738_v41 = vmul.f32 %v2926_v55, %v737_v33  ;;  %6765 = vst [vmem:[#allocation17_spill] sm:$0xff] %v4556_v34  ;;  %vm762_vm9 = vcmp.le.f32.partialorder %v6741_v11, %v4556_v34  ;;  %v4576_v11 = vld [vmem:[%s6313_s4 + $0x28] sm:$0xff] }
 0x2a9   :  { %v1338_v17 = vrot.slane %v1337_v61, 1  ;;  %v1348_v62 = vrot.slane %v1347_v63, 1  ;;  %v1358_v38 = vrot.slane %v1357_v26, 1  ;;  %v4538_v30 = vsel %vm739_vm5, %v728_v57, 0.0 }
 0x2aa   :  { %v1329_v59 = vmax.f32 %v1328_v42, 1.0  ;;  %2848 = vset.pattern.permute.xlu0 %v6757_v58  ;;  %v4536_v28 = vsel %vm739_vm5, %v718_v10, 0.0  ;;  %6762 = vst [vmem:[#allocation49_spill] sm:$0xff] %v4538_v30  ;;  %v4540_v46 = vsel %vm739_vm5, %v738_v41, 0.0  ;;  %v2741_v5 = vsel %vm762_vm9, 1.0, %v6431_v8 }
 0x2ab   :  { %v1339_v25 = vadd.f32 %v1338_v17, %v1337_v61  ;;  %v1349_v3 = vadd.f32 %v1348_v62, %v1347_v63  ;;  %v1359_v12 = vadd.f32 %v1358_v38, %v1357_v26  ;;  %6761 = vst [vmem:[#allocation20_spill] sm:$0xff] %v4536_v28  ;;  %6763 = vst [vmem:[#allocation51_spill] sm:$0xff] %v4540_v46  ;;  %v6769_v55 = vmov 5  }
 0x2ac   :  { %2927 = vrcp.f32 %v1329_v59  ;;  %v4554_v59 = vpop.xlane.xlu1 %744  ;;  %v6770_v53 = vmov 2   ;;  %v6771_v20 = vmov 4   ;;  %v6772_v33 = vmov 6  }
 0x2ad   :  { %6764 = vst [vmem:[#allocation50_spill] sm:$0xff] %v4554_v59  ;;  %vm761_vm8 = vcmp.le.f32.partialorder %v3951_v13, %v4554_v59  ;;  %v4603_v13 = vld [vmem:[%s6313_s4 + $0x30] sm:$0xff]  ;;  %v6773_v10 = vmov 9   ;;  %v6774_v57 = vmov 10   ;;  %v6775_v41 = vmov 11  }
 0x2ae   :  { %v2740_v7 = vsel %vm761_vm8, 1.0, %v6431_v8 }
 0x2b9   :  { %v2928_v1 = vpop.eup %2927 }
 0x2ba   :  { %v4529_v2 = vmul.f32 %v2928_v1, %v1339_v25  ;;  %v4531_v14 = vmul.f32 %v2928_v1, %v1349_v3  ;;  %v4533_v42 = vmul.f32 %v2928_v1, %v1359_v12  ;;  %v6776_v25 = vmov 12  }
 0x2bb   :  { %v6777_v3 = vmov 13   ;;  %v6778_v1 = vmov 7  }
 0x2bc   :  { %6758 = vst [vmem:[#allocation24_spill] sm:$0xff] %v4529_v2  ;;  %6759 = vst [vmem:[#allocation16_spill] sm:$0xff] %v4531_v14 }
 0x2bd   :  { %6760 = vst [vmem:[#allocation30_spill] sm:$0xff] %v4533_v42 }
 0x2f4   :  { %v4558_v40 = vpop.xlane.xlu1 %1368 }
 0x2f5   :  { %6766 = vst [vmem:[#allocation15_spill] sm:$0xff] %v4558_v40  ;;  %vm1383_vm4 = vcmp.le.f32.partialorder %v4328_v50, %v4558_v40 }
 0x2f6   :  { %v2745_v61 = vsel %vm1383_vm4, 1.0, %v6431_v8 }
 0x2f8   :  { %v773_v24 = vpop.permute.xlu1 %772 }
 0x2f9   :  { %v4563_v37 = vmul.f32 %v2741_v5, %v773_v24 }
 0x2fb   :  { %779 = vadd.xlane.f32.xlu0 %v4563_v37 }
 0x2fc   :  { %v1394_v32 = vpop.permute.xlu1 %1393 }
 0x2fd   :  { %v4569_v63 = vmul.f32 %v2745_v61, %v1394_v32  ;;  %v6780_v32 = vmov 8  }
 0x2ff   :  { %1400 = vadd.xlane.f32.xlu0 %v4569_v63 }
 0x315   :  { %1529 = vperm.xlu0 %2848, %v4454_v0   ;;  %v4578_v26 = vpop.xlane.xlu0 %1366 }
 0x316   :  { %6767 = vst [vmem:[#allocation32_spill] sm:$0xff] %v4578_v26  ;;  %vm1382_vm10 = vcmp.le.f32.partialorder %v4489_v4, %v4578_v26  ;;  %v4611_v4 = vld [vmem:[%s6313_s4 + $0x38] sm:$0xff] }
 0x317   :  { %v2744_v17 = vsel %vm1382_vm10, 1.0, %v6431_v8 }
 0x319   :  { %2851 = vset.pattern.permute.xlu0 %v6768_v29 }
 0x31a   :  { %1545 = vperm.xlu0 %2851, %v4576_v11  }
 0x31d   :  { %v769_v50 = vpop.permute.xlu0 %768 }
 0x31e   :  { %v4587_v49 = vmul.f32 %v2740_v7, %v769_v50  ;;  %2853 = vset.pattern.permute.xlu0 %v6769_v55  ;;  %v4662_v7 = vpop.permute.xlu1 %1442 }
 0x31f   :  { %1561 = vperm.xlu0 %2853, %v4454_v0  }
 0x320   :  { %777 = vadd.xlane.f32.xlu1 %v4587_v49 }
 0x321   :  { %v1390_v62 = vpop.permute.xlu0 %1389 }
 0x322   :  { %v4593_v38 = vmul.f32 %v2744_v17, %v1390_v62  ;;  %v4669_v35 = vpop.permute.xlu1 %1453 }
 0x323   :  { %2854 = vset.pattern.permute.xlu0 %v6745_v51 }
 0x324   :  { %1398 = vadd.xlane.f32.xlu1 %v4593_v38  ;;  %1447 = vperm.xlu0 %2854, %v4576_v11  }
 0x328   :  { %1794 = vrot.lane.b32.xlu0 %v4576_v11, %s3045_s2 }
 0x32c   :  { %2413 = vrot.lane.b32.xlu0 %v4603_v13, %s3045_s2 }
 0x330   :  { %2063 = vperm.xlu0 %2854, %v4603_v13  }
 0x334   :  { %2863 = vset.pattern.permute.xlu0 %v6746_v60 }
 0x335   :  { %1457 = vperm.xlu1 %2841, %v4576_v11   ;;  %2078 = vperm.xlu0 %2863, %v4611_v4  }
 0x339   :  { %2842 = vset.pattern.permute.xlu1 %v6770_v53  ;;  %2865 = vset.pattern.permute.xlu0 %v6771_v20 }
 0x33a   :  { %1463 = vperm.xlu1 %2842, %v4454_v0   ;;  %2172 = vperm.xlu0 %2865, %v4603_v13  }
 0x33e   :  { %1467 = vperm.xlu1 %2842, %v4576_v11   ;;  %2866 = vset.pattern.permute.xlu0 %v6772_v33 }
 0x33f   :  { %1595 = vperm.xlu0 %2866, %v4576_v11  }
 0x342   :  { %2843 = vset.pattern.permute.xlu1 %v6773_v10 }
 0x343   :  { %1473 = vperm.xlu1 %2843, %v4454_v0  }
 0x347   :  { %1477 = vperm.xlu1 %2843, %v4576_v11  }
 0x34b   :  { %2844 = vset.pattern.permute.xlu1 %v6774_v57 }
 0x34c   :  { %1483 = vperm.xlu1 %2844, %v4454_v0  }
 0x350   :  { %1487 = vperm.xlu1 %2844, %v4576_v11  }
 0x354   :  { %2845 = vset.pattern.permute.xlu1 %v6775_v41 }
 0x355   :  { %1495 = vperm.xlu1 %2845, %v4454_v0  }
 0x359   :  { %1499 = vperm.xlu1 %2845, %v4576_v11  }
 0x35d   :  { %2846 = vset.pattern.permute.xlu1 %v6776_v25 }
 0x35e   :  { %1507 = vperm.xlu1 %2846, %v4454_v0  }
 0x362   :  { %2847 = vset.pattern.permute.xlu1 %v6777_v3 }
 0x363   :  { %1517 = vperm.xlu1 %2847, %v4454_v0  }
 0x367   :  { %1521 = vperm.xlu1 %2847, %v4576_v11  }
 0x36b   :  { %2849 = vset.pattern.permute.xlu1 %v6757_v58 }
 0x36c   :  { %1533 = vperm.xlu1 %2849, %v4576_v11  }
 0x370   :  { %2850 = vset.pattern.permute.xlu1 %v6768_v29 }
 0x371   :  { %1541 = vperm.xlu1 %2850, %v4454_v0  }
 0x375   :  { %2852 = vset.pattern.permute.xlu1 %v6771_v20 }
 0x376   :  { %1551 = vperm.xlu1 %2852, %v4454_v0  }
 0x37a   :  { %1555 = vperm.xlu1 %2852, %v4576_v11  }
 0x37e   :  { %2855 = vset.pattern.permute.xlu1 %v6769_v55 }
 0x37f   :  { %1565 = vperm.xlu1 %2855, %v4576_v11  }
 0x383   :  { %2856 = vset.pattern.permute.xlu1 %v6772_v33 }
 0x384   :  { %1591 = vperm.xlu1 %2856, %v4454_v0   ;;  %v780_v12 = vpop.xlane.xlu0 %779 }
 0x385   :  { %v782_v62 = vmax.f32 %v780_v12, 1.0 }
 0x387   :  { %2929 = vrcp.f32 %v782_v62 }
 0x388   :  { %2857 = vset.pattern.permute.xlu1 %v6778_v1  ;;  %v1401_v24 = vpop.xlane.xlu0 %1400 }
 0x389   :  { %1601 = vperm.xlu1 %2857, %v4454_v0   ;;  %v1403_v8 = vmax.f32 %v1401_v24, 1.0 }
 0x38b   :  { %2931 = vrcp.f32 %v1403_v8 }
 0x38d   :  { %1605 = vperm.xlu1 %2857, %v4576_v11  }
 0x390   :  { %v4651_v5 = vpop.permute.xlu0 %1529 }
 0x391   :  { %6779 = vst [vmem:[#allocation60_spill] sm:$0xff] %v4651_v5  ;;  %2858 = vset.pattern.permute.xlu1 %v6780_v32 }
 0x392   :  { %1615 = vperm.xlu1 %2858, %v4576_v11  }
 0x394   :  { %v2930_v12 = vpop.eup %2929 }
 0x395   :  { %v4655_v61 = vpop.permute.xlu0 %1545 }
 0x396   :  { %6781 = vst [vmem:[#allocation56_spill] sm:$0xff] %v4655_v61  ;;  %1792 = vrot.lane.b32.xlu1 %v4454_v0, %s3045_s2 }
 0x397   :  { %2859 = vset.pattern.permute.xlu1 %v6772_v33 }
 0x398   :  { %v2932_v8 = vpop.eup %2931 }
 0x399   :  { %v1407_v46 = vmul.f32 %v2932_v8, %v4569_v63 }
 0x39a   :  { %v4660_v50 = vpop.permute.xlu0 %1561 }
 0x39b   :  { %6782 = vst [vmem:[#allocation59_spill] sm:$0xff] %v4660_v50 }
 0x39f   :  { %v4664_v17 = vpop.permute.xlu0 %1447 }
 0x3a3   :  { %v1795_v56 = vpop.permute.xlu0 %1794 }
 0x3a4   :  { %v4667_v43 = vsub.f32 %v4576_v11, %v1795_v56 }
 0x3a6   :  { %1807 = vperm.xlu0 %2866, %v4667_v43  }
 0x3a9   :  { %v778_v44 = vpop.xlane.xlu1 %777 }
 0x3aa   :  { %v781_v34 = vmax.f32 %v778_v44, 1.0  ;;  %2216 = vperm.xlu0 %2866, %v4611_v4   ;;  %v786_v44 = vmul.f32 %v2930_v12, %v4563_v37 }
 0x3ac   :  { %2933 = vrcp.f32 %v781_v34  ;;  %v788_v62 = vmul.f32 %v786_v44, %v6750_v16  ;;  %v798_v26 = vmul.f32 %v786_v44, %v6753_v22  ;;  %v808_v42 = vmul.f32 %v786_v44, %v6748_v52 }
 0x3ad   :  { %v1399_v40 = vpop.xlane.xlu1 %1398  ;;  %v1409_v22 = vmul.f32 %v1407_v46, %v4306_v39 }
 0x3ae   :  { %v1402_v59 = vmax.f32 %v1399_v40, 1.0  ;;  %2870 = vset.pattern.permute.xlu0 %v6770_v53 }
 0x3af   :  { %2084 = vperm.xlu0 %2870, %v4603_v13  }
 0x3b0   :  { %2935 = vrcp.f32 %v1402_v59 }
 0x3b1   :  { %v4675_v56 = vpop.permute.xlu1 %1457 }
 0x3b3   :  { %2873 = vset.pattern.permute.xlu0 %v6773_v10 }
 0x3b4   :  { %2098 = vperm.xlu0 %2873, %v4611_v4  }
 0x3b5   :  { %v4679_v24 = vpop.permute.xlu1 %1463 }
 0x3b6   :  { %6783 = vst [vmem:[#allocation31_spill] sm:$0xff] %v4679_v24 }
 0x3b8   :  { %2874 = vset.pattern.permute.xlu0 %v6776_v25 }
 0x3b9   :  { %v2934_v34 = vpop.eup %2933  ;;  %1511 = vperm.xlu0 %2874, %v4576_v11   ;;  %v4684_v40 = vpop.permute.xlu1 %1467 }
 0x3ba   :  { %6784 = vst [vmem:[#allocation27_spill] sm:$0xff] %v4684_v40  ;;  %v785_v59 = vmul.f32 %v2934_v34, %v4587_v49 }
 0x3bc   :  { %v787_v37 = vmul.f32 %v785_v59, %v6749_v23  ;;  %v797_v12 = vmul.f32 %v785_v59, %v6752_v27  ;;  %v807_v30 = vmul.f32 %v785_v59, %v6747_v9  ;;  %v1419_v27 = vmul.f32 %v1407_v46, %v4299_v47 }
 0x3bd   :  { %v2936_v14 = vpop.eup %2935  ;;  %2128 = vperm.xlu0 %2874, %v4603_v13   ;;  %v1429_v9 = vmul.f32 %v1407_v46, %v4322_v15 }
 0x3be   :  { %v789_v11 = vadd.f32 %v788_v62, %v787_v37  ;;  %v799_v28 = vadd.f32 %v798_v26, %v797_v12  ;;  %v809_v49 = vadd.f32 %v808_v42, %v807_v30  ;;  %v1406_v16 = vmul.f32 %v2936_v14, %v4593_v38  ;;  %v4696_v34 = vpop.permute.xlu1 %1473 }
 0x3c0   :  { %v790_v63 = vrot.slane %v789_v11, 4  ;;  %v800_v52 = vrot.slane %v799_v28, 4  ;;  %v810_v44 = vrot.slane %v809_v49, 4  ;;  %v1408_v23 = vmul.f32 %v1406_v16, %v4472_v18 }
 0x3c1   :  { %v1418_v8 = vmul.f32 %v1406_v16, %v4475_v6  ;;  %v1428_v26 = vmul.f32 %v1406_v16, %v4478_v54  ;;  %2878 = vset.pattern.permute.xlu0 %v6777_v3 }
 0x3c2   :  { %v791_v14 = vadd.f32 %v790_v63, %v789_v11  ;;  %v801_v42 = vadd.f32 %v800_v52, %v799_v28  ;;  %v811_v30 = vadd.f32 %v810_v44, %v809_v49  ;;  %v1410_v38 = vadd.f32 %v1409_v22, %v1408_v23  ;;  %2142 = vperm.xlu0 %2878, %v4611_v4   ;;  %v4706_v39 = vpop.permute.xlu1 %1477 }
 0x3c3   :  { %v1420_v59 = vadd.f32 %v1419_v27, %v1418_v8  ;;  %v1430_v18 = vadd.f32 %v1429_v9, %v1428_v26 }
 0x3c4   :  { %v792_v62 = vrot.slane %v791_v14, 2  ;;  %v802_v47 = vrot.slane %v801_v42, 2  ;;  %v812_v37 = vrot.slane %v811_v30, 2  ;;  %v1411_v15 = vrot.slane %v1410_v38, 4 }
 0x3c5   :  { %v1421_v46 = vrot.slane %v1420_v59, 4  ;;  %v1431_v6 = vrot.slane %v1430_v18, 4 }
 0x3c6   :  { %v793_v12 = vadd.f32 %v792_v62, %v791_v14  ;;  %v1412_v54 = vadd.f32 %v1411_v15, %v1410_v38  ;;  %2879 = vset.pattern.permute.xlu0 %v6780_v32  ;;  %v803_v11 = vadd.f32 %v802_v47, %v801_v42  ;;  %v813_v28 = vadd.f32 %v812_v37, %v811_v30 }
 0x3c7   :  { %v1422_v49 = vadd.f32 %v1421_v46, %v1420_v59  ;;  %v1432_v16 = vadd.f32 %v1431_v6, %v1430_v18  ;;  %1611 = vperm.xlu0 %2879, %v4454_v0   ;;  %v4710_v22 = vpop.permute.xlu1 %1483 }
 0x3c8   :  { %v1413_v63 = vrot.slane %v1412_v54, 2  ;;  %v794_v23 = vrot.slane %v793_v12, 1  ;;  %v804_v9 = vrot.slane %v803_v11, 1  ;;  %v814_v8 = vrot.slane %v813_v28, 1 }
 0x3c9   :  { %v1423_v52 = vrot.slane %v1422_v49, 2  ;;  %v1433_v44 = vrot.slane %v1432_v16, 2 }
 0x3ca   :  { %v1414_v27 = vadd.f32 %v1413_v63, %v1412_v54  ;;  %v795_v18 = vadd.f32 %v794_v23, %v793_v12  ;;  %v805_v47 = vadd.f32 %v804_v9, %v803_v11  ;;  %v815_v37 = vadd.f32 %v814_v8, %v813_v28 }
 0x3cb   :  { %v1424_v26 = vadd.f32 %v1423_v52, %v1422_v49  ;;  %v1434_v14 = vadd.f32 %v1433_v44, %v1432_v16  ;;  %2232 = vperm.xlu0 %2879, %v4603_v13   ;;  %v4713_v38 = vpop.permute.xlu1 %1487 }
 0x3cc   :  { %v1415_v42 = vrot.slane %v1414_v27, 1 }
 0x3cd   :  { %v1425_v30 = vrot.slane %v1424_v26, 1  ;;  %v1435_v59 = vrot.slane %v1434_v14, 1 }
 0x3ce   :  { %v1416_v62 = vadd.f32 %v1415_v42, %v1414_v27 }
 0x3cf   :  { %v1426_v15 = vadd.f32 %v1425_v30, %v1424_v26  ;;  %v1436_v46 = vadd.f32 %v1435_v59, %v1434_v14  ;;  %2883 = vset.pattern.permute.xlu0 %v6775_v41 }
 0x3d0   :  { %v4716_v6 = vadd.f32 %v1416_v62, %v795_v18  ;;  %v4718_v54 = vpop.permute.xlu1 %1495  ;;  %2120 = vperm.xlu0 %2883, %v4611_v4   ;;  %v1451_v18 = vsub.f32 %v6658_v45, %v4664_v17 }
 0x3d1   :  { %6786 = vst [vmem:[#allocation44_spill] sm:$0xff] %v4718_v54  ;;  %v4721_v49 = vadd.f32 %v1426_v15, %v805_v47  ;;  %v4723_v16 = vadd.f32 %v1436_v46, %v815_v37  ;;  %v1450_v15 = vsub.f32 %v6658_v45, %v4662_v7 }
 0x3d2   :  { %6785 = vst [vmem:[#allocation55_spill] sm:$0xff] %v4716_v6  ;;  %v4851_v6 = vsub.f32 %v6669_v31, %v4679_v24  ;;  %v1481_v24 = vmul.f32 %v4706_v39, %v1451_v18 }
 0x3d3   :  { %6787 = vst [vmem:[#allocation52_spill] sm:$0xff] %v4721_v49  ;;  %6788 = vst [vmem:[#allocation25_spill] sm:$0xff] %v4723_v16 }
 0x3d4   :  { %v4725_v63 = vpop.permute.xlu1 %1499  ;;  %2887 = vset.pattern.permute.xlu0 %v6772_v33 }
 0x3d9   :  { %v4728_v12 = vpop.permute.xlu1 %1507 }
 0x3de   :  { %v4730_v11 = vpop.permute.xlu1 %1517 }
 0x3df   :  { %6789 = vst [vmem:[#allocation36_spill] sm:$0xff] %v4730_v11 }
 0x3e2   :  { %v4732_v28 = vpop.permute.xlu1 %1521 }
 0x3e3   :  { %6790 = vst [vmem:[#allocation40_spill] sm:$0xff] %v4732_v28 }
 0x3e7   :  { %v4734_v52 = vpop.permute.xlu1 %1533 }
 0x3e8   :  { %6791 = vst [vmem:[#allocation48_spill] sm:$0xff] %v4734_v52 }
 0x3ec   :  { %v4736_v44 = vpop.permute.xlu1 %1541 }
 0x3ed   :  { %6792 = vst [vmem:[#allocation26_spill] sm:$0xff] %v4736_v44 }
 0x3f1   :  { %v4738_v23 = vpop.permute.xlu1 %1551 }
 0x3f2   :  { %6793 = vst [vmem:[#allocation35_spill] sm:$0xff] %v4738_v23 }
 0x3f5   :  { %v4740_v27 = vpop.permute.xlu1 %1555 }
 0x3f6   :  { %6794 = vst [vmem:[#allocation46_spill] sm:$0xff] %v4740_v27  ;;  %v1559_v47 = vsub.f32 %v6660_v21, %v4740_v27 }
 0x3f8   :  { %v1583_v2 = vmul.f32 %v1559_v47, %v4732_v28  ;;  %v1573_v27 = vmul.f32 %v1559_v47, %v4713_v38  ;;  %v1558_v47 = vsub.f32 %v6660_v21, %v4738_v23 }
 0x3fa   :  { %v4742_v9 = vpop.permute.xlu1 %1565 }
 0x3fb   :  { %6795 = vst [vmem:[#allocation37_spill] sm:$0xff] %v4742_v9  ;;  %v1569_v48 = vsub.f32 %v6669_v31, %v4742_v9 }
 0x3ff   :  { %v4744_v8 = vpop.permute.xlu1 %1591 }
 0x400   :  { %6796 = vst [vmem:[#allocation43_spill] sm:$0xff] %v4744_v8 }
 0x404   :  { %v4746_v26 = vpop.permute.xlu1 %1601 }
 0x405   :  { %6797 = vst [vmem:[#allocation45_spill] sm:$0xff] %v4746_v26 }
 0x408   :  { %v4748_v14 = vpop.permute.xlu1 %1605 }
 0x409   :  { %6798 = vst [vmem:[#allocation22_spill] sm:$0xff] %v4748_v14 }
 0x40d   :  { %v4750_v42 = vpop.permute.xlu1 %1615 }
 0x40e   :  { %6799 = vst [vmem:[#allocation47_spill] sm:$0xff] %v4750_v42  ;;  %v1619_v49 = vsub.f32 %v6669_v31, %v4750_v42 }
 0x411   :  { %v1793_v30 = vpop.permute.xlu1 %1792 }
 0x412   :  { %v4753_v59 = vsub.f32 %v4454_v0, %v1793_v30  ;;  %v2414_v0 = vpop.permute.xlu0 %2413 }
 0x414   :  { %1802 = vperm.xlu1 %2859, %v4753_v59  }
 0x418   :  { %2415 = vrot.lane.b32.xlu1 %v4611_v4, %s3045_s2 }
 0x419   :  { %2860 = vset.pattern.permute.xlu1 %v6778_v1 }
 0x41c   :  { %1845 = vperm.xlu1 %2860, %v4753_v59  }
 0x420   :  { %1849 = vperm.xlu1 %2860, %v4667_v43  }
 0x424   :  { %2861 = vset.pattern.permute.xlu1 %v6745_v51  ;;  %v4779_v51 = vpop.permute.xlu0 %2063 }
 0x425   :  { %2068 = vperm.xlu1 %2861, %v4611_v4   ;;  %6800 = vst [vmem:[#allocation53_spill] sm:$0xff] %v4779_v51 }
 0x429   :  { %2862 = vset.pattern.permute.xlu1 %v6746_v60  ;;  %v4783_v60 = vpop.permute.xlu0 %2078 }
 0x42a   :  { %2074 = vperm.xlu1 %2862, %v4603_v13   ;;  %6801 = vst [vmem:[#allocation23_spill] sm:$0xff] %v4783_v60 }
 0x42e   :  { %2864 = vset.pattern.permute.xlu1 %v6768_v29  ;;  %v4787_v29 = vpop.permute.xlu0 %2172 }
 0x42f   :  { %2162 = vperm.xlu1 %2864, %v4603_v13   ;;  %6802 = vst [vmem:[#allocation21_spill] sm:$0xff] %v4787_v29 }
 0x433   :  { %2166 = vperm.xlu1 %2864, %v4611_v4  }
 0x437   :  { %2867 = vset.pattern.permute.xlu1 %v6771_v20 }
 0x438   :  { %2176 = vperm.xlu1 %2867, %v4611_v4  }
 0x43c   :  { %2868 = vset.pattern.permute.xlu1 %v6772_v33 }
 0x43d   :  { %2212 = vperm.xlu1 %2868, %v4603_v13  }
 0x441   :  { %2869 = vset.pattern.permute.xlu1 %v6778_v1 }
 0x442   :  { %2222 = vperm.xlu1 %2869, %v4603_v13  }
 0x446   :  { %2226 = vperm.xlu1 %2869, %v4611_v4  }
 0x44a   :  { %2871 = vset.pattern.permute.xlu1 %v6770_v53  ;;  %v4792_v53 = vpop.permute.xlu0 %1595 }
 0x44b   :  { %2088 = vperm.xlu1 %2871, %v4611_v4   ;;  %6803 = vst [vmem:[#allocation33_spill] sm:$0xff] %v4792_v53  ;;  %v1599_v62 = vsub.f32 %v6658_v45, %v4792_v53 }
 0x44e   :  { %v4795_v20 = vpop.permute.xlu0 %1807 }
 0x44f   :  { %2872 = vset.pattern.permute.xlu1 %v6773_v10 }
 0x450   :  { %2094 = vperm.xlu1 %2872, %v4603_v13  }
 0x452   :  { %v4799_v10 = vpop.permute.xlu0 %2216 }
 0x453   :  { %6804 = vst [vmem:[#allocation54_spill] sm:$0xff] %v4799_v10 }
 0x454   :  { %2875 = vset.pattern.permute.xlu1 %v6774_v57 }
 0x455   :  { %2104 = vperm.xlu1 %2875, %v4603_v13  }
 0x456   :  { %v4803_v57 = vpop.permute.xlu0 %2084 }
 0x457   :  { %6805 = vst [vmem:[#allocation28_spill] sm:$0xff] %v4803_v57 }
 0x459   :  { %2108 = vperm.xlu1 %2875, %v4611_v4  }
 0x45d   :  { %2876 = vset.pattern.permute.xlu1 %v6776_v25  ;;  %v4807_v25 = vpop.permute.xlu0 %2098 }
 0x45e   :  { %2132 = vperm.xlu1 %2876, %v4611_v4   ;;  %6806 = vst [vmem:[#allocation57_spill] sm:$0xff] %v4807_v25 }
 0x462   :  { %2877 = vset.pattern.permute.xlu1 %v6777_v3  ;;  %v4817_v3 = vsub.f32 %v4603_v13, %v2414_v0  ;;  %v1460_v0 = vsub.f32 %v6660_v21, %v4669_v35 }
 0x463   :  { %2138 = vperm.xlu1 %2877, %v4603_v13  }
 0x467   :  { %2880 = vset.pattern.permute.xlu1 %v6769_v55  ;;  %v4812_v55 = vpop.permute.xlu0 %1511 }
 0x468   :  { %2182 = vperm.xlu1 %2880, %v4603_v13   ;;  %v1515_v37 = vmul.f32 %v4812_v55, %v1451_v18  ;;  %v1631_v30 = vmul.f32 %v1599_v62, %v4812_v55  ;;  %v1587_v18 = vmul.f32 %v1569_v48, %v4734_v52 }
 0x46c   :  { %2186 = vperm.xlu1 %2880, %v4611_v4  }
 0x470   :  { %2881 = vset.pattern.permute.xlu1 %v6780_v32 }
 0x471   :  { %2236 = vperm.xlu1 %2881, %v4611_v4  }
 0x475   :  { %2882 = vset.pattern.permute.xlu1 %v6775_v41  ;;  %v4819_v41 = vpop.permute.xlu0 %2128 }
 0x476   :  { %2116 = vperm.xlu1 %2882, %v4603_v13   ;;  %6807 = vst [vmem:[#allocation9_spill] sm:$0xff] %v4819_v41  ;;  %v1627_v41 = vmul.f32 %v1619_v49, %v4725_v63 }
 0x479   :  { %v4857_v36 = vpop.permute.xlu0 %2142 }
 0x47a   :  { %2884 = vset.pattern.permute.xlu1 %v6757_v58  ;;  %v1549_v58 = vsub.f32 %v6658_v45, %v4655_v61  ;;  %6808 = vst [vmem:[#allocation58_spill] sm:$0xff] %v4857_v36  ;;  %v1621_v36 = vmul.f32 %v1599_v62, %v4706_v39  ;;  %v1480_v62 = vmul.f32 %v4696_v34, %v1450_v15 }
 0x47b   :  { %2150 = vperm.xlu1 %2884, %v4603_v13   ;;  %v1461_v13 = vsub.f32 %v6660_v21, %v4675_v56 }
 0x47c   :  { %v1581_v46 = vmul.f32 %v1549_v58, %v4812_v55 }
 0x47d   :  { %v1525_v16 = vmul.f32 %v4732_v28, %v1461_v13 }
 0x47e   :  { %v1585_v61 = vadd.f32 %v1583_v2, %v1581_v46 }
 0x47f   :  { %2154 = vperm.xlu1 %2884, %v4611_v4   ;;  %v1527_v53 = vadd.f32 %v1525_v16, %v1515_v37  ;;  %v1577_v16 = vmul.f32 %v1569_v48, %v4725_v63  ;;  %v1514_v48 = vmul.f32 %v4728_v12, %v1450_v15 }
 0x483   :  { %2885 = vset.pattern.permute.xlu1 %v6780_v32 }
 0x484   :  { %1891 = vperm.xlu1 %2885, %v4667_v43   ;;  %v1609_v43 = vsub.f32 %v6660_v21, %v4748_v14  ;;  %v1471_v14 = vsub.f32 %v6669_v31, %v4684_v40 }
 0x486   :  { %v1633_v19 = vmul.f32 %v1609_v43, %v4732_v28  ;;  %v1623_v42 = vmul.f32 %v1609_v43, %v4713_v38  ;;  %v1503_v28 = vmul.f32 %v4725_v63, %v1471_v14 }
 0x488   :  { %2886 = vset.pattern.permute.xlu1 %v6772_v33  ;;  %v4844_v33 = vsub.f32 %v6669_v31, %v4660_v50  ;;  %v1491_v50 = vmul.f32 %v4713_v38, %v1461_v13  ;;  %v1635_v9 = vadd.f32 %v1633_v19, %v1631_v30  ;;  %v1537_v13 = vmul.f32 %v4734_v52, %v1471_v14 }
 0x489   :  { %2423 = vperm.xlu1 %2886, %v4817_v3   ;;  %v1637_v19 = vmul.f32 %v1619_v49, %v4734_v52  ;;  %v1625_v37 = vadd.f32 %v1623_v42, %v1621_v36  ;;  %v4882_v30 = vadd.f32 %v1587_v18, %v1585_v61  ;;  %v1524_v49 = vmul.f32 %v4730_v11, %v1460_v0 }
 0x48a   :  { %v1493_v2 = vadd.f32 %v1491_v50, %v1481_v24  ;;  %v4879_v14 = vadd.f32 %v1537_v13, %v1527_v53  ;;  %v1608_v50 = vsub.f32 %v6660_v21, %v4746_v26  ;;  %v1548_v61 = vsub.f32 %v6658_v45, %v4736_v44 }
 0x48b   :  { %v4893_v24 = vadd.f32 %v1627_v41, %v1625_v37  ;;  %v1572_v42 = vmul.f32 %v1558_v47, %v4710_v22  ;;  %v1502_v37 = vmul.f32 %v4718_v54, %v4851_v6 }
 0x48c   :  { %v4889_v25 = vadd.f32 %v1503_v28, %v1493_v2  ;;  %v1598_v28 = vsub.f32 %v6658_v45, %v4744_v8  ;;  %v1622_v18 = vmul.f32 %v1608_v50, %v4710_v22 }
 0x48d   :  { %2889 = vset.pattern.permute.xlu1 %v6778_v1  ;;  %v1571_v1 = vmul.f32 %v1549_v58, %v4706_v39  ;;  %v4886_v58 = vpop.permute.xlu0 %1611  ;;  %v1647_v53 = vmul.f32 %v4893_v24, %v4879_v14 }
 0x48e   :  { %2466 = vperm.xlu1 %2889, %v4817_v3   ;;  %6810 = vst [vmem:[#allocation61_spill] sm:$0xff] %v4886_v58  ;;  %v1618_v41 = vsub.f32 %v6669_v31, %v4886_v58  ;;  %v1580_v58 = vmul.f32 %v1548_v61, %v4728_v12  ;;  %v1620_v26 = vmul.f32 %v1598_v28, %v4696_v34  ;;  %vm1679_vm14 = vcmp.ge.f32.partialorder %v4889_v25, 0.0 }
 0x48f   :  { %v4871_v43 = vpop.permute.xlu1 %1802  ;;  %v1575_v46 = vadd.f32 %v1573_v27, %v1571_v1  ;;  %v1490_v1 = vmul.f32 %v4710_v22, %v1460_v0  ;;  %v1630_v0 = vmul.f32 %v1598_v28, %v4728_v12 }
 0x490   :  { %6809 = vst [vmem:[#allocation19_spill] sm:$0xff] %v4871_v43  ;;  %v4884_v43 = vadd.f32 %v1637_v19, %v1635_v9  ;;  %v1632_v19 = vmul.f32 %v1608_v50, %v4730_v11  ;;  %v1636_v8 = vmul.f32 %v1618_v41, %v4651_v5 }
 0x491   :  { %v4898_v27 = vadd.f32 %v1577_v16, %v1575_v46  ;;  %v1582_v16 = vmul.f32 %v1558_v47, %v4730_v11  ;;  %v1526_v46 = vadd.f32 %v1524_v49, %v1514_v48  ;;  %v1626_v47 = vmul.f32 %v1618_v41, %v4718_v54 }
 0x492   :  { %v1649_v15 = vmul.f32 %v4884_v43, %v4889_v25  ;;  %v1624_v49 = vadd.f32 %v1622_v18, %v1620_v26  ;;  %v1586_v41 = vmul.f32 %v4844_v33, %v4651_v5  ;;  %v1576_v26 = vmul.f32 %v4844_v33, %v4718_v54 }
 0x493   :  { %v2416_v36 = vpop.permute.xlu1 %2415  ;;  %v1653_v13 = vmul.f32 %v4884_v43, %v4898_v27  ;;  %v1584_v48 = vadd.f32 %v1582_v16, %v1580_v58  ;;  %vm1683_vm8 = vcmp.le.f32.partialorder %v4898_v27, 0.0 }
 0x494   :  { %v2420_v9 = vsub.f32 %v4611_v4, %v2416_v36  ;;  %v1655_v4 = vmul.f32 %v4893_v24, %v4882_v30  ;;  %v1570_v36 = vmul.f32 %v1548_v61, %v4696_v34  ;;  %v4928_v50 = vsub.f32 %v1647_v53, %v1649_v15 }
 0x495   :  { %v1634_v61 = vadd.f32 %v1632_v19, %v1630_v0  ;;  %v1641_v53 = vmul.f32 %v4882_v30, %v4889_v25  ;;  %v1643_v15 = vmul.f32 %v4898_v27, %v4879_v14  ;;  %v4947_v58 = vadd.f32 %v1626_v47, %v1624_v49 }
 0x496   :  { %2470 = vperm.xlu1 %2889, %v2420_v9   ;;  %2428 = vperm.xlu0 %2887, %v2420_v9   ;;  %v1574_v52 = vadd.f32 %v1572_v42, %v1570_v36  ;;  %v4930_v23 = vsub.f32 %v1653_v13, %v1655_v4  ;;  %v1492_v42 = vadd.f32 %v1490_v1, %v1480_v62  ;;  %vm1687_vm10 = vcmp.le.f32.partialorder %v4928_v50, 0.0 }
 0x497   :  { %v4918_v2 = vpop.permute.xlu1 %1845  ;;  %6811 = vst [vmem:[#allocation18_spill] sm:$0xff] %v4947_v58  ;;  %v4959_v1 = vadd.f32 %v1586_v41, %v1584_v48  ;;  %v4963_v33 = vsub.f32 %v1641_v53, %v1643_v15  ;;  %v1711_v47 = vsub.f32 %v4889_v25, %v4898_v27  ;;  %v4993_v41 = vsub.f32 %v4882_v30, %v4898_v27 }
 0x498   :  { %v1759_v62 = vadd.f32 %v4930_v23, %v4928_v50  ;;  %v4957_v4 = vadd.f32 %v1576_v26, %v1574_v52  ;;  %vm1697_vm15 = vcmp.le.f32.partialorder %v4930_v23, 0.0 }
 0x499   :  { %6813 = vst [vmem:[#allocation41_spill] sm:$0xff] %v4959_v1  ;;  %v1654_v52 = vmul.f32 %v4947_v58, %v4959_v1  ;;  %vm1701_vm5 = vcmp.ge.f32.partialorder %v4993_v41, 0.0 }
 0x49a   :  { %2890 = vset.pattern.permute.xlu1 %v6780_v32  ;;  %2888 = vset.pattern.permute.xlu0 %v6780_v32  ;;  %v1536_v32 = vmul.f32 %v4651_v5, %v4851_v6  ;;  %6812 = vst [vmem:[#allocation10_spill] sm:$0xff] %v4957_v4  ;;  %v6814_v6 = vmov 15   ;;  %v1727_v5 = vsub.f32 %v4879_v14, %v4884_v43  ;;  %vm5126_vm4 = vmand %vm1697_vm15, %vm1701_vm5 }
 0x49b   :  { %2512 = vperm.xlu1 %2890, %v2420_v9   ;;  %1887 = vperm.xlu0 %2888, %v4753_v59   ;;  %v4935_v28 = vpop.permute.xlu1 %1849  ;;  %v4949_v59 = vadd.f32 %v1636_v8, %v1634_v61  ;;  %v4951_v9 = vadd.f32 %v1502_v37, %v1492_v42  ;;  %v4997_v42 = vsub.f32 %v4893_v24, %v4884_v43 }
 0x49c   :  { %v4955_v13 = vadd.f32 %v1536_v32, %v1526_v46  ;;  %v1713_v32 = vand.u32 2147483647, %v1711_v47 }
 0x49d   :  { %v1648_v18 = vmul.f32 %v4949_v59, %v4951_v9  ;;  %v1652_v19 = vmul.f32 %v4949_v59, %v4957_v4  ;;  %v1710_v37 = vsub.f32 %v4951_v9, %v4957_v4  ;;  %v1640_v49 = vmul.f32 %v4959_v1, %v4951_v9 }
 0x49e   :  { %v1646_v8 = vmul.f32 %v4947_v58, %v4955_v13  ;;  %v1642_v61 = vmul.f32 %v4957_v4, %v4955_v13  ;;  %vm1715_vm3 = vcmp.gt.f32.partialorder %v1713_v32, 1e-12  ;;  %v1726_v32 = vsub.f32 %v4955_v13, %v4949_v59 }
 0x49f   :  { %2508 = vperm.xlu0 %2888, %v4817_v3   ;;  %2892 = vset.pattern.permute.xlu1 %v6814_v6  ;;  %v1761_v3 = vadd.f32 %v1759_v62, %v4963_v33  ;;  %v4981_v36 = vsub.f32 %v1652_v19, %v1654_v52  ;;  %v1712_v53 = vand.u32 2147483647, %v1710_v37  ;;  %vm1678_vm5 = vcmp.ge.f32.partialorder %v4951_v9, 0.0 }
 0x4a0   :  { %v4965_v16 = vpop.permute.xlu1 %2068  ;;  %v4979_v46 = vsub.f32 %v1646_v8, %v1648_v18  ;;  %v5003_v62 = vsub.f32 %v1640_v49, %v1642_v61  ;;  %v5014_v49 = vsub.f32 %v4947_v58, %v4949_v59  ;;  %v1728_v58 = vand.u32 2147483647, %v1726_v32 }
 0x4a1   :  { %6815 = vst [vmem:[#allocation29_spill] sm:$0xff] %v4965_v16  ;;  %v1763_v48 = vand.u32 2147483647, %v1761_v3  ;;  %vm1714_vm0 = vcmp.gt.f32.partialorder %v1712_v53, 1e-12 }
 0x4a2   :  { %v1758_v15 = vadd.f32 %v4981_v36, %v4979_v46  ;;  %v1716_v19 = vsel %vm1714_vm0, %v1710_v37, 1.0  ;;  %6819 = vst [vmem:[#allocation63_spill] sm:$0xff] %v5014_v49  ;;  %v1729_v37 = vand.u32 2147483647, %v1727_v5  ;;  %vm1730_vm11 = vcmp.gt.f32.partialorder %v1728_v58, 1e-12 }
 0x4a3   :  { %2891 = vset.pattern.permute.xlu0 %v6814_v6  ;;  %vm1765_vm6 = vcmp.gt.f32.partialorder %v1763_v48, 1e-12  ;;  %v1743_v6 = vadd.f32 %v4997_v42, %v4993_v41  ;;  %vm1676_vm0 = vcmp.le.f32.partialorder %v5003_v62, 0.0 }
 0x4a4   :  { %v1767_v8 = vsel %vm1765_vm6, %v1761_v3, 1.0  ;;  %v1760_v18 = vadd.f32 %v1758_v15, %v5003_v62  ;;  %v5018_v3 = vsub.f32 %v4959_v1, %v4957_v4  ;;  %vm1731_vm1 = vcmp.gt.f32.partialorder %v1729_v37, 1e-12 }
 0x4a5   :  { %v4983_v0 = vpop.permute.xlu1 %2074  ;;  %2937 = vrcp.f32 %v1767_v8  ;;  %v1745_v48 = vand.u32 2147483647, %v1743_v6  ;;  %v1733_v1 = vsel %vm1731_vm1, %v1727_v5, 1.0  ;;  %vm1689_vm6 = vcmp.ge.f32.partialorder %v4879_v14, 0.0 }
 0x4a6   :  { %6816 = vst [vmem:[#allocation13_spill] sm:$0xff] %v4983_v0  ;;  %v1717_v0 = vsel %vm1715_vm3, %v1711_v47, 1.0  ;;  %v1762_v61 = vand.u32 2147483647, %v1760_v18  ;;  %2939 = vrcp.f32 %v1716_v19  ;;  %v1742_v15 = vadd.f32 %v5014_v49, %v5018_v3 }
 0x4a7   :  { %2941 = vrcp.f32 %v1717_v0  ;;  %vm1747_vm13 = vcmp.gt.f32.partialorder %v1745_v48, 1e-12  ;;  %vm1700_vm9 = vcmp.ge.f32.partialorder %v5018_v3, 0.0  ;;  %vm1688_vm3 = vcmp.ge.f32.partialorder %v4955_v13, 0.0 }
 0x4a8   :  { %vm1764_vm7 = vcmp.gt.f32.partialorder %v1762_v61, 1e-12  ;;  %v1749_v47 = vsel %vm1747_vm13, %v1743_v6, 1.0  ;;  %vm1707_vm13 = vcmp.ge.f32.partialorder %v4997_v42, 0.0 }
 0x4a9   :  { %v1766_v8 = vsel %vm1764_vm7, %v1760_v18, 1.0  ;;  %2943 = vrcp.f32 %v1749_v47  ;;  %v1732_v18 = vsel %vm1730_vm11, %v1726_v32, 1.0  ;;  %vm1693_vm11 = vcmp.le.f32.partialorder %v4884_v43, 0.0  ;;  %vm5158_vm15 = vmand %vm5126_vm4, %vm1707_vm13 }
 0x4aa   :  { %v5001_v26 = vpop.permute.xlu1 %2162  ;;  %2945 = vrcp.f32 %v1766_v8  ;;  %vm5171_vm7 = vmand %vm1687_vm10, %vm1689_vm6  ;;  %vm1696_vm10 = vcmp.le.f32.partialorder %v4981_v36, 0.0  ;;  %vm1686_vm4 = vcmp.le.f32.partialorder %v4979_v46, 0.0  ;;  %vm1665_vm6 = vcmp.ge.f32.partialorder %v4898_v27, 0.0 }
 0x4ab   :  { %6817 = vst [vmem:[#allocation11_spill] sm:$0xff] %v5001_v26  ;;  %v1744_v26 = vand.u32 2147483647, %v1742_v15  ;;  %2947 = vrcp.f32 %v1733_v1 }
 0x4ad   :  { %vm1746_vm2 = vcmp.gt.f32.partialorder %v1744_v26, 1e-12 }
 0x4ae   :  { %v5008_v52 = vpop.permute.xlu1 %2166  ;;  %v1748_v61 = vsel %vm1746_vm2, %v1742_v15, 1.0  ;;  %vm1677_vm2 = vcmp.le.f32.partialorder %v4963_v33, 0.0 }
 0x4af   :  { %6818 = vst [vmem:[#allocation62_spill] sm:$0xff] %v5008_v52  ;;  %2949 = vrcp.f32 %v1748_v61  ;;  %vm5200_vm13 = vmand %vm1677_vm2, %vm1679_vm14 }
 0x4b0   :  { %2951 = vrcp.f32 %v1732_v18  ;;  %vm5217_vm14 = vmand %vm5171_vm7, %vm1693_vm11  ;;  %vm1661_vm11 = vcmp.le.f32.partialorder %v4879_v14, 0.0 }
 0x4b1   :  { %vm5234_vm7 = vmand %vm1696_vm10, %vm1700_vm9 }
 0x4b2   :  { %v2938_v0 = vpop.eup %2937  ;;  %vm5251_vm9 = vmand %vm5200_vm13, %vm1683_vm8  ;;  %vm1659_vm8 = vcmp.le.f32.partialorder %v4889_v25, 0.0 }
 0x4b3   :  { %v5020_v53 = vpop.permute.xlu1 %2176  ;;  %v1771_v6 = vmul.f32 %v2938_v0, %v4928_v50  ;;  %v1777_v15 = vmul.f32 %v2938_v0, %v4963_v33  ;;  %vm5261_vm10 = vmand %vm1686_vm4, %vm1688_vm3 }
 0x4b4   :  { %6820 = vst [vmem:[#allocation64_spill] sm:$0xff] %v5020_v53  ;;  %v2940_v53 = vpop.eup %2939  ;;  %vm5298_vm4 = vmand %vm1676_vm0, %vm1678_vm5  ;;  %vm6882_vm0 = vcmp.le.f32.partialorder %v4893_v24, %v4884_v43  ;;  %vm6883_vm5 = vcmp.ge.f32.partialorder %v4884_v43, 0.0  ;;  %v6890_v24 = vld [vmem:[#allocation33_spill] sm:$0xff] }
 0x4b5   :  { %v2942_v37 = vpop.eup %2941  ;;  %v1720_v5 = vmul.f32 %v2940_v53, %v4951_v9  ;;  %v1781_v44 = vmax.f32 %v1777_v15, 0.0  ;;  %vm5317_vm13 = vmand %vm6883_vm5, %vm6882_vm0  ;;  %vm6894_vm5 = vcmp.le.f32.partialorder %v4882_v30, %v4898_v27 }
 0x4b6   :  { %v1721_v47 = vmul.f32 %v2942_v37, %v4889_v25  ;;  %v2944_v8 = vpop.eup %2943 }
 0x4b7   :  { %v2946_v1 = vpop.eup %2945  ;;  %v1722_v16 = vmax.f32 %v1720_v5, 0.0 }
 0x4b8   :  { %v5026_v19 = vpop.permute.xlu1 %2212  ;;  %v1723_v58 = vmax.f32 %v1721_v47, 0.0  ;;  %v2948_v32 = vpop.eup %2947 }
 0x4b9   :  { %6821 = vst [vmem:[#allocation65_spill] sm:$0xff] %v5026_v19  ;;  %v1773_v19 = vmax.f32 %v1771_v6, 0.0  ;;  %v1770_v6 = vmul.f32 %v2946_v1, %v4979_v46  ;;  %v1724_v37 = vmin.f32 %v1722_v16, 1.0  ;;  %v5055_v16 = vsub.f32 %v6658_v45, %v4779_v51 }
 0x4ba   :  { %v1725_v18 = vmin.f32 %v1723_v58, 1.0  ;;  %v5059_v58 = vsub.f32 %v6660_v21, %v4783_v60  ;;  %v6875_v46 = vmov 0 }
 0x4bb   :  { %v1772_v4 = vmax.f32 %v1770_v6, 0.0  ;;  %v1822_v0 = vmul.f32 %v1724_v37, %v4696_v34 }
 0x4bc   :  { %v2950_v5 = vpop.eup %2949  ;;  %v1823_v49 = vmul.f32 %v1725_v18, %v4706_v39  ;;  %v1907_v60 = vmul.f32 %v1725_v18, %v4725_v63 }
 0x4bd   :  { %v5028_v48 = vpop.permute.xlu1 %2222  ;;  %v1752_v51 = vmul.f32 %v2950_v5, %v5018_v3 }
 0x4be   :  { %6822 = vst [vmem:[#allocation66_spill] sm:$0xff] %v5028_v48  ;;  %v5037_v48 = vmin.f32 %v1773_v19, 1.0 }
 0x4c0   :  { %v1779_v53 = vsub.f32 1.0, %v5037_v48  ;;  %v1837_v42 = vmul.f32 %v5037_v48, %v4713_v38 }
 0x4c1   :  { %v5031_v52 = vpop.permute.xlu1 %2226 }
 0x4c2   :  { %6823 = vst [vmem:[#allocation67_spill] sm:$0xff] %v5031_v52  ;;  %v1753_v52 = vmul.f32 %v2944_v8, %v4993_v41  ;;  %v5046_v47 = vmin.f32 %v1779_v53, %v1781_v44  ;;  %v1864_v8 = vmul.f32 %v1724_v37, %v4710_v22  ;;  %v5064_v44 = vsub.f32 %v6660_v21, %v4787_v29  ;;  %v2952_v53 = vpop.eup %2951 }
 0x4c4   :  { %v1755_v19 = vmax.f32 %v1753_v52, 0.0  ;;  %v1865_v52 = vmul.f32 %v1725_v18, %v4713_v38  ;;  %6827 = vst [vmem:[#allocation71_spill] sm:$0xff] %v5064_v44  ;;  %v1789_v29 = vmul.f32 %v5046_v47, %v4812_v55  ;;  %v6836_v44 = vld [vmem:[#allocation9_spill] sm:$0xff] }
 0x4c6   :  { %v5035_v26 = vpop.permute.xlu1 %2088  ;;  %v5068_v6 = vmin.f32 %v1755_v19, 1.0  ;;  %v5086_v19 = vadd.f32 %v1823_v49, %v4664_v17  ;;  %v5098_v18 = vadd.f32 %v1865_v52, %v4675_v56  ;;  %v5113_v52 = vsub.f32 %v6669_v31, %v4803_v57  ;;  %v5134_v57 = vpop.permute.xlu0 %2232 }
 0x4c7   :  { %6824 = vst [vmem:[#allocation68_spill] sm:$0xff] %v5035_v26  ;;  %v1737_v26 = vmul.f32 %v2948_v32, %v4879_v14  ;;  %v1785_v32 = vmul.f32 %v5037_v48, %v4706_v39  ;;  %v5083_v39 = vadd.f32 %v1864_v8, %v4669_v35  ;;  %v1736_v8 = vmul.f32 %v2952_v53, %v4955_v13 }
 0x4c8   :  { %6828 = vst [vmem:[#allocation72_spill] sm:$0xff] %v5068_v6  ;;  %6833 = vst [vmem:[#allocation77_spill] sm:$0xff] %v5113_v52 }
 0x4c9   :  { %v1739_v15 = vmax.f32 %v1737_v26, 0.0  ;;  %v5080_v26 = vadd.f32 %v1822_v0, %v4662_v7  ;;  %v1787_v49 = vadd.f32 %v1785_v32, %v4664_v17  ;;  %6842 = vst [vmem:[#allocation81_spill] sm:$0xff] %v5134_v57 }
 0x4cb   :  { %v5042_v61 = vpop.permute.xlu1 %2094  ;;  %v5100_v0 = vmin.f32 %v1739_v15, 1.0  ;;  %v6834_v15 = vld [vmem:[#allocation57_spill] sm:$0xff]  ;;  %v1791_v53 = vadd.f32 %v1789_v29, %v1787_v49  ;;  %v1738_v49 = vmax.f32 %v1736_v8, 0.0  ;;  %v1853_v8 = vmul.f32 %v4935_v28, %v5068_v6 }
 0x4cc   :  { %6825 = vst [vmem:[#allocation69_spill] sm:$0xff] %v5042_v61  ;;  %v5071_v61 = vmin.f32 %v1772_v4, 1.0  ;;  %v5092_v4 = vsub.f32 %v6658_v45, %v4799_v10  ;;  %v1754_v10 = vmax.f32 %v1752_v51, 0.0  ;;  %v6852_v51 = vld [vmem:[#allocation19_spill] sm:$0xff] }
 0x4cd   :  { %v1817_v23 = vmul.f32 %v5100_v0, %v4812_v55  ;;  %v5192_v38 = vmin.f32 %v1738_v49, 1.0  ;;  %v6858_v49 = vld [vmem:[#allocation36_spill] sm:$0xff]  ;;  %v6938_v55 = vmov 0 }
 0x4ce   :  { %6829 = vst [vmem:[#allocation73_spill] sm:$0xff] %v5071_v61  ;;  %6831 = vst [vmem:[#allocation75_spill] sm:$0xff] %v5092_v4  ;;  %v5117_v32 = vmul.f32 %v5092_v4, %v6834_v15  ;;  %v1836_v50 = vmul.f32 %v5071_v61, %v4710_v22  ;;  %v6856_v22 = vld [vmem:[#allocation40_spill] sm:$0xff] }
 0x4cf   :  { %6853 = vst [vmem:[#allocation19_spill] sm:$0xff] %v5192_v38  ;;  %v1858_v36 = vmul.f32 %v5192_v38, %v6858_v49 }
 0x4d0   :  { %v5051_v11 = vpop.permute.xlu1 %2104  ;;  %6835 = vst [vmem:[#allocation78_spill] sm:$0xff] %v5117_v32  ;;  %v5147_v32 = vmin.f32 %v1754_v10, 1.0 }
 0x4d1   :  { %6826 = vst [vmem:[#allocation70_spill] sm:$0xff] %v5051_v11  ;;  %v5075_v11 = vmul.f32 %v1724_v37, %v4718_v54  ;;  %v1776_v37 = vmul.f32 %v2946_v1, %v5003_v62  ;;  %v1778_v54 = vsub.f32 1.0, %v5071_v61  ;;  %v5109_v1 = vadd.f32 %v1907_v60, %v4684_v40  ;;  %v6840_v60 = vld [vmem:[#allocation58_spill] sm:$0xff] }
 0x4d2   :  { %v5132_v41 = vmul.f32 %v6840_v60, %v5059_v58  ;;  %v6866_v60 = vld [vmem:[#allocation26_spill] sm:$0xff]  ;;  %v1860_v62 = vadd.f32 %v1858_v36, %v4669_v35  ;;  %v6891_v36 = vld [vmem:[#allocation68_spill] sm:$0xff] }
 0x4d3   :  { %6830 = vst [vmem:[#allocation74_spill] sm:$0xff] %v5075_v11  ;;  %v1811_v11 = vmul.f32 %v4795_v20, %v5068_v6  ;;  %6832 = vst [vmem:[#allocation76_spill] sm:$0xff] %v5109_v1  ;;  %v5121_v20 = vmul.f32 %v6836_v44, %v5055_v16  ;;  %v1780_v1 = vmax.f32 %v1776_v37, 0.0  ;;  %v6862_v6 = vld [vmem:[#allocation46_spill] sm:$0xff] }
 0x4d4   :  { %v5088_v5 = vpop.permute.xlu1 %2108  ;;  %6841 = vst [vmem:[#allocation80_spill] sm:$0xff] %v5132_v41  ;;  %v6844_v41 = vld [vmem:[#allocation56_spill] sm:$0xff] }
 0x4d5   :  { %6837 = vst [vmem:[#allocation79_spill] sm:$0xff] %v5121_v20  ;;  %v1813_v37 = vadd.f32 %v1811_v11, %v6844_v41  ;;  %6845 = vst [vmem:[#allocation56_spill] sm:$0xff] %v5147_v32  ;;  %v5149_v4 = vmin.f32 %v1778_v54, %v1780_v1  ;;  %v5164_v11 = vsub.f32 %v6669_v31, %v5134_v57 }
 0x4d6   :  { %v1784_v1 = vmul.f32 %v5071_v61, %v4696_v34  ;;  %v1810_v57 = vmul.f32 %v6852_v51, %v5147_v32  ;;  %v1859_v51 = vmul.f32 %v5100_v0, %v6856_v22  ;;  %v1855_v20 = vadd.f32 %v1853_v8, %v6862_v6 }
 0x4d7   :  { %6846 = vst [vmem:[#allocation83_spill] sm:$0xff] %v5149_v4  ;;  %6849 = vst [vmem:[#allocation84_spill] sm:$0xff] %v5164_v11  ;;  %v1815_v10 = vsel %vm5158_vm15, %v1813_v37, %v1791_v53  ;;  %v1852_v11 = vmul.f32 %v4918_v2, %v5147_v32  ;;  %v1819_v53 = vadd.f32 %v1817_v23, %v4664_v17  ;;  %v6861_v32 = vld [vmem:[#allocation63_spill] sm:$0xff] }
 0x4d8   :  { %v1841_v2 = vmul.f32 %v5046_v47, %v6856_v22  ;;  %v1788_v23 = vmul.f32 %v5149_v4, %v4728_v12  ;;  %v1840_v37 = vmul.f32 %v5149_v4, %v6858_v49  ;;  %vm1706_vm2 = vcmp.ge.f32.partialorder %v6861_v32, 0.0  ;;  %v6910_v14 = vld [vmem:[#allocation70_spill] sm:$0xff] }
 0x4d9   :  { %v5139_v29 = vpop.permute.xlu1 %2132  ;;  %v1821_v61 = vsel %vm5217_vm14, %v1819_v53, %v1815_v10  ;;  %v1839_v4 = vadd.f32 %v1837_v42, %v4675_v56  ;;  %v1786_v22 = vadd.f32 %v1784_v1, %v4662_v7  ;;  %v1812_v52 = vadd.f32 %v1810_v57, %v6866_v60  ;;  %v6867_v53 = vld [vmem:[#allocation35_spill] sm:$0xff]  ;;  %v6870_v1 = vld [vmem:[#allocation48_spill] sm:$0xff]  ;;  %vm5277_vm3 = vmand %vm5234_vm7, %vm1706_vm2 }
 0x4da   :  { %6843 = vst [vmem:[#allocation82_spill] sm:$0xff] %v5139_v29  ;;  %v6863_v29 = vld [vmem:[#allocation10_spill] sm:$0xff]  ;;  %v1838_v10 = vadd.f32 %v1836_v50, %v4669_v35  ;;  %v1854_v42 = vadd.f32 %v1852_v11, %v6867_v53  ;;  %v1816_v8 = vmul.f32 %v5192_v38, %v4728_v12  ;;  %v1901_v11 = vmul.f32 %v5100_v0, %v6870_v1  ;;  %v6873_v38 = vld [vmem:[#allocation29_spill] sm:$0xff] }
 0x4db   :  { %vm1682_vm1 = vcmp.le.f32.partialorder %v6863_v29, 0.0  ;;  %v1843_v57 = vadd.f32 %v1841_v2, %v1839_v4  ;;  %v1790_v50 = vadd.f32 %v1788_v23, %v1786_v22  ;;  %v1861_v34 = vadd.f32 %v1859_v51, %v4675_v56  ;;  %v6878_v23 = vld [vmem:[#allocation62_spill] sm:$0xff]  ;;  %v6879_v51 = vld [vmem:[#allocation64_spill] sm:$0xff] }
 0x4dc   :  { %v1842_v49 = vadd.f32 %v1840_v37, %v1838_v10  ;;  %v5268_v53 = vsub.f32 %v6658_v45, %v6873_v38  ;;  %v6876_v46 = vsel %vm5277_vm3, 4294967295, %v6875_v46  ;;  %v1827_v0 = vsel %vm5251_vm9, %v5086_v19, %v1821_v61  ;;  %v6919_v38 = vld [vmem:[#allocation58_spill] sm:$0xff] }
 0x4dd   :  { %6877 = vst [vmem:[#allocation63_spill] sm:$0xff] %v6876_v46  ;;  %v1857_v2 = vsel %vm5158_vm15, %v1855_v20, %v1843_v57  ;;  %v5288_v37 = vsub.f32 %v6658_v45, %v6878_v23  ;;  %v5292_v32 = vsub.f32 %v6660_v21, %v6879_v51  ;;  %v1814_v61 = vsel %vm5277_vm3, %v1812_v52, %v1790_v50  ;;  %v6914_v51 = vld [vmem:[#allocation65_spill] sm:$0xff] }
 0x4de   :  { %v5206_v28 = vpop.permute.xlu1 %2138  ;;  %v1856_v19 = vsel %vm5277_vm3, %v1854_v42, %v1842_v49  ;;  %v2112_v20 = vmul.f32 %v5088_v5, %v5059_v58  ;;  %v1879_v22 = vmul.f32 %v5037_v48, %v4725_v63  ;;  %v1818_v10 = vadd.f32 %v1816_v8, %v4662_v7  ;;  %v5352_v49 = vpop.permute.xlu0 %2120  ;;  %v6916_v23 = vld [vmem:[#allocation69_spill] sm:$0xff] }
 0x4df   :  { %6857 = vst [vmem:[#allocation40_spill] sm:$0xff] %v5206_v28  ;;  %v2194_v42 = vmul.f32 %v5292_v32, %v5088_v5  ;;  %v1883_v58 = vmul.f32 %v5046_v47, %v6870_v1  ;;  %vm6886_vm2 = vcmp.le.f32.partialorder %v4949_v59, 0.0  ;;  %v6887_v63 = vmov 0 }
 0x4e0   :  { %vm5329_vm7 = vmand %vm5261_vm10, %vm6886_vm2  ;;  %v1829_v43 = vsel %vm5317_vm13, %v6890_v24, %v1827_v0  ;;  %v1863_v48 = vsel %vm5217_vm14, %v1861_v34, %v1857_v2  ;;  %v2102_v8 = vmul.f32 %v6834_v15, %v5268_v53  ;;  %v5342_v47 = vsub.f32 %v6669_v31, %v6891_v36  ;;  %v6893_v0 = vld [vmem:[#allocation18_spill] sm:$0xff]  ;;  %v6900_v24 = vld [vmem:[#allocation13_spill] sm:$0xff] }
 0x4e1   :  { %v6888_v63 = vsel %vm5329_vm7, 4294967295, %v6887_v63  ;;  %v1820_v1 = vsel %vm5329_vm7, %v1818_v10, %v1814_v61  ;;  %v1862_v12 = vsel %vm5329_vm7, %v1860_v62, %v1856_v19  ;;  %v2192_v50 = vmul.f32 %v5288_v37, %v6834_v15  ;;  %vm5366_vm2 = vmand %vm1665_vm6, %vm6894_vm5 }
 0x4e2   :  { %6889 = vst [vmem:[#allocation46_spill] sm:$0xff] %v6888_v63  ;;  %vm1672_vm0 = vcmp.le.f32.partialorder %v6893_v0, %v4949_v59  ;;  %v2114_v61 = vadd.f32 %v2112_v20, %v2102_v8  ;;  %v1881_v19 = vadd.f32 %v1879_v22, %v4684_v40  ;;  %vm5375_vm10 = vmand %vm5298_vm4, %vm1682_vm1  ;;  %v6897_v10 = vmov 0  ;;  %v6913_v0 = vld [vmem:[#allocation45_spill] sm:$0xff] }
 0x4e3   :  { %v5270_v4 = vpop.permute.xlu1 %2182  ;;  %v6898_v10 = vsel %vm5375_vm10, 4294967295, %v6897_v10  ;;  %v1869_v30 = vsel %vm5251_vm9, %v5098_v18, %v1863_v48  ;;  %v2196_v27 = vadd.f32 %v2194_v42, %v2192_v50  ;;  %v1831_v20 = vsel %vm5366_vm2, %v6844_v41, %v1829_v43  ;;  %v6901_v42 = vld [vmem:[#allocation11_spill] sm:$0xff]  ;;  %vm5412_vm1 = vmand %vm1659_vm8, %vm1661_vm11 }
 0x4e4   :  { %6874 = vst [vmem:[#allocation36_spill] sm:$0xff] %v5270_v4  ;;  %6899 = vst [vmem:[#allocation26_spill] sm:$0xff] %v6898_v10  ;;  %v1826_v54 = vsel %vm5375_vm10, %v5080_v26, %v1820_v1  ;;  %v1868_v22 = vsel %vm5375_vm10, %v5083_v39, %v1862_v12  ;;  %v2081_v8 = vsub.f32 %v6660_v21, %v6900_v24  ;;  %vm6905_vm6 = vcmp.ge.f32.partialorder %v4949_v59, 0.0  ;;  %v6911_v12 = vld [vmem:[#allocation71_spill] sm:$0xff]  ;;  %v6920_v24 = vld [vmem:[#allocation82_spill] sm:$0xff] }
 0x4e5   :  { %v2124_v18 = vmul.f32 %v5352_v49, %v5342_v47  ;;  %v2169_v48 = vsub.f32 %v6658_v45, %v6901_v42  ;;  %v5403_v43 = vadd.f32 %v1883_v58, %v1881_v19  ;;  %v5406_v26 = vadd.f32 %v1901_v11, %v4684_v40  ;;  %vm5421_vm4 = vmand %vm6905_vm6, %vm1672_vm0  ;;  %v6909_v58 = vld [vmem:[#allocation22_spill] sm:$0xff] }
 0x4e6   :  { %v6906_v1 = vmov 0  ;;  %v5428_v11 = vsel %vm5317_vm13, %v6909_v58, %v1869_v30  ;;  %v2111_v25 = vmul.f32 %v6910_v14, %v2081_v8  ;;  %v2193_v19 = vmul.f32 %v6911_v12, %v6910_v14 }
 0x4e7   :  { %v5344_v57 = vpop.permute.xlu1 %2186  ;;  %v6907_v1 = vsel %vm5421_vm4, 4294967295, %v6906_v1  ;;  %v2219_v30 = vsub.f32 %v6658_v45, %v6914_v51  ;;  %v5450_v58 = vsel %vm5412_vm1, %v4664_v17, %v1831_v20  ;;  %v2201_v17 = vmul.f32 %v2169_v48, %v6836_v44  ;;  %v6917_v20 = vld [vmem:[#allocation67_spill] sm:$0xff] }
 0x4e8   :  { %6892 = vst [vmem:[#allocation10_spill] sm:$0xff] %v5344_v57  ;;  %v5356_v34 = vsub.f32 %v6669_v31, %v5344_v57  ;;  %6908 = vst [vmem:[#allocation33_spill] sm:$0xff] %v6907_v1  ;;  %v5443_v57 = vsel %vm5421_vm4, %v6913_v0, %v1868_v22  ;;  %v2230_v1 = vsub.f32 %v6660_v21, %v6917_v20  ;;  %vm1664_vm0 = vcmp.ge.f32.partialorder %v6863_v29, 0.0 }
 0x4e9   :  { %v2145_v63 = vmul.f32 %v5206_v28, %v2081_v8  ;;  %v2203_v46 = vmul.f32 %v6911_v12, %v5206_v28  ;;  %vm1660_vm6 = vcmp.le.f32.partialorder %v4955_v13, 0.0 }
 0x4ea   :  { %v2198_v62 = vmul.f32 %v5356_v34, %v5352_v49  ;;  %v2244_v12 = vmul.f32 %v2230_v1, %v5088_v5 }
 0x4ec   :  { %v5399_v50 = vadd.f32 %v2198_v62, %v2196_v27  ;;  %v5401_v41 = vpop.permute.xlu1 %2236  ;;  %v5433_v27 = vadd.f32 %v2124_v18, %v2114_v61  ;;  %v6912_v62 = vld [vmem:[#allocation43_spill] sm:$0xff]  ;;  %v6915_v61 = vld [vmem:[#allocation66_spill] sm:$0xff] }
 0x4ed   :  { %6902 = vst [vmem:[#allocation48_spill] sm:$0xff] %v5401_v41  ;;  %v5438_v59 = vsel %vm5421_vm4, %v6912_v62, %v1826_v54  ;;  %v2229_v18 = vsub.f32 %v6660_v21, %v6915_v61  ;;  %v2101_v54 = vmul.f32 %v6916_v23, %v5055_v16  ;;  %v2191_v62 = vmul.f32 %v2169_v48, %v6916_v23  ;;  %v6918_v48 = vld [vmem:[#allocation77_spill] sm:$0xff] }
 0x4ee   :  { %v5459_v22 = vsub.f32 %v5433_v27, %v5399_v50  ;;  %v2189_v61 = vsub.f32 %v6669_v31, %v5270_v4 }
 0x4ef   :  { %v2113_v16 = vadd.f32 %v2111_v25, %v2101_v54  ;;  %v2195_v51 = vadd.f32 %v2193_v19, %v2191_v62  ;;  %v2243_v10 = vmul.f32 %v2229_v18, %v6910_v14  ;;  %v2253_v0 = vmul.f32 %v2229_v18, %v5206_v28  ;;  %v6921_v14 = vld [vmem:[#allocation79_spill] sm:$0xff] }
 0x4f0   :  { %v2204_v25 = vmul.f32 %v5292_v32, %v6919_v38  ;;  %v2251_v19 = vmul.f32 %v2219_v30, %v6836_v44  ;;  %v2241_v54 = vmul.f32 %v2219_v30, %v6916_v23  ;;  %v2334_v8 = vand.u32 2147483647, %v5459_v22  ;;  %v6922_v44 = vld [vmem:[#allocation84_spill] sm:$0xff] }
 0x4f1   :  { %v5472_v42 = vpop.permute.xlu1 %2116  ;;  %v2254_v62 = vmul.f32 %v2230_v1, %v6919_v38  ;;  %v2136_v28 = vmul.f32 %v6920_v24, %v5268_v53  ;;  %v2147_v32 = vadd.f32 %v2145_v63, %v6921_v14  ;;  %v2205_v30 = vadd.f32 %v2203_v46, %v2201_v17  ;;  %v6925_v14 = vld [vmem:[#allocation75_spill] sm:$0xff]  ;;  %v6926_v17 = vld [vmem:[#allocation78_spill] sm:$0xff] }
 0x4f2   :  { %v2123_v36 = vmul.f32 %v5472_v42, %v6918_v48  ;;  %v2197_v20 = vmul.f32 %v2189_v61, %v5472_v42  ;;  %v2245_v15 = vadd.f32 %v2243_v10, %v2241_v54  ;;  %v2247_v40 = vmul.f32 %v6922_v44, %v5472_v42 }
 0x4f3   :  { %v2255_v23 = vadd.f32 %v2253_v0, %v2251_v19  ;;  %v2240_v38 = vsub.f32 %v6669_v31, %v5401_v41  ;;  %vm5502_vm11 = vcmp.gt.f32.partialorder %v2334_v8, 1e-12  ;;  %v2202_v10 = vmul.f32 %v5288_v37, %v6920_v24  ;;  %v6927_v19 = vld [vmem:[#allocation41_spill] sm:$0xff]  ;;  %v6928_v37 = vld [vmem:[#allocation80_spill] sm:$0xff] }
 0x4f4   :  { %v5487_v4 = vadd.f32 %v2123_v36, %v2113_v16  ;;  %v5489_v18 = vadd.f32 %v2197_v20, %v2195_v51  ;;  %v2252_v0 = vmul.f32 %v6925_v14, %v6920_v24  ;;  %v2246_v20 = vadd.f32 %v2244_v12, %v6926_v17 }
 0x4f5   :  { %vm1666_vm8 = vcmp.le.f32.partialorder %v6927_v19, %v6863_v29  ;;  %v2148_v8 = vadd.f32 %v6928_v37, %v2136_v28  ;;  %v2338_v12 = vsel %vm5502_vm11, %v5459_v22, 1.0  ;;  %v2248_v14 = vmul.f32 %v2240_v38, %v5352_v49  ;;  %v6935_v29 = vld [vmem:[#allocation35_spill] sm:$0xff] }
 0x4f6   :  { %v2331_v36 = vsub.f32 %v5487_v4, %v5489_v18  ;;  %v5500_v1 = vpop.permute.xlu1 %2150  ;;  %vm1658_vm11 = vcmp.le.f32.partialorder %v4951_v9, 0.0  ;;  %v6942_v9 = vld [vmem:[#allocation47_spill] sm:$0xff] }
 0x4f7   :  { %v2157_v53 = vmul.f32 %v5500_v1, %v6918_v48  ;;  %v2207_v63 = vmul.f32 %v2189_v61, %v5500_v1  ;;  %v2257_v46 = vmul.f32 %v6922_v44, %v5500_v1  ;;  %v5519_v48 = vadd.f32 %v2247_v40, %v2245_v15 }
 0x4f8   :  { %v2333_v16 = vand.u32 2147483647, %v2331_v36 }
 0x4f9   :  { %v5521_v61 = vadd.f32 %v2157_v53, %v2147_v32  ;;  %v5523_v54 = vadd.f32 %v2207_v63, %v2205_v30  ;;  %v5525_v44 = vadd.f32 %v2257_v46, %v2255_v23  ;;  %v2206_v30 = vadd.f32 %v2204_v25, %v2202_v10 }
 0x4fa   :  { %vm2335_vm5 = vcmp.gt.f32.partialorder %v2333_v16, 1e-12  ;;  %v5532_v17 = vpop.permute.xlu1 %2154  ;;  %v5558_v25 = vadd.f32 %v2248_v14, %v2246_v20  ;;  %v6929_v20 = vld [vmem:[#allocation72_spill] sm:$0xff] }
 0x4fb   :  { %v2337_v41 = vsel %vm2335_vm5, %v2331_v36, 1.0  ;;  %v2261_v40 = vmul.f32 %v5523_v54, %v5487_v4  ;;  %v2263_v15 = vmul.f32 %v5489_v18, %v5521_v61  ;;  %v2267_v23 = vmul.f32 %v5519_v48, %v5521_v61 }
 0x4fc   :  { %2953 = vrcp.f32 %v2337_v41  ;;  %v2269_v28 = vmul.f32 %v5525_v44, %v5487_v4  ;;  %v2273_v22 = vmul.f32 %v5525_v44, %v5489_v18  ;;  %v2275_v32 = vmul.f32 %v5519_v48, %v5523_v54 }
 0x4fd   :  { %v2256_v36 = vadd.f32 %v2254_v62, %v2252_v0  ;;  %v2347_v51 = vsub.f32 %v5521_v61, %v5525_v44  ;;  %v2158_v53 = vmul.f32 %v5532_v17, %v5342_v47  ;;  %v2208_v46 = vmul.f32 %v5356_v34, %v5532_v17 }
 0x4fe   :  { %v5551_v41 = vsub.f32 %v2267_v23, %v2269_v28  ;;  %v5553_v63 = vsub.f32 %v2273_v22, %v2275_v32  ;;  %v2258_v16 = vmul.f32 %v2240_v38, %v5532_v17  ;;  %2955 = vrcp.f32 %v2338_v12 }
 0x4ff   :  { %v2349_v62 = vand.u32 2147483647, %v2347_v51  ;;  %v5560_v10 = vadd.f32 %v2158_v53, %v2148_v8  ;;  %v1892_v0 = vpop.permute.xlu1 %1891  ;;  %v5563_v47 = vsub.f32 %v2261_v40, %v2263_v15  ;;  %v5567_v23 = vadd.f32 %v2208_v46, %v2206_v30 }
 0x500   :  { %v2379_v37 = vadd.f32 %v5553_v63, %v5551_v41  ;;  %v5569_v28 = vadd.f32 %v2258_v16, %v2256_v36  ;;  %v1895_v8 = vmul.f32 %v1892_v0, %v6929_v20  ;;  %v6930_v30 = vsel %vm5366_vm2, %v6862_v6, %v5428_v11 }
 0x501   :  { %vm2351_vm5 = vcmp.gt.f32.partialorder %v2349_v62, 1e-12  ;;  %v2264_v38 = vmul.f32 %v5399_v50, %v5560_v10  ;;  %v2268_v34 = vmul.f32 %v5558_v25, %v5560_v10  ;;  %v2262_v40 = vmul.f32 %v5567_v23, %v5433_v27  ;;  %v6936_v62 = vld [vmem:[#allocation37_spill] sm:$0xff] }
 0x502   :  { %v2353_v12 = vsel %vm2351_vm5, %v2347_v51, 1.0  ;;  %v2381_v14 = vadd.f32 %v2379_v37, %v5563_v47  ;;  %v2270_v15 = vmul.f32 %v5569_v28, %v5433_v27  ;;  %v2274_v22 = vmul.f32 %v5569_v28, %v5399_v50  ;;  %vm5598_vm5 = vmand %vm1664_vm0, %vm1666_vm8 }
 0x503   :  { %2957 = vrcp.f32 %v2353_v12  ;;  %v2276_v32 = vmul.f32 %v5558_v25, %v5567_v23  ;;  %v1875_v36 = vsel %vm5412_vm1, %v4675_v56, %v6930_v30  ;;  %v6931_v51 = vmov 0 }
 0x504   :  { %v6932_v51 = vsel %vm5598_vm5, 4294967295, %v6931_v51  ;;  %v2383_v53 = vand.u32 2147483647, %v2381_v14  ;;  %v5602_v46 = vsub.f32 %v2268_v34, %v2270_v15  ;;  %v2348_v16 = vsub.f32 %v5560_v10, %v5569_v28 }
 0x505   :  { %6933 = vst [vmem:[#allocation18_spill] sm:$0xff] %v6932_v51  ;;  %v5608_v6 = vsub.f32 %v6658_v45, %v5450_v58  ;;  %v1830_v56 = vsel %vm5598_vm5, %v6866_v60, %v5438_v59  ;;  %v1872_v11 = vsel %vm5598_vm5, %v6935_v29, %v5443_v57  ;;  %v5618_v19 = vsub.f32 %v2274_v22, %v2276_v32  ;;  %v6944_v29 = vld [vmem:[#allocation60_spill] sm:$0xff] }
 0x506   :  { %v1897_v0 = vadd.f32 %v1895_v8, %v6936_v62  ;;  %vm2385_vm8 = vcmp.gt.f32.partialorder %v2383_v53, 1e-12  ;;  %v5621_v37 = vsub.f32 %v2262_v40, %v2264_v38  ;;  %v2350_v34 = vand.u32 2147483647, %v2348_v16  ;;  %v6941_v40 = vld [vmem:[#allocation76_spill] sm:$0xff] }
 0x507   :  { %6934 = vst [vmem:[#allocation22_spill] sm:$0xff] %v5608_v6  ;;  %v5624_v58 = vsub.f32 %v6660_v21, %v1875_v36  ;;  %v2387_v20 = vsel %vm2385_vm8, %v2381_v14, 1.0  ;;  %v2380_v60 = vadd.f32 %v5618_v19, %v5602_v46  ;;  %v5633_v57 = vsub.f32 %v5523_v54, %v5489_v18  ;;  %vm5646_vm8 = vmand %vm1658_vm11, %vm1660_vm6 }
 0x508   :  { %v1899_v59 = vsel %vm5158_vm15, %v1897_v0, %v5403_v43  ;;  %2959 = vrcp.f32 %v2387_v20  ;;  %vm2352_vm0 = vcmp.gt.f32.partialorder %v2350_v34, 1e-12  ;;  %v5640_v8 = vsub.f32 %v5519_v48, %v5525_v44 }
 0x509   :  { %6937 = vst [vmem:[#allocation71_spill] sm:$0xff] %v5624_v58  ;;  %v1905_v38 = vsel %vm5217_vm14, %v5406_v26, %v1899_v59  ;;  %v6939_v55 = vsel %vm5646_vm8, 4294967295, %v6938_v55  ;;  %v2954_v43 = vpop.eup %2953  ;;  %v2354_v12 = vsel %vm2352_vm0, %v2348_v16, 1.0  ;;  %v2382_v14 = vadd.f32 %v2380_v60, %v5621_v37  ;;  %v6943_v16 = vld [vmem:[#allocation27_spill] sm:$0xff]  ;;  %v6948_v60 = vld [vmem:[#allocation44_spill] sm:$0xff]  ;;  %v6949_v59 = vld [vmem:[#allocation73_spill] sm:$0xff] }
 0x50a   :  { %6940 = vst [vmem:[#allocation43_spill] sm:$0xff] %v6939_v55  ;;  %v1911_v33 = vsel %vm5251_vm9, %v6941_v40, %v1905_v38  ;;  %v1874_v26 = vsel %vm5646_vm8, %v4669_v35, %v1872_v11  ;;  %v2341_v13 = vmul.f32 %v2954_v43, %v5487_v4  ;;  %2961 = vrcp.f32 %v2354_v12  ;;  %v6945_v11 = vld [vmem:[#allocation19_spill] sm:$0xff] }
 0x50b   :  { %v1913_v15 = vsel %vm5317_vm13, %v6942_v9, %v1911_v33  ;;  %v1832_v22 = vsel %vm5646_vm8, %v4662_v7, %v1830_v56  ;;  %v2384_v32 = vand.u32 2147483647, %v2382_v14  ;;  %v2363_v30 = vadd.f32 %v5640_v8, %v5633_v57  ;;  %v2956_v36 = vpop.eup %2955 }
 0x50c   :  { %v1915_v3 = vsel %vm5366_vm2, %v6936_v62, %v1913_v15  ;;  %v1923_v35 = vmul.f32 %v5624_v58, %v5624_v58  ;;  %v2343_v53 = vmax.f32 %v2341_v13, 0.0  ;;  %v1900_v7 = vmul.f32 %v6945_v11, %v6944_v29  ;;  %v6951_v13 = vld [vmem:[#allocation83_spill] sm:$0xff]  ;;  %v6962_v58 = vld [vmem:[#allocation53_spill] sm:$0xff] }
 0x50d   :  { %v1917_v52 = vsel %vm5412_vm1, %v6943_v16, %v1915_v3  ;;  %v5677_v56 = vsub.f32 %v6660_v21, %v1874_v26  ;;  %vm2386_vm15 = vcmp.gt.f32.partialorder %v2384_v32, 1e-12  ;;  %v2365_v2 = vand.u32 2147483647, %v2363_v30  ;;  %v6953_v3 = vld [vmem:[#allocation69_spill] sm:$0xff]  ;;  %v6955_v16 = vld [vmem:[#allocation31_spill] sm:$0xff] }
 0x50e   :  { %v5680_v62 = vsub.f32 %v6669_v31, %v1917_v52  ;;  %v1921_v0 = vmul.f32 %v5608_v6, %v5608_v6  ;;  %v2345_v34 = vmin.f32 %v2343_v53, 1.0  ;;  %v2388_v20 = vsel %vm2386_vm15, %v2382_v14, 1.0  ;;  %v6963_v6 = vld [vmem:[#allocation9_spill] sm:$0xff] }
 0x50f   :  { %6946 = vst [vmem:[#allocation45_spill] sm:$0xff] %v5677_v56  ;;  %v1878_v39 = vmul.f32 %v6949_v59, %v6948_v60  ;;  %v5687_v38 = vsub.f32 %v6658_v45, %v1832_v22  ;;  %2963 = vrcp.f32 %v2388_v20  ;;  %vm2367_vm14 = vcmp.gt.f32.partialorder %v2365_v2, 1e-12  ;;  %v6956_v2 = vld [vmem:[#allocation74_spill] sm:$0xff] }
 0x510   :  { %6947 = vst [vmem:[#allocation77_spill] sm:$0xff] %v5680_v62  ;;  %v1925_v43 = vadd.f32 %v1923_v35, %v1921_v0  ;;  %v1927_v12 = vmul.f32 %v5680_v62, %v5680_v62  ;;  %v2958_v40 = vpop.eup %2957  ;;  %v2527_v33 = vmul.f32 %v2345_v34, %v5472_v42  ;;  %v2369_v26 = vsel %vm2367_vm14, %v2363_v30, 1.0  ;;  %v6958_v60 = vld [vmem:[#allocation70_spill] sm:$0xff] }
 0x511   :  { %6950 = vst [vmem:[#allocation82_spill] sm:$0xff] %v5687_v38  ;;  %v1882_v9 = vmul.f32 %v6951_v13, %v6944_v29  ;;  %v1922_v14 = vmul.f32 %v5677_v56, %v5677_v56  ;;  %v2357_v15 = vmul.f32 %v2958_v40, %v5521_v61  ;;  %2965 = vrcp.f32 %v2369_v26  ;;  %v5704_v53 = vpop.permute.xlu0 %2428  ;;  %v6959_v26 = vld [vmem:[#allocation28_spill] sm:$0xff] }
 0x512   :  { %v5697_v22 = vadd.f32 %v1927_v12, %v1925_v43  ;;  %v5701_v32 = vsub.f32 %v5567_v23, %v5399_v50  ;;  %v2443_v35 = vmul.f32 %v2345_v34, %v6953_v3  ;;  %6954 = vst [vmem:[#allocation84_spill] sm:$0xff] %v5704_v53  ;;  %v5708_v30 = vsub.f32 %v5558_v25, %v5569_v28 }
 0x513   :  { %v1880_v52 = vadd.f32 %v1878_v39, %v6955_v16  ;;  %v2359_v29 = vmax.f32 %v2357_v15, 0.0  ;;  %v2342_v11 = vmul.f32 %v2956_v36, %v5433_v27  ;;  %v5715_v0 = vadd.f32 %v6956_v2, %v6955_v16 }
 0x514   :  { %6952 = vst [vmem:[#allocation79_spill] sm:$0xff] %v5697_v22  ;;  %1989 = vmin.xlane.f32.xlu0 %v5697_v22  ;;  %v1920_v20 = vmul.f32 %v5687_v38, %v5687_v38  ;;  %v2485_v59 = vmul.f32 %v2345_v34, %v6958_v60  ;;  %v2364_v43 = vadd.f32 %v5708_v30, %v5701_v32  ;;  %v6964_v22 = vld [vmem:[#allocation40_spill] sm:$0xff]  ;;  %vm2317_vm13 = vcmp.le.f32.partialorder %v5553_v63, 0.0 }
 0x515   :  { %6957 = vst [vmem:[#allocation75_spill] sm:$0xff] %v5715_v0  ;;  %v5722_v12 = vadd.f32 %v1882_v9, %v1880_v52  ;;  %v5725_v39 = vadd.f32 %v1900_v7, %v6955_v16  ;;  %v2960_v40 = vpop.eup %2959  ;;  %v5728_v36 = vadd.f32 %v2527_v33, %v6959_v26  ;;  %v2361_v13 = vmin.f32 %v2359_v29, 1.0 }
 0x516   :  { %v2344_v15 = vmax.f32 %v2342_v11, 0.0  ;;  %v5730_v2 = vadd.f32 %v1922_v14, %v1920_v20  ;;  %v2391_v62 = vmul.f32 %v2960_v40, %v5551_v41  ;;  %v2397_v34 = vmul.f32 %v2960_v40, %v5563_v47  ;;  %v6965_v11 = vld [vmem:[#allocation13_spill] sm:$0xff]  ;;  %v1888_v40 = vpop.permute.xlu0 %1887 }
 0x517   :  { %6960 = vst [vmem:[#allocation78_spill] sm:$0xff] %v5728_v36  ;;  %v5735_v56 = vadd.f32 %v2443_v35, %v6962_v58  ;;  %v2366_v9 = vand.u32 2147483647, %v2364_v43  ;;  %v2962_v52 = vpop.eup %2961  ;;  %v2521_v7 = vmul.f32 %v2361_v13, %v5500_v1  ;;  %v2437_v38 = vmul.f32 %v2361_v13, %v6963_v6 }
 0x518   :  { %6961 = vst [vmem:[#allocation41_spill] sm:$0xff] %v5730_v2  ;;  %v2479_v33 = vmul.f32 %v2361_v13, %v6964_v22  ;;  %v2346_v21 = vmin.f32 %v2344_v15, 1.0  ;;  %v2393_v29 = vmax.f32 %v2391_v62, 0.0  ;;  %v2358_v14 = vmul.f32 %v2962_v52, %v5560_v10  ;;  %v6967_v62 = vld [vmem:[#allocation57_spill] sm:$0xff] }
 0x519   :  { %v5742_v20 = vadd.f32 %v2485_v59, %v6965_v11  ;;  %vm2368_vm9 = vcmp.gt.f32.partialorder %v2366_v9, 1e-12  ;;  %v2401_v2 = vmax.f32 %v2397_v34, 0.0  ;;  %v5745_v35 = vadd.f32 %v2521_v7, %v6959_v26  ;;  %v2424_v59 = vpop.permute.xlu1 %2423  ;;  %v6968_v9 = vld [vmem:[#allocation56_spill] sm:$0xff] }
 0x51a   :  { %v5748_v45 = vadd.f32 %v2437_v38, %v6962_v58  ;;  %v2370_v31 = vsel %vm2368_vm9, %v2364_v43, 1.0  ;;  %v2395_v55 = vmin.f32 %v2393_v29, 1.0  ;;  %v2360_v16 = vmax.f32 %v2358_v14, 0.0 }
 0x51b   :  { %6966 = vst [vmem:[#allocation80_spill] sm:$0xff] %v5745_v35  ;;  %2967 = vrcp.f32 %v2370_v31  ;;  %v2444_v13 = vmul.f32 %v2346_v21, %v6967_v62  ;;  %vm2307_vm2 = vcmp.le.f32.partialorder %v5551_v41, 0.0  ;;  %v5754_v15 = vadd.f32 %v2479_v33, %v6965_v11 }
 0x51c   :  { %v2486_v34 = vmul.f32 %v2346_v21, %v5088_v5  ;;  %v1894_v52 = vmul.f32 %v1888_v40, %v6968_v9  ;;  %v5759_v38 = vmul.f32 %v2346_v21, %v5352_v49  ;;  %v2964_v43 = vpop.eup %2963  ;;  %v2399_v7 = vsub.f32 1.0, %v2395_v55  ;;  %v6969_v40 = vld [vmem:[#allocation29_spill] sm:$0xff] }
 0x51d   :  { %v2499_v29 = vmul.f32 %v2395_v55, %v5472_v42  ;;  %v2362_v31 = vmin.f32 %v2360_v16, 1.0  ;;  %vm2321_vm6 = vcmp.ge.f32.partialorder %v5633_v57, 0.0  ;;  %v2405_v14 = vmul.f32 %v2395_v55, %v6953_v3 }
 0x51e   :  { %v2392_v33 = vmul.f32 %v2964_v43, %v5602_v46  ;;  %v2398_v36 = vmul.f32 %v2964_v43, %v5621_v37  ;;  %vm2309_vm11 = vcmp.ge.f32.partialorder %v5521_v61, 0.0  ;;  %v2457_v21 = vmul.f32 %v2395_v55, %v6958_v60  ;;  %v2966_v35 = vpop.eup %2965  ;;  %vm5819_vm0 = vmand %vm2317_vm13, %vm2321_vm6 }
 0x51f   :  { %v5770_v9 = vadd.f32 %v2444_v13, %v6969_v40  ;;  %v2403_v42 = vmin.f32 %v2399_v7, %v2401_v2  ;;  %v2501_v16 = vadd.f32 %v2499_v29, %v6959_v26  ;;  %v2522_v53 = vmul.f32 %v2362_v31, %v5532_v17  ;;  %v6971_v13 = vld [vmem:[#allocation68_spill] sm:$0xff]  ;;  %vm5829_vm1 = vmand %vm2307_vm2, %vm2309_vm11 }
 0x520   :  { %v2407_v3 = vadd.f32 %v2405_v14, %v6962_v58  ;;  %v2394_v51 = vmax.f32 %v2392_v33, 0.0  ;;  %v2402_v0 = vmax.f32 %v2398_v36, 0.0  ;;  %v2373_v43 = vmul.f32 %v2966_v35, %v5633_v57  ;;  %v6973_v14 = vld [vmem:[#allocation58_spill] sm:$0xff] }
 0x521   :  { %6970 = vst [vmem:[#allocation72_spill] sm:$0xff] %v5770_v9  ;;  %v2459_v55 = vadd.f32 %v2457_v21, %v6965_v11  ;;  %v2503_v60 = vmul.f32 %v2403_v42, %v5500_v1  ;;  %v5781_v2 = vadd.f32 %v2522_v53, %v6971_v13  ;;  %v2409_v36 = vmul.f32 %v2403_v42, %v6963_v6  ;;  %v2467_v53 = vpop.permute.xlu1 %2466  ;;  %v6974_v6 = vld [vmem:[#allocation23_spill] sm:$0xff] }
 0x522   :  { %v2461_v7 = vmul.f32 %v2403_v42, %v6964_v22  ;;  %v2396_v35 = vmin.f32 %v2394_v51, 1.0  ;;  %v2375_v1 = vmax.f32 %v2373_v43, 0.0  ;;  %v2438_v29 = vmul.f32 %v2362_v31, %v6920_v24 }
 0x523   :  { %6972 = vst [vmem:[#allocation35_spill] sm:$0xff] %v5781_v2  ;;  %v2480_v33 = vmul.f32 %v2362_v31, %v6973_v14  ;;  %v5794_v21 = vadd.f32 %v2503_v60, %v2501_v16  ;;  %v2411_v9 = vadd.f32 %v2409_v36, %v2407_v3  ;;  %v5798_v22 = vadd.f32 %v2486_v34, %v6974_v6 }
 0x524   :  { %v2463_v2 = vadd.f32 %v2461_v7, %v2459_v55  ;;  %v2400_v42 = vsub.f32 1.0, %v2396_v35  ;;  %v2500_v51 = vmul.f32 %v2396_v35, %v5352_v49  ;;  %vm2285_vm15 = vcmp.ge.f32.partialorder %v5489_v18, 0.0  ;;  %v6975_v49 = vld [vmem:[#allocation59_spill] sm:$0xff] }
 0x525   :  { %v2377_v43 = vmin.f32 %v2375_v1, 1.0  ;;  %v2406_v26 = vmul.f32 %v2396_v35, %v6967_v62  ;;  %v5807_v31 = vadd.f32 %v2438_v29, %v6969_v40  ;;  %v2458_v34 = vmul.f32 %v2396_v35, %v5088_v5  ;;  %v2509_v5 = vpop.permute.xlu0 %2508 }
 0x526   :  { %v5811_v16 = vadd.f32 %v2480_v33, %v6974_v6  ;;  %v1896_v3 = vadd.f32 %v1894_v52, %v6975_v49  ;;  %v2404_v55 = vmin.f32 %v2400_v42, %v2402_v0  ;;  %v2502_v60 = vadd.f32 %v2500_v51, %v6971_v13  ;;  %v6986_v33 = vld [vmem:[#allocation21_spill] sm:$0xff] }
 0x527   :  { %v2431_v36 = vmul.f32 %v2424_v59, %v2377_v43  ;;  %v2473_v7 = vmul.f32 %v2467_v53, %v2377_v43  ;;  %vm2279_vm14 = vcmp.le.f32.partialorder %v5487_v4, 0.0  ;;  %v2408_v63 = vadd.f32 %v2406_v26, %v6969_v40  ;;  %v6985_v26 = vld [vmem:[#allocation11_spill] sm:$0xff]  ;;  %v7008_v59 = vld [vmem:[#allocation66_spill] sm:$0xff] }
 0x528   :  { %v2460_v57 = vadd.f32 %v2458_v34, %v6974_v6  ;;  %v1898_v52 = vsel %vm5277_vm3, %v1896_v3, %v5722_v12  ;;  %v5841_v35 = vadd.f32 %v5759_v38, %v6971_v13  ;;  %v2968_v1 = vpop.eup %2967  ;;  %v2504_v41 = vmul.f32 %v2404_v55, %v5532_v17  ;;  %v2471_v38 = vpop.permute.xlu1 %2470 }
 0x529   :  { %vm6981_vm2 = vcmp.ge.f32.partialorder %v5487_v4, 0.0  ;;  %vm6982_vm6 = vcmp.le.f32.partialorder %v5563_v47, 0.0  ;;  %v2433_v29 = vadd.f32 %v2431_v36, %v6985_v26  ;;  %v2475_v42 = vadd.f32 %v2473_v7, %v6986_v33 }
 0x52a   :  { %vm5848_vm11 = vmand %vm6982_vm6, %vm6981_vm2  ;;  %v2410_v12 = vmul.f32 %v2404_v55, %v6920_v24  ;;  %vm6987_vm9 = vcmp.ge.f32.partialorder %v5640_v8, 0.0  ;;  %v2374_v47 = vmul.f32 %v2968_v1, %v5701_v32  ;;  %v2462_v51 = vmul.f32 %v2404_v55, %v6973_v14  ;;  %v7026_v8 = vld [vmem:[#allocation31_spill] sm:$0xff] }
 0x52b   :  { %vm5860_vm13 = vmand %vm5819_vm0, %vm6987_vm9  ;;  %v1904_v3 = vsel %vm5329_vm7, %v5725_v39, %v1898_v52  ;;  %v2515_v24 = vmul.f32 %v2509_v5, %v2377_v43  ;;  %v5870_v36 = vadd.f32 %v2504_v41, %v2502_v60  ;;  %vm6991_vm6 = vcmp.le.f32.partialorder %v5525_v44, 0.0  ;;  %v7001_v5 = vld [vmem:[#allocation75_spill] sm:$0xff]  ;;  %v7009_v41 = vld [vmem:[#allocation61_spill] sm:$0xff] }
 0x52c   :  { %vm5876_vm0 = vmand %vm5829_vm1, %vm6991_vm6  ;;  %v2435_v62 = vsel %vm5860_vm13, %v2433_v29, %v2411_v9  ;;  %v2477_v14 = vsel %vm5860_vm13, %v2475_v42, %v2463_v2  ;;  %vm2314_vm2 = vcmp.le.f32.partialorder %v5569_v28, 0.0  ;;  %v2412_v39 = vadd.f32 %v2410_v12, %v2408_v63  ;;  %v7032_v9 = vld [vmem:[#allocation62_spill] sm:$0xff]  ;;  %v7050_v12 = vld [vmem:[#allocation48_spill] sm:$0xff] }
 0x52d   :  { %vm6994_vm6 = vcmp.le.f32.partialorder %v5489_v18, 0.0  ;;  %v2441_v2 = vsel %vm5876_vm0, %v5748_v45, %v2435_v62  ;;  %v2483_v43 = vsel %vm5876_vm0, %v5754_v15, %v2477_v14  ;;  %vm2304_vm9 = vcmp.le.f32.partialorder %v5399_v50, 0.0 }
 0x52e   :  { %vm5894_vm3 = vmand %vm5848_vm11, %vm6994_vm6  ;;  %v2376_v55 = vmax.f32 %v2374_v47, 0.0  ;;  %v2464_v60 = vadd.f32 %v2462_v51, %v2460_v57  ;;  %vm6997_vm1 = vcmp.le.f32.partialorder %v5519_v48, %v5525_v44  ;;  %vm6998_vm11 = vcmp.ge.f32.partialorder %v5525_v44, 0.0  ;;  %v7003_v57 = vld [vmem:[#allocation36_spill] sm:$0xff]  ;;  %v2513_v51 = vpop.permute.xlu1 %2512 }
 0x52f   :  { %vm5910_vm6 = vmand %vm6998_vm11, %vm6997_vm1  ;;  %v2447_v45 = vsel %vm5894_vm3, %v5735_v56, %v2441_v2  ;;  %v2489_v15 = vsel %vm5894_vm3, %v5742_v20, %v2483_v43  ;;  %v1910_v63 = vsel %vm5375_vm10, %v7001_v5, %v1904_v3  ;;  %v2517_v48 = vadd.f32 %v2515_v24, %v7003_v57  ;;  %v7007_v56 = vld [vmem:[#allocation65_spill] sm:$0xff]  ;;  %v7033_v43 = vld [vmem:[#allocation64_spill] sm:$0xff] }
 0x530   :  { %vm7004_vm1 = vcmp.le.f32.partialorder %v5523_v54, %v5489_v18  ;;  %v2449_v20 = vsel %vm5910_vm6, %v7007_v56, %v2447_v45  ;;  %v2491_v52 = vsel %vm5910_vm6, %v7008_v59, %v2489_v15  ;;  %vm2286_vm10 = vcmp.ge.f32.partialorder %v5399_v50, 0.0  ;;  %v7034_v45 = vld [vmem:[#allocation10_spill] sm:$0xff]  ;;  %v7035_v5 = vld [vmem:[#allocation81_spill] sm:$0xff]  ;;  %v7039_v56 = vld [vmem:[#allocation39_spill] sm:$0xff] }
 0x531   :  { %vm5930_vm11 = vmand %vm2285_vm15, %vm7004_vm1  ;;  %v2378_v1 = vmin.f32 %v2376_v55, 1.0  ;;  %v1912_v54 = vsel %vm5421_vm4, %v7009_v41, %v1910_v63  ;;  %vm7011_vm15 = vcmp.ge.f32.partialorder %v5701_v32, 0.0  ;;  %vm7012_vm1 = vcmp.le.f32.partialorder %v5618_v19, 0.0  ;;  %v7017_v19 = vld [vmem:[#allocation80_spill] sm:$0xff]  ;;  %v7038_v63 = vld [vmem:[#allocation38_spill] sm:$0xff] }
 0x532   :  { %v2451_v18 = vsel %vm5930_vm11, %v6985_v26, %v2449_v20  ;;  %v2493_v29 = vsel %vm5930_vm11, %v6986_v33, %v2491_v52  ;;  %vm5954_vm7 = vmand %vm7012_vm1, %vm7011_vm15  ;;  %v1914_v47 = vsel %vm5598_vm5, %v6975_v49, %v1912_v54  ;;  %v2519_v26 = vsel %vm5860_vm13, %v2517_v48, %v5794_v21  ;;  %v7016_v33 = vld [vmem:[#allocation84_spill] sm:$0xff]  ;;  %v7041_v41 = vld [vmem:[#allocation35_spill] sm:$0xff] }
 0x533   :  { %v2432_v34 = vmul.f32 %v7016_v33, %v2378_v1  ;;  %v2474_v32 = vmul.f32 %v2471_v38, %v2378_v1  ;;  %v2516_v3 = vmul.f32 %v2513_v51, %v2378_v1  ;;  %v2525_v24 = vsel %vm5876_vm0, %v7017_v19, %v2519_v26  ;;  %v7025_v38 = vld [vmem:[#allocation78_spill] sm:$0xff]  ;;  %v7040_v44 = vld [vmem:[#allocation28_spill] sm:$0xff]  ;;  %v7054_v33 = vld [vmem:[#allocation79_spill] sm:$0xff] }
 0x534   :  { %vm7018_vm15 = vcmp.le.f32.partialorder %v5521_v61, 0.0  ;;  %vm7021_vm13 = vcmp.ge.f32.partialorder %v5560_v10, 0.0  ;;  %vm7022_vm1 = vcmp.le.f32.partialorder %v5602_v46, 0.0  ;;  %v2531_v17 = vsel %vm5894_vm3, %v7025_v38, %v2525_v24 }
 0x535   :  { %vm5973_vm5 = vmand %vm2279_vm14, %vm7018_vm15  ;;  %v1916_v4 = vsel %vm5646_vm8, %v7026_v8, %v1914_v47  ;;  %vm7028_vm14 = vcmp.ge.f32.partialorder %v5433_v27, 0.0  ;;  %vm7029_vm0 = vcmp.le.f32.partialorder %v5621_v37, 0.0  ;;  %v2434_v2 = vadd.f32 %v2432_v34, %v7032_v9  ;;  %v7051_v47 = vld [vmem:[#allocation41_spill] sm:$0xff] }
 0x536   :  { %vm5981_vm4 = vmand %vm7022_vm1, %vm7021_vm13  ;;  %v2453_v62 = vsel %vm5973_vm5, %v6962_v58, %v2451_v18  ;;  %v2495_v46 = vsel %vm5973_vm5, %v6965_v11, %v2493_v29  ;;  %v2476_v55 = vadd.f32 %v2474_v32, %v7033_v43  ;;  %v2518_v15 = vadd.f32 %v2516_v3, %v7034_v45  ;;  %v7037_v11 = vld [vmem:[#allocation42_spill] sm:$0xff]  ;;  %v7049_v29 = vld [vmem:[#allocation67_spill] sm:$0xff] }
 0x537   :  { %vm6001_vm15 = vmand %vm7029_vm0, %vm7028_vm14  ;;  %v2533_v58 = vsel %vm5910_vm6, %v7035_v5, %v2531_v17  ;;  %vm7036_vm8 = vcmp.ge.f32.partialorder %v5708_v30, 0.0  ;;  %v6019_v0 = vsub.f32 %v7037_v11, %v1916_v4  ;;  %v6022_v48 = vsub.f32 %v7038_v63, %v2453_v62 }
 0x538   :  { %vm2330_vm3 = vmand %vm5954_vm7, %vm7036_vm8  ;;  %v2535_v37 = vsel %vm5930_vm11, %v7003_v57, %v2533_v58  ;;  %v6025_v20 = vsub.f32 %v7039_v56, %v2495_v46  ;;  %vm7043_vm11 = vcmp.ge.f32.partialorder %v5569_v28, 0.0  ;;  %vm7053_vm13 = vcmp.le.f32.partialorder %v5433_v27, 0.0 }
 0x539   :  { %vm2316_vm6 = vmand %vm5981_vm4, %vm2314_vm2  ;;  %v2436_v30 = vsel %vm2330_vm3, %v2434_v2, %v2412_v39  ;;  %v2478_v7 = vsel %vm2330_vm3, %v2476_v55, %v2464_v60  ;;  %v2520_v59 = vsel %vm2330_vm3, %v2518_v15, %v5870_v36  ;;  %v2537_v57 = vsel %vm5973_vm5, %v7040_v44, %v2535_v37  ;;  %v7044_v36 = vld [vmem:[#allocation72_spill] sm:$0xff]  ;;  %v7056_v15 = vld [vmem:[#allocation34_spill] sm:$0xff] }
 0x53a   :  { %vm2306_vm7 = vmand %vm6001_vm15, %vm2304_vm9  ;;  %v2442_v52 = vsel %vm2316_vm6, %v5807_v31, %v2436_v30  ;;  %v2484_v1 = vsel %vm2316_vm6, %v5811_v16, %v2478_v7  ;;  %v2526_v53 = vsel %vm2316_vm6, %v7041_v41, %v2520_v59  ;;  %v1926_v39 = vmul.f32 %v6019_v0, %v6019_v0  ;;  %v7059_v7 = vld [vmem:[#allocation82_spill] sm:$0xff]  ;;  %v7062_v41 = vld [vmem:[#allocation71_spill] sm:$0xff] }
 0x53b   :  { %vm7042_vm2 = vcmp.le.f32.partialorder %v5558_v25, %v5569_v28  ;;  %v2448_v60 = vsel %vm2306_vm7, %v7044_v36, %v2442_v52  ;;  %v2490_v54 = vsel %vm2306_vm7, %v5798_v22, %v2484_v1  ;;  %v2532_v18 = vsel %vm2306_vm7, %v5841_v35, %v2526_v53  ;;  %v7048_v25 = vld [vmem:[#allocation54_spill] sm:$0xff]  ;;  %v7061_v52 = vld [vmem:[#allocation45_spill] sm:$0xff] }
 0x53c   :  { %vm2296_vm4 = vmand %vm7043_vm11, %vm7042_vm2  ;;  %v6053_v31 = vsub.f32 %v7037_v11, %v2537_v57  ;;  %vm7045_vm9 = vcmp.le.f32.partialorder %v5567_v23, %v5399_v50  ;;  %v6068_v35 = vadd.f32 %v1926_v39, %v7051_v47  ;;  %v2541_v26 = vmul.f32 %v6022_v48, %v6022_v48  ;;  %v7060_v44 = vld [vmem:[#allocation22_spill] sm:$0xff]  ;;  %v7063_v36 = vld [vmem:[#allocation77_spill] sm:$0xff] }
 0x53d   :  { %vm6060_vm5 = vmand %vm2286_vm10, %vm7045_vm9  ;;  %v2450_v28 = vsel %vm2296_vm4, %v7048_v25, %v2448_v60  ;;  %v2492_v42 = vsel %vm2296_vm4, %v7049_v29, %v2490_v54  ;;  %v2534_v22 = vsel %vm2296_vm4, %v7050_v12, %v2532_v18  ;;  %vm7052_vm10 = vcmp.le.f32.partialorder %v5560_v10, 0.0 }
 0x53e   :  { %v2452_v51 = vsel %vm6060_vm5, %v7032_v9, %v2450_v28  ;;  %v2494_v50 = vsel %vm6060_vm5, %v7033_v43, %v2492_v42  ;;  %v2536_v23 = vsel %vm6060_vm5, %v7034_v45, %v2534_v22  ;;  %vm2284_vm1 = vmand %vm7053_vm13, %vm7052_vm10  ;;  %1987 = vmin.xlane.f32.xlu1 %v6068_v35  ;;  %v1930_v34 = vmin.f32 %v6068_v35, %v7054_v33  ;;  %v7055_v45 = vld [vmem:[#allocation14_spill] sm:$0xff] }
 0x53f   :  { %v2543_v32 = vmul.f32 %v6025_v20, %v6025_v20  ;;  %v2454_v3 = vsel %vm2284_vm1, %v6969_v40, %v2452_v51  ;;  %v2547_v19 = vmul.f32 %v6053_v31, %v6053_v31  ;;  %v2496_v10 = vsel %vm2284_vm1, %v6974_v6, %v2494_v50 }
 0x540   :  { %v6094_v24 = vsub.f32 %v7038_v63, %v2454_v3  ;;  %v2538_v27 = vsel %vm2284_vm1, %v6971_v13, %v2536_v23  ;;  %v1931_v49 = vrot.slane %v1930_v34, 4  ;;  %v6099_v38 = vsub.f32 %v7039_v56, %v2496_v10 }
 0x541   :  { %v2545_v21 = vadd.f32 %v2543_v32, %v2541_v26  ;;  %v6102_v17 = vsub.f32 %v7037_v11, %v2538_v27  ;;  %v7057_v5 = vmin.f32 %v7056_v15, 1e+30  ;;  %v7058_v11 = vmov 0.0  }
 0x542   :  { %v2542_v40 = vmul.f32 %v6094_v24, %v6094_v24  ;;  %v1932_v8 = vmin.f32 %v1930_v34, %v1931_v49  ;;  %v2544_v4 = vmul.f32 %v6099_v38, %v6099_v38  ;;  %vm750_vm4 = vcmask 130168  }
 0x543   :  { %v6106_v61 = vadd.f32 %v2547_v19, %v2545_v21  ;;  %v2548_v6 = vmul.f32 %v6102_v17, %v6102_v17  ;;  %v6123_v58 = vmin.f32 %v7057_v5, %v7055_v45  ;;  %v6150_v19 = vld [vmem:[%s6313_s4 + $0x28] sm:$0xff]  ;;  %v6171_v45 = vld [vmem:[%s6313_s4 + $0x30] sm:$0xff] }
 0x544   :  { %v2546_v13 = vadd.f32 %v2544_v4, %v2542_v40  ;;  %v1933_v62 = vrot.slane %v1932_v8, 2  ;;  %v6157_v40 = vld [vmem:[%s6313_s4 + $0x20] sm:$0xff] }
 0x545   :  { %2608 = vmin.xlane.f32.xlu0 %v6106_v61 }
 0x546   :  { %v6113_v46 = vadd.f32 %v2548_v6, %v2546_v13  ;;  %v1934_v14 = vmin.f32 %v1932_v8, %v1933_v62 }
 0x548   :  { %2610 = vmin.xlane.f32.xlu1 %v6113_v46  ;;  %v2551_v9 = vmin.f32 %v6106_v61, %v6113_v46  ;;  %v1935_v2 = vrot.slane %v1934_v14, 1 }
 0x54a   :  { %v2552_v43 = vrot.slane %v2551_v9, 4  ;;  %v6118_v55 = vmin.f32 %v1934_v14, %v1935_v2 }
 0x54c   :  { %vm1937_vm14 = vcmp.le.f32.partialorder %v6068_v35, %v6118_v55  ;;  %vm1938_vm0 = vcmp.le.f32.partialorder %v7054_v33, %v6118_v55  ;;  %v2553_v37 = vmin.f32 %v2551_v9, %v2552_v43  ;;  %vm1982_vm15 = vcmp.lt.f32.partialorder %v6118_v55, %v6123_v58 }
 0x54d   :  { %v2746_v63 = vsel %vm1937_vm14, 1.0, %v7058_v11  ;;  %v2747_v56 = vsel %vm1938_vm0, 1.0, %v7058_v11  ;;  %v6165_v2 = vmin.f32 %v6123_v58, %v6118_v55 }
 0x54e   :  { %v1943_v30 = vadd.f32 %v2747_v56, %v2746_v63  ;;  %v1952_v59 = vmul.f32 %v2746_v63, %v7059_v7  ;;  %v1953_v57 = vmul.f32 %v2747_v56, %v7060_v44  ;;  %v1962_v1 = vmul.f32 %v2746_v63, %v7061_v52 }
 0x54f   :  { %v1963_v53 = vmul.f32 %v2747_v56, %v7062_v41  ;;  %v1972_v39 = vmul.f32 %v2746_v63, %v6019_v0  ;;  %v1973_v60 = vmul.f32 %v2747_v56, %v7063_v36  ;;  %v2554_v54 = vrot.slane %v2553_v37, 2 }
 0x550   :  { %v1944_v18 = vrot.slane %v1943_v30, 4  ;;  %v1954_v16 = vadd.f32 %v1953_v57, %v1952_v59 }
 0x551   :  { %v1964_v25 = vadd.f32 %v1963_v53, %v1962_v1  ;;  %v2555_v28 = vmin.f32 %v2553_v37, %v2554_v54  ;;  %v1974_v42 = vadd.f32 %v1973_v60, %v1972_v39  ;;  %v6180_v53 = vld [vmem:[%s6313_s4 + $0x38] sm:$0xff] }
 0x552   :  { %v1945_v29 = vadd.f32 %v1944_v18, %v1943_v30  ;;  %v1955_v47 = vrot.slane %v1954_v16, 4 }
 0x553   :  { %v2556_v12 = vrot.slane %v2555_v28, 1  ;;  %v1965_v51 = vrot.slane %v1964_v25, 4  ;;  %v1975_v26 = vrot.slane %v1974_v42, 4 }
 0x554   :  { %v1946_v22 = vrot.slane %v1945_v29, 2  ;;  %v1956_v10 = vadd.f32 %v1955_v47, %v1954_v16 }
 0x555   :  { %v6139_v50 = vmin.f32 %v2555_v28, %v2556_v12  ;;  %v1966_v27 = vadd.f32 %v1965_v51, %v1964_v25  ;;  %v1976_v4 = vadd.f32 %v1975_v26, %v1974_v42 }
 0x556   :  { %v1947_v23 = vadd.f32 %v1946_v22, %v1945_v29  ;;  %v1957_v15 = vrot.slane %v1956_v10, 2 }
 0x557   :  { %vm2558_vm8 = vcmp.le.f32.partialorder %v6106_v61, %v6139_v50  ;;  %vm2559_vm3 = vcmp.le.f32.partialorder %v6113_v46, %v6139_v50  ;;  %v1967_v56 = vrot.slane %v1966_v27, 2  ;;  %v1977_v30 = vrot.slane %v1976_v4, 2 }
 0x558   :  { %v1948_v34 = vrot.slane %v1947_v23, 1  ;;  %v2750_v32 = vsel %vm2558_vm8, 1.0, %v7058_v11  ;;  %v2751_v3 = vsel %vm2559_vm3, 1.0, %v7058_v11  ;;  %vm2603_vm6 = vcmp.lt.f32.partialorder %v6139_v50, %v6165_v2 }
 0x559   :  { %2014 = vperm.xlu1 %2892, %v6150_v19   ;;  %v2564_v49 = vadd.f32 %v2751_v3, %v2750_v32  ;;  %v2573_v21 = vmul.f32 %v2750_v32, %v6022_v48  ;;  %v2574_v13 = vmul.f32 %v2751_v3, %v6094_v24  ;;  %v2583_v6 = vmul.f32 %v2750_v32, %v6025_v20 }
 0x55a   :  { %v1949_v8 = vadd.f32 %v1948_v34, %v1947_v23  ;;  %v2584_v14 = vmul.f32 %v2751_v3, %v6099_v38  ;;  %v2593_v43 = vmul.f32 %v2750_v32, %v6053_v31  ;;  %v2594_v59 = vmul.f32 %v2751_v3, %v6102_v17 }
 0x55b   :  { %2010 = vperm.xlu0 %2891, %v6157_v40   ;;  %v2565_v62 = vrot.slane %v2564_v49, 4  ;;  %v2575_v37 = vadd.f32 %v2574_v13, %v2573_v21  ;;  %v1958_v18 = vadd.f32 %v1957_v15, %v1956_v10  ;;  %v1968_v16 = vadd.f32 %v1967_v56, %v1966_v27  ;;  %v7065_v15 = vld [vmem:[#allocation24_spill] sm:$0xff] }
 0x55c   :  { %v1950_v9 = vmax.f32 %v1949_v8, 1.0  ;;  %v2585_v63 = vadd.f32 %v2584_v14, %v2583_v6  ;;  %v2595_v1 = vadd.f32 %v2594_v59, %v2593_v43  ;;  %v1978_v25 = vadd.f32 %v1977_v30, %v1976_v4  ;;  %v7068_v56 = vld [vmem:[#allocation16_spill] sm:$0xff]  ;;  %v7069_v30 = vld [vmem:[#allocation49_spill] sm:$0xff]  ;;  %v7075_v43 = vld [vmem:[#allocation50_spill] sm:$0xff] }
 0x55d   :  { %2631 = vperm.xlu1 %2892, %v6171_v45   ;;  %v2566_v5 = vadd.f32 %v2565_v62, %v2564_v49  ;;  %v2576_v60 = vrot.slane %v2575_v37, 4  ;;  %v1959_v51 = vrot.slane %v1958_v18, 1  ;;  %v1969_v23 = vrot.slane %v1968_v16, 1 }
 0x55e   :  { %2969 = vrcp.f32 %v1950_v9  ;;  %v2586_v54 = vrot.slane %v2585_v63, 4  ;;  %v2596_v28 = vrot.slane %v2595_v1, 4  ;;  %v1979_v26 = vrot.slane %v1978_v25, 1 }
 0x55f   :  { %v2567_v57 = vrot.slane %v2566_v5, 2  ;;  %v2577_v12 = vadd.f32 %v2576_v60, %v2575_v37  ;;  %v1960_v21 = vadd.f32 %v1959_v51, %v1958_v18  ;;  %v1970_v8 = vadd.f32 %v1969_v23, %v1968_v16 }
 0x560   :  { %v2587_v22 = vadd.f32 %v2586_v54, %v2585_v63  ;;  %v2597_v47 = vadd.f32 %v2596_v28, %v2595_v1  ;;  %v1980_v13 = vadd.f32 %v1979_v26, %v1978_v25  ;;  %v7070_v59 = vsel %vm4510_vm12, %v7068_v56, %v7069_v30  ;;  %v7071_v1 = vld [vmem:[#allocation30_spill] sm:$0xff]  ;;  %v7077_v30 = vld [vmem:[#allocation17_spill] sm:$0xff] }
 0x561   :  { %2635 = vperm.xlu1 %2892, %v6180_v53   ;;  %v2568_v39 = vadd.f32 %v2567_v57, %v2566_v5  ;;  %v2578_v32 = vrot.slane %v2577_v12, 2  ;;  %v7066_v5 = vld [vmem:[#allocation20_spill] sm:$0xff]  ;;  %v2607_v26 = vmin.f32 %v6165_v2, %v6139_v50  ;;  %v2992_v56 = vld [vmem:[%s6313_s4 + $0x8] sm:$0xff] }
 0x562   :  { %v2588_v3 = vrot.slane %v2587_v22, 2  ;;  %v2598_v49 = vrot.slane %v2597_v47, 2  ;;  %v7067_v37 = vsel %vm4510_vm12, %v7065_v15, %v7066_v5  ;;  %v7076_v5 = vld [vmem:[#allocation15_spill] sm:$0xff] }
 0x563   :  { %v2569_v29 = vrot.slane %v2568_v39, 1  ;;  %v2579_v62 = vadd.f32 %v2578_v32, %v2577_v12 }
 0x564   :  { %v2589_v14 = vadd.f32 %v2588_v3, %v2587_v22  ;;  %v2599_v9 = vadd.f32 %v2598_v49, %v2597_v47 }
 0x565   :  { %v2570_v42 = vadd.f32 %v2569_v29, %v2568_v39  ;;  %v7072_v39 = vld [vmem:[#allocation51_spill] sm:$0xff]  ;;  %v2580_v18 = vrot.slane %v2579_v62, 1 }
 0x566   :  { %v7073_v60 = vsel %vm4510_vm12, %v7071_v1, %v7072_v39  ;;  %v2590_v16 = vrot.slane %v2589_v14, 1  ;;  %v2600_v25 = vrot.slane %v2599_v9, 1 }
 0x567   :  { %v2571_v34 = vmax.f32 %v2570_v42, 1.0  ;;  %v2581_v28 = vadd.f32 %v2580_v18, %v2579_v62  ;;  %v2989_v62 = vld [vmem:[%s6313_s4 + $0x10] sm:$0xff] }
 0x568   :  { %v2591_v29 = vadd.f32 %v2590_v16, %v2589_v14  ;;  %v2601_v42 = vadd.f32 %v2600_v25, %v2599_v9  ;;  %v7074_v14 = vld [vmem:[#allocation32_spill] sm:$0xff] }
 0x569   :  { %2971 = vrcp.f32 %v2571_v34  ;;  %v1370_v9 = vmul.f32 %v2989_v62, %v7074_v14 }
 0x56b   :  { %v2970_v10 = vpop.eup %2969 }
 0x56c   :  { %v1961_v27 = vmul.f32 %v2970_v10, %v1960_v21  ;;  %v1971_v4 = vmul.f32 %v2970_v10, %v1970_v8  ;;  %v1981_v6 = vmul.f32 %v2970_v10, %v1980_v13 }
 0x56e   :  { %v1983_v63 = vsel %vm1982_vm15, %v1961_v27, %v7067_v37  ;;  %v1984_v57 = vsel %vm1982_vm15, %v1971_v4, %v7070_v59  ;;  %v1985_v54 = vsel %vm1982_vm15, %v1981_v6, %v7073_v60  ;;  %v749_v59 = vmul.f32 %v2992_v56, %v7077_v30 }
 0x570   :  { %v752_v25 = vsel %vm750_vm4, %v749_v59, 0.0 }
 0x576   :  { %v2972_v12 = vpop.eup %2971 }
 0x577   :  { %v2582_v22 = vmul.f32 %v2972_v12, %v2581_v28  ;;  %v2592_v47 = vmul.f32 %v2972_v12, %v2591_v29  ;;  %v2602_v51 = vmul.f32 %v2972_v12, %v2601_v42 }
 0x579   :  { %v6210_v23 = vsel %vm2603_vm6, %v2582_v22, %v1983_v63  ;;  %v6215_v55 = vsel %vm2603_vm6, %v2592_v47, %v1984_v57  ;;  %v6220_v58 = vsel %vm2603_vm6, %v2602_v51, %v1985_v54  ;;  %v1372_v57 = vsel %vm750_vm4, %v1370_v9, 0.0 }
 0x585   :  { %2680 = vadd.xlane.f32.xlu1 %v2607_v26 }
 0x59d   :  { %v1990_v34 = vpop.xlane.xlu0 %1989 }
 0x59e   :  { %vm2004_vm12 = vcmp.le.f32.partialorder %v7054_v33, %v1990_v34  ;;  %v1992_v1 = vmul.f32 %v6150_v19, %v1990_v34 }
 0x59f   :  { %v2749_v13 = vsel %vm2004_vm12, 1.0, %v7058_v11 }
 0x5a0   :  { %v1994_v28 = vsel %vm750_vm4, %v1992_v1, 0.0 }
 0x5c7   :  { %v1988_v32 = vpop.xlane.xlu1 %1987 }
 0x5c8   :  { %vm2003_vm7 = vcmp.le.f32.partialorder %v6068_v35, %v1988_v32  ;;  %v1991_v63 = vmul.f32 %v6157_v40, %v1988_v32 }
 0x5c9   :  { %v2748_v8 = vsel %vm2003_vm7, 1.0, %v7058_v11 }
 0x5ca   :  { %v1993_v18 = vsel %vm750_vm4, %v1991_v63, 0.0 }
 0x5cb   :  { %v1995_v12 = vadd.f32 %v1994_v28, %v1993_v18 }
 0x5cd   :  { %v1996_v51 = vrot.slane %v1995_v12, 4 }
 0x5ce   :  { %v2609_v3 = vpop.xlane.xlu0 %2608 }
 0x5cf   :  { %vm2624_vm2 = vcmp.le.f32.partialorder %v6106_v61, %v2609_v3  ;;  %v2612_v40 = vmul.f32 %v6171_v45, %v2609_v3 }
 0x5d0   :  { %v2752_v33 = vsel %vm2624_vm2, 1.0, %v7058_v11 }
 0x5d1   :  { %v2611_v49 = vpop.xlane.xlu1 %2610  ;;  %v2614_v19 = vsel %vm750_vm4, %v2612_v40, 0.0 }
 0x5d2   :  { %vm2625_vm11 = vcmp.le.f32.partialorder %v6113_v46, %v2611_v49  ;;  %v2990_v46 = vld [vmem:[%s6313_s4] sm:$0xff]  ;;  %v2613_v39 = vmul.f32 %v6180_v53, %v2611_v49  ;;  %v1997_v49 = vadd.f32 %v1996_v51, %v1995_v12 }
 0x5d3   :  { %v2753_v4 = vsel %vm2625_vm11, 1.0, %v7058_v11  ;;  %v748_v15 = vmul.f32 %v2990_v46, %v7075_v43  ;;  %v2991_v11 = vld [vmem:[%s6313_s4 + $0x18] sm:$0xff]  ;;  %s3055_s4 = smov 113  }
 0x5d4   :  { %v1371_v37 = vmul.f32 %v2991_v11, %v7076_v5  ;;  %v2615_v29 = vsel %vm750_vm4, %v2613_v39, 0.0 }
 0x5d5   :  { %v2015_v10 = vpop.permute.xlu1 %2014  ;;  %v751_v60 = vsel %vm750_vm4, %v748_v15, 0.0  ;;  %v2616_v22 = vadd.f32 %v2615_v29, %v2614_v19 }
 0x5d6   :  { %v2011_v21 = vpop.permute.xlu0 %2010  ;;  %v6231_v50 = vmul.f32 %v2749_v13, %v2015_v10  ;;  %v1373_v54 = vsel %vm750_vm4, %v1371_v37, 0.0  ;;  %v753_v42 = vadd.f32 %v752_v25, %v751_v60 }
 0x5d7   :  { %v6229_v27 = vmul.f32 %v2748_v8, %v2011_v21  ;;  %v1374_v16 = vadd.f32 %v1373_v54, %v1372_v57  ;;  %v2617_v34 = vrot.slane %v2616_v22, 4  ;;  %v1998_v8 = vrot.slane %v1997_v49, 2 }
 0x5d8   :  { %2021 = vadd.xlane.f32.xlu1 %v6231_v50  ;;  %v754_v47 = vrot.slane %v753_v42, 4 }
 0x5d9   :  { %2019 = vadd.xlane.f32.xlu0 %v6229_v27  ;;  %v2632_v2 = vpop.permute.xlu1 %2631  ;;  %v1375_v53 = vrot.slane %v1374_v16, 4  ;;  %v2618_v3 = vadd.f32 %v2617_v34, %v2616_v22 }
 0x5da   :  { %v6237_v35 = vmul.f32 %v2752_v33, %v2632_v2  ;;  %v755_v32 = vadd.f32 %v754_v47, %v753_v42  ;;  %v1999_v2 = vadd.f32 %v1998_v8, %v1997_v49 }
 0x5db   :  { %v1376_v26 = vadd.f32 %v1375_v53, %v1374_v16  ;;  %v2619_v10 = vrot.slane %v2618_v3, 2 }
 0x5dc   :  { %2640 = vadd.xlane.f32.xlu1 %v6237_v35  ;;  %v756_v21 = vrot.slane %v755_v32, 2  ;;  %v2000_v14 = vrot.slane %v1999_v2, 1 }
 0x5dd   :  { %v2636_v61 = vpop.permute.xlu1 %2635  ;;  %v1377_v45 = vrot.slane %v1376_v26, 2 }
 0x5de   :  { %v6241_v6 = vmul.f32 %v2753_v4, %v2636_v61  ;;  %v757_v33 = vadd.f32 %v756_v21, %v755_v32  ;;  %v2620_v61 = vadd.f32 %v2619_v10, %v2618_v3  ;;  %v2001_v15 = vadd.f32 %v2000_v14, %v1999_v2 }
 0x5df   :  { %v1378_v13 = vadd.f32 %v1377_v45, %v1376_v26 }
 0x5e0   :  { %2642 = vadd.xlane.f32.xlu1 %v6241_v6  ;;  %v758_v62 = vrot.slane %v757_v33, 1  ;;  %v2621_v46 = vrot.slane %v2620_v61, 1 }
 0x5e1   :  { %v1379_v4 = vrot.slane %v1378_v13, 1 }
 0x5e2   :  { %v759_v43 = vadd.f32 %v758_v62, %v757_v33  ;;  %v2622_v5 = vadd.f32 %v2621_v46, %v2620_v61 }
 0x5e3   :  { %v1380_v9 = vadd.f32 %v1379_v4, %v1378_v13 }
 0x5e5   :  { %v1381_v11 = vadd.f32 %v1380_v9, %v759_v43 }
 0x5e7   :  { %v2002_v37 = vadd.f32 %v2001_v15, %v1381_v11 }
 0x5e9   :  { %v2623_v63 = vadd.f32 %v2622_v5, %v2002_v37 }
 0x5eb   :  { %v2683_v30 = vmul.f32 0.015625, %v2623_v63 }
 0x60e   :  { %v2681_v56 = vpop.xlane.xlu1 %2680 }
 0x60f   :  { %v2682_v59 = vmul.f32 0.0078125, %v2681_v56 }
 0x611   :  { %v2684_v57 = vadd.f32 %v2683_v30, %v2682_v59 }
 0x613   :  { %2686 = vrot.lane.b32.xlu1 %v2684_v57, %s3055_s4 }
 0x614   :  { %3004 = shalt.err (!%p3001_p4)
}
 0x615   :  { %2722 = dma.vmem_to_hbm [thread:$0]  %s2720_s30, 64, %s6315_s6, [#allocation6]   ;;  %vm2689_vm9 = vcmask 0  }
 0x616   :  { %s3057_s6 = smov [#allocation3]  }
 0x617   :  { %s2709_s11 = sshll.u32 %s3057_s6, 4  ;;  %s2710_s11 = int_to_ptr.vmem [resolvable:$true] %s2709_s11 }
 0x618   :  { %s3013_s12 = scalar_lea.vmem %s2710_s11, 16  ;;  %s3017_s13 = scalar_lea.vmem %s2710_s11, 32 }
 0x619   :  { %p3014_p5 = scmp.ne.s32.totalorder %s2710_s11, %s3013_s12  ;;  %p3018_p6 = scmp.lt.s32.totalorder %s2710_s11, %s2710_s11 }
 0x61a   :  { %p3019_p7 = scmp.lt.s32.totalorder %s3017_s13, %s3013_s12 }
 0x61c   :  { %p3020_p8 = por %p3019_p7, %p3018_p6 }
 0x61e   :  { %p3021_p9 = pnand %p3020_p8, %p3014_p5 }
 0x661   :  { %v2022_v39 = vpop.xlane.xlu1 %2021 }
 0x662   :  { %v2020_v1 = vpop.xlane.xlu0 %2019  ;;  %v2024_v54 = vmax.f32 %v2022_v39, 1.0 }
 0x663   :  { %v2023_v60 = vmax.f32 %v2020_v1, 1.0 }
 0x665   :  { %2973 = vrcp.f32 %v2023_v60  ;;  %v2641_v18 = vpop.xlane.xlu1 %2640 }
 0x666   :  { %2975 = vrcp.f32 %v2024_v54  ;;  %v2644_v40 = vmax.f32 %v2641_v18, 1.0 }
 0x668   :  { %2977 = vrcp.f32 %v2644_v40 }
 0x669   :  { %v2643_v16 = vpop.xlane.xlu1 %2642 }
 0x66a   :  { %v2645_v25 = vmax.f32 %v2643_v16, 1.0 }
 0x66c   :  { %2979 = vrcp.f32 %v2645_v25 }
 0x672   :  { %v2974_v28 = vpop.eup %2973 }
 0x673   :  { %v2976_v29 = vpop.eup %2975  ;;  %v2027_v42 = vmul.f32 %v2974_v28, %v6229_v27 }
 0x674   :  { %v2028_v12 = vmul.f32 %v2976_v29, %v6231_v50 }
 0x675   :  { %v2029_v19 = vmul.f32 %v2027_v42, %v7059_v7  ;;  %v2039_v53 = vmul.f32 %v2027_v42, %v7061_v52  ;;  %v2049_v22 = vmul.f32 %v2027_v42, %v6019_v0  ;;  %v2978_v47 = vpop.eup %2977 }
 0x676   :  { %v2030_v51 = vmul.f32 %v2028_v12, %v7060_v44  ;;  %v2040_v26 = vmul.f32 %v2028_v12, %v7062_v41  ;;  %v2050_v34 = vmul.f32 %v2028_v12, %v7063_v36  ;;  %v2648_v32 = vmul.f32 %v2978_v47, %v6237_v35 }
 0x678   :  { %v2031_v49 = vadd.f32 %v2030_v51, %v2029_v19  ;;  %v2041_v45 = vadd.f32 %v2040_v26, %v2039_v53  ;;  %v2051_v27 = vadd.f32 %v2050_v34, %v2049_v22  ;;  %v2650_v52 = vmul.f32 %v2648_v32, %v6022_v48 }
 0x679   :  { %v2980_v3 = vpop.eup %2979  ;;  %v2660_v41 = vmul.f32 %v2648_v32, %v6025_v20  ;;  %v2670_v36 = vmul.f32 %v2648_v32, %v6053_v31 }
 0x67a   :  { %v2032_v50 = vrot.slane %v2031_v49, 4  ;;  %v2042_v21 = vrot.slane %v2041_v45, 4  ;;  %v2052_v7 = vrot.slane %v2051_v27, 4  ;;  %v2649_v0 = vmul.f32 %v2980_v3, %v6241_v6 }
 0x67c   :  { %v2033_v8 = vadd.f32 %v2032_v50, %v2031_v49  ;;  %v2043_v13 = vadd.f32 %v2042_v21, %v2041_v45  ;;  %v2053_v44 = vadd.f32 %v2052_v7, %v2051_v27  ;;  %v2651_v35 = vmul.f32 %v2649_v0, %v6094_v24 }
 0x67d   :  { %v2661_v10 = vmul.f32 %v2649_v0, %v6099_v38  ;;  %v2671_v33 = vmul.f32 %v2649_v0, %v6102_v17 }
 0x67e   :  { %v2034_v2 = vrot.slane %v2033_v8, 2  ;;  %v2044_v4 = vrot.slane %v2043_v13, 2  ;;  %v2054_v61 = vrot.slane %v2053_v44, 2  ;;  %v2652_v62 = vadd.f32 %v2651_v35, %v2650_v52 }
 0x67f   :  { %v2662_v48 = vadd.f32 %v2661_v10, %v2660_v41  ;;  %v2672_v14 = vadd.f32 %v2671_v33, %v2670_v36 }
 0x680   :  { %v2035_v6 = vadd.f32 %v2034_v2, %v2033_v8  ;;  %v2045_v9 = vadd.f32 %v2044_v4, %v2043_v13  ;;  %v2055_v46 = vadd.f32 %v2054_v61, %v2053_v44  ;;  %v2653_v43 = vrot.slane %v2652_v62, 4 }
 0x681   :  { %v2663_v15 = vrot.slane %v2662_v48, 4  ;;  %v2673_v20 = vrot.slane %v2672_v14, 4 }
 0x682   :  { %v2036_v11 = vrot.slane %v2035_v6, 1  ;;  %v2046_v31 = vrot.slane %v2045_v9, 1  ;;  %v2056_v24 = vrot.slane %v2055_v46, 1  ;;  %v2654_v38 = vadd.f32 %v2653_v43, %v2652_v62 }
 0x683   :  { %v2664_v5 = vadd.f32 %v2663_v15, %v2662_v48  ;;  %v2674_v17 = vadd.f32 %v2673_v20, %v2672_v14 }
 0x684   :  { %v2655_v37 = vrot.slane %v2654_v38, 2  ;;  %v2037_v30 = vadd.f32 %v2036_v11, %v2035_v6  ;;  %v2047_v59 = vadd.f32 %v2046_v31, %v2045_v9  ;;  %v2057_v1 = vadd.f32 %v2056_v24, %v2055_v46 }
 0x685   :  { %v2665_v63 = vrot.slane %v2664_v5, 2  ;;  %v2675_v56 = vrot.slane %v2674_v17, 2  ;;  %v2687_v57 = vpop.permute.xlu1 %2686 }
 0x686   :  { %v2656_v39 = vadd.f32 %v2655_v37, %v2654_v38  ;;  %2690 = vst.msk [vmem:[#allocation3] sm:$0x1] %vm2689_vm9, %v2687_v57 }
 0x687   :  { %v2666_v60 = vadd.f32 %v2665_v63, %v2664_v5  ;;  %v2676_v54 = vadd.f32 %v2675_v56, %v2674_v17 }
 0x688   :  { %3024 = shalt.err (!%p3021_p9)
}
 0x689   :  { %2712 = dma.vmem_to_hbm [thread:$0]  %s2710_s11, 16, %s6314_s5, [#allocation4]   ;;  %v2657_v18 = vrot.slane %v2656_v39, 1  ;;  %v2667_v40 = vrot.slane %v2666_v60, 1  ;;  %v2677_v16 = vrot.slane %v2676_v54, 1  ;;  %v7078_v25 = vld [vmem:[#allocation55_spill] sm:$0xff] }
 0x68a   :  { %v2038_v28 = vadd.f32 %v2037_v30, %v7078_v25  ;;  %v7079_v29 = vld [vmem:[#allocation52_spill] sm:$0xff]  ;;  %v7080_v12 = vld [vmem:[#allocation25_spill] sm:$0xff]  ;;  %v2691_v32 = vmul.f32 0.015625, %v6210_v23  ;;  %v2695_v49 = vmul.f32 0.015625, %v6215_v55  ;;  %v2699_v45 = vmul.f32 0.015625, %v6220_v58 }
 0x68b   :  { %v2048_v42 = vadd.f32 %v2047_v59, %v7079_v29  ;;  %v2058_v19 = vadd.f32 %v2057_v1, %v7080_v12  ;;  %v2658_v53 = vadd.f32 %v2657_v18, %v2656_v39  ;;  %v2668_v22 = vadd.f32 %v2667_v40, %v2666_v60 }
 0x68c   :  { %v2678_v47 = vadd.f32 %v2677_v16, %v2676_v54 }
 0x68d   :  { %v2659_v51 = vadd.f32 %v2658_v53, %v2038_v28  ;;  %v2669_v26 = vadd.f32 %v2668_v22, %v2048_v42 }
 0x68e   :  { %v2679_v34 = vadd.f32 %v2678_v47, %v2058_v19 }
 0x68f   :  { %v2692_v27 = vmul.f32 0.03125, %v2659_v51  ;;  %v2696_v3 = vmul.f32 0.03125, %v2669_v26 }
 0x690   :  { %v2700_v50 = vmul.f32 0.03125, %v2679_v34 }
 0x691   :  { %v2693_v21 = vadd.f32 %v2692_v27, %v2691_v32  ;;  %v2697_v7 = vadd.f32 %v2696_v3, %v2695_v49 }
 0x692   :  { %v2701_v52 = vadd.f32 %v2700_v50, %v2699_v45 }
 0x693   :  { %2694 = vst [vmem:[%s6316_s7] sm:$0x1] %v2693_v21  ;;  %2698 = vst [vmem:[%s6316_s7 + $0x1] sm:$0x1] %v2697_v7 }
 0x694   :  { %2702 = vst [vmem:[%s6316_s7 + $0x2] sm:$0x1] %v2701_v52 }
 0x695   :  { %3033 = dma.done.wait [#allocation4], 16  }
 0x696   :  { %3034 = vsyncadd [#allocation4], 4294967280 }
 0x697   :  { %3035 = dma.done.wait [#allocation6], 64  }
 0x698   :  { %3036 = vsyncadd [#allocation6], 4294967232 }
 0x699   :  { %2733 = vsyncpa [#allocation4], 1 }
 0x69a   :  { %2734 = vsyncpa [#allocation6], 1 }

</bundles_post_ra>
